<compile_context>
chip_gen: v6e
topology: v6e:2x2x1
jax: 0.10.0
libtpu: 0.0.40
codegen_flags: <defaults>
</compile_context>

<pallas_src>
import jax
import jax.numpy as jnp
from jax.experimental import pallas as pl
from jax.experimental.pallas import tpu as pltpu

LANE = 128          # TPU lane width: pad FEATURE dims (only) to this
NUM_CONVS = 32      # HLA32 with num_blocks=num_layers=2 -> 32 leaf convs
NUM_LINS = 31       # 16 Block lins + 8 + 4 + 2 + 1 HLA lins
_WCHUNK = 8         # weights are DMA'd HBM->VMEM in chunks of 8 layers
_N_CCHUNK = -(-NUM_CONVS // _WCHUNK)   # 4
_N_LCHUNK = -(-NUM_LINS // _WCHUNK)    # 4


def _round_up(v, m):
    return ((v + m - 1) // m) * m


def _pad2d(x, rows, cols):
    r, c = x.shape
    return jnp.pad(x, ((0, rows - r), (0, cols - c)))


# ----------------------------------------------------------------------------
# The single fused Pallas kernel: walks the whole HLA32 tree, weights streamed
# from HBM in chunks that overlap with compute.
# ----------------------------------------------------------------------------
def _hla32_fused_kernel(a_ref, x_ref, cw_hbm, cb_ref, lw_hbm, lb_ref, o_ref,
                        cw_vmem, lw_vmem, csem, lsem):
    # Issue ALL weight-chunk DMAs up front; they stream in the background
    # while earlier chunks' layers compute.  Trace order is static Python,
    # so chunk waits are placed exactly before the first use of each chunk.
    conv_cp = []
    for c in range(_N_CCHUNK):
        s = c * _WCHUNK
        sz = min(_WCHUNK, NUM_CONVS - s)
        cp = pltpu.make_async_copy(cw_hbm.at[pl.ds(s, sz)],
                                   cw_vmem.at[pl.ds(s, sz)], csem.at[c])
        cp.start()
        conv_cp.append(cp)
    lin_cp = []
    for c in range(_N_LCHUNK):
        s = c * _WCHUNK
        sz = min(_WCHUNK, NUM_LINS - s)
        cp = pltpu.make_async_copy(lw_hbm.at[pl.ds(s, sz)],
                                   lw_vmem.at[pl.ds(s, sz)], lsem.at[c])
        cp.start()
        lin_cp.append(cp)

    a = a_ref[...]                      # bf16 [Np, Np], loaded once, reused 32x
    ctr = {"conv": 0, "lin": 0, "cw_rdy": 0, "lw_rdy": 0}

    def conv(x):                        # x: f32 [Np, P]
        i = ctr["conv"]
        ctr["conv"] += 1
        while ctr["cw_rdy"] <= i // _WCHUNK:        # wait this layer's chunk
            conv_cp[ctr["cw_rdy"]].wait()
            ctr["cw_rdy"] += 1
        xb = x.astype(jnp.bfloat16)
        # Neighbor mean aggregation on the MXU (A is row-normalized).
        agg = jnp.dot(a, xb, preferred_element_type=jnp.float32)
        # Self / neighbor projections as two dots summed (no concat temp).
        h = (jnp.dot(xb, cw_vmem[i, 0], preferred_element_type=jnp.float32)
             + jnp.dot(agg.astype(jnp.bfloat16), cw_vmem[i, 1],
                       preferred_element_type=jnp.float32)
             + cb_ref[i])                            # [Np, P] + [1, P], f32
        return jnp.maximum(h, 0.0)                   # activation=True

    def lin(x):
        i = ctr["lin"]
        ctr["lin"] += 1
        while ctr["lw_rdy"] <= i // _WCHUNK:
            lin_cp[ctr["lw_rdy"]].wait()
            ctr["lw_rdy"] += 1
        return (jnp.dot(x.astype(jnp.bfloat16), lw_vmem[i],
                        preferred_element_type=jnp.float32) + lb_ref[i])

    def block_fwd(x):                   # Block (mode='sum', num_layers=2)
        h1 = conv(x)
        h2 = conv(h1)
        return lin(h1 + h2)

    def hla_fwd(x, sub, relu_block2):   # BlockHLA{4,8,16,32} (mode='sum')
        x1 = jnp.maximum(sub(x), 0.0)   # F.relu(block1(x))
        x2 = sub(x1)
        if relu_block2:                 # HLA8 skips the relu on block2
            x2 = jnp.maximum(x2, 0.0)
        return lin(x1 + x2)

    hla4 = lambda t: hla_fwd(t, block_fwd, True)
    hla8 = lambda t: hla_fwd(t, hla4, False)
    hla16 = lambda t: hla_fwd(t, hla8, True)
    y = hla_fwd(x_ref[...], hla16, True)   # top level: no relu on output

    assert ctr["conv"] == NUM_CONVS and ctr["lin"] == NUM_LINS
    assert ctr["cw_rdy"] == _N_CCHUNK and ctr["lw_rdy"] == _N_LCHUNK
    o_ref[...] = y.astype(o_ref.dtype)


# ----------------------------------------------------------------------------
# Deterministic parameter init (glorot weights, zero biases)
# ----------------------------------------------------------------------------
def _glorot(key, shape):
    limit = (6.0 / (shape[0] + shape[1])) ** 0.5
    return jax.random.uniform(key, shape, jnp.float32, -limit, limit)


def init_linear(key, in_f, out_f):
    return {"w": _glorot(key, (in_f, out_f)),
            "b": jnp.zeros((1, out_f), jnp.float32)}


def init_conv(key, in_f, out_f):
    k1, k2 = jax.random.split(key)
    return {"ws": _glorot(k1, (in_f, out_f)),
            "wn": _glorot(k2, (in_f, out_f)),
            "b": jnp.zeros((1, out_f), jnp.float32)}


def init_block(key, in_dim, hidden, out_dim, num_layers=2):
    keys = jax.random.split(key, num_layers + 1)
    convs = [init_conv(keys[0], in_dim, hidden)]
    for i in range(1, num_layers):
        convs.append(init_conv(keys[i], hidden, hidden))
    return {"convs": convs, "lin": init_linear(keys[-1], hidden, out_dim)}


def init_hla(key, sub_init, in_dim, hidden, out_dim):
    k1, k2, k3 = jax.random.split(key, 3)
    return {"block1": sub_init(k1, in_dim, hidden, hidden),
            "block2": sub_init(k2, hidden, hidden, hidden),
            "lin": init_linear(k3, hidden, out_dim)}


def init_hla4(k, i, h, o):
    return init_hla(k, init_block, i, h, o)


def init_hla8(k, i, h, o):
    return init_hla(k, init_hla4, i, h, o)


def init_hla16(k, i, h, o):
    return init_hla(k, init_hla8, i, h, o)


def init_hla32(k, i, h, o):
    return init_hla(k, init_hla16, i, h, o)


# ----------------------------------------------------------------------------
# Param flattening / packing. Order MUST match the kernel trace order
# (block1, block2, lin recursively).  Matmul weights packed as bf16.
# ----------------------------------------------------------------------------
def _flatten(params, convs, lins):
    if "convs" in params:               # leaf Block
        convs.extend(params["convs"])
        lins.append(params["lin"])
    else:                               # HLA node
        _flatten(params["block1"], convs, lins)
        _flatten(params["block2"], convs, lins)
        lins.append(params["lin"])


def pack_hla32_params(params, p):
    convs, lins = [], []
    _flatten(params, convs, lins)
    assert len(convs) == NUM_CONVS and len(lins) == NUM_LINS
    cw = jnp.stack([jnp.stack([_pad2d(c["ws"], p, p), _pad2d(c["wn"], p, p)])
                    for c in convs]).astype(jnp.bfloat16)      # [32, 2, P, P]
    cb = jnp.stack([_pad2d(c["b"], 1, p) for c in convs])      # [32, 1, P] f32
    lw = jnp.stack([_pad2d(l["w"], p, p)
                    for l in lins]).astype(jnp.bfloat16)       # [31, P, P]
    lb = jnp.stack([_pad2d(l["b"], 1, p) for l in lins])       # [31, 1, P] f32
    return {"cw": cw, "cb": cb, "lw": lw, "lb": lb}


# ----------------------------------------------------------------------------
# Fused forward (single pallas_call)
# ----------------------------------------------------------------------------
def hla32_forward(packed, a, x, *, out_dim):
    n, _ = x.shape
    p = int(packed["lw"].shape[-1])
    assert packed["cw"].shape[0] == NUM_CONVS
    assert packed["lw"].shape[0] == NUM_LINS
    # Node dim only needs sublane alignment (16 covers bf16 packing), NOT 128.
    n_pad = _round_up(max(n, 16), 16)

    # Padded node rows/cols of A are zero, so padded-row garbage never reaches
    # real rows; the wrapper slices [:n, :out_dim] at the end.
    a_p = _pad2d(a.astype(jnp.float32), n_pad, n_pad).astype(jnp.bfloat16)
    x_p = _pad2d(x.astype(jnp.float32), n_pad, p)

    # Advisory cost estimate for the fused call.
    flops = (NUM_CONVS * (2 * n_pad * n_pad * p + 4 * n_pad * p * p)
             + NUM_LINS * 2 * n_pad * p * p)
    bytes_accessed = (a_p.size * 2 + x_p.size * 4
                      + packed["cw"].size * 2 + packed["cb"].size * 4
                      + packed["lw"].size * 2 + packed["lb"].size * 4
                      + n_pad * p * 4)

    vmem_spec = pl.BlockSpec(memory_space=pltpu.MemorySpace.VMEM)
    hbm_spec = pl.BlockSpec(memory_space=pl.ANY)   # weights streamed manually

    out_p = pl.pallas_call(
        _hla32_fused_kernel,
        out_shape=jax.ShapeDtypeStruct((n_pad, p), jnp.float32),
        in_specs=[vmem_spec, vmem_spec, hbm_spec, vmem_spec, hbm_spec,
                  vmem_spec],
        out_specs=vmem_spec,
        scratch_shapes=[
            pltpu.VMEM((NUM_CONVS, 2, p, p), jnp.bfloat16),   # conv weights
            pltpu.VMEM((NUM_LINS, p, p), jnp.bfloat16),       # lin weights
            pltpu.SemaphoreType.DMA((_N_CCHUNK,)),
            pltpu.SemaphoreType.DMA((_N_LCHUNK,)),
        ],
        compiler_params=pltpu.CompilerParams(
            vmem_limit_bytes=12 * 1024 * 1024),
        cost_estimate=pl.CostEstimate(
            flops=int(flops), transcendentals=0,
            bytes_accessed=int(bytes_accessed)),
    )(a_p, x_p, packed["cw"], packed["cb"], packed["lw"], packed["lb"])
    return out_p[:n, :out_dim]


# ----------------------------------------------------------------------------
# Pure-JAX references (unpadded) for sanity checks:
#   * f32 reference (structural check, loose tolerance)
#   * bf16-matched reference (same operand casts as the kernel, tight-ish)
# ----------------------------------------------------------------------------
def _relu(v):
    return jnp.maximum(v, 0.0)


def _f32dot(a, b):
    return jnp.dot(a, b, precision=jax.lax.Precision.HIGHEST)


def _bf16dot(a, b):
    return jnp.dot(a.astype(jnp.bfloat16), b.astype(jnp.bfloat16),
                   preferred_element_type=jnp.float32)


def _make_reference(dot_fn):
    def conv(cp, a, x):
        agg = dot_fn(a, x)
        return _relu(dot_fn(x, cp["ws"]) + dot_fn(agg, cp["wn"]) + cp["b"])

    def block(p, a, x):
        h1 = conv(p["convs"][0], a, x)
        h2 = conv(p["convs"][1], a, h1)
        return dot_fn(h1 + h2, p["lin"]["w"]) + p["lin"]["b"]

    def hla(p, a, x, sub, relu_block2):
        x1 = _relu(sub(p["block1"], a, x))
        x2 = sub(p["block2"], a, x1)
        if relu_block2:
            x2 = _relu(x2)
        return dot_fn(x1 + x2, p["lin"]["w"]) + p["lin"]["b"]

    def hla32(p, a, x):
        h4 = lambda pp, aa, xx: hla(pp, aa, xx, block, True)
        h8 = lambda pp, aa, xx: hla(pp, aa, xx, h4, False)
        h16 = lambda pp, aa, xx: hla(pp, aa, xx, h8, True)
        return hla(p, a, x, h16, True)

    return hla32


hla32_reference_f32 = _make_reference(_f32dot)
hla32_reference_bf16 = _make_reference(_bf16dot)


# ----------------------------------------------------------------------------
# Graph glue: edge_index [2, E] -> dense row-normalized (mean) adjacency
# ----------------------------------------------------------------------------
def edge_index_to_adj(edge_index, num_nodes):
    src, dst = edge_index[0], edge_index[1]
    a = jnp.zeros((num_nodes, num_nodes), jnp.float32).at[dst, src].add(1.0)
    deg = jnp.clip(a.sum(axis=1, keepdims=True), 1.0, None)
    return a / deg


# ----------------------------------------------------------------------------
if __name__ == "__main__":
    N, E = 16, 48
    IN_DIM, HIDDEN, OUT_DIM = 8, 32, 8

    key = jax.random.PRNGKey(0)
    kx, ks, kd, kp = jax.random.split(key, 4)

    x = jax.random.normal(kx, (N, IN_DIM), jnp.float32)
    src = jax.random.randint(ks, (E,), 0, N)
    dst = jax.random.randint(kd, (E,), 0, N)
    edge_index = jnp.stack([src, dst]).astype(jnp.int32)

    params = init_hla32(kp, IN_DIM, HIDDEN, OUT_DIM)
    adj = edge_index_to_adj(edge_index, N)

    P = max(_round_up(IN_DIM, LANE), _round_up(HIDDEN, LANE),
            _round_up(OUT_DIM, LANE))
    packed = pack_hla32_params(params, P)

    fwd = jax.jit(hla32_forward, static_argnames=("out_dim",))
    out = fwd(packed, adj, x, out_dim=OUT_DIM)
    jax.block_until_ready(out)

    assert out.shape == (N, OUT_DIM), out.shape
    assert out.dtype == jnp.float32
    assert bool(jnp.all(jnp.isfinite(out)))

    # Primary check: bf16-matched reference (same casts/dot order as kernel).
    # Catches any transposed / mis-ordered weight (those give O(1) rel error)
    # while leaving headroom for accumulation-order drift over ~95 matmuls.
    ref_bf = hla32_reference_bf16(params, adj, x)
    den_bf = jnp.maximum(jnp.max(jnp.abs(ref_bf)), 1e-3)
    rel_bf = float(jnp.max(jnp.abs(out - ref_bf)) / den_bf)
    assert rel_bf < 5e-2, rel_bf

    # Secondary structural check vs. the full-f32 reference (loose: bf16
    # matmul drift across the deep serial chain is expected).
    ref_f32 = hla32_reference_f32(params, adj, x)
    den_f32 = jnp.maximum(jnp.max(jnp.abs(ref_f32)), 1e-3)
    rel_f32 = float(jnp.max(jnp.abs(out - ref_f32)) / den_f32)
    assert rel_f32 < 0.5, rel_f32

    print("KERNEL_OK")
</pallas_src>

<mosaic_0001>
module attributes {stable_mosaic.version = 11 : i64} {
  func.func @_hla32_fused_kernel(%arg0: memref<16x16xbf16, #tpu.memory_space<vmem>>, %arg1: memref<16x128xf32, #tpu.memory_space<vmem>>, %arg2: memref<32x2x128x128xbf16, #tpu.memory_space<any>>, %arg3: memref<32x1x128xf32, #tpu.memory_space<vmem>>, %arg4: memref<31x128x128xbf16, #tpu.memory_space<any>>, %arg5: memref<31x1x128xf32, #tpu.memory_space<vmem>>, %arg6: memref<16x128xf32, #tpu.memory_space<vmem>>, %arg7: memref<32x2x128x128xbf16, #tpu.memory_space<vmem>>, %arg8: memref<31x128x128xbf16, #tpu.memory_space<vmem>>, %arg9: memref<4x!tpu.dma_semaphore, #tpu.memory_space<semaphore_mem>>, %arg10: memref<4x!tpu.dma_semaphore, #tpu.memory_space<semaphore_mem>>) attributes {dimension_semantics = [], scalar_prefetch = 0 : i64, scratch_operands = 4 : i64, tpu.core_type = #tpu.core_type<tc>} {
    %c0_i32 = arith.constant 0 : i32
    %c0_i32_0 = arith.constant 0 : i32
    %c0_i32_1 = arith.constant 0 : i32
    %c0_i32_2 = arith.constant 0 : i32
    %c0_i32_3 = arith.constant 0 : i32
    %0 = tpu.memref_slice %arg2[%c0_i32_0, %c0_i32_1, %c0_i32_2, %c0_i32_3] : memref<32x2x128x128xbf16, #tpu.memory_space<any>> -> memref<8x2x128x128xbf16, #tpu.memory_space<any>>
    %c0_i32_4 = arith.constant 0 : i32
    %c0_i32_5 = arith.constant 0 : i32
    %c0_i32_6 = arith.constant 0 : i32
    %c0_i32_7 = arith.constant 0 : i32
    %1 = tpu.memref_slice %arg7[%c0_i32_4, %c0_i32_5, %c0_i32_6, %c0_i32_7] : memref<32x2x128x128xbf16, #tpu.memory_space<vmem>> -> memref<8x2x128x128xbf16, #tpu.memory_space<vmem>>
    %2 = tpu.memref_slice %arg9[%c0_i32] : memref<4x!tpu.dma_semaphore, #tpu.memory_space<semaphore_mem>> -> memref<1x!tpu.dma_semaphore, #tpu.memory_space<semaphore_mem>>
    %3 = tpu.memref_squeeze %2 : memref<1x!tpu.dma_semaphore, #tpu.memory_space<semaphore_mem>> -> memref<!tpu.dma_semaphore, #tpu.memory_space<semaphore_mem>>
    tpu.enqueue_dma source(%0 : memref<8x2x128x128xbf16, #tpu.memory_space<any>>) target(%1 : memref<8x2x128x128xbf16, #tpu.memory_space<vmem>>) target_semaphore(%3 : memref<!tpu.dma_semaphore, #tpu.memory_space<semaphore_mem>>)
    %c1_i32 = arith.constant 1 : i32
    %c8_i32 = arith.constant 8 : i32
    %c0_i32_8 = arith.constant 0 : i32
    %c0_i32_9 = arith.constant 0 : i32
    %c0_i32_10 = arith.constant 0 : i32
    %4 = tpu.memref_slice %arg2[%c8_i32, %c0_i32_8, %c0_i32_9, %c0_i32_10] : memref<32x2x128x128xbf16, #tpu.memory_space<any>> -> memref<8x2x128x128xbf16, #tpu.memory_space<any>>
    %c8_i32_11 = arith.constant 8 : i32
    %c0_i32_12 = arith.constant 0 : i32
    %c0_i32_13 = arith.constant 0 : i32
    %c0_i32_14 = arith.constant 0 : i32
    %5 = tpu.memref_slice %arg7[%c8_i32_11, %c0_i32_12, %c0_i32_13, %c0_i32_14] : memref<32x2x128x128xbf16, #tpu.memory_space<vmem>> -> memref<8x2x128x128xbf16, #tpu.memory_space<vmem>>
    %6 = tpu.memref_slice %arg9[%c1_i32] : memref<4x!tpu.dma_semaphore, #tpu.memory_space<semaphore_mem>> -> memref<1x!tpu.dma_semaphore, #tpu.memory_space<semaphore_mem>>
    %7 = tpu.memref_squeeze %6 : memref<1x!tpu.dma_semaphore, #tpu.memory_space<semaphore_mem>> -> memref<!tpu.dma_semaphore, #tpu.memory_space<semaphore_mem>>
    tpu.enqueue_dma source(%4 : memref<8x2x128x128xbf16, #tpu.memory_space<any>>) target(%5 : memref<8x2x128x128xbf16, #tpu.memory_space<vmem>>) target_semaphore(%7 : memref<!tpu.dma_semaphore, #tpu.memory_space<semaphore_mem>>)
    %c2_i32 = arith.constant 2 : i32
    %c16_i32 = arith.constant 16 : i32
    %c0_i32_15 = arith.constant 0 : i32
    %c0_i32_16 = arith.constant 0 : i32
    %c0_i32_17 = arith.constant 0 : i32
    %8 = tpu.memref_slice %arg2[%c16_i32, %c0_i32_15, %c0_i32_16, %c0_i32_17] : memref<32x2x128x128xbf16, #tpu.memory_space<any>> -> memref<8x2x128x128xbf16, #tpu.memory_space<any>>
    %c16_i32_18 = arith.constant 16 : i32
    %c0_i32_19 = arith.constant 0 : i32
    %c0_i32_20 = arith.constant 0 : i32
    %c0_i32_21 = arith.constant 0 : i32
    %9 = tpu.memref_slice %arg7[%c16_i32_18, %c0_i32_19, %c0_i32_20, %c0_i32_21] : memref<32x2x128x128xbf16, #tpu.memory_space<vmem>> -> memref<8x2x128x128xbf16, #tpu.memory_space<vmem>>
    %10 = tpu.memref_slice %arg9[%c2_i32] : memref<4x!tpu.dma_semaphore, #tpu.memory_space<semaphore_mem>> -> memref<1x!tpu.dma_semaphore, #tpu.memory_space<semaphore_mem>>
    %11 = tpu.memref_squeeze %10 : memref<1x!tpu.dma_semaphore, #tpu.memory_space<semaphore_mem>> -> memref<!tpu.dma_semaphore, #tpu.memory_space<semaphore_mem>>
    tpu.enqueue_dma source(%8 : memref<8x2x128x128xbf16, #tpu.memory_space<any>>) target(%9 : memref<8x2x128x128xbf16, #tpu.memory_space<vmem>>) target_semaphore(%11 : memref<!tpu.dma_semaphore, #tpu.memory_space<semaphore_mem>>)
    %c3_i32 = arith.constant 3 : i32
    %c24_i32 = arith.constant 24 : i32
    %c0_i32_22 = arith.constant 0 : i32
    %c0_i32_23 = arith.constant 0 : i32
    %c0_i32_24 = arith.constant 0 : i32
    %12 = tpu.memref_slice %arg2[%c24_i32, %c0_i32_22, %c0_i32_23, %c0_i32_24] : memref<32x2x128x128xbf16, #tpu.memory_space<any>> -> memref<8x2x128x128xbf16, #tpu.memory_space<any>>
    %c24_i32_25 = arith.constant 24 : i32
    %c0_i32_26 = arith.constant 0 : i32
    %c0_i32_27 = arith.constant 0 : i32
    %c0_i32_28 = arith.constant 0 : i32
    %13 = tpu.memref_slice %arg7[%c24_i32_25, %c0_i32_26, %c0_i32_27, %c0_i32_28] : memref<32x2x128x128xbf16, #tpu.memory_space<vmem>> -> memref<8x2x128x128xbf16, #tpu.memory_space<vmem>>
    %14 = tpu.memref_slice %arg9[%c3_i32] : memref<4x!tpu.dma_semaphore, #tpu.memory_space<semaphore_mem>> -> memref<1x!tpu.dma_semaphore, #tpu.memory_space<semaphore_mem>>
    %15 = tpu.memref_squeeze %14 : memref<1x!tpu.dma_semaphore, #tpu.memory_space<semaphore_mem>> -> memref<!tpu.dma_semaphore, #tpu.memory_space<semaphore_mem>>
    tpu.enqueue_dma source(%12 : memref<8x2x128x128xbf16, #tpu.memory_space<any>>) target(%13 : memref<8x2x128x128xbf16, #tpu.memory_space<vmem>>) target_semaphore(%15 : memref<!tpu.dma_semaphore, #tpu.memory_space<semaphore_mem>>)
    %c0_i32_29 = arith.constant 0 : i32
    %c0_i32_30 = arith.constant 0 : i32
    %c0_i32_31 = arith.constant 0 : i32
    %c0_i32_32 = arith.constant 0 : i32
    %16 = tpu.memref_slice %arg4[%c0_i32_30, %c0_i32_31, %c0_i32_32] : memref<31x128x128xbf16, #tpu.memory_space<any>> -> memref<8x128x128xbf16, #tpu.memory_space<any>>
    %c0_i32_33 = arith.constant 0 : i32
    %c0_i32_34 = arith.constant 0 : i32
    %c0_i32_35 = arith.constant 0 : i32
    %17 = tpu.memref_slice %arg8[%c0_i32_33, %c0_i32_34, %c0_i32_35] : memref<31x128x128xbf16, #tpu.memory_space<vmem>> -> memref<8x128x128xbf16, #tpu.memory_space<vmem>>
    %18 = tpu.memref_slice %arg10[%c0_i32_29] : memref<4x!tpu.dma_semaphore, #tpu.memory_space<semaphore_mem>> -> memref<1x!tpu.dma_semaphore, #tpu.memory_space<semaphore_mem>>
    %19 = tpu.memref_squeeze %18 : memref<1x!tpu.dma_semaphore, #tpu.memory_space<semaphore_mem>> -> memref<!tpu.dma_semaphore, #tpu.memory_space<semaphore_mem>>
    tpu.enqueue_dma source(%16 : memref<8x128x128xbf16, #tpu.memory_space<any>>) target(%17 : memref<8x128x128xbf16, #tpu.memory_space<vmem>>) target_semaphore(%19 : memref<!tpu.dma_semaphore, #tpu.memory_space<semaphore_mem>>)
    %c1_i32_36 = arith.constant 1 : i32
    %c8_i32_37 = arith.constant 8 : i32
    %c0_i32_38 = arith.constant 0 : i32
    %c0_i32_39 = arith.constant 0 : i32
    %20 = tpu.memref_slice %arg4[%c8_i32_37, %c0_i32_38, %c0_i32_39] : memref<31x128x128xbf16, #tpu.memory_space<any>> -> memref<8x128x128xbf16, #tpu.memory_space<any>>
    %c8_i32_40 = arith.constant 8 : i32
    %c0_i32_41 = arith.constant 0 : i32
    %c0_i32_42 = arith.constant 0 : i32
    %21 = tpu.memref_slice %arg8[%c8_i32_40, %c0_i32_41, %c0_i32_42] : memref<31x128x128xbf16, #tpu.memory_space<vmem>> -> memref<8x128x128xbf16, #tpu.memory_space<vmem>>
    %22 = tpu.memref_slice %arg10[%c1_i32_36] : memref<4x!tpu.dma_semaphore, #tpu.memory_space<semaphore_mem>> -> memref<1x!tpu.dma_semaphore, #tpu.memory_space<semaphore_mem>>
    %23 = tpu.memref_squeeze %22 : memref<1x!tpu.dma_semaphore, #tpu.memory_space<semaphore_mem>> -> memref<!tpu.dma_semaphore, #tpu.memory_space<semaphore_mem>>
    tpu.enqueue_dma source(%20 : memref<8x128x128xbf16, #tpu.memory_space<any>>) target(%21 : memref<8x128x128xbf16, #tpu.memory_space<vmem>>) target_semaphore(%23 : memref<!tpu.dma_semaphore, #tpu.memory_space<semaphore_mem>>)
    %c2_i32_43 = arith.constant 2 : i32
    %c16_i32_44 = arith.constant 16 : i32
    %c0_i32_45 = arith.constant 0 : i32
    %c0_i32_46 = arith.constant 0 : i32
    %24 = tpu.memref_slice %arg4[%c16_i32_44, %c0_i32_45, %c0_i32_46] : memref<31x128x128xbf16, #tpu.memory_space<any>> -> memref<8x128x128xbf16, #tpu.memory_space<any>>
    %c16_i32_47 = arith.constant 16 : i32
    %c0_i32_48 = arith.constant 0 : i32
    %c0_i32_49 = arith.constant 0 : i32
    %25 = tpu.memref_slice %arg8[%c16_i32_47, %c0_i32_48, %c0_i32_49] : memref<31x128x128xbf16, #tpu.memory_space<vmem>> -> memref<8x128x128xbf16, #tpu.memory_space<vmem>>
    %26 = tpu.memref_slice %arg10[%c2_i32_43] : memref<4x!tpu.dma_semaphore, #tpu.memory_space<semaphore_mem>> -> memref<1x!tpu.dma_semaphore, #tpu.memory_space<semaphore_mem>>
    %27 = tpu.memref_squeeze %26 : memref<1x!tpu.dma_semaphore, #tpu.memory_space<semaphore_mem>> -> memref<!tpu.dma_semaphore, #tpu.memory_space<semaphore_mem>>
    tpu.enqueue_dma source(%24 : memref<8x128x128xbf16, #tpu.memory_space<any>>) target(%25 : memref<8x128x128xbf16, #tpu.memory_space<vmem>>) target_semaphore(%27 : memref<!tpu.dma_semaphore, #tpu.memory_space<semaphore_mem>>)
    %c3_i32_50 = arith.constant 3 : i32
    %c24_i32_51 = arith.constant 24 : i32
    %c0_i32_52 = arith.constant 0 : i32
    %c0_i32_53 = arith.constant 0 : i32
    %28 = tpu.memref_slice %arg4[%c24_i32_51, %c0_i32_52, %c0_i32_53] : memref<31x128x128xbf16, #tpu.memory_space<any>> -> memref<7x128x128xbf16, #tpu.memory_space<any>>
    %c24_i32_54 = arith.constant 24 : i32
    %c0_i32_55 = arith.constant 0 : i32
    %c0_i32_56 = arith.constant 0 : i32
    %29 = tpu.memref_slice %arg8[%c24_i32_54, %c0_i32_55, %c0_i32_56] : memref<31x128x128xbf16, #tpu.memory_space<vmem>> -> memref<7x128x128xbf16, #tpu.memory_space<vmem>>
    %30 = tpu.memref_slice %arg10[%c3_i32_50] : memref<4x!tpu.dma_semaphore, #tpu.memory_space<semaphore_mem>> -> memref<1x!tpu.dma_semaphore, #tpu.memory_space<semaphore_mem>>
    %31 = tpu.memref_squeeze %30 : memref<1x!tpu.dma_semaphore, #tpu.memory_space<semaphore_mem>> -> memref<!tpu.dma_semaphore, #tpu.memory_space<semaphore_mem>>
    tpu.enqueue_dma source(%28 : memref<7x128x128xbf16, #tpu.memory_space<any>>) target(%29 : memref<7x128x128xbf16, #tpu.memory_space<vmem>>) target_semaphore(%31 : memref<!tpu.dma_semaphore, #tpu.memory_space<semaphore_mem>>)
    %c0 = arith.constant 0 : index
    %c0_57 = arith.constant 0 : index
    %32 = vector.load %arg0[%c0, %c0_57] : memref<16x16xbf16, #tpu.memory_space<vmem>>, vector<16x16xbf16>
    %c0_58 = arith.constant 0 : index
    %c0_59 = arith.constant 0 : index
    %33 = vector.load %arg1[%c0_58, %c0_59] : memref<16x128xf32, #tpu.memory_space<vmem>>, vector<16x128xf32>
    %c0_i32_60 = arith.constant 0 : i32
    %c0_i32_61 = arith.constant 0 : i32
    %c0_i32_62 = arith.constant 0 : i32
    %c0_i32_63 = arith.constant 0 : i32
    %c0_i32_64 = arith.constant 0 : i32
    %34 = tpu.memref_slice %arg2[%c0_i32_61, %c0_i32_62, %c0_i32_63, %c0_i32_64] : memref<32x2x128x128xbf16, #tpu.memory_space<any>> -> memref<8x2x128x128xbf16, #tpu.memory_space<any>>
    %c0_i32_65 = arith.constant 0 : i32
    %c0_i32_66 = arith.constant 0 : i32
    %c0_i32_67 = arith.constant 0 : i32
    %c0_i32_68 = arith.constant 0 : i32
    %35 = tpu.memref_slice %arg7[%c0_i32_65, %c0_i32_66, %c0_i32_67, %c0_i32_68] : memref<32x2x128x128xbf16, #tpu.memory_space<vmem>> -> memref<8x2x128x128xbf16, #tpu.memory_space<vmem>>
    %36 = tpu.memref_slice %arg9[%c0_i32_60] : memref<4x!tpu.dma_semaphore, #tpu.memory_space<semaphore_mem>> -> memref<1x!tpu.dma_semaphore, #tpu.memory_space<semaphore_mem>>
    %37 = tpu.memref_squeeze %36 : memref<1x!tpu.dma_semaphore, #tpu.memory_space<semaphore_mem>> -> memref<!tpu.dma_semaphore, #tpu.memory_space<semaphore_mem>>
    tpu.wait_dma2 semaphore(%37 : memref<!tpu.dma_semaphore, #tpu.memory_space<semaphore_mem>>) src(%34 : memref<8x2x128x128xbf16, #tpu.memory_space<any>>) dst(%35 : memref<8x2x128x128xbf16, #tpu.memory_space<vmem>>)
    %38 = arith.truncf %33 : vector<16x128xf32> to vector<16x128xbf16>
    %cst = arith.constant dense<0.000000e+00> : vector<16x128xf32>
    %39 = tpu.matmul %32, %38, %cst {dimension_numbers = #tpu.dot_dimension_numbers<[1], [0], [0], [1], [0, 0, 1, 1], [], []>} : vector<16x16xbf16>, vector<16x128xbf16>, vector<16x128xf32> -> vector<16x128xf32>
    %c0_69 = arith.constant 0 : index
    %c0_70 = arith.constant 0 : index
    %c0_71 = arith.constant 0 : index
    %c0_72 = arith.constant 0 : index
    %40 = vector.load %arg7[%c0_69, %c0_70, %c0_71, %c0_72] : memref<32x2x128x128xbf16, #tpu.memory_space<vmem>>, vector<1x1x128x128xbf16>
    %41 = vector.shape_cast %40 : vector<1x1x128x128xbf16> to vector<128x128xbf16>
    %cst_73 = arith.constant dense<0.000000e+00> : vector<16x128xf32>
    %42 = tpu.matmul %38, %41, %cst_73 {dimension_numbers = #tpu.dot_dimension_numbers<[1], [0], [0], [1], [0, 0, 1, 1], [], []>} : vector<16x128xbf16>, vector<128x128xbf16>, vector<16x128xf32> -> vector<16x128xf32>
    %43 = arith.truncf %39 : vector<16x128xf32> to vector<16x128xbf16>
    %c0_74 = arith.constant 0 : index
    %c1 = arith.constant 1 : index
    %c0_75 = arith.constant 0 : index
    %c0_76 = arith.constant 0 : index
    %44 = vector.load %arg7[%c0_74, %c1, %c0_75, %c0_76] : memref<32x2x128x128xbf16, #tpu.memory_space<vmem>>, vector<1x1x128x128xbf16>
    %45 = vector.shape_cast %44 : vector<1x1x128x128xbf16> to vector<128x128xbf16>
    %cst_77 = arith.constant dense<0.000000e+00> : vector<16x128xf32>
    %46 = tpu.matmul %43, %45, %cst_77 {dimension_numbers = #tpu.dot_dimension_numbers<[1], [0], [0], [1], [0, 0, 1, 1], [], []>} : vector<16x128xbf16>, vector<128x128xbf16>, vector<16x128xf32> -> vector<16x128xf32>
    %47 = arith.addf %42, %46 : vector<16x128xf32>
    %c0_78 = arith.constant 0 : index
    %c0_79 = arith.constant 0 : index
    %c0_80 = arith.constant 0 : index
    %48 = vector.load %arg3[%c0_78, %c0_79, %c0_80] : memref<32x1x128xf32, #tpu.memory_space<vmem>>, vector<1x1x128xf32>
    %49 = vector.shape_cast %48 : vector<1x1x128xf32> to vector<1x128xf32>
    %50 = vector.broadcast %49 : vector<1x128xf32> to vector<16x128xf32>
    %51 = arith.addf %47, %50 : vector<16x128xf32>
    %cst_81 = arith.constant 0.000000e+00 : f32
    %52 = vector.broadcast %cst_81 : f32 to vector<16x128xf32>
    %53 = arith.maximumf %51, %52 : vector<16x128xf32>
    %54 = arith.truncf %53 : vector<16x128xf32> to vector<16x128xbf16>
    %cst_82 = arith.constant dense<0.000000e+00> : vector<16x128xf32>
    %55 = tpu.matmul %32, %54, %cst_82 {dimension_numbers = #tpu.dot_dimension_numbers<[1], [0], [0], [1], [0, 0, 1, 1], [], []>} : vector<16x16xbf16>, vector<16x128xbf16>, vector<16x128xf32> -> vector<16x128xf32>
    %c1_83 = arith.constant 1 : index
    %c0_84 = arith.constant 0 : index
    %c0_85 = arith.constant 0 : index
    %c0_86 = arith.constant 0 : index
    %56 = vector.load %arg7[%c1_83, %c0_84, %c0_85, %c0_86] : memref<32x2x128x128xbf16, #tpu.memory_space<vmem>>, vector<1x1x128x128xbf16>
    %57 = vector.shape_cast %56 : vector<1x1x128x128xbf16> to vector<128x128xbf16>
    %cst_87 = arith.constant dense<0.000000e+00> : vector<16x128xf32>
    %58 = tpu.matmul %54, %57, %cst_87 {dimension_numbers = #tpu.dot_dimension_numbers<[1], [0], [0], [1], [0, 0, 1, 1], [], []>} : vector<16x128xbf16>, vector<128x128xbf16>, vector<16x128xf32> -> vector<16x128xf32>
    %59 = arith.truncf %55 : vector<16x128xf32> to vector<16x128xbf16>
    %c1_88 = arith.constant 1 : index
    %c1_89 = arith.constant 1 : index
    %c0_90 = arith.constant 0 : index
    %c0_91 = arith.constant 0 : index
    %60 = vector.load %arg7[%c1_88, %c1_89, %c0_90, %c0_91] : memref<32x2x128x128xbf16, #tpu.memory_space<vmem>>, vector<1x1x128x128xbf16>
    %61 = vector.shape_cast %60 : vector<1x1x128x128xbf16> to vector<128x128xbf16>
    %cst_92 = arith.constant dense<0.000000e+00> : vector<16x128xf32>
    %62 = tpu.matmul %59, %61, %cst_92 {dimension_numbers = #tpu.dot_dimension_numbers<[1], [0], [0], [1], [0, 0, 1, 1], [], []>} : vector<16x128xbf16>, vector<128x128xbf16>, vector<16x128xf32> -> vector<16x128xf32>
    %63 = arith.addf %58, %62 : vector<16x128xf32>
    %c1_93 = arith.constant 1 : index
    %c0_94 = arith.constant 0 : index
    %c0_95 = arith.constant 0 : index
    %64 = vector.load %arg3[%c1_93, %c0_94, %c0_95] : memref<32x1x128xf32, #tpu.memory_space<vmem>>, vector<1x1x128xf32>
    %65 = vector.shape_cast %64 : vector<1x1x128xf32> to vector<1x128xf32>
    %66 = vector.broadcast %65 : vector<1x128xf32> to vector<16x128xf32>
    %67 = arith.addf %63, %66 : vector<16x128xf32>
    %cst_96 = arith.constant 0.000000e+00 : f32
    %68 = vector.broadcast %cst_96 : f32 to vector<16x128xf32>
    %69 = arith.maximumf %67, %68 : vector<16x128xf32>
    %70 = arith.addf %53, %69 : vector<16x128xf32>
    %c0_i32_97 = arith.constant 0 : i32
    %c0_i32_98 = arith.constant 0 : i32
    %c0_i32_99 = arith.constant 0 : i32
    %c0_i32_100 = arith.constant 0 : i32
    %71 = tpu.memref_slice %arg4[%c0_i32_98, %c0_i32_99, %c0_i32_100] : memref<31x128x128xbf16, #tpu.memory_space<any>> -> memref<8x128x128xbf16, #tpu.memory_space<any>>
    %c0_i32_101 = arith.constant 0 : i32
    %c0_i32_102 = arith.constant 0 : i32
    %c0_i32_103 = arith.constant 0 : i32
    %72 = tpu.memref_slice %arg8[%c0_i32_101, %c0_i32_102, %c0_i32_103] : memref<31x128x128xbf16, #tpu.memory_space<vmem>> -> memref<8x128x128xbf16, #tpu.memory_space<vmem>>
    %73 = tpu.memref_slice %arg10[%c0_i32_97] : memref<4x!tpu.dma_semaphore, #tpu.memory_space<semaphore_mem>> -> memref<1x!tpu.dma_semaphore, #tpu.memory_space<semaphore_mem>>
    %74 = tpu.memref_squeeze %73 : memref<1x!tpu.dma_semaphore, #tpu.memory_space<semaphore_mem>> -> memref<!tpu.dma_semaphore, #tpu.memory_space<semaphore_mem>>
    tpu.wait_dma2 semaphore(%74 : memref<!tpu.dma_semaphore, #tpu.memory_space<semaphore_mem>>) src(%71 : memref<8x128x128xbf16, #tpu.memory_space<any>>) dst(%72 : memref<8x128x128xbf16, #tpu.memory_space<vmem>>)
    %75 = arith.truncf %70 : vector<16x128xf32> to vector<16x128xbf16>
    %c0_104 = arith.constant 0 : index
    %c0_105 = arith.constant 0 : index
    %c0_106 = arith.constant 0 : index
    %76 = vector.load %arg8[%c0_104, %c0_105, %c0_106] : memref<31x128x128xbf16, #tpu.memory_space<vmem>>, vector<1x128x128xbf16>
    %77 = vector.shape_cast %76 : vector<1x128x128xbf16> to vector<128x128xbf16>
    %cst_107 = arith.constant dense<0.000000e+00> : vector<16x128xf32>
    %78 = tpu.matmul %75, %77, %cst_107 {dimension_numbers = #tpu.dot_dimension_numbers<[1], [0], [0], [1], [0, 0, 1, 1], [], []>} : vector<16x128xbf16>, vector<128x128xbf16>, vector<16x128xf32> -> vector<16x128xf32>
    %c0_108 = arith.constant 0 : index
    %c0_109 = arith.constant 0 : index
    %c0_110 = arith.constant 0 : index
    %79 = vector.load %arg5[%c0_108, %c0_109, %c0_110] : memref<31x1x128xf32, #tpu.memory_space<vmem>>, vector<1x1x128xf32>
    %80 = vector.shape_cast %79 : vector<1x1x128xf32> to vector<1x128xf32>
    %81 = vector.broadcast %80 : vector<1x128xf32> to vector<16x128xf32>
    %82 = arith.addf %78, %81 : vector<16x128xf32>
    %cst_111 = arith.constant 0.000000e+00 : f32
    %83 = vector.broadcast %cst_111 : f32 to vector<16x128xf32>
    %84 = arith.maximumf %82, %83 : vector<16x128xf32>
    %85 = arith.truncf %84 : vector<16x128xf32> to vector<16x128xbf16>
    %cst_112 = arith.constant dense<0.000000e+00> : vector<16x128xf32>
    %86 = tpu.matmul %32, %85, %cst_112 {dimension_numbers = #tpu.dot_dimension_numbers<[1], [0], [0], [1], [0, 0, 1, 1], [], []>} : vector<16x16xbf16>, vector<16x128xbf16>, vector<16x128xf32> -> vector<16x128xf32>
    %c2 = arith.constant 2 : index
    %c0_113 = arith.constant 0 : index
    %c0_114 = arith.constant 0 : index
    %c0_115 = arith.constant 0 : index
    %87 = vector.load %arg7[%c2, %c0_113, %c0_114, %c0_115] : memref<32x2x128x128xbf16, #tpu.memory_space<vmem>>, vector<1x1x128x128xbf16>
    %88 = vector.shape_cast %87 : vector<1x1x128x128xbf16> to vector<128x128xbf16>
    %cst_116 = arith.constant dense<0.000000e+00> : vector<16x128xf32>
    %89 = tpu.matmul %85, %88, %cst_116 {dimension_numbers = #tpu.dot_dimension_numbers<[1], [0], [0], [1], [0, 0, 1, 1], [], []>} : vector<16x128xbf16>, vector<128x128xbf16>, vector<16x128xf32> -> vector<16x128xf32>
    %90 = arith.truncf %86 : vector<16x128xf32> to vector<16x128xbf16>
    %c2_117 = arith.constant 2 : index
    %c1_118 = arith.constant 1 : index
    %c0_119 = arith.constant 0 : index
    %c0_120 = arith.constant 0 : index
    %91 = vector.load %arg7[%c2_117, %c1_118, %c0_119, %c0_120] : memref<32x2x128x128xbf16, #tpu.memory_space<vmem>>, vector<1x1x128x128xbf16>
    %92 = vector.shape_cast %91 : vector<1x1x128x128xbf16> to vector<128x128xbf16>
    %cst_121 = arith.constant dense<0.000000e+00> : vector<16x128xf32>
    %93 = tpu.matmul %90, %92, %cst_121 {dimension_numbers = #tpu.dot_dimension_numbers<[1], [0], [0], [1], [0, 0, 1, 1], [], []>} : vector<16x128xbf16>, vector<128x128xbf16>, vector<16x128xf32> -> vector<16x128xf32>
    %94 = arith.addf %89, %93 : vector<16x128xf32>
    %c2_122 = arith.constant 2 : index
    %c0_123 = arith.constant 0 : index
    %c0_124 = arith.constant 0 : index
    %95 = vector.load %arg3[%c2_122, %c0_123, %c0_124] : memref<32x1x128xf32, #tpu.memory_space<vmem>>, vector<1x1x128xf32>
    %96 = vector.shape_cast %95 : vector<1x1x128xf32> to vector<1x128xf32>
    %97 = vector.broadcast %96 : vector<1x128xf32> to vector<16x128xf32>
    %98 = arith.addf %94, %97 : vector<16x128xf32>
    %cst_125 = arith.constant 0.000000e+00 : f32
    %99 = vector.broadcast %cst_125 : f32 to vector<16x128xf32>
    %100 = arith.maximumf %98, %99 : vector<16x128xf32>
    %101 = arith.truncf %100 : vector<16x128xf32> to vector<16x128xbf16>
    %cst_126 = arith.constant dense<0.000000e+00> : vector<16x128xf32>
    %102 = tpu.matmul %32, %101, %cst_126 {dimension_numbers = #tpu.dot_dimension_numbers<[1], [0], [0], [1], [0, 0, 1, 1], [], []>} : vector<16x16xbf16>, vector<16x128xbf16>, vector<16x128xf32> -> vector<16x128xf32>
    %c3 = arith.constant 3 : index
    %c0_127 = arith.constant 0 : index
    %c0_128 = arith.constant 0 : index
    %c0_129 = arith.constant 0 : index
    %103 = vector.load %arg7[%c3, %c0_127, %c0_128, %c0_129] : memref<32x2x128x128xbf16, #tpu.memory_space<vmem>>, vector<1x1x128x128xbf16>
    %104 = vector.shape_cast %103 : vector<1x1x128x128xbf16> to vector<128x128xbf16>
    %cst_130 = arith.constant dense<0.000000e+00> : vector<16x128xf32>
    %105 = tpu.matmul %101, %104, %cst_130 {dimension_numbers = #tpu.dot_dimension_numbers<[1], [0], [0], [1], [0, 0, 1, 1], [], []>} : vector<16x128xbf16>, vector<128x128xbf16>, vector<16x128xf32> -> vector<16x128xf32>
    %106 = arith.truncf %102 : vector<16x128xf32> to vector<16x128xbf16>
    %c3_131 = arith.constant 3 : index
    %c1_132 = arith.constant 1 : index
    %c0_133 = arith.constant 0 : index
    %c0_134 = arith.constant 0 : index
    %107 = vector.load %arg7[%c3_131, %c1_132, %c0_133, %c0_134] : memref<32x2x128x128xbf16, #tpu.memory_space<vmem>>, vector<1x1x128x128xbf16>
    %108 = vector.shape_cast %107 : vector<1x1x128x128xbf16> to vector<128x128xbf16>
    %cst_135 = arith.constant dense<0.000000e+00> : vector<16x128xf32>
    %109 = tpu.matmul %106, %108, %cst_135 {dimension_numbers = #tpu.dot_dimension_numbers<[1], [0], [0], [1], [0, 0, 1, 1], [], []>} : vector<16x128xbf16>, vector<128x128xbf16>, vector<16x128xf32> -> vector<16x128xf32>
    %110 = arith.addf %105, %109 : vector<16x128xf32>
    %c3_136 = arith.constant 3 : index
    %c0_137 = arith.constant 0 : index
    %c0_138 = arith.constant 0 : index
    %111 = vector.load %arg3[%c3_136, %c0_137, %c0_138] : memref<32x1x128xf32, #tpu.memory_space<vmem>>, vector<1x1x128xf32>
    %112 = vector.shape_cast %111 : vector<1x1x128xf32> to vector<1x128xf32>
    %113 = vector.broadcast %112 : vector<1x128xf32> to vector<16x128xf32>
    %114 = arith.addf %110, %113 : vector<16x128xf32>
    %cst_139 = arith.constant 0.000000e+00 : f32
    %115 = vector.broadcast %cst_139 : f32 to vector<16x128xf32>
    %116 = arith.maximumf %114, %115 : vector<16x128xf32>
    %117 = arith.addf %100, %116 : vector<16x128xf32>
    %118 = arith.truncf %117 : vector<16x128xf32> to vector<16x128xbf16>
    %c1_140 = arith.constant 1 : index
    %c0_141 = arith.constant 0 : index
    %c0_142 = arith.constant 0 : index
    %119 = vector.load %arg8[%c1_140, %c0_141, %c0_142] : memref<31x128x128xbf16, #tpu.memory_space<vmem>>, vector<1x128x128xbf16>
    %120 = vector.shape_cast %119 : vector<1x128x128xbf16> to vector<128x128xbf16>
    %cst_143 = arith.constant dense<0.000000e+00> : vector<16x128xf32>
    %121 = tpu.matmul %118, %120, %cst_143 {dimension_numbers = #tpu.dot_dimension_numbers<[1], [0], [0], [1], [0, 0, 1, 1], [], []>} : vector<16x128xbf16>, vector<128x128xbf16>, vector<16x128xf32> -> vector<16x128xf32>
    %c1_144 = arith.constant 1 : index
    %c0_145 = arith.constant 0 : index
    %c0_146 = arith.constant 0 : index
    %122 = vector.load %arg5[%c1_144, %c0_145, %c0_146] : memref<31x1x128xf32, #tpu.memory_space<vmem>>, vector<1x1x128xf32>
    %123 = vector.shape_cast %122 : vector<1x1x128xf32> to vector<1x128xf32>
    %124 = vector.broadcast %123 : vector<1x128xf32> to vector<16x128xf32>
    %125 = arith.addf %121, %124 : vector<16x128xf32>
    %cst_147 = arith.constant 0.000000e+00 : f32
    %126 = vector.broadcast %cst_147 : f32 to vector<16x128xf32>
    %127 = arith.maximumf %125, %126 : vector<16x128xf32>
    %128 = arith.addf %84, %127 : vector<16x128xf32>
    %129 = arith.truncf %128 : vector<16x128xf32> to vector<16x128xbf16>
    %c2_148 = arith.constant 2 : index
    %c0_149 = arith.constant 0 : index
    %c0_150 = arith.constant 0 : index
    %130 = vector.load %arg8[%c2_148, %c0_149, %c0_150] : memref<31x128x128xbf16, #tpu.memory_space<vmem>>, vector<1x128x128xbf16>
    %131 = vector.shape_cast %130 : vector<1x128x128xbf16> to vector<128x128xbf16>
    %cst_151 = arith.constant dense<0.000000e+00> : vector<16x128xf32>
    %132 = tpu.matmul %129, %131, %cst_151 {dimension_numbers = #tpu.dot_dimension_numbers<[1], [0], [0], [1], [0, 0, 1, 1], [], []>} : vector<16x128xbf16>, vector<128x128xbf16>, vector<16x128xf32> -> vector<16x128xf32>
    %c2_152 = arith.constant 2 : index
    %c0_153 = arith.constant 0 : index
    %c0_154 = arith.constant 0 : index
    %133 = vector.load %arg5[%c2_152, %c0_153, %c0_154] : memref<31x1x128xf32, #tpu.memory_space<vmem>>, vector<1x1x128xf32>
    %134 = vector.shape_cast %133 : vector<1x1x128xf32> to vector<1x128xf32>
    %135 = vector.broadcast %134 : vector<1x128xf32> to vector<16x128xf32>
    %136 = arith.addf %132, %135 : vector<16x128xf32>
    %cst_155 = arith.constant 0.000000e+00 : f32
    %137 = vector.broadcast %cst_155 : f32 to vector<16x128xf32>
    %138 = arith.maximumf %136, %137 : vector<16x128xf32>
    %139 = arith.truncf %138 : vector<16x128xf32> to vector<16x128xbf16>
    %cst_156 = arith.constant dense<0.000000e+00> : vector<16x128xf32>
    %140 = tpu.matmul %32, %139, %cst_156 {dimension_numbers = #tpu.dot_dimension_numbers<[1], [0], [0], [1], [0, 0, 1, 1], [], []>} : vector<16x16xbf16>, vector<16x128xbf16>, vector<16x128xf32> -> vector<16x128xf32>
    %c4 = arith.constant 4 : index
    %c0_157 = arith.constant 0 : index
    %c0_158 = arith.constant 0 : index
    %c0_159 = arith.constant 0 : index
    %141 = vector.load %arg7[%c4, %c0_157, %c0_158, %c0_159] : memref<32x2x128x128xbf16, #tpu.memory_space<vmem>>, vector<1x1x128x128xbf16>
    %142 = vector.shape_cast %141 : vector<1x1x128x128xbf16> to vector<128x128xbf16>
    %cst_160 = arith.constant dense<0.000000e+00> : vector<16x128xf32>
    %143 = tpu.matmul %139, %142, %cst_160 {dimension_numbers = #tpu.dot_dimension_numbers<[1], [0], [0], [1], [0, 0, 1, 1], [], []>} : vector<16x128xbf16>, vector<128x128xbf16>, vector<16x128xf32> -> vector<16x128xf32>
    %144 = arith.truncf %140 : vector<16x128xf32> to vector<16x128xbf16>
    %c4_161 = arith.constant 4 : index
    %c1_162 = arith.constant 1 : index
    %c0_163 = arith.constant 0 : index
    %c0_164 = arith.constant 0 : index
    %145 = vector.load %arg7[%c4_161, %c1_162, %c0_163, %c0_164] : memref<32x2x128x128xbf16, #tpu.memory_space<vmem>>, vector<1x1x128x128xbf16>
    %146 = vector.shape_cast %145 : vector<1x1x128x128xbf16> to vector<128x128xbf16>
    %cst_165 = arith.constant dense<0.000000e+00> : vector<16x128xf32>
    %147 = tpu.matmul %144, %146, %cst_165 {dimension_numbers = #tpu.dot_dimension_numbers<[1], [0], [0], [1], [0, 0, 1, 1], [], []>} : vector<16x128xbf16>, vector<128x128xbf16>, vector<16x128xf32> -> vector<16x128xf32>
    %148 = arith.addf %143, %147 : vector<16x128xf32>
    %c4_166 = arith.constant 4 : index
    %c0_167 = arith.constant 0 : index
    %c0_168 = arith.constant 0 : index
    %149 = vector.load %arg3[%c4_166, %c0_167, %c0_168] : memref<32x1x128xf32, #tpu.memory_space<vmem>>, vector<1x1x128xf32>
    %150 = vector.shape_cast %149 : vector<1x1x128xf32> to vector<1x128xf32>
    %151 = vector.broadcast %150 : vector<1x128xf32> to vector<16x128xf32>
    %152 = arith.addf %148, %151 : vector<16x128xf32>
    %cst_169 = arith.constant 0.000000e+00 : f32
    %153 = vector.broadcast %cst_169 : f32 to vector<16x128xf32>
    %154 = arith.maximumf %152, %153 : vector<16x128xf32>
    %155 = arith.truncf %154 : vector<16x128xf32> to vector<16x128xbf16>
    %cst_170 = arith.constant dense<0.000000e+00> : vector<16x128xf32>
    %156 = tpu.matmul %32, %155, %cst_170 {dimension_numbers = #tpu.dot_dimension_numbers<[1], [0], [0], [1], [0, 0, 1, 1], [], []>} : vector<16x16xbf16>, vector<16x128xbf16>, vector<16x128xf32> -> vector<16x128xf32>
    %c5 = arith.constant 5 : index
    %c0_171 = arith.constant 0 : index
    %c0_172 = arith.constant 0 : index
    %c0_173 = arith.constant 0 : index
    %157 = vector.load %arg7[%c5, %c0_171, %c0_172, %c0_173] : memref<32x2x128x128xbf16, #tpu.memory_space<vmem>>, vector<1x1x128x128xbf16>
    %158 = vector.shape_cast %157 : vector<1x1x128x128xbf16> to vector<128x128xbf16>
    %cst_174 = arith.constant dense<0.000000e+00> : vector<16x128xf32>
    %159 = tpu.matmul %155, %158, %cst_174 {dimension_numbers = #tpu.dot_dimension_numbers<[1], [0], [0], [1], [0, 0, 1, 1], [], []>} : vector<16x128xbf16>, vector<128x128xbf16>, vector<16x128xf32> -> vector<16x128xf32>
    %160 = arith.truncf %156 : vector<16x128xf32> to vector<16x128xbf16>
    %c5_175 = arith.constant 5 : index
    %c1_176 = arith.constant 1 : index
    %c0_177 = arith.constant 0 : index
    %c0_178 = arith.constant 0 : index
    %161 = vector.load %arg7[%c5_175, %c1_176, %c0_177, %c0_178] : memref<32x2x128x128xbf16, #tpu.memory_space<vmem>>, vector<1x1x128x128xbf16>
    %162 = vector.shape_cast %161 : vector<1x1x128x128xbf16> to vector<128x128xbf16>
    %cst_179 = arith.constant dense<0.000000e+00> : vector<16x128xf32>
    %163 = tpu.matmul %160, %162, %cst_179 {dimension_numbers = #tpu.dot_dimension_numbers<[1], [0], [0], [1], [0, 0, 1, 1], [], []>} : vector<16x128xbf16>, vector<128x128xbf16>, vector<16x128xf32> -> vector<16x128xf32>
    %164 = arith.addf %159, %163 : vector<16x128xf32>
    %c5_180 = arith.constant 5 : index
    %c0_181 = arith.constant 0 : index
    %c0_182 = arith.constant 0 : index
    %165 = vector.load %arg3[%c5_180, %c0_181, %c0_182] : memref<32x1x128xf32, #tpu.memory_space<vmem>>, vector<1x1x128xf32>
    %166 = vector.shape_cast %165 : vector<1x1x128xf32> to vector<1x128xf32>
    %167 = vector.broadcast %166 : vector<1x128xf32> to vector<16x128xf32>
    %168 = arith.addf %164, %167 : vector<16x128xf32>
    %cst_183 = arith.constant 0.000000e+00 : f32
    %169 = vector.broadcast %cst_183 : f32 to vector<16x128xf32>
    %170 = arith.maximumf %168, %169 : vector<16x128xf32>
    %171 = arith.addf %154, %170 : vector<16x128xf32>
    %172 = arith.truncf %171 : vector<16x128xf32> to vector<16x128xbf16>
    %c3_184 = arith.constant 3 : index
    %c0_185 = arith.constant 0 : index
    %c0_186 = arith.constant 0 : index
    %173 = vector.load %arg8[%c3_184, %c0_185, %c0_186] : memref<31x128x128xbf16, #tpu.memory_space<vmem>>, vector<1x128x128xbf16>
    %174 = vector.shape_cast %173 : vector<1x128x128xbf16> to vector<128x128xbf16>
    %cst_187 = arith.constant dense<0.000000e+00> : vector<16x128xf32>
    %175 = tpu.matmul %172, %174, %cst_187 {dimension_numbers = #tpu.dot_dimension_numbers<[1], [0], [0], [1], [0, 0, 1, 1], [], []>} : vector<16x128xbf16>, vector<128x128xbf16>, vector<16x128xf32> -> vector<16x128xf32>
    %c3_188 = arith.constant 3 : index
    %c0_189 = arith.constant 0 : index
    %c0_190 = arith.constant 0 : index
    %176 = vector.load %arg5[%c3_188, %c0_189, %c0_190] : memref<31x1x128xf32, #tpu.memory_space<vmem>>, vector<1x1x128xf32>
    %177 = vector.shape_cast %176 : vector<1x1x128xf32> to vector<1x128xf32>
    %178 = vector.broadcast %177 : vector<1x128xf32> to vector<16x128xf32>
    %179 = arith.addf %175, %178 : vector<16x128xf32>
    %cst_191 = arith.constant 0.000000e+00 : f32
    %180 = vector.broadcast %cst_191 : f32 to vector<16x128xf32>
    %181 = arith.maximumf %179, %180 : vector<16x128xf32>
    %182 = arith.truncf %181 : vector<16x128xf32> to vector<16x128xbf16>
    %cst_192 = arith.constant dense<0.000000e+00> : vector<16x128xf32>
    %183 = tpu.matmul %32, %182, %cst_192 {dimension_numbers = #tpu.dot_dimension_numbers<[1], [0], [0], [1], [0, 0, 1, 1], [], []>} : vector<16x16xbf16>, vector<16x128xbf16>, vector<16x128xf32> -> vector<16x128xf32>
    %c6 = arith.constant 6 : index
    %c0_193 = arith.constant 0 : index
    %c0_194 = arith.constant 0 : index
    %c0_195 = arith.constant 0 : index
    %184 = vector.load %arg7[%c6, %c0_193, %c0_194, %c0_195] : memref<32x2x128x128xbf16, #tpu.memory_space<vmem>>, vector<1x1x128x128xbf16>
    %185 = vector.shape_cast %184 : vector<1x1x128x128xbf16> to vector<128x128xbf16>
    %cst_196 = arith.constant dense<0.000000e+00> : vector<16x128xf32>
    %186 = tpu.matmul %182, %185, %cst_196 {dimension_numbers = #tpu.dot_dimension_numbers<[1], [0], [0], [1], [0, 0, 1, 1], [], []>} : vector<16x128xbf16>, vector<128x128xbf16>, vector<16x128xf32> -> vector<16x128xf32>
    %187 = arith.truncf %183 : vector<16x128xf32> to vector<16x128xbf16>
    %c6_197 = arith.constant 6 : index
    %c1_198 = arith.constant 1 : index
    %c0_199 = arith.constant 0 : index
    %c0_200 = arith.constant 0 : index
    %188 = vector.load %arg7[%c6_197, %c1_198, %c0_199, %c0_200] : memref<32x2x128x128xbf16, #tpu.memory_space<vmem>>, vector<1x1x128x128xbf16>
    %189 = vector.shape_cast %188 : vector<1x1x128x128xbf16> to vector<128x128xbf16>
    %cst_201 = arith.constant dense<0.000000e+00> : vector<16x128xf32>
    %190 = tpu.matmul %187, %189, %cst_201 {dimension_numbers = #tpu.dot_dimension_numbers<[1], [0], [0], [1], [0, 0, 1, 1], [], []>} : vector<16x128xbf16>, vector<128x128xbf16>, vector<16x128xf32> -> vector<16x128xf32>
    %191 = arith.addf %186, %190 : vector<16x128xf32>
    %c6_202 = arith.constant 6 : index
    %c0_203 = arith.constant 0 : index
    %c0_204 = arith.constant 0 : index
    %192 = vector.load %arg3[%c6_202, %c0_203, %c0_204] : memref<32x1x128xf32, #tpu.memory_space<vmem>>, vector<1x1x128xf32>
    %193 = vector.shape_cast %192 : vector<1x1x128xf32> to vector<1x128xf32>
    %194 = vector.broadcast %193 : vector<1x128xf32> to vector<16x128xf32>
    %195 = arith.addf %191, %194 : vector<16x128xf32>
    %cst_205 = arith.constant 0.000000e+00 : f32
    %196 = vector.broadcast %cst_205 : f32 to vector<16x128xf32>
    %197 = arith.maximumf %195, %196 : vector<16x128xf32>
    %198 = arith.truncf %197 : vector<16x128xf32> to vector<16x128xbf16>
    %cst_206 = arith.constant dense<0.000000e+00> : vector<16x128xf32>
    %199 = tpu.matmul %32, %198, %cst_206 {dimension_numbers = #tpu.dot_dimension_numbers<[1], [0], [0], [1], [0, 0, 1, 1], [], []>} : vector<16x16xbf16>, vector<16x128xbf16>, vector<16x128xf32> -> vector<16x128xf32>
    %c7 = arith.constant 7 : index
    %c0_207 = arith.constant 0 : index
    %c0_208 = arith.constant 0 : index
    %c0_209 = arith.constant 0 : index
    %200 = vector.load %arg7[%c7, %c0_207, %c0_208, %c0_209] : memref<32x2x128x128xbf16, #tpu.memory_space<vmem>>, vector<1x1x128x128xbf16>
    %201 = vector.shape_cast %200 : vector<1x1x128x128xbf16> to vector<128x128xbf16>
    %cst_210 = arith.constant dense<0.000000e+00> : vector<16x128xf32>
    %202 = tpu.matmul %198, %201, %cst_210 {dimension_numbers = #tpu.dot_dimension_numbers<[1], [0], [0], [1], [0, 0, 1, 1], [], []>} : vector<16x128xbf16>, vector<128x128xbf16>, vector<16x128xf32> -> vector<16x128xf32>
    %203 = arith.truncf %199 : vector<16x128xf32> to vector<16x128xbf16>
    %c7_211 = arith.constant 7 : index
    %c1_212 = arith.constant 1 : index
    %c0_213 = arith.constant 0 : index
    %c0_214 = arith.constant 0 : index
    %204 = vector.load %arg7[%c7_211, %c1_212, %c0_213, %c0_214] : memref<32x2x128x128xbf16, #tpu.memory_space<vmem>>, vector<1x1x128x128xbf16>
    %205 = vector.shape_cast %204 : vector<1x1x128x128xbf16> to vector<128x128xbf16>
    %cst_215 = arith.constant dense<0.000000e+00> : vector<16x128xf32>
    %206 = tpu.matmul %203, %205, %cst_215 {dimension_numbers = #tpu.dot_dimension_numbers<[1], [0], [0], [1], [0, 0, 1, 1], [], []>} : vector<16x128xbf16>, vector<128x128xbf16>, vector<16x128xf32> -> vector<16x128xf32>
    %207 = arith.addf %202, %206 : vector<16x128xf32>
    %c7_216 = arith.constant 7 : index
    %c0_217 = arith.constant 0 : index
    %c0_218 = arith.constant 0 : index
    %208 = vector.load %arg3[%c7_216, %c0_217, %c0_218] : memref<32x1x128xf32, #tpu.memory_space<vmem>>, vector<1x1x128xf32>
    %209 = vector.shape_cast %208 : vector<1x1x128xf32> to vector<1x128xf32>
    %210 = vector.broadcast %209 : vector<1x128xf32> to vector<16x128xf32>
    %211 = arith.addf %207, %210 : vector<16x128xf32>
    %cst_219 = arith.constant 0.000000e+00 : f32
    %212 = vector.broadcast %cst_219 : f32 to vector<16x128xf32>
    %213 = arith.maximumf %211, %212 : vector<16x128xf32>
    %214 = arith.addf %197, %213 : vector<16x128xf32>
    %215 = arith.truncf %214 : vector<16x128xf32> to vector<16x128xbf16>
    %c4_220 = arith.constant 4 : index
    %c0_221 = arith.constant 0 : index
    %c0_222 = arith.constant 0 : index
    %216 = vector.load %arg8[%c4_220, %c0_221, %c0_222] : memref<31x128x128xbf16, #tpu.memory_space<vmem>>, vector<1x128x128xbf16>
    %217 = vector.shape_cast %216 : vector<1x128x128xbf16> to vector<128x128xbf16>
    %cst_223 = arith.constant dense<0.000000e+00> : vector<16x128xf32>
    %218 = tpu.matmul %215, %217, %cst_223 {dimension_numbers = #tpu.dot_dimension_numbers<[1], [0], [0], [1], [0, 0, 1, 1], [], []>} : vector<16x128xbf16>, vector<128x128xbf16>, vector<16x128xf32> -> vector<16x128xf32>
    %c4_224 = arith.constant 4 : index
    %c0_225 = arith.constant 0 : index
    %c0_226 = arith.constant 0 : index
    %219 = vector.load %arg5[%c4_224, %c0_225, %c0_226] : memref<31x1x128xf32, #tpu.memory_space<vmem>>, vector<1x1x128xf32>
    %220 = vector.shape_cast %219 : vector<1x1x128xf32> to vector<1x128xf32>
    %221 = vector.broadcast %220 : vector<1x128xf32> to vector<16x128xf32>
    %222 = arith.addf %218, %221 : vector<16x128xf32>
    %cst_227 = arith.constant 0.000000e+00 : f32
    %223 = vector.broadcast %cst_227 : f32 to vector<16x128xf32>
    %224 = arith.maximumf %222, %223 : vector<16x128xf32>
    %225 = arith.addf %181, %224 : vector<16x128xf32>
    %226 = arith.truncf %225 : vector<16x128xf32> to vector<16x128xbf16>
    %c5_228 = arith.constant 5 : index
    %c0_229 = arith.constant 0 : index
    %c0_230 = arith.constant 0 : index
    %227 = vector.load %arg8[%c5_228, %c0_229, %c0_230] : memref<31x128x128xbf16, #tpu.memory_space<vmem>>, vector<1x128x128xbf16>
    %228 = vector.shape_cast %227 : vector<1x128x128xbf16> to vector<128x128xbf16>
    %cst_231 = arith.constant dense<0.000000e+00> : vector<16x128xf32>
    %229 = tpu.matmul %226, %228, %cst_231 {dimension_numbers = #tpu.dot_dimension_numbers<[1], [0], [0], [1], [0, 0, 1, 1], [], []>} : vector<16x128xbf16>, vector<128x128xbf16>, vector<16x128xf32> -> vector<16x128xf32>
    %c5_232 = arith.constant 5 : index
    %c0_233 = arith.constant 0 : index
    %c0_234 = arith.constant 0 : index
    %230 = vector.load %arg5[%c5_232, %c0_233, %c0_234] : memref<31x1x128xf32, #tpu.memory_space<vmem>>, vector<1x1x128xf32>
    %231 = vector.shape_cast %230 : vector<1x1x128xf32> to vector<1x128xf32>
    %232 = vector.broadcast %231 : vector<1x128xf32> to vector<16x128xf32>
    %233 = arith.addf %229, %232 : vector<16x128xf32>
    %234 = arith.addf %138, %233 : vector<16x128xf32>
    %235 = arith.truncf %234 : vector<16x128xf32> to vector<16x128xbf16>
    %c6_235 = arith.constant 6 : index
    %c0_236 = arith.constant 0 : index
    %c0_237 = arith.constant 0 : index
    %236 = vector.load %arg8[%c6_235, %c0_236, %c0_237] : memref<31x128x128xbf16, #tpu.memory_space<vmem>>, vector<1x128x128xbf16>
    %237 = vector.shape_cast %236 : vector<1x128x128xbf16> to vector<128x128xbf16>
    %cst_238 = arith.constant dense<0.000000e+00> : vector<16x128xf32>
    %238 = tpu.matmul %235, %237, %cst_238 {dimension_numbers = #tpu.dot_dimension_numbers<[1], [0], [0], [1], [0, 0, 1, 1], [], []>} : vector<16x128xbf16>, vector<128x128xbf16>, vector<16x128xf32> -> vector<16x128xf32>
    %c6_239 = arith.constant 6 : index
    %c0_240 = arith.constant 0 : index
    %c0_241 = arith.constant 0 : index
    %239 = vector.load %arg5[%c6_239, %c0_240, %c0_241] : memref<31x1x128xf32, #tpu.memory_space<vmem>>, vector<1x1x128xf32>
    %240 = vector.shape_cast %239 : vector<1x1x128xf32> to vector<1x128xf32>
    %241 = vector.broadcast %240 : vector<1x128xf32> to vector<16x128xf32>
    %242 = arith.addf %238, %241 : vector<16x128xf32>
    %cst_242 = arith.constant 0.000000e+00 : f32
    %243 = vector.broadcast %cst_242 : f32 to vector<16x128xf32>
    %244 = arith.maximumf %242, %243 : vector<16x128xf32>
    %c1_i32_243 = arith.constant 1 : i32
    %c8_i32_244 = arith.constant 8 : i32
    %c0_i32_245 = arith.constant 0 : i32
    %c0_i32_246 = arith.constant 0 : i32
    %c0_i32_247 = arith.constant 0 : i32
    %245 = tpu.memref_slice %arg2[%c8_i32_244, %c0_i32_245, %c0_i32_246, %c0_i32_247] : memref<32x2x128x128xbf16, #tpu.memory_space<any>> -> memref<8x2x128x128xbf16, #tpu.memory_space<any>>
    %c8_i32_248 = arith.constant 8 : i32
    %c0_i32_249 = arith.constant 0 : i32
    %c0_i32_250 = arith.constant 0 : i32
    %c0_i32_251 = arith.constant 0 : i32
    %246 = tpu.memref_slice %arg7[%c8_i32_248, %c0_i32_249, %c0_i32_250, %c0_i32_251] : memref<32x2x128x128xbf16, #tpu.memory_space<vmem>> -> memref<8x2x128x128xbf16, #tpu.memory_space<vmem>>
    %247 = tpu.memref_slice %arg9[%c1_i32_243] : memref<4x!tpu.dma_semaphore, #tpu.memory_space<semaphore_mem>> -> memref<1x!tpu.dma_semaphore, #tpu.memory_space<semaphore_mem>>
    %248 = tpu.memref_squeeze %247 : memref<1x!tpu.dma_semaphore, #tpu.memory_space<semaphore_mem>> -> memref<!tpu.dma_semaphore, #tpu.memory_space<semaphore_mem>>
    tpu.wait_dma2 semaphore(%248 : memref<!tpu.dma_semaphore, #tpu.memory_space<semaphore_mem>>) src(%245 : memref<8x2x128x128xbf16, #tpu.memory_space<any>>) dst(%246 : memref<8x2x128x128xbf16, #tpu.memory_space<vmem>>)
    %249 = arith.truncf %244 : vector<16x128xf32> to vector<16x128xbf16>
    %cst_252 = arith.constant dense<0.000000e+00> : vector<16x128xf32>
    %250 = tpu.matmul %32, %249, %cst_252 {dimension_numbers = #tpu.dot_dimension_numbers<[1], [0], [0], [1], [0, 0, 1, 1], [], []>} : vector<16x16xbf16>, vector<16x128xbf16>, vector<16x128xf32> -> vector<16x128xf32>
    %c8 = arith.constant 8 : index
    %c0_253 = arith.constant 0 : index
    %c0_254 = arith.constant 0 : index
    %c0_255 = arith.constant 0 : index
    %251 = vector.load %arg7[%c8, %c0_253, %c0_254, %c0_255] : memref<32x2x128x128xbf16, #tpu.memory_space<vmem>>, vector<1x1x128x128xbf16>
    %252 = vector.shape_cast %251 : vector<1x1x128x128xbf16> to vector<128x128xbf16>
    %cst_256 = arith.constant dense<0.000000e+00> : vector<16x128xf32>
    %253 = tpu.matmul %249, %252, %cst_256 {dimension_numbers = #tpu.dot_dimension_numbers<[1], [0], [0], [1], [0, 0, 1, 1], [], []>} : vector<16x128xbf16>, vector<128x128xbf16>, vector<16x128xf32> -> vector<16x128xf32>
    %254 = arith.truncf %250 : vector<16x128xf32> to vector<16x128xbf16>
    %c8_257 = arith.constant 8 : index
    %c1_258 = arith.constant 1 : index
    %c0_259 = arith.constant 0 : index
    %c0_260 = arith.constant 0 : index
    %255 = vector.load %arg7[%c8_257, %c1_258, %c0_259, %c0_260] : memref<32x2x128x128xbf16, #tpu.memory_space<vmem>>, vector<1x1x128x128xbf16>
    %256 = vector.shape_cast %255 : vector<1x1x128x128xbf16> to vector<128x128xbf16>
    %cst_261 = arith.constant dense<0.000000e+00> : vector<16x128xf32>
    %257 = tpu.matmul %254, %256, %cst_261 {dimension_numbers = #tpu.dot_dimension_numbers<[1], [0], [0], [1], [0, 0, 1, 1], [], []>} : vector<16x128xbf16>, vector<128x128xbf16>, vector<16x128xf32> -> vector<16x128xf32>
    %258 = arith.addf %253, %257 : vector<16x128xf32>
    %c8_262 = arith.constant 8 : index
    %c0_263 = arith.constant 0 : index
    %c0_264 = arith.constant 0 : index
    %259 = vector.load %arg3[%c8_262, %c0_263, %c0_264] : memref<32x1x128xf32, #tpu.memory_space<vmem>>, vector<1x1x128xf32>
    %260 = vector.shape_cast %259 : vector<1x1x128xf32> to vector<1x128xf32>
    %261 = vector.broadcast %260 : vector<1x128xf32> to vector<16x128xf32>
    %262 = arith.addf %258, %261 : vector<16x128xf32>
    %cst_265 = arith.constant 0.000000e+00 : f32
    %263 = vector.broadcast %cst_265 : f32 to vector<16x128xf32>
    %264 = arith.maximumf %262, %263 : vector<16x128xf32>
    %265 = arith.truncf %264 : vector<16x128xf32> to vector<16x128xbf16>
    %cst_266 = arith.constant dense<0.000000e+00> : vector<16x128xf32>
    %266 = tpu.matmul %32, %265, %cst_266 {dimension_numbers = #tpu.dot_dimension_numbers<[1], [0], [0], [1], [0, 0, 1, 1], [], []>} : vector<16x16xbf16>, vector<16x128xbf16>, vector<16x128xf32> -> vector<16x128xf32>
    %c9 = arith.constant 9 : index
    %c0_267 = arith.constant 0 : index
    %c0_268 = arith.constant 0 : index
    %c0_269 = arith.constant 0 : index
    %267 = vector.load %arg7[%c9, %c0_267, %c0_268, %c0_269] : memref<32x2x128x128xbf16, #tpu.memory_space<vmem>>, vector<1x1x128x128xbf16>
    %268 = vector.shape_cast %267 : vector<1x1x128x128xbf16> to vector<128x128xbf16>
    %cst_270 = arith.constant dense<0.000000e+00> : vector<16x128xf32>
    %269 = tpu.matmul %265, %268, %cst_270 {dimension_numbers = #tpu.dot_dimension_numbers<[1], [0], [0], [1], [0, 0, 1, 1], [], []>} : vector<16x128xbf16>, vector<128x128xbf16>, vector<16x128xf32> -> vector<16x128xf32>
    %270 = arith.truncf %266 : vector<16x128xf32> to vector<16x128xbf16>
    %c9_271 = arith.constant 9 : index
    %c1_272 = arith.constant 1 : index
    %c0_273 = arith.constant 0 : index
    %c0_274 = arith.constant 0 : index
    %271 = vector.load %arg7[%c9_271, %c1_272, %c0_273, %c0_274] : memref<32x2x128x128xbf16, #tpu.memory_space<vmem>>, vector<1x1x128x128xbf16>
    %272 = vector.shape_cast %271 : vector<1x1x128x128xbf16> to vector<128x128xbf16>
    %cst_275 = arith.constant dense<0.000000e+00> : vector<16x128xf32>
    %273 = tpu.matmul %270, %272, %cst_275 {dimension_numbers = #tpu.dot_dimension_numbers<[1], [0], [0], [1], [0, 0, 1, 1], [], []>} : vector<16x128xbf16>, vector<128x128xbf16>, vector<16x128xf32> -> vector<16x128xf32>
    %274 = arith.addf %269, %273 : vector<16x128xf32>
    %c9_276 = arith.constant 9 : index
    %c0_277 = arith.constant 0 : index
    %c0_278 = arith.constant 0 : index
    %275 = vector.load %arg3[%c9_276, %c0_277, %c0_278] : memref<32x1x128xf32, #tpu.memory_space<vmem>>, vector<1x1x128xf32>
    %276 = vector.shape_cast %275 : vector<1x1x128xf32> to vector<1x128xf32>
    %277 = vector.broadcast %276 : vector<1x128xf32> to vector<16x128xf32>
    %278 = arith.addf %274, %277 : vector<16x128xf32>
    %cst_279 = arith.constant 0.000000e+00 : f32
    %279 = vector.broadcast %cst_279 : f32 to vector<16x128xf32>
    %280 = arith.maximumf %278, %279 : vector<16x128xf32>
    %281 = arith.addf %264, %280 : vector<16x128xf32>
    %282 = arith.truncf %281 : vector<16x128xf32> to vector<16x128xbf16>
    %c7_280 = arith.constant 7 : index
    %c0_281 = arith.constant 0 : index
    %c0_282 = arith.constant 0 : index
    %283 = vector.load %arg8[%c7_280, %c0_281, %c0_282] : memref<31x128x128xbf16, #tpu.memory_space<vmem>>, vector<1x128x128xbf16>
    %284 = vector.shape_cast %283 : vector<1x128x128xbf16> to vector<128x128xbf16>
    %cst_283 = arith.constant dense<0.000000e+00> : vector<16x128xf32>
    %285 = tpu.matmul %282, %284, %cst_283 {dimension_numbers = #tpu.dot_dimension_numbers<[1], [0], [0], [1], [0, 0, 1, 1], [], []>} : vector<16x128xbf16>, vector<128x128xbf16>, vector<16x128xf32> -> vector<16x128xf32>
    %c7_284 = arith.constant 7 : index
    %c0_285 = arith.constant 0 : index
    %c0_286 = arith.constant 0 : index
    %286 = vector.load %arg5[%c7_284, %c0_285, %c0_286] : memref<31x1x128xf32, #tpu.memory_space<vmem>>, vector<1x1x128xf32>
    %287 = vector.shape_cast %286 : vector<1x1x128xf32> to vector<1x128xf32>
    %288 = vector.broadcast %287 : vector<1x128xf32> to vector<16x128xf32>
    %289 = arith.addf %285, %288 : vector<16x128xf32>
    %cst_287 = arith.constant 0.000000e+00 : f32
    %290 = vector.broadcast %cst_287 : f32 to vector<16x128xf32>
    %291 = arith.maximumf %289, %290 : vector<16x128xf32>
    %292 = arith.truncf %291 : vector<16x128xf32> to vector<16x128xbf16>
    %cst_288 = arith.constant dense<0.000000e+00> : vector<16x128xf32>
    %293 = tpu.matmul %32, %292, %cst_288 {dimension_numbers = #tpu.dot_dimension_numbers<[1], [0], [0], [1], [0, 0, 1, 1], [], []>} : vector<16x16xbf16>, vector<16x128xbf16>, vector<16x128xf32> -> vector<16x128xf32>
    %c10 = arith.constant 10 : index
    %c0_289 = arith.constant 0 : index
    %c0_290 = arith.constant 0 : index
    %c0_291 = arith.constant 0 : index
    %294 = vector.load %arg7[%c10, %c0_289, %c0_290, %c0_291] : memref<32x2x128x128xbf16, #tpu.memory_space<vmem>>, vector<1x1x128x128xbf16>
    %295 = vector.shape_cast %294 : vector<1x1x128x128xbf16> to vector<128x128xbf16>
    %cst_292 = arith.constant dense<0.000000e+00> : vector<16x128xf32>
    %296 = tpu.matmul %292, %295, %cst_292 {dimension_numbers = #tpu.dot_dimension_numbers<[1], [0], [0], [1], [0, 0, 1, 1], [], []>} : vector<16x128xbf16>, vector<128x128xbf16>, vector<16x128xf32> -> vector<16x128xf32>
    %297 = arith.truncf %293 : vector<16x128xf32> to vector<16x128xbf16>
    %c10_293 = arith.constant 10 : index
    %c1_294 = arith.constant 1 : index
    %c0_295 = arith.constant 0 : index
    %c0_296 = arith.constant 0 : index
    %298 = vector.load %arg7[%c10_293, %c1_294, %c0_295, %c0_296] : memref<32x2x128x128xbf16, #tpu.memory_space<vmem>>, vector<1x1x128x128xbf16>
    %299 = vector.shape_cast %298 : vector<1x1x128x128xbf16> to vector<128x128xbf16>
    %cst_297 = arith.constant dense<0.000000e+00> : vector<16x128xf32>
    %300 = tpu.matmul %297, %299, %cst_297 {dimension_numbers = #tpu.dot_dimension_numbers<[1], [0], [0], [1], [0, 0, 1, 1], [], []>} : vector<16x128xbf16>, vector<128x128xbf16>, vector<16x128xf32> -> vector<16x128xf32>
    %301 = arith.addf %296, %300 : vector<16x128xf32>
    %c10_298 = arith.constant 10 : index
    %c0_299 = arith.constant 0 : index
    %c0_300 = arith.constant 0 : index
    %302 = vector.load %arg3[%c10_298, %c0_299, %c0_300] : memref<32x1x128xf32, #tpu.memory_space<vmem>>, vector<1x1x128xf32>
    %303 = vector.shape_cast %302 : vector<1x1x128xf32> to vector<1x128xf32>
    %304 = vector.broadcast %303 : vector<1x128xf32> to vector<16x128xf32>
    %305 = arith.addf %301, %304 : vector<16x128xf32>
    %cst_301 = arith.constant 0.000000e+00 : f32
    %306 = vector.broadcast %cst_301 : f32 to vector<16x128xf32>
    %307 = arith.maximumf %305, %306 : vector<16x128xf32>
    %308 = arith.truncf %307 : vector<16x128xf32> to vector<16x128xbf16>
    %cst_302 = arith.constant dense<0.000000e+00> : vector<16x128xf32>
    %309 = tpu.matmul %32, %308, %cst_302 {dimension_numbers = #tpu.dot_dimension_numbers<[1], [0], [0], [1], [0, 0, 1, 1], [], []>} : vector<16x16xbf16>, vector<16x128xbf16>, vector<16x128xf32> -> vector<16x128xf32>
    %c11 = arith.constant 11 : index
    %c0_303 = arith.constant 0 : index
    %c0_304 = arith.constant 0 : index
    %c0_305 = arith.constant 0 : index
    %310 = vector.load %arg7[%c11, %c0_303, %c0_304, %c0_305] : memref<32x2x128x128xbf16, #tpu.memory_space<vmem>>, vector<1x1x128x128xbf16>
    %311 = vector.shape_cast %310 : vector<1x1x128x128xbf16> to vector<128x128xbf16>
    %cst_306 = arith.constant dense<0.000000e+00> : vector<16x128xf32>
    %312 = tpu.matmul %308, %311, %cst_306 {dimension_numbers = #tpu.dot_dimension_numbers<[1], [0], [0], [1], [0, 0, 1, 1], [], []>} : vector<16x128xbf16>, vector<128x128xbf16>, vector<16x128xf32> -> vector<16x128xf32>
    %313 = arith.truncf %309 : vector<16x128xf32> to vector<16x128xbf16>
    %c11_307 = arith.constant 11 : index
    %c1_308 = arith.constant 1 : index
    %c0_309 = arith.constant 0 : index
    %c0_310 = arith.constant 0 : index
    %314 = vector.load %arg7[%c11_307, %c1_308, %c0_309, %c0_310] : memref<32x2x128x128xbf16, #tpu.memory_space<vmem>>, vector<1x1x128x128xbf16>
    %315 = vector.shape_cast %314 : vector<1x1x128x128xbf16> to vector<128x128xbf16>
    %cst_311 = arith.constant dense<0.000000e+00> : vector<16x128xf32>
    %316 = tpu.matmul %313, %315, %cst_311 {dimension_numbers = #tpu.dot_dimension_numbers<[1], [0], [0], [1], [0, 0, 1, 1], [], []>} : vector<16x128xbf16>, vector<128x128xbf16>, vector<16x128xf32> -> vector<16x128xf32>
    %317 = arith.addf %312, %316 : vector<16x128xf32>
    %c11_312 = arith.constant 11 : index
    %c0_313 = arith.constant 0 : index
    %c0_314 = arith.constant 0 : index
    %318 = vector.load %arg3[%c11_312, %c0_313, %c0_314] : memref<32x1x128xf32, #tpu.memory_space<vmem>>, vector<1x1x128xf32>
    %319 = vector.shape_cast %318 : vector<1x1x128xf32> to vector<1x128xf32>
    %320 = vector.broadcast %319 : vector<1x128xf32> to vector<16x128xf32>
    %321 = arith.addf %317, %320 : vector<16x128xf32>
    %cst_315 = arith.constant 0.000000e+00 : f32
    %322 = vector.broadcast %cst_315 : f32 to vector<16x128xf32>
    %323 = arith.maximumf %321, %322 : vector<16x128xf32>
    %324 = arith.addf %307, %323 : vector<16x128xf32>
    %c1_i32_316 = arith.constant 1 : i32
    %c8_i32_317 = arith.constant 8 : i32
    %c0_i32_318 = arith.constant 0 : i32
    %c0_i32_319 = arith.constant 0 : i32
    %325 = tpu.memref_slice %arg4[%c8_i32_317, %c0_i32_318, %c0_i32_319] : memref<31x128x128xbf16, #tpu.memory_space<any>> -> memref<8x128x128xbf16, #tpu.memory_space<any>>
    %c8_i32_320 = arith.constant 8 : i32
    %c0_i32_321 = arith.constant 0 : i32
    %c0_i32_322 = arith.constant 0 : i32
    %326 = tpu.memref_slice %arg8[%c8_i32_320, %c0_i32_321, %c0_i32_322] : memref<31x128x128xbf16, #tpu.memory_space<vmem>> -> memref<8x128x128xbf16, #tpu.memory_space<vmem>>
    %327 = tpu.memref_slice %arg10[%c1_i32_316] : memref<4x!tpu.dma_semaphore, #tpu.memory_space<semaphore_mem>> -> memref<1x!tpu.dma_semaphore, #tpu.memory_space<semaphore_mem>>
    %328 = tpu.memref_squeeze %327 : memref<1x!tpu.dma_semaphore, #tpu.memory_space<semaphore_mem>> -> memref<!tpu.dma_semaphore, #tpu.memory_space<semaphore_mem>>
    tpu.wait_dma2 semaphore(%328 : memref<!tpu.dma_semaphore, #tpu.memory_space<semaphore_mem>>) src(%325 : memref<8x128x128xbf16, #tpu.memory_space<any>>) dst(%326 : memref<8x128x128xbf16, #tpu.memory_space<vmem>>)
    %329 = arith.truncf %324 : vector<16x128xf32> to vector<16x128xbf16>
    %c8_323 = arith.constant 8 : index
    %c0_324 = arith.constant 0 : index
    %c0_325 = arith.constant 0 : index
    %330 = vector.load %arg8[%c8_323, %c0_324, %c0_325] : memref<31x128x128xbf16, #tpu.memory_space<vmem>>, vector<1x128x128xbf16>
    %331 = vector.shape_cast %330 : vector<1x128x128xbf16> to vector<128x128xbf16>
    %cst_326 = arith.constant dense<0.000000e+00> : vector<16x128xf32>
    %332 = tpu.matmul %329, %331, %cst_326 {dimension_numbers = #tpu.dot_dimension_numbers<[1], [0], [0], [1], [0, 0, 1, 1], [], []>} : vector<16x128xbf16>, vector<128x128xbf16>, vector<16x128xf32> -> vector<16x128xf32>
    %c8_327 = arith.constant 8 : index
    %c0_328 = arith.constant 0 : index
    %c0_329 = arith.constant 0 : index
    %333 = vector.load %arg5[%c8_327, %c0_328, %c0_329] : memref<31x1x128xf32, #tpu.memory_space<vmem>>, vector<1x1x128xf32>
    %334 = vector.shape_cast %333 : vector<1x1x128xf32> to vector<1x128xf32>
    %335 = vector.broadcast %334 : vector<1x128xf32> to vector<16x128xf32>
    %336 = arith.addf %332, %335 : vector<16x128xf32>
    %cst_330 = arith.constant 0.000000e+00 : f32
    %337 = vector.broadcast %cst_330 : f32 to vector<16x128xf32>
    %338 = arith.maximumf %336, %337 : vector<16x128xf32>
    %339 = arith.addf %291, %338 : vector<16x128xf32>
    %340 = arith.truncf %339 : vector<16x128xf32> to vector<16x128xbf16>
    %c9_331 = arith.constant 9 : index
    %c0_332 = arith.constant 0 : index
    %c0_333 = arith.constant 0 : index
    %341 = vector.load %arg8[%c9_331, %c0_332, %c0_333] : memref<31x128x128xbf16, #tpu.memory_space<vmem>>, vector<1x128x128xbf16>
    %342 = vector.shape_cast %341 : vector<1x128x128xbf16> to vector<128x128xbf16>
    %cst_334 = arith.constant dense<0.000000e+00> : vector<16x128xf32>
    %343 = tpu.matmul %340, %342, %cst_334 {dimension_numbers = #tpu.dot_dimension_numbers<[1], [0], [0], [1], [0, 0, 1, 1], [], []>} : vector<16x128xbf16>, vector<128x128xbf16>, vector<16x128xf32> -> vector<16x128xf32>
    %c9_335 = arith.constant 9 : index
    %c0_336 = arith.constant 0 : index
    %c0_337 = arith.constant 0 : index
    %344 = vector.load %arg5[%c9_335, %c0_336, %c0_337] : memref<31x1x128xf32, #tpu.memory_space<vmem>>, vector<1x1x128xf32>
    %345 = vector.shape_cast %344 : vector<1x1x128xf32> to vector<1x128xf32>
    %346 = vector.broadcast %345 : vector<1x128xf32> to vector<16x128xf32>
    %347 = arith.addf %343, %346 : vector<16x128xf32>
    %cst_338 = arith.constant 0.000000e+00 : f32
    %348 = vector.broadcast %cst_338 : f32 to vector<16x128xf32>
    %349 = arith.maximumf %347, %348 : vector<16x128xf32>
    %350 = arith.truncf %349 : vector<16x128xf32> to vector<16x128xbf16>
    %cst_339 = arith.constant dense<0.000000e+00> : vector<16x128xf32>
    %351 = tpu.matmul %32, %350, %cst_339 {dimension_numbers = #tpu.dot_dimension_numbers<[1], [0], [0], [1], [0, 0, 1, 1], [], []>} : vector<16x16xbf16>, vector<16x128xbf16>, vector<16x128xf32> -> vector<16x128xf32>
    %c12 = arith.constant 12 : index
    %c0_340 = arith.constant 0 : index
    %c0_341 = arith.constant 0 : index
    %c0_342 = arith.constant 0 : index
    %352 = vector.load %arg7[%c12, %c0_340, %c0_341, %c0_342] : memref<32x2x128x128xbf16, #tpu.memory_space<vmem>>, vector<1x1x128x128xbf16>
    %353 = vector.shape_cast %352 : vector<1x1x128x128xbf16> to vector<128x128xbf16>
    %cst_343 = arith.constant dense<0.000000e+00> : vector<16x128xf32>
    %354 = tpu.matmul %350, %353, %cst_343 {dimension_numbers = #tpu.dot_dimension_numbers<[1], [0], [0], [1], [0, 0, 1, 1], [], []>} : vector<16x128xbf16>, vector<128x128xbf16>, vector<16x128xf32> -> vector<16x128xf32>
    %355 = arith.truncf %351 : vector<16x128xf32> to vector<16x128xbf16>
    %c12_344 = arith.constant 12 : index
    %c1_345 = arith.constant 1 : index
    %c0_346 = arith.constant 0 : index
    %c0_347 = arith.constant 0 : index
    %356 = vector.load %arg7[%c12_344, %c1_345, %c0_346, %c0_347] : memref<32x2x128x128xbf16, #tpu.memory_space<vmem>>, vector<1x1x128x128xbf16>
    %357 = vector.shape_cast %356 : vector<1x1x128x128xbf16> to vector<128x128xbf16>
    %cst_348 = arith.constant dense<0.000000e+00> : vector<16x128xf32>
    %358 = tpu.matmul %355, %357, %cst_348 {dimension_numbers = #tpu.dot_dimension_numbers<[1], [0], [0], [1], [0, 0, 1, 1], [], []>} : vector<16x128xbf16>, vector<128x128xbf16>, vector<16x128xf32> -> vector<16x128xf32>
    %359 = arith.addf %354, %358 : vector<16x128xf32>
    %c12_349 = arith.constant 12 : index
    %c0_350 = arith.constant 0 : index
    %c0_351 = arith.constant 0 : index
    %360 = vector.load %arg3[%c12_349, %c0_350, %c0_351] : memref<32x1x128xf32, #tpu.memory_space<vmem>>, vector<1x1x128xf32>
    %361 = vector.shape_cast %360 : vector<1x1x128xf32> to vector<1x128xf32>
    %362 = vector.broadcast %361 : vector<1x128xf32> to vector<16x128xf32>
    %363 = arith.addf %359, %362 : vector<16x128xf32>
    %cst_352 = arith.constant 0.000000e+00 : f32
    %364 = vector.broadcast %cst_352 : f32 to vector<16x128xf32>
    %365 = arith.maximumf %363, %364 : vector<16x128xf32>
    %366 = arith.truncf %365 : vector<16x128xf32> to vector<16x128xbf16>
    %cst_353 = arith.constant dense<0.000000e+00> : vector<16x128xf32>
    %367 = tpu.matmul %32, %366, %cst_353 {dimension_numbers = #tpu.dot_dimension_numbers<[1], [0], [0], [1], [0, 0, 1, 1], [], []>} : vector<16x16xbf16>, vector<16x128xbf16>, vector<16x128xf32> -> vector<16x128xf32>
    %c13 = arith.constant 13 : index
    %c0_354 = arith.constant 0 : index
    %c0_355 = arith.constant 0 : index
    %c0_356 = arith.constant 0 : index
    %368 = vector.load %arg7[%c13, %c0_354, %c0_355, %c0_356] : memref<32x2x128x128xbf16, #tpu.memory_space<vmem>>, vector<1x1x128x128xbf16>
    %369 = vector.shape_cast %368 : vector<1x1x128x128xbf16> to vector<128x128xbf16>
    %cst_357 = arith.constant dense<0.000000e+00> : vector<16x128xf32>
    %370 = tpu.matmul %366, %369, %cst_357 {dimension_numbers = #tpu.dot_dimension_numbers<[1], [0], [0], [1], [0, 0, 1, 1], [], []>} : vector<16x128xbf16>, vector<128x128xbf16>, vector<16x128xf32> -> vector<16x128xf32>
    %371 = arith.truncf %367 : vector<16x128xf32> to vector<16x128xbf16>
    %c13_358 = arith.constant 13 : index
    %c1_359 = arith.constant 1 : index
    %c0_360 = arith.constant 0 : index
    %c0_361 = arith.constant 0 : index
    %372 = vector.load %arg7[%c13_358, %c1_359, %c0_360, %c0_361] : memref<32x2x128x128xbf16, #tpu.memory_space<vmem>>, vector<1x1x128x128xbf16>
    %373 = vector.shape_cast %372 : vector<1x1x128x128xbf16> to vector<128x128xbf16>
    %cst_362 = arith.constant dense<0.000000e+00> : vector<16x128xf32>
    %374 = tpu.matmul %371, %373, %cst_362 {dimension_numbers = #tpu.dot_dimension_numbers<[1], [0], [0], [1], [0, 0, 1, 1], [], []>} : vector<16x128xbf16>, vector<128x128xbf16>, vector<16x128xf32> -> vector<16x128xf32>
    %375 = arith.addf %370, %374 : vector<16x128xf32>
    %c13_363 = arith.constant 13 : index
    %c0_364 = arith.constant 0 : index
    %c0_365 = arith.constant 0 : index
    %376 = vector.load %arg3[%c13_363, %c0_364, %c0_365] : memref<32x1x128xf32, #tpu.memory_space<vmem>>, vector<1x1x128xf32>
    %377 = vector.shape_cast %376 : vector<1x1x128xf32> to vector<1x128xf32>
    %378 = vector.broadcast %377 : vector<1x128xf32> to vector<16x128xf32>
    %379 = arith.addf %375, %378 : vector<16x128xf32>
    %cst_366 = arith.constant 0.000000e+00 : f32
    %380 = vector.broadcast %cst_366 : f32 to vector<16x128xf32>
    %381 = arith.maximumf %379, %380 : vector<16x128xf32>
    %382 = arith.addf %365, %381 : vector<16x128xf32>
    %383 = arith.truncf %382 : vector<16x128xf32> to vector<16x128xbf16>
    %c10_367 = arith.constant 10 : index
    %c0_368 = arith.constant 0 : index
    %c0_369 = arith.constant 0 : index
    %384 = vector.load %arg8[%c10_367, %c0_368, %c0_369] : memref<31x128x128xbf16, #tpu.memory_space<vmem>>, vector<1x128x128xbf16>
    %385 = vector.shape_cast %384 : vector<1x128x128xbf16> to vector<128x128xbf16>
    %cst_370 = arith.constant dense<0.000000e+00> : vector<16x128xf32>
    %386 = tpu.matmul %383, %385, %cst_370 {dimension_numbers = #tpu.dot_dimension_numbers<[1], [0], [0], [1], [0, 0, 1, 1], [], []>} : vector<16x128xbf16>, vector<128x128xbf16>, vector<16x128xf32> -> vector<16x128xf32>
    %c10_371 = arith.constant 10 : index
    %c0_372 = arith.constant 0 : index
    %c0_373 = arith.constant 0 : index
    %387 = vector.load %arg5[%c10_371, %c0_372, %c0_373] : memref<31x1x128xf32, #tpu.memory_space<vmem>>, vector<1x1x128xf32>
    %388 = vector.shape_cast %387 : vector<1x1x128xf32> to vector<1x128xf32>
    %389 = vector.broadcast %388 : vector<1x128xf32> to vector<16x128xf32>
    %390 = arith.addf %386, %389 : vector<16x128xf32>
    %cst_374 = arith.constant 0.000000e+00 : f32
    %391 = vector.broadcast %cst_374 : f32 to vector<16x128xf32>
    %392 = arith.maximumf %390, %391 : vector<16x128xf32>
    %393 = arith.truncf %392 : vector<16x128xf32> to vector<16x128xbf16>
    %cst_375 = arith.constant dense<0.000000e+00> : vector<16x128xf32>
    %394 = tpu.matmul %32, %393, %cst_375 {dimension_numbers = #tpu.dot_dimension_numbers<[1], [0], [0], [1], [0, 0, 1, 1], [], []>} : vector<16x16xbf16>, vector<16x128xbf16>, vector<16x128xf32> -> vector<16x128xf32>
    %c14 = arith.constant 14 : index
    %c0_376 = arith.constant 0 : index
    %c0_377 = arith.constant 0 : index
    %c0_378 = arith.constant 0 : index
    %395 = vector.load %arg7[%c14, %c0_376, %c0_377, %c0_378] : memref<32x2x128x128xbf16, #tpu.memory_space<vmem>>, vector<1x1x128x128xbf16>
    %396 = vector.shape_cast %395 : vector<1x1x128x128xbf16> to vector<128x128xbf16>
    %cst_379 = arith.constant dense<0.000000e+00> : vector<16x128xf32>
    %397 = tpu.matmul %393, %396, %cst_379 {dimension_numbers = #tpu.dot_dimension_numbers<[1], [0], [0], [1], [0, 0, 1, 1], [], []>} : vector<16x128xbf16>, vector<128x128xbf16>, vector<16x128xf32> -> vector<16x128xf32>
    %398 = arith.truncf %394 : vector<16x128xf32> to vector<16x128xbf16>
    %c14_380 = arith.constant 14 : index
    %c1_381 = arith.constant 1 : index
    %c0_382 = arith.constant 0 : index
    %c0_383 = arith.constant 0 : index
    %399 = vector.load %arg7[%c14_380, %c1_381, %c0_382, %c0_383] : memref<32x2x128x128xbf16, #tpu.memory_space<vmem>>, vector<1x1x128x128xbf16>
    %400 = vector.shape_cast %399 : vector<1x1x128x128xbf16> to vector<128x128xbf16>
    %cst_384 = arith.constant dense<0.000000e+00> : vector<16x128xf32>
    %401 = tpu.matmul %398, %400, %cst_384 {dimension_numbers = #tpu.dot_dimension_numbers<[1], [0], [0], [1], [0, 0, 1, 1], [], []>} : vector<16x128xbf16>, vector<128x128xbf16>, vector<16x128xf32> -> vector<16x128xf32>
    %402 = arith.addf %397, %401 : vector<16x128xf32>
    %c14_385 = arith.constant 14 : index
    %c0_386 = arith.constant 0 : index
    %c0_387 = arith.constant 0 : index
    %403 = vector.load %arg3[%c14_385, %c0_386, %c0_387] : memref<32x1x128xf32, #tpu.memory_space<vmem>>, vector<1x1x128xf32>
    %404 = vector.shape_cast %403 : vector<1x1x128xf32> to vector<1x128xf32>
    %405 = vector.broadcast %404 : vector<1x128xf32> to vector<16x128xf32>
    %406 = arith.addf %402, %405 : vector<16x128xf32>
    %cst_388 = arith.constant 0.000000e+00 : f32
    %407 = vector.broadcast %cst_388 : f32 to vector<16x128xf32>
    %408 = arith.maximumf %406, %407 : vector<16x128xf32>
    %409 = arith.truncf %408 : vector<16x128xf32> to vector<16x128xbf16>
    %cst_389 = arith.constant dense<0.000000e+00> : vector<16x128xf32>
    %410 = tpu.matmul %32, %409, %cst_389 {dimension_numbers = #tpu.dot_dimension_numbers<[1], [0], [0], [1], [0, 0, 1, 1], [], []>} : vector<16x16xbf16>, vector<16x128xbf16>, vector<16x128xf32> -> vector<16x128xf32>
    %c15 = arith.constant 15 : index
    %c0_390 = arith.constant 0 : index
    %c0_391 = arith.constant 0 : index
    %c0_392 = arith.constant 0 : index
    %411 = vector.load %arg7[%c15, %c0_390, %c0_391, %c0_392] : memref<32x2x128x128xbf16, #tpu.memory_space<vmem>>, vector<1x1x128x128xbf16>
    %412 = vector.shape_cast %411 : vector<1x1x128x128xbf16> to vector<128x128xbf16>
    %cst_393 = arith.constant dense<0.000000e+00> : vector<16x128xf32>
    %413 = tpu.matmul %409, %412, %cst_393 {dimension_numbers = #tpu.dot_dimension_numbers<[1], [0], [0], [1], [0, 0, 1, 1], [], []>} : vector<16x128xbf16>, vector<128x128xbf16>, vector<16x128xf32> -> vector<16x128xf32>
    %414 = arith.truncf %410 : vector<16x128xf32> to vector<16x128xbf16>
    %c15_394 = arith.constant 15 : index
    %c1_395 = arith.constant 1 : index
    %c0_396 = arith.constant 0 : index
    %c0_397 = arith.constant 0 : index
    %415 = vector.load %arg7[%c15_394, %c1_395, %c0_396, %c0_397] : memref<32x2x128x128xbf16, #tpu.memory_space<vmem>>, vector<1x1x128x128xbf16>
    %416 = vector.shape_cast %415 : vector<1x1x128x128xbf16> to vector<128x128xbf16>
    %cst_398 = arith.constant dense<0.000000e+00> : vector<16x128xf32>
    %417 = tpu.matmul %414, %416, %cst_398 {dimension_numbers = #tpu.dot_dimension_numbers<[1], [0], [0], [1], [0, 0, 1, 1], [], []>} : vector<16x128xbf16>, vector<128x128xbf16>, vector<16x128xf32> -> vector<16x128xf32>
    %418 = arith.addf %413, %417 : vector<16x128xf32>
    %c15_399 = arith.constant 15 : index
    %c0_400 = arith.constant 0 : index
    %c0_401 = arith.constant 0 : index
    %419 = vector.load %arg3[%c15_399, %c0_400, %c0_401] : memref<32x1x128xf32, #tpu.memory_space<vmem>>, vector<1x1x128xf32>
    %420 = vector.shape_cast %419 : vector<1x1x128xf32> to vector<1x128xf32>
    %421 = vector.broadcast %420 : vector<1x128xf32> to vector<16x128xf32>
    %422 = arith.addf %418, %421 : vector<16x128xf32>
    %cst_402 = arith.constant 0.000000e+00 : f32
    %423 = vector.broadcast %cst_402 : f32 to vector<16x128xf32>
    %424 = arith.maximumf %422, %423 : vector<16x128xf32>
    %425 = arith.addf %408, %424 : vector<16x128xf32>
    %426 = arith.truncf %425 : vector<16x128xf32> to vector<16x128xbf16>
    %c11_403 = arith.constant 11 : index
    %c0_404 = arith.constant 0 : index
    %c0_405 = arith.constant 0 : index
    %427 = vector.load %arg8[%c11_403, %c0_404, %c0_405] : memref<31x128x128xbf16, #tpu.memory_space<vmem>>, vector<1x128x128xbf16>
    %428 = vector.shape_cast %427 : vector<1x128x128xbf16> to vector<128x128xbf16>
    %cst_406 = arith.constant dense<0.000000e+00> : vector<16x128xf32>
    %429 = tpu.matmul %426, %428, %cst_406 {dimension_numbers = #tpu.dot_dimension_numbers<[1], [0], [0], [1], [0, 0, 1, 1], [], []>} : vector<16x128xbf16>, vector<128x128xbf16>, vector<16x128xf32> -> vector<16x128xf32>
    %c11_407 = arith.constant 11 : index
    %c0_408 = arith.constant 0 : index
    %c0_409 = arith.constant 0 : index
    %430 = vector.load %arg5[%c11_407, %c0_408, %c0_409] : memref<31x1x128xf32, #tpu.memory_space<vmem>>, vector<1x1x128xf32>
    %431 = vector.shape_cast %430 : vector<1x1x128xf32> to vector<1x128xf32>
    %432 = vector.broadcast %431 : vector<1x128xf32> to vector<16x128xf32>
    %433 = arith.addf %429, %432 : vector<16x128xf32>
    %cst_410 = arith.constant 0.000000e+00 : f32
    %434 = vector.broadcast %cst_410 : f32 to vector<16x128xf32>
    %435 = arith.maximumf %433, %434 : vector<16x128xf32>
    %436 = arith.addf %392, %435 : vector<16x128xf32>
    %437 = arith.truncf %436 : vector<16x128xf32> to vector<16x128xbf16>
    %c12_411 = arith.constant 12 : index
    %c0_412 = arith.constant 0 : index
    %c0_413 = arith.constant 0 : index
    %438 = vector.load %arg8[%c12_411, %c0_412, %c0_413] : memref<31x128x128xbf16, #tpu.memory_space<vmem>>, vector<1x128x128xbf16>
    %439 = vector.shape_cast %438 : vector<1x128x128xbf16> to vector<128x128xbf16>
    %cst_414 = arith.constant dense<0.000000e+00> : vector<16x128xf32>
    %440 = tpu.matmul %437, %439, %cst_414 {dimension_numbers = #tpu.dot_dimension_numbers<[1], [0], [0], [1], [0, 0, 1, 1], [], []>} : vector<16x128xbf16>, vector<128x128xbf16>, vector<16x128xf32> -> vector<16x128xf32>
    %c12_415 = arith.constant 12 : index
    %c0_416 = arith.constant 0 : index
    %c0_417 = arith.constant 0 : index
    %441 = vector.load %arg5[%c12_415, %c0_416, %c0_417] : memref<31x1x128xf32, #tpu.memory_space<vmem>>, vector<1x1x128xf32>
    %442 = vector.shape_cast %441 : vector<1x1x128xf32> to vector<1x128xf32>
    %443 = vector.broadcast %442 : vector<1x128xf32> to vector<16x128xf32>
    %444 = arith.addf %440, %443 : vector<16x128xf32>
    %445 = arith.addf %349, %444 : vector<16x128xf32>
    %446 = arith.truncf %445 : vector<16x128xf32> to vector<16x128xbf16>
    %c13_418 = arith.constant 13 : index
    %c0_419 = arith.constant 0 : index
    %c0_420 = arith.constant 0 : index
    %447 = vector.load %arg8[%c13_418, %c0_419, %c0_420] : memref<31x128x128xbf16, #tpu.memory_space<vmem>>, vector<1x128x128xbf16>
    %448 = vector.shape_cast %447 : vector<1x128x128xbf16> to vector<128x128xbf16>
    %cst_421 = arith.constant dense<0.000000e+00> : vector<16x128xf32>
    %449 = tpu.matmul %446, %448, %cst_421 {dimension_numbers = #tpu.dot_dimension_numbers<[1], [0], [0], [1], [0, 0, 1, 1], [], []>} : vector<16x128xbf16>, vector<128x128xbf16>, vector<16x128xf32> -> vector<16x128xf32>
    %c13_422 = arith.constant 13 : index
    %c0_423 = arith.constant 0 : index
    %c0_424 = arith.constant 0 : index
    %450 = vector.load %arg5[%c13_422, %c0_423, %c0_424] : memref<31x1x128xf32, #tpu.memory_space<vmem>>, vector<1x1x128xf32>
    %451 = vector.shape_cast %450 : vector<1x1x128xf32> to vector<1x128xf32>
    %452 = vector.broadcast %451 : vector<1x128xf32> to vector<16x128xf32>
    %453 = arith.addf %449, %452 : vector<16x128xf32>
    %cst_425 = arith.constant 0.000000e+00 : f32
    %454 = vector.broadcast %cst_425 : f32 to vector<16x128xf32>
    %455 = arith.maximumf %453, %454 : vector<16x128xf32>
    %456 = arith.addf %244, %455 : vector<16x128xf32>
    %457 = arith.truncf %456 : vector<16x128xf32> to vector<16x128xbf16>
    %c14_426 = arith.constant 14 : index
    %c0_427 = arith.constant 0 : index
    %c0_428 = arith.constant 0 : index
    %458 = vector.load %arg8[%c14_426, %c0_427, %c0_428] : memref<31x128x128xbf16, #tpu.memory_space<vmem>>, vector<1x128x128xbf16>
    %459 = vector.shape_cast %458 : vector<1x128x128xbf16> to vector<128x128xbf16>
    %cst_429 = arith.constant dense<0.000000e+00> : vector<16x128xf32>
    %460 = tpu.matmul %457, %459, %cst_429 {dimension_numbers = #tpu.dot_dimension_numbers<[1], [0], [0], [1], [0, 0, 1, 1], [], []>} : vector<16x128xbf16>, vector<128x128xbf16>, vector<16x128xf32> -> vector<16x128xf32>
    %c14_430 = arith.constant 14 : index
    %c0_431 = arith.constant 0 : index
    %c0_432 = arith.constant 0 : index
    %461 = vector.load %arg5[%c14_430, %c0_431, %c0_432] : memref<31x1x128xf32, #tpu.memory_space<vmem>>, vector<1x1x128xf32>
    %462 = vector.shape_cast %461 : vector<1x1x128xf32> to vector<1x128xf32>
    %463 = vector.broadcast %462 : vector<1x128xf32> to vector<16x128xf32>
    %464 = arith.addf %460, %463 : vector<16x128xf32>
    %cst_433 = arith.constant 0.000000e+00 : f32
    %465 = vector.broadcast %cst_433 : f32 to vector<16x128xf32>
    %466 = arith.maximumf %464, %465 : vector<16x128xf32>
    %c2_i32_434 = arith.constant 2 : i32
    %c16_i32_435 = arith.constant 16 : i32
    %c0_i32_436 = arith.constant 0 : i32
    %c0_i32_437 = arith.constant 0 : i32
    %c0_i32_438 = arith.constant 0 : i32
    %467 = tpu.memref_slice %arg2[%c16_i32_435, %c0_i32_436, %c0_i32_437, %c0_i32_438] : memref<32x2x128x128xbf16, #tpu.memory_space<any>> -> memref<8x2x128x128xbf16, #tpu.memory_space<any>>
    %c16_i32_439 = arith.constant 16 : i32
    %c0_i32_440 = arith.constant 0 : i32
    %c0_i32_441 = arith.constant 0 : i32
    %c0_i32_442 = arith.constant 0 : i32
    %468 = tpu.memref_slice %arg7[%c16_i32_439, %c0_i32_440, %c0_i32_441, %c0_i32_442] : memref<32x2x128x128xbf16, #tpu.memory_space<vmem>> -> memref<8x2x128x128xbf16, #tpu.memory_space<vmem>>
    %469 = tpu.memref_slice %arg9[%c2_i32_434] : memref<4x!tpu.dma_semaphore, #tpu.memory_space<semaphore_mem>> -> memref<1x!tpu.dma_semaphore, #tpu.memory_space<semaphore_mem>>
    %470 = tpu.memref_squeeze %469 : memref<1x!tpu.dma_semaphore, #tpu.memory_space<semaphore_mem>> -> memref<!tpu.dma_semaphore, #tpu.memory_space<semaphore_mem>>
    tpu.wait_dma2 semaphore(%470 : memref<!tpu.dma_semaphore, #tpu.memory_space<semaphore_mem>>) src(%467 : memref<8x2x128x128xbf16, #tpu.memory_space<any>>) dst(%468 : memref<8x2x128x128xbf16, #tpu.memory_space<vmem>>)
    %471 = arith.truncf %466 : vector<16x128xf32> to vector<16x128xbf16>
    %cst_443 = arith.constant dense<0.000000e+00> : vector<16x128xf32>
    %472 = tpu.matmul %32, %471, %cst_443 {dimension_numbers = #tpu.dot_dimension_numbers<[1], [0], [0], [1], [0, 0, 1, 1], [], []>} : vector<16x16xbf16>, vector<16x128xbf16>, vector<16x128xf32> -> vector<16x128xf32>
    %c16 = arith.constant 16 : index
    %c0_444 = arith.constant 0 : index
    %c0_445 = arith.constant 0 : index
    %c0_446 = arith.constant 0 : index
    %473 = vector.load %arg7[%c16, %c0_444, %c0_445, %c0_446] : memref<32x2x128x128xbf16, #tpu.memory_space<vmem>>, vector<1x1x128x128xbf16>
    %474 = vector.shape_cast %473 : vector<1x1x128x128xbf16> to vector<128x128xbf16>
    %cst_447 = arith.constant dense<0.000000e+00> : vector<16x128xf32>
    %475 = tpu.matmul %471, %474, %cst_447 {dimension_numbers = #tpu.dot_dimension_numbers<[1], [0], [0], [1], [0, 0, 1, 1], [], []>} : vector<16x128xbf16>, vector<128x128xbf16>, vector<16x128xf32> -> vector<16x128xf32>
    %476 = arith.truncf %472 : vector<16x128xf32> to vector<16x128xbf16>
    %c16_448 = arith.constant 16 : index
    %c1_449 = arith.constant 1 : index
    %c0_450 = arith.constant 0 : index
    %c0_451 = arith.constant 0 : index
    %477 = vector.load %arg7[%c16_448, %c1_449, %c0_450, %c0_451] : memref<32x2x128x128xbf16, #tpu.memory_space<vmem>>, vector<1x1x128x128xbf16>
    %478 = vector.shape_cast %477 : vector<1x1x128x128xbf16> to vector<128x128xbf16>
    %cst_452 = arith.constant dense<0.000000e+00> : vector<16x128xf32>
    %479 = tpu.matmul %476, %478, %cst_452 {dimension_numbers = #tpu.dot_dimension_numbers<[1], [0], [0], [1], [0, 0, 1, 1], [], []>} : vector<16x128xbf16>, vector<128x128xbf16>, vector<16x128xf32> -> vector<16x128xf32>
    %480 = arith.addf %475, %479 : vector<16x128xf32>
    %c16_453 = arith.constant 16 : index
    %c0_454 = arith.constant 0 : index
    %c0_455 = arith.constant 0 : index
    %481 = vector.load %arg3[%c16_453, %c0_454, %c0_455] : memref<32x1x128xf32, #tpu.memory_space<vmem>>, vector<1x1x128xf32>
    %482 = vector.shape_cast %481 : vector<1x1x128xf32> to vector<1x128xf32>
    %483 = vector.broadcast %482 : vector<1x128xf32> to vector<16x128xf32>
    %484 = arith.addf %480, %483 : vector<16x128xf32>
    %cst_456 = arith.constant 0.000000e+00 : f32
    %485 = vector.broadcast %cst_456 : f32 to vector<16x128xf32>
    %486 = arith.maximumf %484, %485 : vector<16x128xf32>
    %487 = arith.truncf %486 : vector<16x128xf32> to vector<16x128xbf16>
    %cst_457 = arith.constant dense<0.000000e+00> : vector<16x128xf32>
    %488 = tpu.matmul %32, %487, %cst_457 {dimension_numbers = #tpu.dot_dimension_numbers<[1], [0], [0], [1], [0, 0, 1, 1], [], []>} : vector<16x16xbf16>, vector<16x128xbf16>, vector<16x128xf32> -> vector<16x128xf32>
    %c17 = arith.constant 17 : index
    %c0_458 = arith.constant 0 : index
    %c0_459 = arith.constant 0 : index
    %c0_460 = arith.constant 0 : index
    %489 = vector.load %arg7[%c17, %c0_458, %c0_459, %c0_460] : memref<32x2x128x128xbf16, #tpu.memory_space<vmem>>, vector<1x1x128x128xbf16>
    %490 = vector.shape_cast %489 : vector<1x1x128x128xbf16> to vector<128x128xbf16>
    %cst_461 = arith.constant dense<0.000000e+00> : vector<16x128xf32>
    %491 = tpu.matmul %487, %490, %cst_461 {dimension_numbers = #tpu.dot_dimension_numbers<[1], [0], [0], [1], [0, 0, 1, 1], [], []>} : vector<16x128xbf16>, vector<128x128xbf16>, vector<16x128xf32> -> vector<16x128xf32>
    %492 = arith.truncf %488 : vector<16x128xf32> to vector<16x128xbf16>
    %c17_462 = arith.constant 17 : index
    %c1_463 = arith.constant 1 : index
    %c0_464 = arith.constant 0 : index
    %c0_465 = arith.constant 0 : index
    %493 = vector.load %arg7[%c17_462, %c1_463, %c0_464, %c0_465] : memref<32x2x128x128xbf16, #tpu.memory_space<vmem>>, vector<1x1x128x128xbf16>
    %494 = vector.shape_cast %493 : vector<1x1x128x128xbf16> to vector<128x128xbf16>
    %cst_466 = arith.constant dense<0.000000e+00> : vector<16x128xf32>
    %495 = tpu.matmul %492, %494, %cst_466 {dimension_numbers = #tpu.dot_dimension_numbers<[1], [0], [0], [1], [0, 0, 1, 1], [], []>} : vector<16x128xbf16>, vector<128x128xbf16>, vector<16x128xf32> -> vector<16x128xf32>
    %496 = arith.addf %491, %495 : vector<16x128xf32>
    %c17_467 = arith.constant 17 : index
    %c0_468 = arith.constant 0 : index
    %c0_469 = arith.constant 0 : index
    %497 = vector.load %arg3[%c17_467, %c0_468, %c0_469] : memref<32x1x128xf32, #tpu.memory_space<vmem>>, vector<1x1x128xf32>
    %498 = vector.shape_cast %497 : vector<1x1x128xf32> to vector<1x128xf32>
    %499 = vector.broadcast %498 : vector<1x128xf32> to vector<16x128xf32>
    %500 = arith.addf %496, %499 : vector<16x128xf32>
    %cst_470 = arith.constant 0.000000e+00 : f32
    %501 = vector.broadcast %cst_470 : f32 to vector<16x128xf32>
    %502 = arith.maximumf %500, %501 : vector<16x128xf32>
    %503 = arith.addf %486, %502 : vector<16x128xf32>
    %504 = arith.truncf %503 : vector<16x128xf32> to vector<16x128xbf16>
    %c15_471 = arith.constant 15 : index
    %c0_472 = arith.constant 0 : index
    %c0_473 = arith.constant 0 : index
    %505 = vector.load %arg8[%c15_471, %c0_472, %c0_473] : memref<31x128x128xbf16, #tpu.memory_space<vmem>>, vector<1x128x128xbf16>
    %506 = vector.shape_cast %505 : vector<1x128x128xbf16> to vector<128x128xbf16>
    %cst_474 = arith.constant dense<0.000000e+00> : vector<16x128xf32>
    %507 = tpu.matmul %504, %506, %cst_474 {dimension_numbers = #tpu.dot_dimension_numbers<[1], [0], [0], [1], [0, 0, 1, 1], [], []>} : vector<16x128xbf16>, vector<128x128xbf16>, vector<16x128xf32> -> vector<16x128xf32>
    %c15_475 = arith.constant 15 : index
    %c0_476 = arith.constant 0 : index
    %c0_477 = arith.constant 0 : index
    %508 = vector.load %arg5[%c15_475, %c0_476, %c0_477] : memref<31x1x128xf32, #tpu.memory_space<vmem>>, vector<1x1x128xf32>
    %509 = vector.shape_cast %508 : vector<1x1x128xf32> to vector<1x128xf32>
    %510 = vector.broadcast %509 : vector<1x128xf32> to vector<16x128xf32>
    %511 = arith.addf %507, %510 : vector<16x128xf32>
    %cst_478 = arith.constant 0.000000e+00 : f32
    %512 = vector.broadcast %cst_478 : f32 to vector<16x128xf32>
    %513 = arith.maximumf %511, %512 : vector<16x128xf32>
    %514 = arith.truncf %513 : vector<16x128xf32> to vector<16x128xbf16>
    %cst_479 = arith.constant dense<0.000000e+00> : vector<16x128xf32>
    %515 = tpu.matmul %32, %514, %cst_479 {dimension_numbers = #tpu.dot_dimension_numbers<[1], [0], [0], [1], [0, 0, 1, 1], [], []>} : vector<16x16xbf16>, vector<16x128xbf16>, vector<16x128xf32> -> vector<16x128xf32>
    %c18 = arith.constant 18 : index
    %c0_480 = arith.constant 0 : index
    %c0_481 = arith.constant 0 : index
    %c0_482 = arith.constant 0 : index
    %516 = vector.load %arg7[%c18, %c0_480, %c0_481, %c0_482] : memref<32x2x128x128xbf16, #tpu.memory_space<vmem>>, vector<1x1x128x128xbf16>
    %517 = vector.shape_cast %516 : vector<1x1x128x128xbf16> to vector<128x128xbf16>
    %cst_483 = arith.constant dense<0.000000e+00> : vector<16x128xf32>
    %518 = tpu.matmul %514, %517, %cst_483 {dimension_numbers = #tpu.dot_dimension_numbers<[1], [0], [0], [1], [0, 0, 1, 1], [], []>} : vector<16x128xbf16>, vector<128x128xbf16>, vector<16x128xf32> -> vector<16x128xf32>
    %519 = arith.truncf %515 : vector<16x128xf32> to vector<16x128xbf16>
    %c18_484 = arith.constant 18 : index
    %c1_485 = arith.constant 1 : index
    %c0_486 = arith.constant 0 : index
    %c0_487 = arith.constant 0 : index
    %520 = vector.load %arg7[%c18_484, %c1_485, %c0_486, %c0_487] : memref<32x2x128x128xbf16, #tpu.memory_space<vmem>>, vector<1x1x128x128xbf16>
    %521 = vector.shape_cast %520 : vector<1x1x128x128xbf16> to vector<128x128xbf16>
    %cst_488 = arith.constant dense<0.000000e+00> : vector<16x128xf32>
    %522 = tpu.matmul %519, %521, %cst_488 {dimension_numbers = #tpu.dot_dimension_numbers<[1], [0], [0], [1], [0, 0, 1, 1], [], []>} : vector<16x128xbf16>, vector<128x128xbf16>, vector<16x128xf32> -> vector<16x128xf32>
    %523 = arith.addf %518, %522 : vector<16x128xf32>
    %c18_489 = arith.constant 18 : index
    %c0_490 = arith.constant 0 : index
    %c0_491 = arith.constant 0 : index
    %524 = vector.load %arg3[%c18_489, %c0_490, %c0_491] : memref<32x1x128xf32, #tpu.memory_space<vmem>>, vector<1x1x128xf32>
    %525 = vector.shape_cast %524 : vector<1x1x128xf32> to vector<1x128xf32>
    %526 = vector.broadcast %525 : vector<1x128xf32> to vector<16x128xf32>
    %527 = arith.addf %523, %526 : vector<16x128xf32>
    %cst_492 = arith.constant 0.000000e+00 : f32
    %528 = vector.broadcast %cst_492 : f32 to vector<16x128xf32>
    %529 = arith.maximumf %527, %528 : vector<16x128xf32>
    %530 = arith.truncf %529 : vector<16x128xf32> to vector<16x128xbf16>
    %cst_493 = arith.constant dense<0.000000e+00> : vector<16x128xf32>
    %531 = tpu.matmul %32, %530, %cst_493 {dimension_numbers = #tpu.dot_dimension_numbers<[1], [0], [0], [1], [0, 0, 1, 1], [], []>} : vector<16x16xbf16>, vector<16x128xbf16>, vector<16x128xf32> -> vector<16x128xf32>
    %c19 = arith.constant 19 : index
    %c0_494 = arith.constant 0 : index
    %c0_495 = arith.constant 0 : index
    %c0_496 = arith.constant 0 : index
    %532 = vector.load %arg7[%c19, %c0_494, %c0_495, %c0_496] : memref<32x2x128x128xbf16, #tpu.memory_space<vmem>>, vector<1x1x128x128xbf16>
    %533 = vector.shape_cast %532 : vector<1x1x128x128xbf16> to vector<128x128xbf16>
    %cst_497 = arith.constant dense<0.000000e+00> : vector<16x128xf32>
    %534 = tpu.matmul %530, %533, %cst_497 {dimension_numbers = #tpu.dot_dimension_numbers<[1], [0], [0], [1], [0, 0, 1, 1], [], []>} : vector<16x128xbf16>, vector<128x128xbf16>, vector<16x128xf32> -> vector<16x128xf32>
    %535 = arith.truncf %531 : vector<16x128xf32> to vector<16x128xbf16>
    %c19_498 = arith.constant 19 : index
    %c1_499 = arith.constant 1 : index
    %c0_500 = arith.constant 0 : index
    %c0_501 = arith.constant 0 : index
    %536 = vector.load %arg7[%c19_498, %c1_499, %c0_500, %c0_501] : memref<32x2x128x128xbf16, #tpu.memory_space<vmem>>, vector<1x1x128x128xbf16>
    %537 = vector.shape_cast %536 : vector<1x1x128x128xbf16> to vector<128x128xbf16>
    %cst_502 = arith.constant dense<0.000000e+00> : vector<16x128xf32>
    %538 = tpu.matmul %535, %537, %cst_502 {dimension_numbers = #tpu.dot_dimension_numbers<[1], [0], [0], [1], [0, 0, 1, 1], [], []>} : vector<16x128xbf16>, vector<128x128xbf16>, vector<16x128xf32> -> vector<16x128xf32>
    %539 = arith.addf %534, %538 : vector<16x128xf32>
    %c19_503 = arith.constant 19 : index
    %c0_504 = arith.constant 0 : index
    %c0_505 = arith.constant 0 : index
    %540 = vector.load %arg3[%c19_503, %c0_504, %c0_505] : memref<32x1x128xf32, #tpu.memory_space<vmem>>, vector<1x1x128xf32>
    %541 = vector.shape_cast %540 : vector<1x1x128xf32> to vector<1x128xf32>
    %542 = vector.broadcast %541 : vector<1x128xf32> to vector<16x128xf32>
    %543 = arith.addf %539, %542 : vector<16x128xf32>
    %cst_506 = arith.constant 0.000000e+00 : f32
    %544 = vector.broadcast %cst_506 : f32 to vector<16x128xf32>
    %545 = arith.maximumf %543, %544 : vector<16x128xf32>
    %546 = arith.addf %529, %545 : vector<16x128xf32>
    %c2_i32_507 = arith.constant 2 : i32
    %c16_i32_508 = arith.constant 16 : i32
    %c0_i32_509 = arith.constant 0 : i32
    %c0_i32_510 = arith.constant 0 : i32
    %547 = tpu.memref_slice %arg4[%c16_i32_508, %c0_i32_509, %c0_i32_510] : memref<31x128x128xbf16, #tpu.memory_space<any>> -> memref<8x128x128xbf16, #tpu.memory_space<any>>
    %c16_i32_511 = arith.constant 16 : i32
    %c0_i32_512 = arith.constant 0 : i32
    %c0_i32_513 = arith.constant 0 : i32
    %548 = tpu.memref_slice %arg8[%c16_i32_511, %c0_i32_512, %c0_i32_513] : memref<31x128x128xbf16, #tpu.memory_space<vmem>> -> memref<8x128x128xbf16, #tpu.memory_space<vmem>>
    %549 = tpu.memref_slice %arg10[%c2_i32_507] : memref<4x!tpu.dma_semaphore, #tpu.memory_space<semaphore_mem>> -> memref<1x!tpu.dma_semaphore, #tpu.memory_space<semaphore_mem>>
    %550 = tpu.memref_squeeze %549 : memref<1x!tpu.dma_semaphore, #tpu.memory_space<semaphore_mem>> -> memref<!tpu.dma_semaphore, #tpu.memory_space<semaphore_mem>>
    tpu.wait_dma2 semaphore(%550 : memref<!tpu.dma_semaphore, #tpu.memory_space<semaphore_mem>>) src(%547 : memref<8x128x128xbf16, #tpu.memory_space<any>>) dst(%548 : memref<8x128x128xbf16, #tpu.memory_space<vmem>>)
    %551 = arith.truncf %546 : vector<16x128xf32> to vector<16x128xbf16>
    %c16_514 = arith.constant 16 : index
    %c0_515 = arith.constant 0 : index
    %c0_516 = arith.constant 0 : index
    %552 = vector.load %arg8[%c16_514, %c0_515, %c0_516] : memref<31x128x128xbf16, #tpu.memory_space<vmem>>, vector<1x128x128xbf16>
    %553 = vector.shape_cast %552 : vector<1x128x128xbf16> to vector<128x128xbf16>
    %cst_517 = arith.constant dense<0.000000e+00> : vector<16x128xf32>
    %554 = tpu.matmul %551, %553, %cst_517 {dimension_numbers = #tpu.dot_dimension_numbers<[1], [0], [0], [1], [0, 0, 1, 1], [], []>} : vector<16x128xbf16>, vector<128x128xbf16>, vector<16x128xf32> -> vector<16x128xf32>
    %c16_518 = arith.constant 16 : index
    %c0_519 = arith.constant 0 : index
    %c0_520 = arith.constant 0 : index
    %555 = vector.load %arg5[%c16_518, %c0_519, %c0_520] : memref<31x1x128xf32, #tpu.memory_space<vmem>>, vector<1x1x128xf32>
    %556 = vector.shape_cast %555 : vector<1x1x128xf32> to vector<1x128xf32>
    %557 = vector.broadcast %556 : vector<1x128xf32> to vector<16x128xf32>
    %558 = arith.addf %554, %557 : vector<16x128xf32>
    %cst_521 = arith.constant 0.000000e+00 : f32
    %559 = vector.broadcast %cst_521 : f32 to vector<16x128xf32>
    %560 = arith.maximumf %558, %559 : vector<16x128xf32>
    %561 = arith.addf %513, %560 : vector<16x128xf32>
    %562 = arith.truncf %561 : vector<16x128xf32> to vector<16x128xbf16>
    %c17_522 = arith.constant 17 : index
    %c0_523 = arith.constant 0 : index
    %c0_524 = arith.constant 0 : index
    %563 = vector.load %arg8[%c17_522, %c0_523, %c0_524] : memref<31x128x128xbf16, #tpu.memory_space<vmem>>, vector<1x128x128xbf16>
    %564 = vector.shape_cast %563 : vector<1x128x128xbf16> to vector<128x128xbf16>
    %cst_525 = arith.constant dense<0.000000e+00> : vector<16x128xf32>
    %565 = tpu.matmul %562, %564, %cst_525 {dimension_numbers = #tpu.dot_dimension_numbers<[1], [0], [0], [1], [0, 0, 1, 1], [], []>} : vector<16x128xbf16>, vector<128x128xbf16>, vector<16x128xf32> -> vector<16x128xf32>
    %c17_526 = arith.constant 17 : index
    %c0_527 = arith.constant 0 : index
    %c0_528 = arith.constant 0 : index
    %566 = vector.load %arg5[%c17_526, %c0_527, %c0_528] : memref<31x1x128xf32, #tpu.memory_space<vmem>>, vector<1x1x128xf32>
    %567 = vector.shape_cast %566 : vector<1x1x128xf32> to vector<1x128xf32>
    %568 = vector.broadcast %567 : vector<1x128xf32> to vector<16x128xf32>
    %569 = arith.addf %565, %568 : vector<16x128xf32>
    %cst_529 = arith.constant 0.000000e+00 : f32
    %570 = vector.broadcast %cst_529 : f32 to vector<16x128xf32>
    %571 = arith.maximumf %569, %570 : vector<16x128xf32>
    %572 = arith.truncf %571 : vector<16x128xf32> to vector<16x128xbf16>
    %cst_530 = arith.constant dense<0.000000e+00> : vector<16x128xf32>
    %573 = tpu.matmul %32, %572, %cst_530 {dimension_numbers = #tpu.dot_dimension_numbers<[1], [0], [0], [1], [0, 0, 1, 1], [], []>} : vector<16x16xbf16>, vector<16x128xbf16>, vector<16x128xf32> -> vector<16x128xf32>
    %c20 = arith.constant 20 : index
    %c0_531 = arith.constant 0 : index
    %c0_532 = arith.constant 0 : index
    %c0_533 = arith.constant 0 : index
    %574 = vector.load %arg7[%c20, %c0_531, %c0_532, %c0_533] : memref<32x2x128x128xbf16, #tpu.memory_space<vmem>>, vector<1x1x128x128xbf16>
    %575 = vector.shape_cast %574 : vector<1x1x128x128xbf16> to vector<128x128xbf16>
    %cst_534 = arith.constant dense<0.000000e+00> : vector<16x128xf32>
    %576 = tpu.matmul %572, %575, %cst_534 {dimension_numbers = #tpu.dot_dimension_numbers<[1], [0], [0], [1], [0, 0, 1, 1], [], []>} : vector<16x128xbf16>, vector<128x128xbf16>, vector<16x128xf32> -> vector<16x128xf32>
    %577 = arith.truncf %573 : vector<16x128xf32> to vector<16x128xbf16>
    %c20_535 = arith.constant 20 : index
    %c1_536 = arith.constant 1 : index
    %c0_537 = arith.constant 0 : index
    %c0_538 = arith.constant 0 : index
    %578 = vector.load %arg7[%c20_535, %c1_536, %c0_537, %c0_538] : memref<32x2x128x128xbf16, #tpu.memory_space<vmem>>, vector<1x1x128x128xbf16>
    %579 = vector.shape_cast %578 : vector<1x1x128x128xbf16> to vector<128x128xbf16>
    %cst_539 = arith.constant dense<0.000000e+00> : vector<16x128xf32>
    %580 = tpu.matmul %577, %579, %cst_539 {dimension_numbers = #tpu.dot_dimension_numbers<[1], [0], [0], [1], [0, 0, 1, 1], [], []>} : vector<16x128xbf16>, vector<128x128xbf16>, vector<16x128xf32> -> vector<16x128xf32>
    %581 = arith.addf %576, %580 : vector<16x128xf32>
    %c20_540 = arith.constant 20 : index
    %c0_541 = arith.constant 0 : index
    %c0_542 = arith.constant 0 : index
    %582 = vector.load %arg3[%c20_540, %c0_541, %c0_542] : memref<32x1x128xf32, #tpu.memory_space<vmem>>, vector<1x1x128xf32>
    %583 = vector.shape_cast %582 : vector<1x1x128xf32> to vector<1x128xf32>
    %584 = vector.broadcast %583 : vector<1x128xf32> to vector<16x128xf32>
    %585 = arith.addf %581, %584 : vector<16x128xf32>
    %cst_543 = arith.constant 0.000000e+00 : f32
    %586 = vector.broadcast %cst_543 : f32 to vector<16x128xf32>
    %587 = arith.maximumf %585, %586 : vector<16x128xf32>
    %588 = arith.truncf %587 : vector<16x128xf32> to vector<16x128xbf16>
    %cst_544 = arith.constant dense<0.000000e+00> : vector<16x128xf32>
    %589 = tpu.matmul %32, %588, %cst_544 {dimension_numbers = #tpu.dot_dimension_numbers<[1], [0], [0], [1], [0, 0, 1, 1], [], []>} : vector<16x16xbf16>, vector<16x128xbf16>, vector<16x128xf32> -> vector<16x128xf32>
    %c21 = arith.constant 21 : index
    %c0_545 = arith.constant 0 : index
    %c0_546 = arith.constant 0 : index
    %c0_547 = arith.constant 0 : index
    %590 = vector.load %arg7[%c21, %c0_545, %c0_546, %c0_547] : memref<32x2x128x128xbf16, #tpu.memory_space<vmem>>, vector<1x1x128x128xbf16>
    %591 = vector.shape_cast %590 : vector<1x1x128x128xbf16> to vector<128x128xbf16>
    %cst_548 = arith.constant dense<0.000000e+00> : vector<16x128xf32>
    %592 = tpu.matmul %588, %591, %cst_548 {dimension_numbers = #tpu.dot_dimension_numbers<[1], [0], [0], [1], [0, 0, 1, 1], [], []>} : vector<16x128xbf16>, vector<128x128xbf16>, vector<16x128xf32> -> vector<16x128xf32>
    %593 = arith.truncf %589 : vector<16x128xf32> to vector<16x128xbf16>
    %c21_549 = arith.constant 21 : index
    %c1_550 = arith.constant 1 : index
    %c0_551 = arith.constant 0 : index
    %c0_552 = arith.constant 0 : index
    %594 = vector.load %arg7[%c21_549, %c1_550, %c0_551, %c0_552] : memref<32x2x128x128xbf16, #tpu.memory_space<vmem>>, vector<1x1x128x128xbf16>
    %595 = vector.shape_cast %594 : vector<1x1x128x128xbf16> to vector<128x128xbf16>
    %cst_553 = arith.constant dense<0.000000e+00> : vector<16x128xf32>
    %596 = tpu.matmul %593, %595, %cst_553 {dimension_numbers = #tpu.dot_dimension_numbers<[1], [0], [0], [1], [0, 0, 1, 1], [], []>} : vector<16x128xbf16>, vector<128x128xbf16>, vector<16x128xf32> -> vector<16x128xf32>
    %597 = arith.addf %592, %596 : vector<16x128xf32>
    %c21_554 = arith.constant 21 : index
    %c0_555 = arith.constant 0 : index
    %c0_556 = arith.constant 0 : index
    %598 = vector.load %arg3[%c21_554, %c0_555, %c0_556] : memref<32x1x128xf32, #tpu.memory_space<vmem>>, vector<1x1x128xf32>
    %599 = vector.shape_cast %598 : vector<1x1x128xf32> to vector<1x128xf32>
    %600 = vector.broadcast %599 : vector<1x128xf32> to vector<16x128xf32>
    %601 = arith.addf %597, %600 : vector<16x128xf32>
    %cst_557 = arith.constant 0.000000e+00 : f32
    %602 = vector.broadcast %cst_557 : f32 to vector<16x128xf32>
    %603 = arith.maximumf %601, %602 : vector<16x128xf32>
    %604 = arith.addf %587, %603 : vector<16x128xf32>
    %605 = arith.truncf %604 : vector<16x128xf32> to vector<16x128xbf16>
    %c18_558 = arith.constant 18 : index
    %c0_559 = arith.constant 0 : index
    %c0_560 = arith.constant 0 : index
    %606 = vector.load %arg8[%c18_558, %c0_559, %c0_560] : memref<31x128x128xbf16, #tpu.memory_space<vmem>>, vector<1x128x128xbf16>
    %607 = vector.shape_cast %606 : vector<1x128x128xbf16> to vector<128x128xbf16>
    %cst_561 = arith.constant dense<0.000000e+00> : vector<16x128xf32>
    %608 = tpu.matmul %605, %607, %cst_561 {dimension_numbers = #tpu.dot_dimension_numbers<[1], [0], [0], [1], [0, 0, 1, 1], [], []>} : vector<16x128xbf16>, vector<128x128xbf16>, vector<16x128xf32> -> vector<16x128xf32>
    %c18_562 = arith.constant 18 : index
    %c0_563 = arith.constant 0 : index
    %c0_564 = arith.constant 0 : index
    %609 = vector.load %arg5[%c18_562, %c0_563, %c0_564] : memref<31x1x128xf32, #tpu.memory_space<vmem>>, vector<1x1x128xf32>
    %610 = vector.shape_cast %609 : vector<1x1x128xf32> to vector<1x128xf32>
    %611 = vector.broadcast %610 : vector<1x128xf32> to vector<16x128xf32>
    %612 = arith.addf %608, %611 : vector<16x128xf32>
    %cst_565 = arith.constant 0.000000e+00 : f32
    %613 = vector.broadcast %cst_565 : f32 to vector<16x128xf32>
    %614 = arith.maximumf %612, %613 : vector<16x128xf32>
    %615 = arith.truncf %614 : vector<16x128xf32> to vector<16x128xbf16>
    %cst_566 = arith.constant dense<0.000000e+00> : vector<16x128xf32>
    %616 = tpu.matmul %32, %615, %cst_566 {dimension_numbers = #tpu.dot_dimension_numbers<[1], [0], [0], [1], [0, 0, 1, 1], [], []>} : vector<16x16xbf16>, vector<16x128xbf16>, vector<16x128xf32> -> vector<16x128xf32>
    %c22 = arith.constant 22 : index
    %c0_567 = arith.constant 0 : index
    %c0_568 = arith.constant 0 : index
    %c0_569 = arith.constant 0 : index
    %617 = vector.load %arg7[%c22, %c0_567, %c0_568, %c0_569] : memref<32x2x128x128xbf16, #tpu.memory_space<vmem>>, vector<1x1x128x128xbf16>
    %618 = vector.shape_cast %617 : vector<1x1x128x128xbf16> to vector<128x128xbf16>
    %cst_570 = arith.constant dense<0.000000e+00> : vector<16x128xf32>
    %619 = tpu.matmul %615, %618, %cst_570 {dimension_numbers = #tpu.dot_dimension_numbers<[1], [0], [0], [1], [0, 0, 1, 1], [], []>} : vector<16x128xbf16>, vector<128x128xbf16>, vector<16x128xf32> -> vector<16x128xf32>
    %620 = arith.truncf %616 : vector<16x128xf32> to vector<16x128xbf16>
    %c22_571 = arith.constant 22 : index
    %c1_572 = arith.constant 1 : index
    %c0_573 = arith.constant 0 : index
    %c0_574 = arith.constant 0 : index
    %621 = vector.load %arg7[%c22_571, %c1_572, %c0_573, %c0_574] : memref<32x2x128x128xbf16, #tpu.memory_space<vmem>>, vector<1x1x128x128xbf16>
    %622 = vector.shape_cast %621 : vector<1x1x128x128xbf16> to vector<128x128xbf16>
    %cst_575 = arith.constant dense<0.000000e+00> : vector<16x128xf32>
    %623 = tpu.matmul %620, %622, %cst_575 {dimension_numbers = #tpu.dot_dimension_numbers<[1], [0], [0], [1], [0, 0, 1, 1], [], []>} : vector<16x128xbf16>, vector<128x128xbf16>, vector<16x128xf32> -> vector<16x128xf32>
    %624 = arith.addf %619, %623 : vector<16x128xf32>
    %c22_576 = arith.constant 22 : index
    %c0_577 = arith.constant 0 : index
    %c0_578 = arith.constant 0 : index
    %625 = vector.load %arg3[%c22_576, %c0_577, %c0_578] : memref<32x1x128xf32, #tpu.memory_space<vmem>>, vector<1x1x128xf32>
    %626 = vector.shape_cast %625 : vector<1x1x128xf32> to vector<1x128xf32>
    %627 = vector.broadcast %626 : vector<1x128xf32> to vector<16x128xf32>
    %628 = arith.addf %624, %627 : vector<16x128xf32>
    %cst_579 = arith.constant 0.000000e+00 : f32
    %629 = vector.broadcast %cst_579 : f32 to vector<16x128xf32>
    %630 = arith.maximumf %628, %629 : vector<16x128xf32>
    %631 = arith.truncf %630 : vector<16x128xf32> to vector<16x128xbf16>
    %cst_580 = arith.constant dense<0.000000e+00> : vector<16x128xf32>
    %632 = tpu.matmul %32, %631, %cst_580 {dimension_numbers = #tpu.dot_dimension_numbers<[1], [0], [0], [1], [0, 0, 1, 1], [], []>} : vector<16x16xbf16>, vector<16x128xbf16>, vector<16x128xf32> -> vector<16x128xf32>
    %c23 = arith.constant 23 : index
    %c0_581 = arith.constant 0 : index
    %c0_582 = arith.constant 0 : index
    %c0_583 = arith.constant 0 : index
    %633 = vector.load %arg7[%c23, %c0_581, %c0_582, %c0_583] : memref<32x2x128x128xbf16, #tpu.memory_space<vmem>>, vector<1x1x128x128xbf16>
    %634 = vector.shape_cast %633 : vector<1x1x128x128xbf16> to vector<128x128xbf16>
    %cst_584 = arith.constant dense<0.000000e+00> : vector<16x128xf32>
    %635 = tpu.matmul %631, %634, %cst_584 {dimension_numbers = #tpu.dot_dimension_numbers<[1], [0], [0], [1], [0, 0, 1, 1], [], []>} : vector<16x128xbf16>, vector<128x128xbf16>, vector<16x128xf32> -> vector<16x128xf32>
    %636 = arith.truncf %632 : vector<16x128xf32> to vector<16x128xbf16>
    %c23_585 = arith.constant 23 : index
    %c1_586 = arith.constant 1 : index
    %c0_587 = arith.constant 0 : index
    %c0_588 = arith.constant 0 : index
    %637 = vector.load %arg7[%c23_585, %c1_586, %c0_587, %c0_588] : memref<32x2x128x128xbf16, #tpu.memory_space<vmem>>, vector<1x1x128x128xbf16>
    %638 = vector.shape_cast %637 : vector<1x1x128x128xbf16> to vector<128x128xbf16>
    %cst_589 = arith.constant dense<0.000000e+00> : vector<16x128xf32>
    %639 = tpu.matmul %636, %638, %cst_589 {dimension_numbers = #tpu.dot_dimension_numbers<[1], [0], [0], [1], [0, 0, 1, 1], [], []>} : vector<16x128xbf16>, vector<128x128xbf16>, vector<16x128xf32> -> vector<16x128xf32>
    %640 = arith.addf %635, %639 : vector<16x128xf32>
    %c23_590 = arith.constant 23 : index
    %c0_591 = arith.constant 0 : index
    %c0_592 = arith.constant 0 : index
    %641 = vector.load %arg3[%c23_590, %c0_591, %c0_592] : memref<32x1x128xf32, #tpu.memory_space<vmem>>, vector<1x1x128xf32>
    %642 = vector.shape_cast %641 : vector<1x1x128xf32> to vector<1x128xf32>
    %643 = vector.broadcast %642 : vector<1x128xf32> to vector<16x128xf32>
    %644 = arith.addf %640, %643 : vector<16x128xf32>
    %cst_593 = arith.constant 0.000000e+00 : f32
    %645 = vector.broadcast %cst_593 : f32 to vector<16x128xf32>
    %646 = arith.maximumf %644, %645 : vector<16x128xf32>
    %647 = arith.addf %630, %646 : vector<16x128xf32>
    %648 = arith.truncf %647 : vector<16x128xf32> to vector<16x128xbf16>
    %c19_594 = arith.constant 19 : index
    %c0_595 = arith.constant 0 : index
    %c0_596 = arith.constant 0 : index
    %649 = vector.load %arg8[%c19_594, %c0_595, %c0_596] : memref<31x128x128xbf16, #tpu.memory_space<vmem>>, vector<1x128x128xbf16>
    %650 = vector.shape_cast %649 : vector<1x128x128xbf16> to vector<128x128xbf16>
    %cst_597 = arith.constant dense<0.000000e+00> : vector<16x128xf32>
    %651 = tpu.matmul %648, %650, %cst_597 {dimension_numbers = #tpu.dot_dimension_numbers<[1], [0], [0], [1], [0, 0, 1, 1], [], []>} : vector<16x128xbf16>, vector<128x128xbf16>, vector<16x128xf32> -> vector<16x128xf32>
    %c19_598 = arith.constant 19 : index
    %c0_599 = arith.constant 0 : index
    %c0_600 = arith.constant 0 : index
    %652 = vector.load %arg5[%c19_598, %c0_599, %c0_600] : memref<31x1x128xf32, #tpu.memory_space<vmem>>, vector<1x1x128xf32>
    %653 = vector.shape_cast %652 : vector<1x1x128xf32> to vector<1x128xf32>
    %654 = vector.broadcast %653 : vector<1x128xf32> to vector<16x128xf32>
    %655 = arith.addf %651, %654 : vector<16x128xf32>
    %cst_601 = arith.constant 0.000000e+00 : f32
    %656 = vector.broadcast %cst_601 : f32 to vector<16x128xf32>
    %657 = arith.maximumf %655, %656 : vector<16x128xf32>
    %658 = arith.addf %614, %657 : vector<16x128xf32>
    %659 = arith.truncf %658 : vector<16x128xf32> to vector<16x128xbf16>
    %c20_602 = arith.constant 20 : index
    %c0_603 = arith.constant 0 : index
    %c0_604 = arith.constant 0 : index
    %660 = vector.load %arg8[%c20_602, %c0_603, %c0_604] : memref<31x128x128xbf16, #tpu.memory_space<vmem>>, vector<1x128x128xbf16>
    %661 = vector.shape_cast %660 : vector<1x128x128xbf16> to vector<128x128xbf16>
    %cst_605 = arith.constant dense<0.000000e+00> : vector<16x128xf32>
    %662 = tpu.matmul %659, %661, %cst_605 {dimension_numbers = #tpu.dot_dimension_numbers<[1], [0], [0], [1], [0, 0, 1, 1], [], []>} : vector<16x128xbf16>, vector<128x128xbf16>, vector<16x128xf32> -> vector<16x128xf32>
    %c20_606 = arith.constant 20 : index
    %c0_607 = arith.constant 0 : index
    %c0_608 = arith.constant 0 : index
    %663 = vector.load %arg5[%c20_606, %c0_607, %c0_608] : memref<31x1x128xf32, #tpu.memory_space<vmem>>, vector<1x1x128xf32>
    %664 = vector.shape_cast %663 : vector<1x1x128xf32> to vector<1x128xf32>
    %665 = vector.broadcast %664 : vector<1x128xf32> to vector<16x128xf32>
    %666 = arith.addf %662, %665 : vector<16x128xf32>
    %667 = arith.addf %571, %666 : vector<16x128xf32>
    %668 = arith.truncf %667 : vector<16x128xf32> to vector<16x128xbf16>
    %c21_609 = arith.constant 21 : index
    %c0_610 = arith.constant 0 : index
    %c0_611 = arith.constant 0 : index
    %669 = vector.load %arg8[%c21_609, %c0_610, %c0_611] : memref<31x128x128xbf16, #tpu.memory_space<vmem>>, vector<1x128x128xbf16>
    %670 = vector.shape_cast %669 : vector<1x128x128xbf16> to vector<128x128xbf16>
    %cst_612 = arith.constant dense<0.000000e+00> : vector<16x128xf32>
    %671 = tpu.matmul %668, %670, %cst_612 {dimension_numbers = #tpu.dot_dimension_numbers<[1], [0], [0], [1], [0, 0, 1, 1], [], []>} : vector<16x128xbf16>, vector<128x128xbf16>, vector<16x128xf32> -> vector<16x128xf32>
    %c21_613 = arith.constant 21 : index
    %c0_614 = arith.constant 0 : index
    %c0_615 = arith.constant 0 : index
    %672 = vector.load %arg5[%c21_613, %c0_614, %c0_615] : memref<31x1x128xf32, #tpu.memory_space<vmem>>, vector<1x1x128xf32>
    %673 = vector.shape_cast %672 : vector<1x1x128xf32> to vector<1x128xf32>
    %674 = vector.broadcast %673 : vector<1x128xf32> to vector<16x128xf32>
    %675 = arith.addf %671, %674 : vector<16x128xf32>
    %cst_616 = arith.constant 0.000000e+00 : f32
    %676 = vector.broadcast %cst_616 : f32 to vector<16x128xf32>
    %677 = arith.maximumf %675, %676 : vector<16x128xf32>
    %c3_i32_617 = arith.constant 3 : i32
    %c24_i32_618 = arith.constant 24 : i32
    %c0_i32_619 = arith.constant 0 : i32
    %c0_i32_620 = arith.constant 0 : i32
    %c0_i32_621 = arith.constant 0 : i32
    %678 = tpu.memref_slice %arg2[%c24_i32_618, %c0_i32_619, %c0_i32_620, %c0_i32_621] : memref<32x2x128x128xbf16, #tpu.memory_space<any>> -> memref<8x2x128x128xbf16, #tpu.memory_space<any>>
    %c24_i32_622 = arith.constant 24 : i32
    %c0_i32_623 = arith.constant 0 : i32
    %c0_i32_624 = arith.constant 0 : i32
    %c0_i32_625 = arith.constant 0 : i32
    %679 = tpu.memref_slice %arg7[%c24_i32_622, %c0_i32_623, %c0_i32_624, %c0_i32_625] : memref<32x2x128x128xbf16, #tpu.memory_space<vmem>> -> memref<8x2x128x128xbf16, #tpu.memory_space<vmem>>
    %680 = tpu.memref_slice %arg9[%c3_i32_617] : memref<4x!tpu.dma_semaphore, #tpu.memory_space<semaphore_mem>> -> memref<1x!tpu.dma_semaphore, #tpu.memory_space<semaphore_mem>>
    %681 = tpu.memref_squeeze %680 : memref<1x!tpu.dma_semaphore, #tpu.memory_space<semaphore_mem>> -> memref<!tpu.dma_semaphore, #tpu.memory_space<semaphore_mem>>
    tpu.wait_dma2 semaphore(%681 : memref<!tpu.dma_semaphore, #tpu.memory_space<semaphore_mem>>) src(%678 : memref<8x2x128x128xbf16, #tpu.memory_space<any>>) dst(%679 : memref<8x2x128x128xbf16, #tpu.memory_space<vmem>>)
    %682 = arith.truncf %677 : vector<16x128xf32> to vector<16x128xbf16>
    %cst_626 = arith.constant dense<0.000000e+00> : vector<16x128xf32>
    %683 = tpu.matmul %32, %682, %cst_626 {dimension_numbers = #tpu.dot_dimension_numbers<[1], [0], [0], [1], [0, 0, 1, 1], [], []>} : vector<16x16xbf16>, vector<16x128xbf16>, vector<16x128xf32> -> vector<16x128xf32>
    %c24 = arith.constant 24 : index
    %c0_627 = arith.constant 0 : index
    %c0_628 = arith.constant 0 : index
    %c0_629 = arith.constant 0 : index
    %684 = vector.load %arg7[%c24, %c0_627, %c0_628, %c0_629] : memref<32x2x128x128xbf16, #tpu.memory_space<vmem>>, vector<1x1x128x128xbf16>
    %685 = vector.shape_cast %684 : vector<1x1x128x128xbf16> to vector<128x128xbf16>
    %cst_630 = arith.constant dense<0.000000e+00> : vector<16x128xf32>
    %686 = tpu.matmul %682, %685, %cst_630 {dimension_numbers = #tpu.dot_dimension_numbers<[1], [0], [0], [1], [0, 0, 1, 1], [], []>} : vector<16x128xbf16>, vector<128x128xbf16>, vector<16x128xf32> -> vector<16x128xf32>
    %687 = arith.truncf %683 : vector<16x128xf32> to vector<16x128xbf16>
    %c24_631 = arith.constant 24 : index
    %c1_632 = arith.constant 1 : index
    %c0_633 = arith.constant 0 : index
    %c0_634 = arith.constant 0 : index
    %688 = vector.load %arg7[%c24_631, %c1_632, %c0_633, %c0_634] : memref<32x2x128x128xbf16, #tpu.memory_space<vmem>>, vector<1x1x128x128xbf16>
    %689 = vector.shape_cast %688 : vector<1x1x128x128xbf16> to vector<128x128xbf16>
    %cst_635 = arith.constant dense<0.000000e+00> : vector<16x128xf32>
    %690 = tpu.matmul %687, %689, %cst_635 {dimension_numbers = #tpu.dot_dimension_numbers<[1], [0], [0], [1], [0, 0, 1, 1], [], []>} : vector<16x128xbf16>, vector<128x128xbf16>, vector<16x128xf32> -> vector<16x128xf32>
    %691 = arith.addf %686, %690 : vector<16x128xf32>
    %c24_636 = arith.constant 24 : index
    %c0_637 = arith.constant 0 : index
    %c0_638 = arith.constant 0 : index
    %692 = vector.load %arg3[%c24_636, %c0_637, %c0_638] : memref<32x1x128xf32, #tpu.memory_space<vmem>>, vector<1x1x128xf32>
    %693 = vector.shape_cast %692 : vector<1x1x128xf32> to vector<1x128xf32>
    %694 = vector.broadcast %693 : vector<1x128xf32> to vector<16x128xf32>
    %695 = arith.addf %691, %694 : vector<16x128xf32>
    %cst_639 = arith.constant 0.000000e+00 : f32
    %696 = vector.broadcast %cst_639 : f32 to vector<16x128xf32>
    %697 = arith.maximumf %695, %696 : vector<16x128xf32>
    %698 = arith.truncf %697 : vector<16x128xf32> to vector<16x128xbf16>
    %cst_640 = arith.constant dense<0.000000e+00> : vector<16x128xf32>
    %699 = tpu.matmul %32, %698, %cst_640 {dimension_numbers = #tpu.dot_dimension_numbers<[1], [0], [0], [1], [0, 0, 1, 1], [], []>} : vector<16x16xbf16>, vector<16x128xbf16>, vector<16x128xf32> -> vector<16x128xf32>
    %c25 = arith.constant 25 : index
    %c0_641 = arith.constant 0 : index
    %c0_642 = arith.constant 0 : index
    %c0_643 = arith.constant 0 : index
    %700 = vector.load %arg7[%c25, %c0_641, %c0_642, %c0_643] : memref<32x2x128x128xbf16, #tpu.memory_space<vmem>>, vector<1x1x128x128xbf16>
    %701 = vector.shape_cast %700 : vector<1x1x128x128xbf16> to vector<128x128xbf16>
    %cst_644 = arith.constant dense<0.000000e+00> : vector<16x128xf32>
    %702 = tpu.matmul %698, %701, %cst_644 {dimension_numbers = #tpu.dot_dimension_numbers<[1], [0], [0], [1], [0, 0, 1, 1], [], []>} : vector<16x128xbf16>, vector<128x128xbf16>, vector<16x128xf32> -> vector<16x128xf32>
    %703 = arith.truncf %699 : vector<16x128xf32> to vector<16x128xbf16>
    %c25_645 = arith.constant 25 : index
    %c1_646 = arith.constant 1 : index
    %c0_647 = arith.constant 0 : index
    %c0_648 = arith.constant 0 : index
    %704 = vector.load %arg7[%c25_645, %c1_646, %c0_647, %c0_648] : memref<32x2x128x128xbf16, #tpu.memory_space<vmem>>, vector<1x1x128x128xbf16>
    %705 = vector.shape_cast %704 : vector<1x1x128x128xbf16> to vector<128x128xbf16>
    %cst_649 = arith.constant dense<0.000000e+00> : vector<16x128xf32>
    %706 = tpu.matmul %703, %705, %cst_649 {dimension_numbers = #tpu.dot_dimension_numbers<[1], [0], [0], [1], [0, 0, 1, 1], [], []>} : vector<16x128xbf16>, vector<128x128xbf16>, vector<16x128xf32> -> vector<16x128xf32>
    %707 = arith.addf %702, %706 : vector<16x128xf32>
    %c25_650 = arith.constant 25 : index
    %c0_651 = arith.constant 0 : index
    %c0_652 = arith.constant 0 : index
    %708 = vector.load %arg3[%c25_650, %c0_651, %c0_652] : memref<32x1x128xf32, #tpu.memory_space<vmem>>, vector<1x1x128xf32>
    %709 = vector.shape_cast %708 : vector<1x1x128xf32> to vector<1x128xf32>
    %710 = vector.broadcast %709 : vector<1x128xf32> to vector<16x128xf32>
    %711 = arith.addf %707, %710 : vector<16x128xf32>
    %cst_653 = arith.constant 0.000000e+00 : f32
    %712 = vector.broadcast %cst_653 : f32 to vector<16x128xf32>
    %713 = arith.maximumf %711, %712 : vector<16x128xf32>
    %714 = arith.addf %697, %713 : vector<16x128xf32>
    %715 = arith.truncf %714 : vector<16x128xf32> to vector<16x128xbf16>
    %c22_654 = arith.constant 22 : index
    %c0_655 = arith.constant 0 : index
    %c0_656 = arith.constant 0 : index
    %716 = vector.load %arg8[%c22_654, %c0_655, %c0_656] : memref<31x128x128xbf16, #tpu.memory_space<vmem>>, vector<1x128x128xbf16>
    %717 = vector.shape_cast %716 : vector<1x128x128xbf16> to vector<128x128xbf16>
    %cst_657 = arith.constant dense<0.000000e+00> : vector<16x128xf32>
    %718 = tpu.matmul %715, %717, %cst_657 {dimension_numbers = #tpu.dot_dimension_numbers<[1], [0], [0], [1], [0, 0, 1, 1], [], []>} : vector<16x128xbf16>, vector<128x128xbf16>, vector<16x128xf32> -> vector<16x128xf32>
    %c22_658 = arith.constant 22 : index
    %c0_659 = arith.constant 0 : index
    %c0_660 = arith.constant 0 : index
    %719 = vector.load %arg5[%c22_658, %c0_659, %c0_660] : memref<31x1x128xf32, #tpu.memory_space<vmem>>, vector<1x1x128xf32>
    %720 = vector.shape_cast %719 : vector<1x1x128xf32> to vector<1x128xf32>
    %721 = vector.broadcast %720 : vector<1x128xf32> to vector<16x128xf32>
    %722 = arith.addf %718, %721 : vector<16x128xf32>
    %cst_661 = arith.constant 0.000000e+00 : f32
    %723 = vector.broadcast %cst_661 : f32 to vector<16x128xf32>
    %724 = arith.maximumf %722, %723 : vector<16x128xf32>
    %725 = arith.truncf %724 : vector<16x128xf32> to vector<16x128xbf16>
    %cst_662 = arith.constant dense<0.000000e+00> : vector<16x128xf32>
    %726 = tpu.matmul %32, %725, %cst_662 {dimension_numbers = #tpu.dot_dimension_numbers<[1], [0], [0], [1], [0, 0, 1, 1], [], []>} : vector<16x16xbf16>, vector<16x128xbf16>, vector<16x128xf32> -> vector<16x128xf32>
    %c26 = arith.constant 26 : index
    %c0_663 = arith.constant 0 : index
    %c0_664 = arith.constant 0 : index
    %c0_665 = arith.constant 0 : index
    %727 = vector.load %arg7[%c26, %c0_663, %c0_664, %c0_665] : memref<32x2x128x128xbf16, #tpu.memory_space<vmem>>, vector<1x1x128x128xbf16>
    %728 = vector.shape_cast %727 : vector<1x1x128x128xbf16> to vector<128x128xbf16>
    %cst_666 = arith.constant dense<0.000000e+00> : vector<16x128xf32>
    %729 = tpu.matmul %725, %728, %cst_666 {dimension_numbers = #tpu.dot_dimension_numbers<[1], [0], [0], [1], [0, 0, 1, 1], [], []>} : vector<16x128xbf16>, vector<128x128xbf16>, vector<16x128xf32> -> vector<16x128xf32>
    %730 = arith.truncf %726 : vector<16x128xf32> to vector<16x128xbf16>
    %c26_667 = arith.constant 26 : index
    %c1_668 = arith.constant 1 : index
    %c0_669 = arith.constant 0 : index
    %c0_670 = arith.constant 0 : index
    %731 = vector.load %arg7[%c26_667, %c1_668, %c0_669, %c0_670] : memref<32x2x128x128xbf16, #tpu.memory_space<vmem>>, vector<1x1x128x128xbf16>
    %732 = vector.shape_cast %731 : vector<1x1x128x128xbf16> to vector<128x128xbf16>
    %cst_671 = arith.constant dense<0.000000e+00> : vector<16x128xf32>
    %733 = tpu.matmul %730, %732, %cst_671 {dimension_numbers = #tpu.dot_dimension_numbers<[1], [0], [0], [1], [0, 0, 1, 1], [], []>} : vector<16x128xbf16>, vector<128x128xbf16>, vector<16x128xf32> -> vector<16x128xf32>
    %734 = arith.addf %729, %733 : vector<16x128xf32>
    %c26_672 = arith.constant 26 : index
    %c0_673 = arith.constant 0 : index
    %c0_674 = arith.constant 0 : index
    %735 = vector.load %arg3[%c26_672, %c0_673, %c0_674] : memref<32x1x128xf32, #tpu.memory_space<vmem>>, vector<1x1x128xf32>
    %736 = vector.shape_cast %735 : vector<1x1x128xf32> to vector<1x128xf32>
    %737 = vector.broadcast %736 : vector<1x128xf32> to vector<16x128xf32>
    %738 = arith.addf %734, %737 : vector<16x128xf32>
    %cst_675 = arith.constant 0.000000e+00 : f32
    %739 = vector.broadcast %cst_675 : f32 to vector<16x128xf32>
    %740 = arith.maximumf %738, %739 : vector<16x128xf32>
    %741 = arith.truncf %740 : vector<16x128xf32> to vector<16x128xbf16>
    %cst_676 = arith.constant dense<0.000000e+00> : vector<16x128xf32>
    %742 = tpu.matmul %32, %741, %cst_676 {dimension_numbers = #tpu.dot_dimension_numbers<[1], [0], [0], [1], [0, 0, 1, 1], [], []>} : vector<16x16xbf16>, vector<16x128xbf16>, vector<16x128xf32> -> vector<16x128xf32>
    %c27 = arith.constant 27 : index
    %c0_677 = arith.constant 0 : index
    %c0_678 = arith.constant 0 : index
    %c0_679 = arith.constant 0 : index
    %743 = vector.load %arg7[%c27, %c0_677, %c0_678, %c0_679] : memref<32x2x128x128xbf16, #tpu.memory_space<vmem>>, vector<1x1x128x128xbf16>
    %744 = vector.shape_cast %743 : vector<1x1x128x128xbf16> to vector<128x128xbf16>
    %cst_680 = arith.constant dense<0.000000e+00> : vector<16x128xf32>
    %745 = tpu.matmul %741, %744, %cst_680 {dimension_numbers = #tpu.dot_dimension_numbers<[1], [0], [0], [1], [0, 0, 1, 1], [], []>} : vector<16x128xbf16>, vector<128x128xbf16>, vector<16x128xf32> -> vector<16x128xf32>
    %746 = arith.truncf %742 : vector<16x128xf32> to vector<16x128xbf16>
    %c27_681 = arith.constant 27 : index
    %c1_682 = arith.constant 1 : index
    %c0_683 = arith.constant 0 : index
    %c0_684 = arith.constant 0 : index
    %747 = vector.load %arg7[%c27_681, %c1_682, %c0_683, %c0_684] : memref<32x2x128x128xbf16, #tpu.memory_space<vmem>>, vector<1x1x128x128xbf16>
    %748 = vector.shape_cast %747 : vector<1x1x128x128xbf16> to vector<128x128xbf16>
    %cst_685 = arith.constant dense<0.000000e+00> : vector<16x128xf32>
    %749 = tpu.matmul %746, %748, %cst_685 {dimension_numbers = #tpu.dot_dimension_numbers<[1], [0], [0], [1], [0, 0, 1, 1], [], []>} : vector<16x128xbf16>, vector<128x128xbf16>, vector<16x128xf32> -> vector<16x128xf32>
    %750 = arith.addf %745, %749 : vector<16x128xf32>
    %c27_686 = arith.constant 27 : index
    %c0_687 = arith.constant 0 : index
    %c0_688 = arith.constant 0 : index
    %751 = vector.load %arg3[%c27_686, %c0_687, %c0_688] : memref<32x1x128xf32, #tpu.memory_space<vmem>>, vector<1x1x128xf32>
    %752 = vector.shape_cast %751 : vector<1x1x128xf32> to vector<1x128xf32>
    %753 = vector.broadcast %752 : vector<1x128xf32> to vector<16x128xf32>
    %754 = arith.addf %750, %753 : vector<16x128xf32>
    %cst_689 = arith.constant 0.000000e+00 : f32
    %755 = vector.broadcast %cst_689 : f32 to vector<16x128xf32>
    %756 = arith.maximumf %754, %755 : vector<16x128xf32>
    %757 = arith.addf %740, %756 : vector<16x128xf32>
    %758 = arith.truncf %757 : vector<16x128xf32> to vector<16x128xbf16>
    %c23_690 = arith.constant 23 : index
    %c0_691 = arith.constant 0 : index
    %c0_692 = arith.constant 0 : index
    %759 = vector.load %arg8[%c23_690, %c0_691, %c0_692] : memref<31x128x128xbf16, #tpu.memory_space<vmem>>, vector<1x128x128xbf16>
    %760 = vector.shape_cast %759 : vector<1x128x128xbf16> to vector<128x128xbf16>
    %cst_693 = arith.constant dense<0.000000e+00> : vector<16x128xf32>
    %761 = tpu.matmul %758, %760, %cst_693 {dimension_numbers = #tpu.dot_dimension_numbers<[1], [0], [0], [1], [0, 0, 1, 1], [], []>} : vector<16x128xbf16>, vector<128x128xbf16>, vector<16x128xf32> -> vector<16x128xf32>
    %c23_694 = arith.constant 23 : index
    %c0_695 = arith.constant 0 : index
    %c0_696 = arith.constant 0 : index
    %762 = vector.load %arg5[%c23_694, %c0_695, %c0_696] : memref<31x1x128xf32, #tpu.memory_space<vmem>>, vector<1x1x128xf32>
    %763 = vector.shape_cast %762 : vector<1x1x128xf32> to vector<1x128xf32>
    %764 = vector.broadcast %763 : vector<1x128xf32> to vector<16x128xf32>
    %765 = arith.addf %761, %764 : vector<16x128xf32>
    %cst_697 = arith.constant 0.000000e+00 : f32
    %766 = vector.broadcast %cst_697 : f32 to vector<16x128xf32>
    %767 = arith.maximumf %765, %766 : vector<16x128xf32>
    %768 = arith.addf %724, %767 : vector<16x128xf32>
    %c3_i32_698 = arith.constant 3 : i32
    %c24_i32_699 = arith.constant 24 : i32
    %c0_i32_700 = arith.constant 0 : i32
    %c0_i32_701 = arith.constant 0 : i32
    %769 = tpu.memref_slice %arg4[%c24_i32_699, %c0_i32_700, %c0_i32_701] : memref<31x128x128xbf16, #tpu.memory_space<any>> -> memref<7x128x128xbf16, #tpu.memory_space<any>>
    %c24_i32_702 = arith.constant 24 : i32
    %c0_i32_703 = arith.constant 0 : i32
    %c0_i32_704 = arith.constant 0 : i32
    %770 = tpu.memref_slice %arg8[%c24_i32_702, %c0_i32_703, %c0_i32_704] : memref<31x128x128xbf16, #tpu.memory_space<vmem>> -> memref<7x128x128xbf16, #tpu.memory_space<vmem>>
    %771 = tpu.memref_slice %arg10[%c3_i32_698] : memref<4x!tpu.dma_semaphore, #tpu.memory_space<semaphore_mem>> -> memref<1x!tpu.dma_semaphore, #tpu.memory_space<semaphore_mem>>
    %772 = tpu.memref_squeeze %771 : memref<1x!tpu.dma_semaphore, #tpu.memory_space<semaphore_mem>> -> memref<!tpu.dma_semaphore, #tpu.memory_space<semaphore_mem>>
    tpu.wait_dma2 semaphore(%772 : memref<!tpu.dma_semaphore, #tpu.memory_space<semaphore_mem>>) src(%769 : memref<7x128x128xbf16, #tpu.memory_space<any>>) dst(%770 : memref<7x128x128xbf16, #tpu.memory_space<vmem>>)
    %773 = arith.truncf %768 : vector<16x128xf32> to vector<16x128xbf16>
    %c24_705 = arith.constant 24 : index
    %c0_706 = arith.constant 0 : index
    %c0_707 = arith.constant 0 : index
    %774 = vector.load %arg8[%c24_705, %c0_706, %c0_707] : memref<31x128x128xbf16, #tpu.memory_space<vmem>>, vector<1x128x128xbf16>
    %775 = vector.shape_cast %774 : vector<1x128x128xbf16> to vector<128x128xbf16>
    %cst_708 = arith.constant dense<0.000000e+00> : vector<16x128xf32>
    %776 = tpu.matmul %773, %775, %cst_708 {dimension_numbers = #tpu.dot_dimension_numbers<[1], [0], [0], [1], [0, 0, 1, 1], [], []>} : vector<16x128xbf16>, vector<128x128xbf16>, vector<16x128xf32> -> vector<16x128xf32>
    %c24_709 = arith.constant 24 : index
    %c0_710 = arith.constant 0 : index
    %c0_711 = arith.constant 0 : index
    %777 = vector.load %arg5[%c24_709, %c0_710, %c0_711] : memref<31x1x128xf32, #tpu.memory_space<vmem>>, vector<1x1x128xf32>
    %778 = vector.shape_cast %777 : vector<1x1x128xf32> to vector<1x128xf32>
    %779 = vector.broadcast %778 : vector<1x128xf32> to vector<16x128xf32>
    %780 = arith.addf %776, %779 : vector<16x128xf32>
    %cst_712 = arith.constant 0.000000e+00 : f32
    %781 = vector.broadcast %cst_712 : f32 to vector<16x128xf32>
    %782 = arith.maximumf %780, %781 : vector<16x128xf32>
    %783 = arith.truncf %782 : vector<16x128xf32> to vector<16x128xbf16>
    %cst_713 = arith.constant dense<0.000000e+00> : vector<16x128xf32>
    %784 = tpu.matmul %32, %783, %cst_713 {dimension_numbers = #tpu.dot_dimension_numbers<[1], [0], [0], [1], [0, 0, 1, 1], [], []>} : vector<16x16xbf16>, vector<16x128xbf16>, vector<16x128xf32> -> vector<16x128xf32>
    %c28 = arith.constant 28 : index
    %c0_714 = arith.constant 0 : index
    %c0_715 = arith.constant 0 : index
    %c0_716 = arith.constant 0 : index
    %785 = vector.load %arg7[%c28, %c0_714, %c0_715, %c0_716] : memref<32x2x128x128xbf16, #tpu.memory_space<vmem>>, vector<1x1x128x128xbf16>
    %786 = vector.shape_cast %785 : vector<1x1x128x128xbf16> to vector<128x128xbf16>
    %cst_717 = arith.constant dense<0.000000e+00> : vector<16x128xf32>
    %787 = tpu.matmul %783, %786, %cst_717 {dimension_numbers = #tpu.dot_dimension_numbers<[1], [0], [0], [1], [0, 0, 1, 1], [], []>} : vector<16x128xbf16>, vector<128x128xbf16>, vector<16x128xf32> -> vector<16x128xf32>
    %788 = arith.truncf %784 : vector<16x128xf32> to vector<16x128xbf16>
    %c28_718 = arith.constant 28 : index
    %c1_719 = arith.constant 1 : index
    %c0_720 = arith.constant 0 : index
    %c0_721 = arith.constant 0 : index
    %789 = vector.load %arg7[%c28_718, %c1_719, %c0_720, %c0_721] : memref<32x2x128x128xbf16, #tpu.memory_space<vmem>>, vector<1x1x128x128xbf16>
    %790 = vector.shape_cast %789 : vector<1x1x128x128xbf16> to vector<128x128xbf16>
    %cst_722 = arith.constant dense<0.000000e+00> : vector<16x128xf32>
    %791 = tpu.matmul %788, %790, %cst_722 {dimension_numbers = #tpu.dot_dimension_numbers<[1], [0], [0], [1], [0, 0, 1, 1], [], []>} : vector<16x128xbf16>, vector<128x128xbf16>, vector<16x128xf32> -> vector<16x128xf32>
    %792 = arith.addf %787, %791 : vector<16x128xf32>
    %c28_723 = arith.constant 28 : index
    %c0_724 = arith.constant 0 : index
    %c0_725 = arith.constant 0 : index
    %793 = vector.load %arg3[%c28_723, %c0_724, %c0_725] : memref<32x1x128xf32, #tpu.memory_space<vmem>>, vector<1x1x128xf32>
    %794 = vector.shape_cast %793 : vector<1x1x128xf32> to vector<1x128xf32>
    %795 = vector.broadcast %794 : vector<1x128xf32> to vector<16x128xf32>
    %796 = arith.addf %792, %795 : vector<16x128xf32>
    %cst_726 = arith.constant 0.000000e+00 : f32
    %797 = vector.broadcast %cst_726 : f32 to vector<16x128xf32>
    %798 = arith.maximumf %796, %797 : vector<16x128xf32>
    %799 = arith.truncf %798 : vector<16x128xf32> to vector<16x128xbf16>
    %cst_727 = arith.constant dense<0.000000e+00> : vector<16x128xf32>
    %800 = tpu.matmul %32, %799, %cst_727 {dimension_numbers = #tpu.dot_dimension_numbers<[1], [0], [0], [1], [0, 0, 1, 1], [], []>} : vector<16x16xbf16>, vector<16x128xbf16>, vector<16x128xf32> -> vector<16x128xf32>
    %c29 = arith.constant 29 : index
    %c0_728 = arith.constant 0 : index
    %c0_729 = arith.constant 0 : index
    %c0_730 = arith.constant 0 : index
    %801 = vector.load %arg7[%c29, %c0_728, %c0_729, %c0_730] : memref<32x2x128x128xbf16, #tpu.memory_space<vmem>>, vector<1x1x128x128xbf16>
    %802 = vector.shape_cast %801 : vector<1x1x128x128xbf16> to vector<128x128xbf16>
    %cst_731 = arith.constant dense<0.000000e+00> : vector<16x128xf32>
    %803 = tpu.matmul %799, %802, %cst_731 {dimension_numbers = #tpu.dot_dimension_numbers<[1], [0], [0], [1], [0, 0, 1, 1], [], []>} : vector<16x128xbf16>, vector<128x128xbf16>, vector<16x128xf32> -> vector<16x128xf32>
    %804 = arith.truncf %800 : vector<16x128xf32> to vector<16x128xbf16>
    %c29_732 = arith.constant 29 : index
    %c1_733 = arith.constant 1 : index
    %c0_734 = arith.constant 0 : index
    %c0_735 = arith.constant 0 : index
    %805 = vector.load %arg7[%c29_732, %c1_733, %c0_734, %c0_735] : memref<32x2x128x128xbf16, #tpu.memory_space<vmem>>, vector<1x1x128x128xbf16>
    %806 = vector.shape_cast %805 : vector<1x1x128x128xbf16> to vector<128x128xbf16>
    %cst_736 = arith.constant dense<0.000000e+00> : vector<16x128xf32>
    %807 = tpu.matmul %804, %806, %cst_736 {dimension_numbers = #tpu.dot_dimension_numbers<[1], [0], [0], [1], [0, 0, 1, 1], [], []>} : vector<16x128xbf16>, vector<128x128xbf16>, vector<16x128xf32> -> vector<16x128xf32>
    %808 = arith.addf %803, %807 : vector<16x128xf32>
    %c29_737 = arith.constant 29 : index
    %c0_738 = arith.constant 0 : index
    %c0_739 = arith.constant 0 : index
    %809 = vector.load %arg3[%c29_737, %c0_738, %c0_739] : memref<32x1x128xf32, #tpu.memory_space<vmem>>, vector<1x1x128xf32>
    %810 = vector.shape_cast %809 : vector<1x1x128xf32> to vector<1x128xf32>
    %811 = vector.broadcast %810 : vector<1x128xf32> to vector<16x128xf32>
    %812 = arith.addf %808, %811 : vector<16x128xf32>
    %cst_740 = arith.constant 0.000000e+00 : f32
    %813 = vector.broadcast %cst_740 : f32 to vector<16x128xf32>
    %814 = arith.maximumf %812, %813 : vector<16x128xf32>
    %815 = arith.addf %798, %814 : vector<16x128xf32>
    %816 = arith.truncf %815 : vector<16x128xf32> to vector<16x128xbf16>
    %c25_741 = arith.constant 25 : index
    %c0_742 = arith.constant 0 : index
    %c0_743 = arith.constant 0 : index
    %817 = vector.load %arg8[%c25_741, %c0_742, %c0_743] : memref<31x128x128xbf16, #tpu.memory_space<vmem>>, vector<1x128x128xbf16>
    %818 = vector.shape_cast %817 : vector<1x128x128xbf16> to vector<128x128xbf16>
    %cst_744 = arith.constant dense<0.000000e+00> : vector<16x128xf32>
    %819 = tpu.matmul %816, %818, %cst_744 {dimension_numbers = #tpu.dot_dimension_numbers<[1], [0], [0], [1], [0, 0, 1, 1], [], []>} : vector<16x128xbf16>, vector<128x128xbf16>, vector<16x128xf32> -> vector<16x128xf32>
    %c25_745 = arith.constant 25 : index
    %c0_746 = arith.constant 0 : index
    %c0_747 = arith.constant 0 : index
    %820 = vector.load %arg5[%c25_745, %c0_746, %c0_747] : memref<31x1x128xf32, #tpu.memory_space<vmem>>, vector<1x1x128xf32>
    %821 = vector.shape_cast %820 : vector<1x1x128xf32> to vector<1x128xf32>
    %822 = vector.broadcast %821 : vector<1x128xf32> to vector<16x128xf32>
    %823 = arith.addf %819, %822 : vector<16x128xf32>
    %cst_748 = arith.constant 0.000000e+00 : f32
    %824 = vector.broadcast %cst_748 : f32 to vector<16x128xf32>
    %825 = arith.maximumf %823, %824 : vector<16x128xf32>
    %826 = arith.truncf %825 : vector<16x128xf32> to vector<16x128xbf16>
    %cst_749 = arith.constant dense<0.000000e+00> : vector<16x128xf32>
    %827 = tpu.matmul %32, %826, %cst_749 {dimension_numbers = #tpu.dot_dimension_numbers<[1], [0], [0], [1], [0, 0, 1, 1], [], []>} : vector<16x16xbf16>, vector<16x128xbf16>, vector<16x128xf32> -> vector<16x128xf32>
    %c30 = arith.constant 30 : index
    %c0_750 = arith.constant 0 : index
    %c0_751 = arith.constant 0 : index
    %c0_752 = arith.constant 0 : index
    %828 = vector.load %arg7[%c30, %c0_750, %c0_751, %c0_752] : memref<32x2x128x128xbf16, #tpu.memory_space<vmem>>, vector<1x1x128x128xbf16>
    %829 = vector.shape_cast %828 : vector<1x1x128x128xbf16> to vector<128x128xbf16>
    %cst_753 = arith.constant dense<0.000000e+00> : vector<16x128xf32>
    %830 = tpu.matmul %826, %829, %cst_753 {dimension_numbers = #tpu.dot_dimension_numbers<[1], [0], [0], [1], [0, 0, 1, 1], [], []>} : vector<16x128xbf16>, vector<128x128xbf16>, vector<16x128xf32> -> vector<16x128xf32>
    %831 = arith.truncf %827 : vector<16x128xf32> to vector<16x128xbf16>
    %c30_754 = arith.constant 30 : index
    %c1_755 = arith.constant 1 : index
    %c0_756 = arith.constant 0 : index
    %c0_757 = arith.constant 0 : index
    %832 = vector.load %arg7[%c30_754, %c1_755, %c0_756, %c0_757] : memref<32x2x128x128xbf16, #tpu.memory_space<vmem>>, vector<1x1x128x128xbf16>
    %833 = vector.shape_cast %832 : vector<1x1x128x128xbf16> to vector<128x128xbf16>
    %cst_758 = arith.constant dense<0.000000e+00> : vector<16x128xf32>
    %834 = tpu.matmul %831, %833, %cst_758 {dimension_numbers = #tpu.dot_dimension_numbers<[1], [0], [0], [1], [0, 0, 1, 1], [], []>} : vector<16x128xbf16>, vector<128x128xbf16>, vector<16x128xf32> -> vector<16x128xf32>
    %835 = arith.addf %830, %834 : vector<16x128xf32>
    %c30_759 = arith.constant 30 : index
    %c0_760 = arith.constant 0 : index
    %c0_761 = arith.constant 0 : index
    %836 = vector.load %arg3[%c30_759, %c0_760, %c0_761] : memref<32x1x128xf32, #tpu.memory_space<vmem>>, vector<1x1x128xf32>
    %837 = vector.shape_cast %836 : vector<1x1x128xf32> to vector<1x128xf32>
    %838 = vector.broadcast %837 : vector<1x128xf32> to vector<16x128xf32>
    %839 = arith.addf %835, %838 : vector<16x128xf32>
    %cst_762 = arith.constant 0.000000e+00 : f32
    %840 = vector.broadcast %cst_762 : f32 to vector<16x128xf32>
    %841 = arith.maximumf %839, %840 : vector<16x128xf32>
    %842 = arith.truncf %841 : vector<16x128xf32> to vector<16x128xbf16>
    %cst_763 = arith.constant dense<0.000000e+00> : vector<16x128xf32>
    %843 = tpu.matmul %32, %842, %cst_763 {dimension_numbers = #tpu.dot_dimension_numbers<[1], [0], [0], [1], [0, 0, 1, 1], [], []>} : vector<16x16xbf16>, vector<16x128xbf16>, vector<16x128xf32> -> vector<16x128xf32>
    %c31 = arith.constant 31 : index
    %c0_764 = arith.constant 0 : index
    %c0_765 = arith.constant 0 : index
    %c0_766 = arith.constant 0 : index
    %844 = vector.load %arg7[%c31, %c0_764, %c0_765, %c0_766] : memref<32x2x128x128xbf16, #tpu.memory_space<vmem>>, vector<1x1x128x128xbf16>
    %845 = vector.shape_cast %844 : vector<1x1x128x128xbf16> to vector<128x128xbf16>
    %cst_767 = arith.constant dense<0.000000e+00> : vector<16x128xf32>
    %846 = tpu.matmul %842, %845, %cst_767 {dimension_numbers = #tpu.dot_dimension_numbers<[1], [0], [0], [1], [0, 0, 1, 1], [], []>} : vector<16x128xbf16>, vector<128x128xbf16>, vector<16x128xf32> -> vector<16x128xf32>
    %847 = arith.truncf %843 : vector<16x128xf32> to vector<16x128xbf16>
    %c31_768 = arith.constant 31 : index
    %c1_769 = arith.constant 1 : index
    %c0_770 = arith.constant 0 : index
    %c0_771 = arith.constant 0 : index
    %848 = vector.load %arg7[%c31_768, %c1_769, %c0_770, %c0_771] : memref<32x2x128x128xbf16, #tpu.memory_space<vmem>>, vector<1x1x128x128xbf16>
    %849 = vector.shape_cast %848 : vector<1x1x128x128xbf16> to vector<128x128xbf16>
    %cst_772 = arith.constant dense<0.000000e+00> : vector<16x128xf32>
    %850 = tpu.matmul %847, %849, %cst_772 {dimension_numbers = #tpu.dot_dimension_numbers<[1], [0], [0], [1], [0, 0, 1, 1], [], []>} : vector<16x128xbf16>, vector<128x128xbf16>, vector<16x128xf32> -> vector<16x128xf32>
    %851 = arith.addf %846, %850 : vector<16x128xf32>
    %c31_773 = arith.constant 31 : index
    %c0_774 = arith.constant 0 : index
    %c0_775 = arith.constant 0 : index
    %852 = vector.load %arg3[%c31_773, %c0_774, %c0_775] : memref<32x1x128xf32, #tpu.memory_space<vmem>>, vector<1x1x128xf32>
    %853 = vector.shape_cast %852 : vector<1x1x128xf32> to vector<1x128xf32>
    %854 = vector.broadcast %853 : vector<1x128xf32> to vector<16x128xf32>
    %855 = arith.addf %851, %854 : vector<16x128xf32>
    %cst_776 = arith.constant 0.000000e+00 : f32
    %856 = vector.broadcast %cst_776 : f32 to vector<16x128xf32>
    %857 = arith.maximumf %855, %856 : vector<16x128xf32>
    %858 = arith.addf %841, %857 : vector<16x128xf32>
    %859 = arith.truncf %858 : vector<16x128xf32> to vector<16x128xbf16>
    %c26_777 = arith.constant 26 : index
    %c0_778 = arith.constant 0 : index
    %c0_779 = arith.constant 0 : index
    %860 = vector.load %arg8[%c26_777, %c0_778, %c0_779] : memref<31x128x128xbf16, #tpu.memory_space<vmem>>, vector<1x128x128xbf16>
    %861 = vector.shape_cast %860 : vector<1x128x128xbf16> to vector<128x128xbf16>
    %cst_780 = arith.constant dense<0.000000e+00> : vector<16x128xf32>
    %862 = tpu.matmul %859, %861, %cst_780 {dimension_numbers = #tpu.dot_dimension_numbers<[1], [0], [0], [1], [0, 0, 1, 1], [], []>} : vector<16x128xbf16>, vector<128x128xbf16>, vector<16x128xf32> -> vector<16x128xf32>
    %c26_781 = arith.constant 26 : index
    %c0_782 = arith.constant 0 : index
    %c0_783 = arith.constant 0 : index
    %863 = vector.load %arg5[%c26_781, %c0_782, %c0_783] : memref<31x1x128xf32, #tpu.memory_space<vmem>>, vector<1x1x128xf32>
    %864 = vector.shape_cast %863 : vector<1x1x128xf32> to vector<1x128xf32>
    %865 = vector.broadcast %864 : vector<1x128xf32> to vector<16x128xf32>
    %866 = arith.addf %862, %865 : vector<16x128xf32>
    %cst_784 = arith.constant 0.000000e+00 : f32
    %867 = vector.broadcast %cst_784 : f32 to vector<16x128xf32>
    %868 = arith.maximumf %866, %867 : vector<16x128xf32>
    %869 = arith.addf %825, %868 : vector<16x128xf32>
    %870 = arith.truncf %869 : vector<16x128xf32> to vector<16x128xbf16>
    %c27_785 = arith.constant 27 : index
    %c0_786 = arith.constant 0 : index
    %c0_787 = arith.constant 0 : index
    %871 = vector.load %arg8[%c27_785, %c0_786, %c0_787] : memref<31x128x128xbf16, #tpu.memory_space<vmem>>, vector<1x128x128xbf16>
    %872 = vector.shape_cast %871 : vector<1x128x128xbf16> to vector<128x128xbf16>
    %cst_788 = arith.constant dense<0.000000e+00> : vector<16x128xf32>
    %873 = tpu.matmul %870, %872, %cst_788 {dimension_numbers = #tpu.dot_dimension_numbers<[1], [0], [0], [1], [0, 0, 1, 1], [], []>} : vector<16x128xbf16>, vector<128x128xbf16>, vector<16x128xf32> -> vector<16x128xf32>
    %c27_789 = arith.constant 27 : index
    %c0_790 = arith.constant 0 : index
    %c0_791 = arith.constant 0 : index
    %874 = vector.load %arg5[%c27_789, %c0_790, %c0_791] : memref<31x1x128xf32, #tpu.memory_space<vmem>>, vector<1x1x128xf32>
    %875 = vector.shape_cast %874 : vector<1x1x128xf32> to vector<1x128xf32>
    %876 = vector.broadcast %875 : vector<1x128xf32> to vector<16x128xf32>
    %877 = arith.addf %873, %876 : vector<16x128xf32>
    %878 = arith.addf %782, %877 : vector<16x128xf32>
    %879 = arith.truncf %878 : vector<16x128xf32> to vector<16x128xbf16>
    %c28_792 = arith.constant 28 : index
    %c0_793 = arith.constant 0 : index
    %c0_794 = arith.constant 0 : index
    %880 = vector.load %arg8[%c28_792, %c0_793, %c0_794] : memref<31x128x128xbf16, #tpu.memory_space<vmem>>, vector<1x128x128xbf16>
    %881 = vector.shape_cast %880 : vector<1x128x128xbf16> to vector<128x128xbf16>
    %cst_795 = arith.constant dense<0.000000e+00> : vector<16x128xf32>
    %882 = tpu.matmul %879, %881, %cst_795 {dimension_numbers = #tpu.dot_dimension_numbers<[1], [0], [0], [1], [0, 0, 1, 1], [], []>} : vector<16x128xbf16>, vector<128x128xbf16>, vector<16x128xf32> -> vector<16x128xf32>
    %c28_796 = arith.constant 28 : index
    %c0_797 = arith.constant 0 : index
    %c0_798 = arith.constant 0 : index
    %883 = vector.load %arg5[%c28_796, %c0_797, %c0_798] : memref<31x1x128xf32, #tpu.memory_space<vmem>>, vector<1x1x128xf32>
    %884 = vector.shape_cast %883 : vector<1x1x128xf32> to vector<1x128xf32>
    %885 = vector.broadcast %884 : vector<1x128xf32> to vector<16x128xf32>
    %886 = arith.addf %882, %885 : vector<16x128xf32>
    %cst_799 = arith.constant 0.000000e+00 : f32
    %887 = vector.broadcast %cst_799 : f32 to vector<16x128xf32>
    %888 = arith.maximumf %886, %887 : vector<16x128xf32>
    %889 = arith.addf %677, %888 : vector<16x128xf32>
    %890 = arith.truncf %889 : vector<16x128xf32> to vector<16x128xbf16>
    %c29_800 = arith.constant 29 : index
    %c0_801 = arith.constant 0 : index
    %c0_802 = arith.constant 0 : index
    %891 = vector.load %arg8[%c29_800, %c0_801, %c0_802] : memref<31x128x128xbf16, #tpu.memory_space<vmem>>, vector<1x128x128xbf16>
    %892 = vector.shape_cast %891 : vector<1x128x128xbf16> to vector<128x128xbf16>
    %cst_803 = arith.constant dense<0.000000e+00> : vector<16x128xf32>
    %893 = tpu.matmul %890, %892, %cst_803 {dimension_numbers = #tpu.dot_dimension_numbers<[1], [0], [0], [1], [0, 0, 1, 1], [], []>} : vector<16x128xbf16>, vector<128x128xbf16>, vector<16x128xf32> -> vector<16x128xf32>
    %c29_804 = arith.constant 29 : index
    %c0_805 = arith.constant 0 : index
    %c0_806 = arith.constant 0 : index
    %894 = vector.load %arg5[%c29_804, %c0_805, %c0_806] : memref<31x1x128xf32, #tpu.memory_space<vmem>>, vector<1x1x128xf32>
    %895 = vector.shape_cast %894 : vector<1x1x128xf32> to vector<1x128xf32>
    %896 = vector.broadcast %895 : vector<1x128xf32> to vector<16x128xf32>
    %897 = arith.addf %893, %896 : vector<16x128xf32>
    %cst_807 = arith.constant 0.000000e+00 : f32
    %898 = vector.broadcast %cst_807 : f32 to vector<16x128xf32>
    %899 = arith.maximumf %897, %898 : vector<16x128xf32>
    %900 = arith.addf %466, %899 : vector<16x128xf32>
    %901 = arith.truncf %900 : vector<16x128xf32> to vector<16x128xbf16>
    %c30_808 = arith.constant 30 : index
    %c0_809 = arith.constant 0 : index
    %c0_810 = arith.constant 0 : index
    %902 = vector.load %arg8[%c30_808, %c0_809, %c0_810] : memref<31x128x128xbf16, #tpu.memory_space<vmem>>, vector<1x128x128xbf16>
    %903 = vector.shape_cast %902 : vector<1x128x128xbf16> to vector<128x128xbf16>
    %cst_811 = arith.constant dense<0.000000e+00> : vector<16x128xf32>
    %904 = tpu.matmul %901, %903, %cst_811 {dimension_numbers = #tpu.dot_dimension_numbers<[1], [0], [0], [1], [0, 0, 1, 1], [], []>} : vector<16x128xbf16>, vector<128x128xbf16>, vector<16x128xf32> -> vector<16x128xf32>
    %c30_812 = arith.constant 30 : index
    %c0_813 = arith.constant 0 : index
    %c0_814 = arith.constant 0 : index
    %905 = vector.load %arg5[%c30_812, %c0_813, %c0_814] : memref<31x1x128xf32, #tpu.memory_space<vmem>>, vector<1x1x128xf32>
    %906 = vector.shape_cast %905 : vector<1x1x128xf32> to vector<1x128xf32>
    %907 = vector.broadcast %906 : vector<1x128xf32> to vector<16x128xf32>
    %908 = arith.addf %904, %907 : vector<16x128xf32>
    %c0_815 = arith.constant 0 : index
    %c0_816 = arith.constant 0 : index
    %909 = vector.load %arg6[%c0_815, %c0_816] : memref<16x128xf32, #tpu.memory_space<vmem>>, vector<16x128xf32>
    tpu.vector_store %arg6[%c0_815, %c0_816], %908 {strides = array<i32>} : memref<16x128xf32, #tpu.memory_space<vmem>>, vector<16x128xf32>,
    return
  }
}

</mosaic_0001>

<bundles_post_ra>
// kernel: hla32_forward.1
= control target key start
LH: loop header
LB: loop body
LE: loop exit
PB: predicated region body
PF: predicated region fallthrough
CT: control target
= control target key end

     0   :  { %11 = vsyncpa [#allocation7], 0  ;;  %s19001_s0 = inlined_call_operand.vmem [shape: bf16[16,16], index: 0, kind: input, shape index: {}]   ;;  %s19002_s1 = inlined_call_operand.vmem [shape: f32[16,128], index: 1, kind: input, shape index: {}]   ;;  %s19003_s2 = inlined_call_operand.hbm [shape: bf16[32,2,128,128], index: 2, kind: input, shape index: {}]   ;;  %s19004_s3 = inlined_call_operand.hbm [shape: f32[32,1,128], index: 3, kind: input, shape index: {}]   ;;  %s19005_s4 = inlined_call_operand.hbm [shape: bf16[31,128,128], index: 4, kind: input, shape index: {}]   ;;  %s19006_s5 = inlined_call_operand.hbm [shape: f32[31,1,128], index: 5, kind: input, shape index: {}]   ;;  %s19007_s6 = inlined_call_operand.vmem [shape: f32[16,128], index: 6, kind: output, shape index: {}]  }
   0x1   :  { %12 = vsyncpa [#allocation9], 0  ;;  %s17354_s21 = smov [#allocation6]  }
   0x2   :  { %s22_s22 = sshll.u32 %s17354_s21, 4  ;;  %s23_s22 = int_to_ptr.vmem [resolvable:$true] %s22_s22 }
   0x3   :  { %s17124_s23 = scalar_lea.vmem %s23_s22, 512  ;;  %p17129_p1 = scmp.lt.s32.totalorder %s23_s22, %s23_s22 }
   0x4   :  { %p17125_p0 = scmp.ne.s32.totalorder %s23_s22, %s17124_s23  ;;  %p17130_p2 = scmp.lt.s32.totalorder %s17124_s23, %s17124_s23 }
   0x6   :  { %p17131_p3 = por %p17130_p2, %p17129_p1 }
   0x8   :  { %p17132_p4 = pnand %p17131_p3, %p17125_p0 }
   0xa   :  { %17135 = shalt.err (!%p17132_p4)
}
   0xb   :  { %s17355_s24 = smov 16   ;;  %s17356_s25 = smov 1  }
   0xc   :  { %28 = dma.hbm_to_vmem [thread:$0]  %s19004_s3, 512, %s23_s22, [#allocation7], %s17355_s24, %s17355_s24, %s17356_s25  }
   0xd   :  { %s17357_s28 = smov [#allocation8]  }
   0xe   :  { %s34_s29 = sshll.u32 %s17357_s28, 4  ;;  %s35_s29 = int_to_ptr.vmem [resolvable:$true] %s34_s29 }
   0xf   :  { %s17144_s30 = scalar_lea.vmem %s35_s29, 496  ;;  %s17148_s7 = scalar_lea.vmem %s35_s29, 512 }
  0x10   :  { %p17145_p5 = scmp.ne.s32.totalorder %s35_s29, %s17144_s30  ;;  %p17149_p6 = scmp.lt.s32.totalorder %s35_s29, %s35_s29 }
  0x11   :  { %p17150_p7 = scmp.lt.s32.totalorder %s17148_s7, %s17144_s30 }
  0x13   :  { %p17151_p8 = por %p17150_p7, %p17149_p6 }
  0x15   :  { %p17152_p9 = pnand %p17151_p8, %p17145_p5 }
  0x17   :  { %17155 = shalt.err (!%p17152_p9)
}
  0x18   :  { %40 = dma.hbm_to_vmem [thread:$0]  %s19006_s5, 496, %s35_s29, [#allocation9], %s17355_s24, %s17355_s24, %s17356_s25  }
  0x19   :  { %17334 = dma.done.wait [#allocation7], 512  }
  0x1a   :  { %17335 = vsyncadd [#allocation7], 4294966784 }
  0x1b   :  { %17336 = dma.done.wait [#allocation9], 496  }
  0x1c   :  { %17337 = vsyncadd [#allocation9], 4294966800  ;;  %s17358_s3 = smov [#allocation2]   ;;  %s17359_s11 = smov [#allocation3]  }
  0x1d   :  { %s55_s10 = sshll.u32 %s17358_s3, 4  ;;  %s108_s12 = sshll.u32 %s17359_s11, 4  ;;  %s17409_s10 = int_to_ptr.vmem [resolvable:$true] %s55_s10  ;;  %s17411_s12 = int_to_ptr.vmem [resolvable:$true] %s108_s12 }
  0x1e   :  { %s17164_s13 = scalar_lea.vmem %s17409_s10, 16384  ;;  %s17416_s14 = scalar_lea.vmem %s17409_s10, 65536 }
  0x1f   :  { %p17165_p10 = scmp.ne.s32.totalorder %s17409_s10, %s17164_s13  ;;  %p17169_p11 = scmp.lt.s32.totalorder %s17409_s10, %s17409_s10 }
  0x20   :  { %p17170_p12 = scmp.lt.s32.totalorder %s17416_s14, %s17164_s13 }
  0x22   :  { %p17171_p13 = por %p17170_p12, %p17169_p11 }
  0x24   :  { %p17172_p0 = pnand %p17171_p13, %p17165_p10 }
  0x26   :  { %17175 = shalt.err (!%p17172_p0)  }
  0x27   :  { %58 = dma.hbm_to_vmem [thread:$0]  %s19003_s2, 16384, %s17409_s10, [#allocation4] }
  0x28   :  { %s17184_s16 = scalar_lea.vmem %s17411_s12, 8192  ;;  %s17428_s17 = scalar_lea.vmem %s17411_s12, 31744 }
  0x29   :  { %p17185_p1 = scmp.ne.s32.totalorder %s17411_s12, %s17184_s16  ;;  %p17189_p2 = scmp.lt.s32.totalorder %s17411_s12, %s17411_s12 }
  0x2a   :  { %p17190_p3 = scmp.lt.s32.totalorder %s17428_s17, %s17184_s16 }
  0x2c   :  { %p17191_p4 = por %p17190_p3, %p17189_p2 }
  0x2e   :  { %p17192_p5 = pnand %p17191_p4, %p17185_p1 }
  0x30   :  { %17195 = shalt.err (!%p17192_p5)  }
  0x31   :  { %111 = dma.hbm_to_vmem [thread:$0]  %s19005_s4, 8192, %s17411_s12, [#allocation5]  ;;  %v17446_v0 = vld [vmem:[%s19001_s0] sm:$0xf]  ;;  %v17451_v1 = vld [vmem:[%s19001_s0 + $0x4] sm:$0xf] }
  0x32   :  { %s59_s22 = scalar_lea.hbm %s19003_s2, 16384  ;;  %s17360_s23 = smov [#allocation2 + $0x400]   ;;  %v17456_v2 = vld [vmem:[%s19002_s1] sm:$0xff]  ;;  %v17461_v3 = vld [vmem:[%s19002_s1 + $0x8] sm:$0xff] }
  0x33   :  { %s69_s24 = sshll.u32 %s17360_s23, 4  ;;  %s112_s27 = scalar_lea.hbm %s19005_s4, 8192  ;;  %s70_s24 = int_to_ptr.vmem [resolvable:$true] %s69_s24 }
  0x34   :  { %s17206_s13 = scalar_lea.vmem %s70_s24, 16384  ;;  %p17211_p7 = scmp.lt.s32.totalorder %s70_s24, %s17409_s10 }
  0x35   :  { %p17207_p6 = scmp.ne.s32.totalorder %s70_s24, %s17206_s13  ;;  %p17212_p8 = scmp.lt.s32.totalorder %s17416_s14, %s17206_s13 }
  0x37   :  { %p17213_p9 = por %p17212_p8, %p17211_p7 }
  0x39   :  { %p17214_p10 = pnand %p17213_p9, %p17207_p6 }
  0x3b   :  { %17217 = shalt.err (!%p17214_p10)  }
  0x3c   :  { %72 = dma.hbm_to_vmem [thread:$0]  %s59_s22, 16384, %s70_s24, [#allocation4 + $0x1] }
  0x3d   :  { %s17361_s0 = smov [#allocation3 + $0x200]   ;;  %s73_s18 = scalar_lea.hbm %s19003_s2, 32768 }
  0x3e   :  { %s122_s5 = sshll.u32 %s17361_s0, 4  ;;  %s123_s5 = int_to_ptr.vmem [resolvable:$true] %s122_s5 }
  0x3f   :  { %s17229_s19 = scalar_lea.vmem %s123_s5, 8192  ;;  %p17234_p12 = scmp.lt.s32.totalorder %s123_s5, %s17411_s12 }
  0x40   :  { %p17230_p11 = scmp.ne.s32.totalorder %s123_s5, %s17229_s19  ;;  %p17235_p13 = scmp.lt.s32.totalorder %s17428_s17, %s17229_s19 }
  0x42   :  { %p17236_p0 = por %p17235_p13, %p17234_p12 }
  0x44   :  { %p17237_p1 = pnand %p17236_p0, %p17230_p11 }
  0x46   :  { %17240 = shalt.err (!%p17237_p1)  }
  0x47   :  { %125 = dma.hbm_to_vmem [thread:$0]  %s112_s27, 8192, %s123_s5, [#allocation5 + $0x1] }
  0x48   :  { %s17362_s1 = smov [#allocation2 + $0x800]   ;;  %s126_s23 = scalar_lea.hbm %s19005_s4, 16384 }
  0x49   :  { %s83_s20 = sshll.u32 %s17362_s1, 4  ;;  %s84_s20 = int_to_ptr.vmem [resolvable:$true] %s83_s20 }
  0x4a   :  { %s17252_s24 = scalar_lea.vmem %s84_s20, 16384  ;;  %p17257_p3 = scmp.lt.s32.totalorder %s84_s20, %s17409_s10 }
  0x4b   :  { %p17253_p2 = scmp.ne.s32.totalorder %s84_s20, %s17252_s24  ;;  %p17258_p4 = scmp.lt.s32.totalorder %s17416_s14, %s17252_s24 }
  0x4d   :  { %p17259_p5 = por %p17258_p4, %p17257_p3 }
  0x4f   :  { %p17260_p6 = pnand %p17259_p5, %p17253_p2 }
  0x51   :  { %17263 = shalt.err (!%p17260_p6)  }
  0x52   :  { %86 = dma.hbm_to_vmem [thread:$0]  %s73_s18, 16384, %s84_s20, [#allocation4 + $0x2] }
  0x53   :  { %s17363_s25 = smov [#allocation3 + $0x400]   ;;  %s87_s29 = scalar_lea.hbm %s19003_s2, 49152 }
  0x54   :  { %s136_s26 = sshll.u32 %s17363_s25, 4  ;;  %s137_s26 = int_to_ptr.vmem [resolvable:$true] %s136_s26 }
  0x55   :  { %s17275_s30 = scalar_lea.vmem %s137_s26, 8192  ;;  %p17280_p8 = scmp.lt.s32.totalorder %s137_s26, %s17411_s12 }
  0x56   :  { %p17276_p7 = scmp.ne.s32.totalorder %s137_s26, %s17275_s30  ;;  %p17281_p9 = scmp.lt.s32.totalorder %s17428_s17, %s17275_s30 }
  0x58   :  { %p17282_p10 = por %p17281_p9, %p17280_p8 }
  0x5a   :  { %p17283_p11 = pnand %p17282_p10, %p17276_p7 }
  0x5c   :  { %17286 = shalt.err (!%p17283_p11)  }
  0x5d   :  { %139 = dma.hbm_to_vmem [thread:$0]  %s126_s23, 8192, %s137_s26, [#allocation5 + $0x2] }
  0x5e   :  { %s17364_s7 = smov [#allocation2 + $0xc00]   ;;  %s140_s11 = scalar_lea.hbm %s19005_s4, 24576 }
  0x5f   :  { %s97_s8 = sshll.u32 %s17364_s7, 4  ;;  %s98_s8 = int_to_ptr.vmem [resolvable:$true] %s97_s8 }
  0x60   :  { %s17298_s13 = scalar_lea.vmem %s98_s8, 16384  ;;  %p17303_p13 = scmp.lt.s32.totalorder %s98_s8, %s17409_s10 }
  0x61   :  { %p17299_p12 = scmp.ne.s32.totalorder %s98_s8, %s17298_s13  ;;  %p17304_p0 = scmp.lt.s32.totalorder %s17416_s14, %s17298_s13 }
  0x63   :  { %p17305_p1 = por %p17304_p0, %p17303_p13 }
  0x65   :  { %p17306_p2 = pnand %p17305_p1, %p17299_p12 }
  0x67   :  { %17309 = shalt.err (!%p17306_p2)  }
  0x68   :  { %100 = dma.hbm_to_vmem [thread:$0]  %s87_s29, 16384, %s98_s8, [#allocation4 + $0x3] }
  0x69   :  { %s17365_s2 = smov [#allocation3 + $0x600]  }
  0x6a   :  { %s150_s0 = sshll.u32 %s17365_s2, 4  ;;  %s151_s0 = int_to_ptr.vmem [resolvable:$true] %s150_s0 }
  0x6b   :  { %s17321_s5 = scalar_lea.vmem %s151_s0, 7168  ;;  %p17326_p4 = scmp.lt.s32.totalorder %s151_s0, %s17411_s12 }
  0x6c   :  { %p17322_p3 = scmp.ne.s32.totalorder %s151_s0, %s17321_s5  ;;  %p17327_p5 = scmp.lt.s32.totalorder %s17428_s17, %s17321_s5 }
  0x6e   :  { %p17328_p6 = por %p17327_p5, %p17326_p4 }
  0x70   :  { %p17329_p7 = pnand %p17328_p6, %p17322_p3 }
  0x72   :  { %17332 = shalt.err (!%p17329_p7)  }
  0x73   :  { %153 = dma.hbm_to_vmem [thread:$0]  %s140_s11, 7168, %s151_s0, [#allocation5 + $0x3]  ;;  %v164_v4 = vpack.c.bf16 %v17461_v3, %v17456_v2 }
  0x74   :  { %17338 = dma.done.wait [#allocation4], 16384 }
  0x75   :  { %17339 = vsyncadd [#allocation4], 4294950912  ;;  %v17366_v5 = vmov 0.0   ;;  %vm17367_vm0 = vmmov 0   ;;  %v17494_v6 = vcombine.low %v17446_v0, %v17451_v1  ;;  %vm170_vm1 = vcmask 130048   ;;  %v16356_v7 = vld [vmem:[#allocation2 + $0x38] sm:$0xff]  }
  0x76   :  { %14250 = vmatprep.subr.bf16.mxu0 %v17366_v5  ;;  %14252 = vmatprep.mubr.msk.bf16.mxu0 %vm17367_vm0, %v17366_v5  ;;  %v16357_v8 = vld [vmem:[#allocation2 + $0x30] sm:$0xff]   ;;  %v16358_v9 = vld [vmem:[#allocation2 + $0x78] sm:$0xff]   ;;  %v16359_v11 = vld [vmem:[#allocation2 + $0x28] sm:$0xff]  }
  0x77   :  { %14251 = vmatpush3.bf16.msra.mxu0 %v164_v4  ;;  %14256 = vmatprep.subr.bf16.mxu1 %v17366_v5  ;;  %v16360_v10 = vld [vmem:[#allocation2 + $0x70] sm:$0xff]   ;;  %v16362_v12 = vld [vmem:[#allocation2 + $0x68] sm:$0xff]   ;;  %v16361_v13 = vld [vmem:[#allocation2 + $0x20] sm:$0xff]  }
  0x78   :  { %14276 = vmatprep.subr.bf16.mxu0 %v17366_v5  ;;  %14272 = vmatprep.mubr.msk.bf16.mxu1 %vm17367_vm0, %v17366_v5  ;;  %v16364_v14 = vld [vmem:[#allocation2 + $0x60] sm:$0xff]   ;;  %v16363_v15 = vld [vmem:[#allocation2 + $0x18] sm:$0xff]   ;;  %v16365_v17 = vld [vmem:[#allocation2 + $0x10] sm:$0xff]  }
  0x79   :  { %14257 = vmatpush3.bf16.msra.mxu1 %v16358_v9  ;;  %v16366_v16 = vld [vmem:[#allocation2 + $0x58] sm:$0xff]   ;;  %v16368_v18 = vld [vmem:[#allocation2 + $0x50] sm:$0xff]   ;;  %v16367_v19 = vld [vmem:[#allocation2 + $0x8] sm:$0xff]  }
  0x7a   :  { %14253 = vmatmul.mubr.msk.bf16.vlgmr.msra.gmra.mxu0 %vm170_vm1, %v17494_v6  ;;  %14258 = vmatprep.subr.bf16.mxu1 %v17366_v5  ;;  %v16369_v20 = vld [vmem:[#allocation2] sm:$0xff]   ;;  %v16370_v21 = vld [vmem:[#allocation2 + $0x48] sm:$0xff]   ;;  %v16372_v26 = vld [vmem:[#allocation2 + $0xb8] sm:$0xff]  }
  0x7b   :  { %14292 = vmatprep.mubr.msk.bf16.mxu0 %vm17367_vm0, %v17366_v5  ;;  %14277 = vmatpush3.bf16.msra.mxu0 %v16356_v7  ;;  %v16371_v22 = vld [vmem:[#allocation2 + $0x40] sm:$0xff]   ;;  %v16373_v29 = vld [vmem:[#allocation2 + $0xb0] sm:$0xff]   ;;  %v16374_v30 = vld [vmem:[#allocation2 + $0xa8] sm:$0xff]  }
  0x7c   :  { %14278 = vmatprep.subr.bf16.mxu0 %v17366_v5  ;;  %v16375_v31 = vld [vmem:[#allocation2 + $0xa0] sm:$0xff]   ;;  %v16376_v32 = vld [vmem:[#allocation2 + $0x98] sm:$0xff]   ;;  %v16377_v37 = vld [vmem:[#allocation2 + $0x90] sm:$0xff]  }
  0x7d   :  { %14259 = vmatpush3.bf16.msra.mxu1 %v16360_v10  ;;  %v16378_v38 = vld [vmem:[#allocation2 + $0x88] sm:$0xff]   ;;  %v16379_v39 = vld [vmem:[#allocation2 + $0x80] sm:$0xff]   ;;  %v16380_v52 = vld [vmem:[#allocation2 + $0xf8] sm:$0xff]  }
  0x7e   :  { %14260 = vmatprep.subr.bf16.mxu1 %v17366_v5  ;;  %v12485_v42 = vld [vmem:[#allocation6] ss:$0 sm:$0xff]  ;;  %v16381_v53 = vld [vmem:[#allocation2 + $0xf0] sm:$0xff]   ;;  %v16382_v54 = vld [vmem:[#allocation2 + $0xe8] sm:$0xff]  }
  0x7f   :  { %14279 = vmatpush3.bf16.msra.mxu0 %v16357_v8  ;;  %v16383_v55 = vld [vmem:[#allocation2 + $0xe0] sm:$0xff]   ;;  %v16384_v56 = vld [vmem:[#allocation2 + $0xd8] sm:$0xff]   ;;  %v16385_v57 = vld [vmem:[#allocation2 + $0xd0] sm:$0xff]  }
  0x80   :  { %14280 = vmatprep.subr.bf16.mxu0 %v17366_v5  ;;  %v16386_v58 = vld [vmem:[#allocation2 + $0xc8] sm:$0xff]   ;;  %v16387_v59 = vld [vmem:[#allocation2 + $0xc0] sm:$0xff]  }
  0x81   :  { %14261 = vmatpush3.bf16.msra.mxu1 %v16362_v12  ;;  %v12503_v8 = vld [vmem:[#allocation6 + $0x1] ss:$0 sm:$0xff] }
  0x82   :  { %14262 = vmatprep.subr.bf16.mxu1 %v17366_v5 }
  0x83   :  { %14281 = vmatpush3.bf16.msra.mxu0 %v16359_v11 }
  0x84   :  { %14282 = vmatprep.subr.bf16.mxu0 %v17366_v5 }
  0x85   :  { %14263 = vmatpush3.bf16.msra.mxu1 %v16364_v14 }
  0x86   :  { %14264 = vmatprep.subr.bf16.mxu1 %v17366_v5 }
  0x87   :  { %14283 = vmatpush3.bf16.msra.mxu0 %v16361_v13 }
  0x88   :  { %14284 = vmatprep.subr.bf16.mxu0 %v17366_v5 }
  0x89   :  { %14265 = vmatpush3.bf16.msra.mxu1 %v16366_v16 }
  0x8a   :  { %14266 = vmatprep.subr.bf16.mxu1 %v17366_v5 }
  0x8b   :  { %14285 = vmatpush3.bf16.msra.mxu0 %v16363_v15 }
  0x8c   :  { %14286 = vmatprep.subr.bf16.mxu0 %v17366_v5 }
  0x8d   :  { %14267 = vmatpush3.bf16.msra.mxu1 %v16368_v18 }
  0x8e   :  { %14268 = vmatprep.subr.bf16.mxu1 %v17366_v5 }
  0x8f   :  { %14287 = vmatpush3.bf16.msra.mxu0 %v16365_v17 }
  0x90   :  { %14288 = vmatprep.subr.bf16.mxu0 %v17366_v5 }
  0x91   :  { %14269 = vmatpush3.bf16.msra.mxu1 %v16370_v21 }
  0x92   :  { %14270 = vmatprep.subr.bf16.mxu1 %v17366_v5 }
  0x93   :  { %14289 = vmatpush3.bf16.msra.mxu0 %v16367_v19 }
  0x94   :  { %14290 = vmatprep.subr.bf16.mxu0 %v17366_v5 }
  0x95   :  { %14271 = vmatpush3.bf16.msra.mxu1 %v16371_v22 }
  0x96   :  { %14322 = vmatprep.subr.bf16.mxu1 %v17366_v5 }
  0x97   :  { %14291 = vmatpush3.bf16.msra.mxu0 %v16369_v20 }
  0x98   :  { %14296 = vmatprep.subr.bf16.mxu0 %v17366_v5 }
  0x9a   :  { %14293 = vmatmul.mubr.bf16.vlgmr.msra.gmra.mxu0 %v164_v4 }
  0x9b   :  { %14298 = vmatprep.mubr.msk.bf16.mxu0 %vm17367_vm0, %v17366_v5 }
 0x13a   :  { %v208_v23 = vpop.f32.mrf.mxu0 }
 0x13c   :  { %v14254_v24 = vpop.f32.mrf.mxu0 }
 0x13e   :  { %v211_v25 = vpop.f32.mrf.mxu0 }
 0x13f   :  { %v231_v27 = vpack.c.bf16 %v211_v25, %v208_v23 }
 0x140   :  { %v14255_v28 = vpop.f32.mrf.mxu0 }
 0x141   :  { %14273 = vmatmul.mubr.bf16.vlgmr.msra.gmra.mxu1 %v231_v27 }
 0x142   :  { %14323 = vmatpush3.bf16.msra.mxu1 %v16372_v26  ;;  %14338 = vmatprep.mubr.msk.bf16.mxu1 %vm17367_vm0, %v17366_v5 }
 0x143   :  { %14324 = vmatprep.subr.bf16.mxu1 %v17366_v5 }
 0x146   :  { %14325 = vmatpush3.bf16.msra.mxu1 %v16373_v29 }
 0x147   :  { %14326 = vmatprep.subr.bf16.mxu1 %v17366_v5 }
 0x14a   :  { %14327 = vmatpush3.bf16.msra.mxu1 %v16374_v30 }
 0x14b   :  { %14328 = vmatprep.subr.bf16.mxu1 %v17366_v5 }
 0x14e   :  { %14329 = vmatpush3.bf16.msra.mxu1 %v16375_v31 }
 0x14f   :  { %14330 = vmatprep.subr.bf16.mxu1 %v17366_v5 }
 0x152   :  { %14331 = vmatpush3.bf16.msra.mxu1 %v16376_v32 }
 0x153   :  { %14332 = vmatprep.subr.bf16.mxu1 %v17366_v5 }
 0x156   :  { %14333 = vmatpush3.bf16.msra.mxu1 %v16377_v37 }
 0x157   :  { %14334 = vmatprep.subr.bf16.mxu1 %v17366_v5 }
 0x15a   :  { %v420_v33 = vpop.f32.mrf.mxu0  ;;  %14335 = vmatpush3.bf16.msra.mxu1 %v16378_v38 }
 0x15b   :  { %14336 = vmatprep.subr.bf16.mxu1 %v17366_v5 }
 0x15c   :  { %v14294_v34 = vpop.f32.mrf.mxu0 }
 0x15e   :  { %v423_v35 = vpop.f32.mrf.mxu0  ;;  %14337 = vmatpush3.bf16.msra.mxu1 %v16379_v39 }
 0x160   :  { %v14295_v36 = vpop.f32.mrf.mxu0 }
 0x201   :  { %v331_v40 = vpop.f32.mrf.mxu1 }
 0x202   :  { %v421_v41 = vadd.f32 %v420_v33, %v331_v40 }
 0x203   :  { %v14274_v43 = vpop.f32.mrf.mxu1 }
 0x204   :  { %v434_v45 = vadd.f32 %v12485_v42, %v421_v41 }
 0x205   :  { %v334_v44 = vpop.f32.mrf.mxu1 }
 0x206   :  { %v424_v46 = vadd.f32 %v423_v35, %v334_v44  ;;  %v436_v49 = vmax.f32 %v434_v45, 0.0 }
 0x207   :  { %v14275_v47 = vpop.f32.mrf.mxu1 }
 0x208   :  { %v435_v48 = vadd.f32 %v12485_v42, %v424_v46 }
 0x20a   :  { %v437_v50 = vmax.f32 %v435_v48, 0.0 }
 0x20c   :  { %v438_v51 = vpack.c.bf16 %v437_v50, %v436_v49 }
 0x20e   :  { %14297 = vmatpush3.bf16.msra.mxu0 %v438_v51  ;;  %14339 = vmatmul.mubr.bf16.vlgmr.msra.gmra.mxu1 %v438_v51 }
 0x20f   :  { %14302 = vmatprep.subr.bf16.mxu0 %v17366_v5 }
 0x211   :  { %14299 = vmatmul.mubr.msk.bf16.vlgmr.msra.gmra.mxu0 %vm170_vm1, %v17494_v6 }
 0x212   :  { %14303 = vmatpush3.bf16.msra.mxu0 %v16380_v52  ;;  %14318 = vmatprep.mubr.msk.bf16.mxu0 %vm17367_vm0, %v17366_v5 }
 0x213   :  { %14304 = vmatprep.subr.bf16.mxu0 %v17366_v5 }
 0x216   :  { %14305 = vmatpush3.bf16.msra.mxu0 %v16381_v53 }
 0x217   :  { %14306 = vmatprep.subr.bf16.mxu0 %v17366_v5 }
 0x21a   :  { %14307 = vmatpush3.bf16.msra.mxu0 %v16382_v54 }
 0x21b   :  { %14308 = vmatprep.subr.bf16.mxu0 %v17366_v5 }
 0x21e   :  { %14309 = vmatpush3.bf16.msra.mxu0 %v16383_v55 }
 0x21f   :  { %14310 = vmatprep.subr.bf16.mxu0 %v17366_v5 }
 0x222   :  { %14311 = vmatpush3.bf16.msra.mxu0 %v16384_v56 }
 0x223   :  { %14312 = vmatprep.subr.bf16.mxu0 %v17366_v5 }
 0x226   :  { %14313 = vmatpush3.bf16.msra.mxu0 %v16385_v57 }
 0x227   :  { %14314 = vmatprep.subr.bf16.mxu0 %v17366_v5 }
 0x22a   :  { %14315 = vmatpush3.bf16.msra.mxu0 %v16386_v58 }
 0x22b   :  { %14316 = vmatprep.subr.bf16.mxu0 %v17366_v5 }
 0x22e   :  { %14317 = vmatpush3.bf16.msra.mxu0 %v16387_v59 }
 0x2ce   :  { %v686_v60 = vpop.f32.mrf.mxu1 }
 0x2d0   :  { %v14340_v61 = vpop.f32.mrf.mxu1 }
 0x2d1   :  { %v473_v62 = vpop.f32.mrf.mxu0 }
 0x2d2   :  { %v689_v63 = vpop.f32.mrf.mxu1 }
 0x2d3   :  { %v14300_v0 = vpop.f32.mrf.mxu0 }
 0x2d4   :  { %v14341_v1 = vpop.f32.mrf.mxu1 }
 0x2d5   :  { %v476_v2 = vpop.f32.mrf.mxu0 }
 0x2d6   :  { %v497_v3 = vpack.c.bf16 %v476_v2, %v473_v62 }
 0x2d7   :  { %v14301_v4 = vpop.f32.mrf.mxu0 }
 0x2d8   :  { %14319 = vmatmul.mubr.bf16.vlgmr.msra.gmra.mxu0 %v497_v3 }
 0x398   :  { %v597_v7 = vpop.f32.mrf.mxu0 }
 0x399   :  { %v687_v9 = vadd.f32 %v686_v60, %v597_v7 }
 0x39a   :  { %v14320_v10 = vpop.f32.mrf.mxu0 }
 0x39b   :  { %v701_v11 = vadd.f32 %v12503_v8, %v687_v9 }
 0x39c   :  { %v600_v12 = vpop.f32.mrf.mxu0 }
 0x39d   :  { %v703_v13 = vmax.f32 %v701_v11, 0.0  ;;  %v690_v14 = vadd.f32 %v689_v63, %v600_v12 }
 0x39e   :  { %v14321_v15 = vpop.f32.mrf.mxu0 }
 0x39f   :  { %v705_v16 = vadd.f32 %v703_v13, %v436_v49  ;;  %v702_v17 = vadd.f32 %v12503_v8, %v690_v14 }
 0x3a1   :  { %v704_v18 = vmax.f32 %v702_v17, 0.0 }
 0x3a3   :  { %v706_v19 = vadd.f32 %v704_v18, %v437_v50 }
 0x3a4   :  { %17340 = dma.done.wait [#allocation5], 8192 }
 0x3a5   :  { %17341 = vsyncadd [#allocation5], 4294959104  ;;  %14342 = vmatprep.subr.bf16.mxu0 %v17366_v5  ;;  %14358 = vmatprep.mubr.msk.bf16.mxu0 %vm17367_vm0, %v17366_v5  ;;  %v16388_v20 = vld [vmem:[#allocation3 + $0x38] sm:$0xff]   ;;  %v16389_v21 = vld [vmem:[#allocation3 + $0x30] sm:$0xff]   ;;  %v711_v29 = vpack.c.bf16 %v706_v19, %v705_v16 }
 0x3a6   :  { %14362 = vmatprep.subr.bf16.mxu1 %v17366_v5  ;;  %14364 = vmatprep.mubr.msk.bf16.mxu1 %vm17367_vm0, %v17366_v5  ;;  %v16390_v22 = vld [vmem:[#allocation3 + $0x28] sm:$0xff]   ;;  %v16391_v23 = vld [vmem:[#allocation3 + $0x20] sm:$0xff]   ;;  %v16392_v24 = vld [vmem:[#allocation3 + $0x18] sm:$0xff]  }
 0x3a7   :  { %14343 = vmatpush3.bf16.msra.mxu0 %v16388_v20  ;;  %v16393_v25 = vld [vmem:[#allocation3 + $0x10] sm:$0xff]   ;;  %v16394_v26 = vld [vmem:[#allocation3 + $0x8] sm:$0xff]   ;;  %v16395_v27 = vld [vmem:[#allocation3] sm:$0xff]  }
 0x3a8   :  { %14344 = vmatprep.subr.bf16.mxu0 %v17366_v5  ;;  %v16396_v28 = vld [vmem:[#allocation2 + $0x138] sm:$0xff]   ;;  %v16397_v30 = vld [vmem:[#allocation2 + $0x130] sm:$0xff]   ;;  %v16398_v31 = vld [vmem:[#allocation2 + $0x128] sm:$0xff]  }
 0x3a9   :  { %v16399_v32 = vld [vmem:[#allocation2 + $0x120] sm:$0xff]   ;;  %v16400_v33 = vld [vmem:[#allocation2 + $0x118] sm:$0xff]   ;;  %v16401_v34 = vld [vmem:[#allocation2 + $0x110] sm:$0xff]  }
 0x3aa   :  { %v16402_v35 = vld [vmem:[#allocation2 + $0x108] sm:$0xff]   ;;  %v16403_v36 = vld [vmem:[#allocation2 + $0x100] sm:$0xff]   ;;  %v16404_v47 = vld [vmem:[#allocation2 + $0x178] sm:$0xff]  }
 0x3ab   :  { %14345 = vmatpush3.bf16.msra.mxu0 %v16389_v21  ;;  %v12504_v37 = vld [vmem:[#allocation8] ss:$0 sm:$0xff]  ;;  %v16405_v48 = vld [vmem:[#allocation2 + $0x170] sm:$0xff]   ;;  %v16406_v49 = vld [vmem:[#allocation2 + $0x168] sm:$0xff]  }
 0x3ac   :  { %14346 = vmatprep.subr.bf16.mxu0 %v17366_v5  ;;  %v16407_v50 = vld [vmem:[#allocation2 + $0x160] sm:$0xff]   ;;  %v16408_v51 = vld [vmem:[#allocation2 + $0x158] sm:$0xff]   ;;  %v16409_v52 = vld [vmem:[#allocation2 + $0x150] sm:$0xff]  }
 0x3ad   :  { %v16410_v53 = vld [vmem:[#allocation2 + $0x148] sm:$0xff]   ;;  %v16411_v54 = vld [vmem:[#allocation2 + $0x140] sm:$0xff]   ;;  %v16412_v55 = vld [vmem:[#allocation2 + $0x1b8] sm:$0xff]  }
 0x3ae   :  { %v16413_v56 = vld [vmem:[#allocation2 + $0x1b0] sm:$0xff]   ;;  %v16414_v57 = vld [vmem:[#allocation2 + $0x1a8] sm:$0xff]   ;;  %v16415_v58 = vld [vmem:[#allocation2 + $0x1a0] sm:$0xff]  }
 0x3af   :  { %14347 = vmatpush3.bf16.msra.mxu0 %v16390_v22  ;;  %v16416_v59 = vld [vmem:[#allocation2 + $0x198] sm:$0xff]   ;;  %v16417_v7 = vld [vmem:[#allocation2 + $0x190] sm:$0xff]   ;;  %v16418_v8 = vld [vmem:[#allocation2 + $0x188] sm:$0xff]  }
 0x3b0   :  { %14348 = vmatprep.subr.bf16.mxu0 %v17366_v5  ;;  %v16419_v9 = vld [vmem:[#allocation2 + $0x180] sm:$0xff]   ;;  %v16420_v22 = vld [vmem:[#allocation2 + $0x1f8] sm:$0xff]  }
 0x3b1   :  { %v12530_v12 = vld [vmem:[#allocation6 + $0x2] ss:$0 sm:$0xff] }
 0x3b3   :  { %14349 = vmatpush3.bf16.msra.mxu0 %v16391_v23  ;;  %v16421_v23 = vld [vmem:[#allocation2 + $0x1f0] sm:$0xff]  }
 0x3b4   :  { %14350 = vmatprep.subr.bf16.mxu0 %v17366_v5 }
 0x3b7   :  { %14351 = vmatpush3.bf16.msra.mxu0 %v16392_v24  ;;  %v16422_v24 = vld [vmem:[#allocation2 + $0x1e8] sm:$0xff]  }
 0x3b8   :  { %14352 = vmatprep.subr.bf16.mxu0 %v17366_v5 }
 0x3bb   :  { %14353 = vmatpush3.bf16.msra.mxu0 %v16393_v25  ;;  %v16423_v25 = vld [vmem:[#allocation2 + $0x1e0] sm:$0xff]  }
 0x3bc   :  { %14354 = vmatprep.subr.bf16.mxu0 %v17366_v5 }
 0x3bf   :  { %14355 = vmatpush3.bf16.msra.mxu0 %v16394_v26  ;;  %v16424_v26 = vld [vmem:[#allocation2 + $0x1d8] sm:$0xff]  }
 0x3c0   :  { %14356 = vmatprep.subr.bf16.mxu0 %v17366_v5 }
 0x3c3   :  { %14357 = vmatpush3.bf16.msra.mxu0 %v16395_v27  ;;  %v16425_v27 = vld [vmem:[#allocation2 + $0x1d0] sm:$0xff]  }
 0x3c4   :  { %14388 = vmatprep.subr.bf16.mxu0 %v17366_v5 }
 0x3c6   :  { %14359 = vmatmul.mubr.bf16.vlgmr.msra.gmra.mxu0 %v711_v29  ;;  %v16427_v29 = vld [vmem:[#allocation2 + $0x1c0] sm:$0xff]  }
 0x3c7   :  { %14389 = vmatpush3.bf16.msra.mxu0 %v16396_v28  ;;  %14404 = vmatprep.mubr.msk.bf16.mxu0 %vm17367_vm0, %v17366_v5  ;;  %v16426_v28 = vld [vmem:[#allocation2 + $0x1c8] sm:$0xff]  }
 0x3c8   :  { %14390 = vmatprep.subr.bf16.mxu0 %v17366_v5 }
 0x3cb   :  { %14391 = vmatpush3.bf16.msra.mxu0 %v16397_v30 }
 0x3cc   :  { %14392 = vmatprep.subr.bf16.mxu0 %v17366_v5 }
 0x3cf   :  { %14393 = vmatpush3.bf16.msra.mxu0 %v16398_v31 }
 0x3d0   :  { %14394 = vmatprep.subr.bf16.mxu0 %v17366_v5 }
 0x3d3   :  { %14395 = vmatpush3.bf16.msra.mxu0 %v16399_v32 }
 0x3d4   :  { %14396 = vmatprep.subr.bf16.mxu0 %v17366_v5 }
 0x3d7   :  { %14397 = vmatpush3.bf16.msra.mxu0 %v16400_v33 }
 0x3d8   :  { %14398 = vmatprep.subr.bf16.mxu0 %v17366_v5 }
 0x3db   :  { %14399 = vmatpush3.bf16.msra.mxu0 %v16401_v34 }
 0x3dc   :  { %14400 = vmatprep.subr.bf16.mxu0 %v17366_v5 }
 0x3df   :  { %14401 = vmatpush3.bf16.msra.mxu0 %v16402_v35 }
 0x3e0   :  { %14402 = vmatprep.subr.bf16.mxu0 %v17366_v5 }
 0x3e3   :  { %14403 = vmatpush3.bf16.msra.mxu0 %v16403_v36 }
 0x3e4   :  { %14434 = vmatprep.subr.bf16.mxu0 %v17366_v5 }
 0x486   :  { %v817_v38 = vpop.f32.mrf.mxu0 }
 0x487   :  { %v17567_v40 = vadd.f32 %v12504_v37, %v817_v38 }
 0x488   :  { %v14360_v39 = vpop.f32.mrf.mxu0 }
 0x489   :  { %v824_v44 = vmax.f32 %v17567_v40, 0.0  ;;  %v16447_v40 = vld [vmem:[#allocation2 + $0x220] sm:$0xff]  }
 0x48a   :  { %v820_v41 = vpop.f32.mrf.mxu0 }
 0x48b   :  { %v17569_v42 = vadd.f32 %v12504_v37, %v820_v41  ;;  %v16428_v37 = vld [vmem:[#allocation3 + $0x78] sm:$0xff]   ;;  %v16429_v41 = vld [vmem:[#allocation3 + $0x70] sm:$0xff]  }
 0x48c   :  { %v14361_v43 = vpop.f32.mrf.mxu0 }
 0x48d   :  { %v825_v45 = vmax.f32 %v17569_v42, 0.0  ;;  %v16430_v43 = vld [vmem:[#allocation3 + $0x68] sm:$0xff]   ;;  %v16448_v42 = vld [vmem:[#allocation2 + $0x218] sm:$0xff]  }
 0x48f   :  { %v826_v46 = vpack.c.bf16 %v825_v45, %v824_v44 }
 0x491   :  { %14363 = vmatpush3.bf16.msra.mxu1 %v826_v46  ;;  %14405 = vmatmul.mubr.bf16.vlgmr.msra.gmra.mxu0 %v826_v46  ;;  %v16431_v46 = vld [vmem:[#allocation3 + $0x60] sm:$0xff]  }
 0x492   :  { %14368 = vmatprep.subr.bf16.mxu1 %v17366_v5  ;;  %14450 = vmatprep.mubr.msk.bf16.mxu0 %vm17367_vm0, %v17366_v5 }
 0x493   :  { %14435 = vmatpush3.bf16.msra.mxu0 %v16412_v55  ;;  %v16440_v55 = vld [vmem:[#allocation3 + $0x98] sm:$0xff]  }
 0x494   :  { %14365 = vmatmul.mubr.msk.bf16.vlgmr.msra.gmra.mxu1 %vm170_vm1, %v17494_v6  ;;  %14436 = vmatprep.subr.bf16.mxu0 %v17366_v5 }
 0x495   :  { %14369 = vmatpush3.bf16.msra.mxu1 %v16404_v47  ;;  %14384 = vmatprep.mubr.msk.bf16.mxu1 %vm17367_vm0, %v17366_v5  ;;  %v16432_v47 = vld [vmem:[#allocation3 + $0x58] sm:$0xff]  }
 0x496   :  { %14370 = vmatprep.subr.bf16.mxu1 %v17366_v5 }
 0x497   :  { %14437 = vmatpush3.bf16.msra.mxu0 %v16413_v56 }
 0x498   :  { %14438 = vmatprep.subr.bf16.mxu0 %v17366_v5 }
 0x499   :  { %14371 = vmatpush3.bf16.msra.mxu1 %v16405_v48  ;;  %v16433_v48 = vld [vmem:[#allocation3 + $0x50] sm:$0xff]  }
 0x49a   :  { %14372 = vmatprep.subr.bf16.mxu1 %v17366_v5 }
 0x49b   :  { %14439 = vmatpush3.bf16.msra.mxu0 %v16414_v57  ;;  %v12548_v57 = vld [vmem:[#allocation6 + $0x3] ss:$0 sm:$0xff] }
 0x49c   :  { %14440 = vmatprep.subr.bf16.mxu0 %v17366_v5 }
 0x49d   :  { %14373 = vmatpush3.bf16.msra.mxu1 %v16406_v49  ;;  %v16434_v49 = vld [vmem:[#allocation3 + $0x48] sm:$0xff]  }
 0x49e   :  { %14374 = vmatprep.subr.bf16.mxu1 %v17366_v5 }
 0x49f   :  { %14441 = vmatpush3.bf16.msra.mxu0 %v16415_v58 }
 0x4a0   :  { %14442 = vmatprep.subr.bf16.mxu0 %v17366_v5 }
 0x4a1   :  { %14375 = vmatpush3.bf16.msra.mxu1 %v16407_v50  ;;  %v16435_v50 = vld [vmem:[#allocation3 + $0x40] sm:$0xff]  }
 0x4a2   :  { %14376 = vmatprep.subr.bf16.mxu1 %v17366_v5 }
 0x4a3   :  { %14443 = vmatpush3.bf16.msra.mxu0 %v16416_v59 }
 0x4a4   :  { %14444 = vmatprep.subr.bf16.mxu0 %v17366_v5 }
 0x4a5   :  { %14377 = vmatpush3.bf16.msra.mxu1 %v16408_v51  ;;  %v16436_v51 = vld [vmem:[#allocation3 + $0xb8] sm:$0xff]  }
 0x4a6   :  { %14378 = vmatprep.subr.bf16.mxu1 %v17366_v5 }
 0x4a7   :  { %14445 = vmatpush3.bf16.msra.mxu0 %v16417_v7 }
 0x4a8   :  { %14446 = vmatprep.subr.bf16.mxu0 %v17366_v5 }
 0x4a9   :  { %14379 = vmatpush3.bf16.msra.mxu1 %v16409_v52  ;;  %v16437_v52 = vld [vmem:[#allocation3 + $0xb0] sm:$0xff]  }
 0x4aa   :  { %14380 = vmatprep.subr.bf16.mxu1 %v17366_v5 }
 0x4ab   :  { %14447 = vmatpush3.bf16.msra.mxu0 %v16418_v8  ;;  %v16441_v8 = vld [vmem:[#allocation3 + $0x90] sm:$0xff]  }
 0x4ac   :  { %14448 = vmatprep.subr.bf16.mxu0 %v17366_v5 }
 0x4ad   :  { %14381 = vmatpush3.bf16.msra.mxu1 %v16410_v53  ;;  %v16438_v53 = vld [vmem:[#allocation3 + $0xa8] sm:$0xff]  }
 0x4ae   :  { %14382 = vmatprep.subr.bf16.mxu1 %v17366_v5 }
 0x4af   :  { %14449 = vmatpush3.bf16.msra.mxu0 %v16419_v9  ;;  %v16442_v9 = vld [vmem:[#allocation3 + $0x88] sm:$0xff]  }
 0x4b0   :  { %14474 = vmatprep.subr.bf16.mxu0 %v17366_v5 }
 0x4b1   :  { %14383 = vmatpush3.bf16.msra.mxu1 %v16411_v54  ;;  %v16439_v54 = vld [vmem:[#allocation3 + $0xa0] sm:$0xff]  }
 0x4b2   :  { %14408 = vmatprep.subr.bf16.mxu1 %v17366_v5 }
 0x551   :  { %v1074_v60 = vpop.f32.mrf.mxu0 }
 0x553   :  { %v14406_v61 = vpop.f32.mrf.mxu0 }
 0x554   :  { %v861_v62 = vpop.f32.mrf.mxu1 }
 0x555   :  { %v1077_v63 = vpop.f32.mrf.mxu0 }
 0x556   :  { %v14366_v0 = vpop.f32.mrf.mxu1 }
 0x557   :  { %v14407_v1 = vpop.f32.mrf.mxu0 }
 0x558   :  { %v864_v2 = vpop.f32.mrf.mxu1 }
 0x559   :  { %v885_v3 = vpack.c.bf16 %v864_v2, %v861_v62 }
 0x55a   :  { %v14367_v4 = vpop.f32.mrf.mxu1 }
 0x55b   :  { %14385 = vmatmul.mubr.bf16.vlgmr.msra.gmra.mxu1 %v885_v3 }
 0x55c   :  { %14410 = vmatprep.mubr.msk.bf16.mxu1 %vm17367_vm0, %v17366_v5 }
 0x61b   :  { %v985_v10 = vpop.f32.mrf.mxu1 }
 0x61c   :  { %v1075_v11 = vadd.f32 %v1074_v60, %v985_v10  ;;  %v16443_v10 = vld [vmem:[#allocation3 + $0x80] sm:$0xff]  }
 0x61d   :  { %v14386_v13 = vpop.f32.mrf.mxu1 }
 0x61e   :  { %v17602_v15 = vadd.f32 %v12530_v12, %v1075_v11  ;;  %v12549_v11 = vld [vmem:[#allocation8 + $0x1] ss:$0 sm:$0xff] }
 0x61f   :  { %v988_v14 = vpop.f32.mrf.mxu1 }
 0x620   :  { %v1078_v16 = vadd.f32 %v1077_v63, %v988_v14  ;;  %v1091_v19 = vmax.f32 %v17602_v15, 0.0 }
 0x621   :  { %v14387_v17 = vpop.f32.mrf.mxu1 }
 0x622   :  { %v17604_v18 = vadd.f32 %v12530_v12, %v1078_v16 }
 0x624   :  { %v1092_v20 = vmax.f32 %v17604_v18, 0.0 }
 0x626   :  { %v1093_v21 = vpack.c.bf16 %v1092_v20, %v1091_v19 }
 0x628   :  { %14409 = vmatpush3.bf16.msra.mxu1 %v1093_v21  ;;  %14451 = vmatmul.mubr.bf16.vlgmr.msra.gmra.mxu0 %v1093_v21 }
 0x629   :  { %14414 = vmatprep.subr.bf16.mxu1 %v17366_v5  ;;  %14490 = vmatprep.mubr.msk.bf16.mxu0 %vm17367_vm0, %v17366_v5 }
 0x62a   :  { %14475 = vmatpush3.bf16.msra.mxu0 %v16436_v51 }
 0x62b   :  { %14411 = vmatmul.mubr.msk.bf16.vlgmr.msra.gmra.mxu1 %vm170_vm1, %v17494_v6  ;;  %14476 = vmatprep.subr.bf16.mxu0 %v17366_v5 }
 0x62c   :  { %14415 = vmatpush3.bf16.msra.mxu1 %v16420_v22  ;;  %14430 = vmatprep.mubr.msk.bf16.mxu1 %vm17367_vm0, %v17366_v5  ;;  %v16444_v22 = vld [vmem:[#allocation2 + $0x238] sm:$0xff]  }
 0x62d   :  { %14416 = vmatprep.subr.bf16.mxu1 %v17366_v5 }
 0x62e   :  { %14477 = vmatpush3.bf16.msra.mxu0 %v16437_v52 }
 0x62f   :  { %14478 = vmatprep.subr.bf16.mxu0 %v17366_v5 }
 0x630   :  { %14417 = vmatpush3.bf16.msra.mxu1 %v16421_v23 }
 0x631   :  { %14418 = vmatprep.subr.bf16.mxu1 %v17366_v5 }
 0x632   :  { %14479 = vmatpush3.bf16.msra.mxu0 %v16438_v53 }
 0x633   :  { %14480 = vmatprep.subr.bf16.mxu0 %v17366_v5 }
 0x634   :  { %14419 = vmatpush3.bf16.msra.mxu1 %v16422_v24  ;;  %v16445_v24 = vld [vmem:[#allocation2 + $0x230] sm:$0xff]  }
 0x635   :  { %14420 = vmatprep.subr.bf16.mxu1 %v17366_v5 }
 0x636   :  { %14481 = vmatpush3.bf16.msra.mxu0 %v16439_v54 }
 0x637   :  { %14482 = vmatprep.subr.bf16.mxu0 %v17366_v5 }
 0x638   :  { %14421 = vmatpush3.bf16.msra.mxu1 %v16423_v25  ;;  %v16446_v25 = vld [vmem:[#allocation2 + $0x228] sm:$0xff]  }
 0x639   :  { %14422 = vmatprep.subr.bf16.mxu1 %v17366_v5 }
 0x63a   :  { %14483 = vmatpush3.bf16.msra.mxu0 %v16440_v55 }
 0x63b   :  { %14484 = vmatprep.subr.bf16.mxu0 %v17366_v5 }
 0x63c   :  { %14423 = vmatpush3.bf16.msra.mxu1 %v16424_v26  ;;  %v16451_v26 = vld [vmem:[#allocation2 + $0x200] sm:$0xff]  }
 0x63d   :  { %14424 = vmatprep.subr.bf16.mxu1 %v17366_v5 }
 0x63e   :  { %14485 = vmatpush3.bf16.msra.mxu0 %v16441_v8 }
 0x63f   :  { %14486 = vmatprep.subr.bf16.mxu0 %v17366_v5 }
 0x640   :  { %14425 = vmatpush3.bf16.msra.mxu1 %v16425_v27  ;;  %v12558_v27 = vld [vmem:[#allocation8 + $0x2] ss:$0 sm:$0xff] }
 0x641   :  { %14426 = vmatprep.subr.bf16.mxu1 %v17366_v5 }
 0x642   :  { %14487 = vmatpush3.bf16.msra.mxu0 %v16442_v9 }
 0x643   :  { %14488 = vmatprep.subr.bf16.mxu0 %v17366_v5 }
 0x644   :  { %14427 = vmatpush3.bf16.msra.mxu1 %v16426_v28 }
 0x645   :  { %14428 = vmatprep.subr.bf16.mxu1 %v17366_v5 }
 0x646   :  { %14489 = vmatpush3.bf16.msra.mxu0 %v16443_v10 }
 0x647   :  { %14520 = vmatprep.subr.bf16.mxu0 %v17366_v5 }
 0x648   :  { %14429 = vmatpush3.bf16.msra.mxu1 %v16427_v29 }
 0x649   :  { %14454 = vmatprep.subr.bf16.mxu1 %v17366_v5 }
 0x6e8   :  { %v1341_v30 = vpop.f32.mrf.mxu0 }
 0x6ea   :  { %v14452_v31 = vpop.f32.mrf.mxu0 }
 0x6eb   :  { %v1128_v32 = vpop.f32.mrf.mxu1 }
 0x6ec   :  { %v1344_v33 = vpop.f32.mrf.mxu0 }
 0x6ed   :  { %v14412_v34 = vpop.f32.mrf.mxu1 }
 0x6ee   :  { %v14453_v35 = vpop.f32.mrf.mxu0 }
 0x6ef   :  { %v1131_v36 = vpop.f32.mrf.mxu1 }
 0x6f0   :  { %v1152_v38 = vpack.c.bf16 %v1131_v36, %v1128_v32 }
 0x6f1   :  { %v14413_v39 = vpop.f32.mrf.mxu1 }
 0x6f2   :  { %14431 = vmatmul.mubr.bf16.vlgmr.msra.gmra.mxu1 %v1152_v38  ;;  %v16453_v38 = vld [vmem:[#allocation2 + $0x270] sm:$0xff]   ;;  %v16454_v39 = vld [vmem:[#allocation2 + $0x268] sm:$0xff]  }
 0x6f3   :  { %14455 = vmatpush3.bf16.msra.mxu1 %v16428_v37  ;;  %14470 = vmatprep.mubr.msk.bf16.mxu1 %vm17367_vm0, %v17366_v5  ;;  %v16452_v37 = vld [vmem:[#allocation2 + $0x278] sm:$0xff]  }
 0x6f4   :  { %14456 = vmatprep.subr.bf16.mxu1 %v17366_v5 }
 0x6f7   :  { %14457 = vmatpush3.bf16.msra.mxu1 %v16429_v41  ;;  %v16455_v41 = vld [vmem:[#allocation2 + $0x260] sm:$0xff]  }
 0x6f8   :  { %14458 = vmatprep.subr.bf16.mxu1 %v17366_v5 }
 0x6fb   :  { %14459 = vmatpush3.bf16.msra.mxu1 %v16430_v43  ;;  %v16456_v43 = vld [vmem:[#allocation2 + $0x258] sm:$0xff]  }
 0x6fc   :  { %14460 = vmatprep.subr.bf16.mxu1 %v17366_v5 }
 0x6ff   :  { %14461 = vmatpush3.bf16.msra.mxu1 %v16431_v46  ;;  %v16457_v46 = vld [vmem:[#allocation2 + $0x250] sm:$0xff]  }
 0x700   :  { %14462 = vmatprep.subr.bf16.mxu1 %v17366_v5 }
 0x703   :  { %14463 = vmatpush3.bf16.msra.mxu1 %v16432_v47  ;;  %v16458_v47 = vld [vmem:[#allocation2 + $0x248] sm:$0xff]  }
 0x704   :  { %14464 = vmatprep.subr.bf16.mxu1 %v17366_v5 }
 0x707   :  { %14465 = vmatpush3.bf16.msra.mxu1 %v16433_v48  ;;  %v16459_v48 = vld [vmem:[#allocation2 + $0x240] sm:$0xff]  }
 0x708   :  { %14466 = vmatprep.subr.bf16.mxu1 %v17366_v5 }
 0x70b   :  { %14467 = vmatpush3.bf16.msra.mxu1 %v16434_v49 }
 0x70c   :  { %14468 = vmatprep.subr.bf16.mxu1 %v17366_v5 }
 0x70f   :  { %14469 = vmatpush3.bf16.msra.mxu1 %v16435_v50 }
 0x710   :  { %14494 = vmatprep.subr.bf16.mxu1 %v17366_v5 }
 0x7b2   :  { %v1252_v56 = vpop.f32.mrf.mxu1 }
 0x7b3   :  { %v1342_v58 = vadd.f32 %v1341_v30, %v1252_v56 }
 0x7b4   :  { %v14432_v59 = vpop.f32.mrf.mxu1 }
 0x7b5   :  { %v1356_v60 = vadd.f32 %v12548_v57, %v1342_v58  ;;  %v16468_v58 = vld [vmem:[#allocation2 + $0x2f8] sm:$0xff]   ;;  %v16469_v59 = vld [vmem:[#allocation2 + $0x2f0] sm:$0xff]  }
 0x7b6   :  { %v1255_v61 = vpop.f32.mrf.mxu1 }
 0x7b7   :  { %v1345_v62 = vadd.f32 %v1344_v33, %v1255_v61  ;;  %v1358_v0 = vmax.f32 %v1356_v60, 0.0  ;;  %v16470_v60 = vld [vmem:[#allocation2 + $0x2e8] sm:$0xff]   ;;  %v16471_v61 = vld [vmem:[#allocation2 + $0x2e0] sm:$0xff]  }
 0x7b8   :  { %v14433_v63 = vpop.f32.mrf.mxu1 }
 0x7b9   :  { %v1357_v1 = vadd.f32 %v12548_v57, %v1345_v62  ;;  %v1360_v3 = vadd.f32 %v1358_v0, %v1091_v19  ;;  %v16472_v62 = vld [vmem:[#allocation2 + $0x2d8] sm:$0xff]   ;;  %v16473_v63 = vld [vmem:[#allocation2 + $0x2d0] sm:$0xff]  }
 0x7bb   :  { %v1359_v2 = vmax.f32 %v1357_v1, 0.0 }
 0x7bd   :  { %v1361_v4 = vadd.f32 %v1359_v2, %v1092_v20  ;;  %v12584_v2 = vld [vmem:[#allocation6 + $0x4] ss:$0 sm:$0xff] }
 0x7bf   :  { %v1362_v7 = vpack.c.bf16 %v1361_v4, %v1360_v3 }
 0x7c1   :  { %14471 = vmatmul.mubr.bf16.vlgmr.msra.gmra.mxu1 %v1362_v7 }
 0x7c2   :  { %14496 = vmatprep.mubr.msk.bf16.mxu1 %vm17367_vm0, %v17366_v5 }
 0x881   :  { %v1470_v12 = vpop.f32.mrf.mxu1 }
 0x882   :  { %v1471_v13 = vadd.f32 %v12549_v11, %v1470_v12 }
 0x883   :  { %v14472_v14 = vpop.f32.mrf.mxu1 }
 0x884   :  { %v1477_v16 = vmax.f32 %v1471_v13, 0.0  ;;  %v16460_v14 = vld [vmem:[#allocation2 + $0x2b8] sm:$0xff]  }
 0x885   :  { %v1473_v15 = vpop.f32.mrf.mxu1 }
 0x886   :  { %v1474_v17 = vadd.f32 %v12549_v11, %v1473_v15  ;;  %v1479_v20 = vadd.f32 %v1477_v16, %v824_v44  ;;  %v16449_v44 = vld [vmem:[#allocation2 + $0x210] sm:$0xff]   ;;  %v16462_v16 = vld [vmem:[#allocation2 + $0x2a8] sm:$0xff]  }
 0x887   :  { %v14473_v18 = vpop.f32.mrf.mxu1  ;;  %v16461_v15 = vld [vmem:[#allocation2 + $0x2b0] sm:$0xff]  }
 0x888   :  { %v1478_v19 = vmax.f32 %v1474_v17, 0.0  ;;  %v16463_v17 = vld [vmem:[#allocation2 + $0x2a0] sm:$0xff]   ;;  %v16464_v18 = vld [vmem:[#allocation2 + $0x298] sm:$0xff]  }
 0x88a   :  { %v1480_v21 = vadd.f32 %v1478_v19, %v825_v45  ;;  %v16450_v45 = vld [vmem:[#allocation2 + $0x208] sm:$0xff]   ;;  %v16465_v19 = vld [vmem:[#allocation2 + $0x290] sm:$0xff]  }
 0x88c   :  { %v1481_v23 = vpack.c.bf16 %v1480_v21, %v1479_v20  ;;  %v16466_v20 = vld [vmem:[#allocation2 + $0x288] sm:$0xff]   ;;  %v16467_v21 = vld [vmem:[#allocation2 + $0x280] sm:$0xff]  }
 0x88e   :  { %14491 = vmatmul.mubr.bf16.vlgmr.msra.gmra.mxu0 %v1481_v23  ;;  %v16475_v23 = vld [vmem:[#allocation2 + $0x2c0] sm:$0xff]  }
 0x88f   :  { %14521 = vmatpush3.bf16.msra.mxu0 %v16444_v22  ;;  %14536 = vmatprep.mubr.msk.bf16.mxu0 %vm17367_vm0, %v17366_v5  ;;  %v16474_v22 = vld [vmem:[#allocation2 + $0x2c8] sm:$0xff]  }
 0x890   :  { %14522 = vmatprep.subr.bf16.mxu0 %v17366_v5 }
 0x893   :  { %14523 = vmatpush3.bf16.msra.mxu0 %v16445_v24 }
 0x894   :  { %14524 = vmatprep.subr.bf16.mxu0 %v17366_v5 }
 0x897   :  { %14525 = vmatpush3.bf16.msra.mxu0 %v16446_v25 }
 0x898   :  { %14526 = vmatprep.subr.bf16.mxu0 %v17366_v5 }
 0x89b   :  { %14527 = vmatpush3.bf16.msra.mxu0 %v16447_v40 }
 0x89c   :  { %14528 = vmatprep.subr.bf16.mxu0 %v17366_v5 }
 0x89f   :  { %14529 = vmatpush3.bf16.msra.mxu0 %v16448_v42  ;;  %v16476_v42 = vld [vmem:[#allocation3 + $0xf8] sm:$0xff]  }
 0x8a0   :  { %14530 = vmatprep.subr.bf16.mxu0 %v17366_v5 }
 0x8a3   :  { %14531 = vmatpush3.bf16.msra.mxu0 %v16449_v44 }
 0x8a4   :  { %14532 = vmatprep.subr.bf16.mxu0 %v17366_v5 }
 0x8a7   :  { %14533 = vmatpush3.bf16.msra.mxu0 %v16450_v45 }
 0x8a8   :  { %14534 = vmatprep.subr.bf16.mxu0 %v17366_v5 }
 0x8ab   :  { %14535 = vmatpush3.bf16.msra.mxu0 %v16451_v26  ;;  %v16477_v26 = vld [vmem:[#allocation3 + $0xf0] sm:$0xff]  }
 0x8ac   :  { %14546 = vmatprep.subr.bf16.mxu0 %v17366_v5 }
 0x94e   :  { %v1589_v28 = vpop.f32.mrf.mxu0 }
 0x94f   :  { %v17665_v30 = vadd.f32 %v12558_v27, %v1589_v28  ;;  %v16479_v28 = vld [vmem:[#allocation3 + $0xe0] sm:$0xff]  }
 0x950   :  { %v14492_v29 = vpop.f32.mrf.mxu0 }
 0x951   :  { %v1596_v34 = vmax.f32 %v17665_v30, 0.0 }
 0x952   :  { %v1592_v31 = vpop.f32.mrf.mxu0 }
 0x953   :  { %v17667_v32 = vadd.f32 %v12558_v27, %v1592_v31  ;;  %v16478_v27 = vld [vmem:[#allocation3 + $0xe8] sm:$0xff]  }
 0x954   :  { %v14493_v33 = vpop.f32.mrf.mxu0 }
 0x955   :  { %v1597_v35 = vmax.f32 %v17667_v32, 0.0 }
 0x957   :  { %v1598_v36 = vpack.c.bf16 %v1597_v35, %v1596_v34 }
 0x959   :  { %14495 = vmatpush3.bf16.msra.mxu1 %v1598_v36  ;;  %14537 = vmatmul.mubr.bf16.vlgmr.msra.gmra.mxu0 %v1598_v36 }
 0x95a   :  { %14500 = vmatprep.subr.bf16.mxu1 %v17366_v5  ;;  %14562 = vmatprep.mubr.msk.bf16.mxu0 %vm17367_vm0, %v17366_v5 }
 0x95b   :  { %14547 = vmatpush3.bf16.msra.mxu0 %v16468_v58  ;;  %v16484_v58 = vld [vmem:[#allocation2 + $0x338] sm:$0xff]  }
 0x95c   :  { %14497 = vmatmul.mubr.msk.bf16.vlgmr.msra.gmra.mxu1 %vm170_vm1, %v17494_v6  ;;  %14548 = vmatprep.subr.bf16.mxu0 %v17366_v5 }
 0x95d   :  { %14501 = vmatpush3.bf16.msra.mxu1 %v16452_v37  ;;  %14516 = vmatprep.mubr.msk.bf16.mxu1 %vm17367_vm0, %v17366_v5  ;;  %v16480_v37 = vld [vmem:[#allocation3 + $0xd8] sm:$0xff]  }
 0x95e   :  { %14502 = vmatprep.subr.bf16.mxu1 %v17366_v5 }
 0x95f   :  { %14549 = vmatpush3.bf16.msra.mxu0 %v16469_v59 }
 0x960   :  { %14550 = vmatprep.subr.bf16.mxu0 %v17366_v5 }
 0x961   :  { %14503 = vmatpush3.bf16.msra.mxu1 %v16453_v38  ;;  %v16481_v38 = vld [vmem:[#allocation3 + $0xd0] sm:$0xff]  }
 0x962   :  { %14504 = vmatprep.subr.bf16.mxu1 %v17366_v5 }
 0x963   :  { %14551 = vmatpush3.bf16.msra.mxu0 %v16470_v60  ;;  %v16485_v60 = vld [vmem:[#allocation2 + $0x330] sm:$0xff]  }
 0x964   :  { %14552 = vmatprep.subr.bf16.mxu0 %v17366_v5 }
 0x965   :  { %14505 = vmatpush3.bf16.msra.mxu1 %v16454_v39  ;;  %v16482_v39 = vld [vmem:[#allocation3 + $0xc8] sm:$0xff]  }
 0x966   :  { %14506 = vmatprep.subr.bf16.mxu1 %v17366_v5 }
 0x967   :  { %14553 = vmatpush3.bf16.msra.mxu0 %v16471_v61  ;;  %v16486_v61 = vld [vmem:[#allocation2 + $0x328] sm:$0xff]  }
 0x968   :  { %14554 = vmatprep.subr.bf16.mxu0 %v17366_v5 }
 0x969   :  { %14507 = vmatpush3.bf16.msra.mxu1 %v16455_v41  ;;  %v16483_v41 = vld [vmem:[#allocation3 + $0xc0] sm:$0xff]  }
 0x96a   :  { %14508 = vmatprep.subr.bf16.mxu1 %v17366_v5 }
 0x96b   :  { %14555 = vmatpush3.bf16.msra.mxu0 %v16472_v62  ;;  %v16487_v62 = vld [vmem:[#allocation2 + $0x320] sm:$0xff]  }
 0x96c   :  { %14556 = vmatprep.subr.bf16.mxu0 %v17366_v5 }
 0x96d   :  { %14509 = vmatpush3.bf16.msra.mxu1 %v16456_v43 }
 0x96e   :  { %14510 = vmatprep.subr.bf16.mxu1 %v17366_v5 }
 0x96f   :  { %14557 = vmatpush3.bf16.msra.mxu0 %v16473_v63  ;;  %v16488_v63 = vld [vmem:[#allocation2 + $0x318] sm:$0xff]  }
 0x970   :  { %14558 = vmatprep.subr.bf16.mxu0 %v17366_v5 }
 0x971   :  { %14511 = vmatpush3.bf16.msra.mxu1 %v16457_v46  ;;  %v12602_v46 = vld [vmem:[#allocation6 + $0x5] ss:$0 sm:$0xff] }
 0x972   :  { %14512 = vmatprep.subr.bf16.mxu1 %v17366_v5 }
 0x973   :  { %14559 = vmatpush3.bf16.msra.mxu0 %v16474_v22  ;;  %v16499_v22 = vld [vmem:[#allocation2 + $0x340] sm:$0xff]  }
 0x974   :  { %14560 = vmatprep.subr.bf16.mxu0 %v17366_v5 }
 0x975   :  { %14513 = vmatpush3.bf16.msra.mxu1 %v16458_v47 }
 0x976   :  { %14514 = vmatprep.subr.bf16.mxu1 %v17366_v5 }
 0x977   :  { %14561 = vmatpush3.bf16.msra.mxu0 %v16475_v23  ;;  %v16500_v23 = vld [vmem:[#allocation2 + $0x3b8] sm:$0xff]  }
 0x978   :  { %14586 = vmatprep.subr.bf16.mxu0 %v17366_v5 }
 0x979   :  { %14515 = vmatpush3.bf16.msra.mxu1 %v16459_v48 }
 0x97a   :  { %14540 = vmatprep.subr.bf16.mxu1 %v17366_v5 }
 0xa19   :  { %v1846_v49 = vpop.f32.mrf.mxu0 }
 0xa1b   :  { %v14538_v50 = vpop.f32.mrf.mxu0 }
 0xa1c   :  { %v1633_v51 = vpop.f32.mrf.mxu1 }
 0xa1d   :  { %v1849_v52 = vpop.f32.mrf.mxu0 }
 0xa1e   :  { %v14498_v53 = vpop.f32.mrf.mxu1 }
 0xa1f   :  { %v14539_v54 = vpop.f32.mrf.mxu0 }
 0xa20   :  { %v1636_v55 = vpop.f32.mrf.mxu1 }
 0xa21   :  { %v1657_v56 = vpack.c.bf16 %v1636_v55, %v1633_v51 }
 0xa22   :  { %v14499_v57 = vpop.f32.mrf.mxu1 }
 0xa23   :  { %14517 = vmatmul.mubr.bf16.vlgmr.msra.gmra.mxu1 %v1657_v56 }
 0xa24   :  { %14542 = vmatprep.mubr.msk.bf16.mxu1 %vm17367_vm0, %v17366_v5 }
 0xae3   :  { %v1757_v0 = vpop.f32.mrf.mxu1 }
 0xae4   :  { %v1847_v1 = vadd.f32 %v1846_v49, %v1757_v0  ;;  %v16489_v0 = vld [vmem:[#allocation2 + $0x310] sm:$0xff]  }
 0xae5   :  { %v14518_v3 = vpop.f32.mrf.mxu1 }
 0xae6   :  { %v17698_v7 = vadd.f32 %v12584_v2, %v1847_v1  ;;  %v16490_v1 = vld [vmem:[#allocation2 + $0x308] sm:$0xff]   ;;  %v12603_v3 = vld [vmem:[#allocation8 + $0x3] ss:$0 sm:$0xff] }
 0xae7   :  { %v1760_v4 = vpop.f32.mrf.mxu1 }
 0xae8   :  { %v1850_v8 = vadd.f32 %v1849_v52, %v1760_v4  ;;  %v1863_v11 = vmax.f32 %v17698_v7, 0.0 }
 0xae9   :  { %v14519_v9 = vpop.f32.mrf.mxu1 }
 0xaea   :  { %v17700_v10 = vadd.f32 %v12584_v2, %v1850_v8  ;;  %v16491_v2 = vld [vmem:[#allocation2 + $0x300] sm:$0xff]  }
 0xaec   :  { %v1864_v12 = vmax.f32 %v17700_v10, 0.0 }
 0xaee   :  { %v1865_v13 = vpack.c.bf16 %v1864_v12, %v1863_v11 }
 0xaf0   :  { %14541 = vmatpush3.bf16.msra.mxu1 %v1865_v13 }
 0xaf1   :  { %14566 = vmatprep.subr.bf16.mxu1 %v17366_v5 }
 0xaf3   :  { %14543 = vmatmul.mubr.msk.bf16.vlgmr.msra.gmra.mxu1 %vm170_vm1, %v17494_v6 }
 0xaf4   :  { %14567 = vmatpush3.bf16.msra.mxu1 %v16460_v14  ;;  %14582 = vmatprep.mubr.msk.bf16.mxu1 %vm17367_vm0, %v17366_v5 }
 0xaf5   :  { %14568 = vmatprep.subr.bf16.mxu1 %v17366_v5 }
 0xaf8   :  { %14569 = vmatpush3.bf16.msra.mxu1 %v16461_v15  ;;  %v16492_v15 = vld [vmem:[#allocation2 + $0x378] sm:$0xff]  }
 0xaf9   :  { %14570 = vmatprep.subr.bf16.mxu1 %v17366_v5 }
 0xafc   :  { %14571 = vmatpush3.bf16.msra.mxu1 %v16462_v16  ;;  %v16493_v16 = vld [vmem:[#allocation2 + $0x370] sm:$0xff]  }
 0xafd   :  { %14572 = vmatprep.subr.bf16.mxu1 %v17366_v5 }
 0xb00   :  { %14573 = vmatpush3.bf16.msra.mxu1 %v16463_v17  ;;  %v16494_v17 = vld [vmem:[#allocation2 + $0x368] sm:$0xff]  }
 0xb01   :  { %14574 = vmatprep.subr.bf16.mxu1 %v17366_v5 }
 0xb04   :  { %14575 = vmatpush3.bf16.msra.mxu1 %v16464_v18  ;;  %v16495_v18 = vld [vmem:[#allocation2 + $0x360] sm:$0xff]  }
 0xb05   :  { %14576 = vmatprep.subr.bf16.mxu1 %v17366_v5 }
 0xb08   :  { %14577 = vmatpush3.bf16.msra.mxu1 %v16465_v19  ;;  %v16496_v19 = vld [vmem:[#allocation2 + $0x358] sm:$0xff]  }
 0xb09   :  { %14578 = vmatprep.subr.bf16.mxu1 %v17366_v5 }
 0xb0c   :  { %14579 = vmatpush3.bf16.msra.mxu1 %v16466_v20  ;;  %v16497_v20 = vld [vmem:[#allocation2 + $0x350] sm:$0xff]  }
 0xb0d   :  { %14580 = vmatprep.subr.bf16.mxu1 %v17366_v5 }
 0xb10   :  { %14581 = vmatpush3.bf16.msra.mxu1 %v16467_v21  ;;  %v16498_v21 = vld [vmem:[#allocation2 + $0x348] sm:$0xff]  }
 0xb11   :  { %14606 = vmatprep.subr.bf16.mxu1 %v17366_v5 }
 0xb13   :  { %14583 = vmatmul.mubr.bf16.vlgmr.msra.gmra.mxu1 %v1865_v13 }
 0xb14   :  { %14608 = vmatprep.mubr.msk.bf16.mxu1 %vm17367_vm0, %v17366_v5 }
 0xbb3   :  { %v1900_v24 = vpop.f32.mrf.mxu1 }
 0xbb5   :  { %v14544_v25 = vpop.f32.mrf.mxu1 }
 0xbb6   :  { %v16502_v25 = vld [vmem:[#allocation2 + $0x3a8] sm:$0xff]  }
 0xbb7   :  { %v1903_v40 = vpop.f32.mrf.mxu1 }
 0xbb8   :  { %v1924_v44 = vpack.c.bf16 %v1903_v40, %v1900_v24  ;;  %v16501_v24 = vld [vmem:[#allocation2 + $0x3b0] sm:$0xff]   ;;  %v16503_v40 = vld [vmem:[#allocation2 + $0x3a0] sm:$0xff]  }
 0xbb9   :  { %v14545_v45 = vpop.f32.mrf.mxu1 }
 0xbba   :  { %14563 = vmatmul.mubr.bf16.vlgmr.msra.gmra.mxu0 %v1924_v44 }
 0xbbb   :  { %14587 = vmatpush3.bf16.msra.mxu0 %v16476_v42  ;;  %14602 = vmatprep.mubr.msk.bf16.mxu0 %vm17367_vm0, %v17366_v5  ;;  %v16504_v42 = vld [vmem:[#allocation2 + $0x398] sm:$0xff]  }
 0xbbc   :  { %14588 = vmatprep.subr.bf16.mxu0 %v17366_v5 }
 0xbbf   :  { %14589 = vmatpush3.bf16.msra.mxu0 %v16477_v26 }
 0xbc0   :  { %14590 = vmatprep.subr.bf16.mxu0 %v17366_v5 }
 0xbc3   :  { %14591 = vmatpush3.bf16.msra.mxu0 %v16478_v27 }
 0xbc4   :  { %14592 = vmatprep.subr.bf16.mxu0 %v17366_v5 }
 0xbc7   :  { %14593 = vmatpush3.bf16.msra.mxu0 %v16479_v28 }
 0xbc8   :  { %14594 = vmatprep.subr.bf16.mxu0 %v17366_v5 }
 0xbcb   :  { %14595 = vmatpush3.bf16.msra.mxu0 %v16480_v37  ;;  %v16505_v37 = vld [vmem:[#allocation2 + $0x390] sm:$0xff]  }
 0xbcc   :  { %14596 = vmatprep.subr.bf16.mxu0 %v17366_v5 }
 0xbcf   :  { %14597 = vmatpush3.bf16.msra.mxu0 %v16481_v38  ;;  %v16506_v38 = vld [vmem:[#allocation2 + $0x388] sm:$0xff]  }
 0xbd0   :  { %14598 = vmatprep.subr.bf16.mxu0 %v17366_v5 }
 0xbd3   :  { %v2113_v29 = vpop.f32.mrf.mxu1  ;;  %14599 = vmatpush3.bf16.msra.mxu0 %v16482_v39  ;;  %v16507_v39 = vld [vmem:[#allocation2 + $0x380] sm:$0xff]  }
 0xbd4   :  { %14600 = vmatprep.subr.bf16.mxu0 %v17366_v5 }
 0xbd5   :  { %v14584_v31 = vpop.f32.mrf.mxu1 }
 0xbd7   :  { %v2116_v33 = vpop.f32.mrf.mxu1  ;;  %14601 = vmatpush3.bf16.msra.mxu0 %v16483_v41 }
 0xbd8   :  { %14632 = vmatprep.subr.bf16.mxu0 %v17366_v5 }
 0xbd9   :  { %v14585_v36 = vpop.f32.mrf.mxu1 }
 0xc7a   :  { %v2024_v43 = vpop.f32.mrf.mxu0 }
 0xc7b   :  { %v2114_v47 = vadd.f32 %v2113_v29, %v2024_v43 }
 0xc7c   :  { %v14564_v48 = vpop.f32.mrf.mxu0 }
 0xc7d   :  { %v2128_v49 = vadd.f32 %v12602_v46, %v2114_v47 }
 0xc7e   :  { %v2027_v50 = vpop.f32.mrf.mxu0 }
 0xc7f   :  { %v2117_v51 = vadd.f32 %v2116_v33, %v2027_v50  ;;  %v2130_v53 = vmax.f32 %v2128_v49, 0.0 }
 0xc80   :  { %v14565_v52 = vpop.f32.mrf.mxu0 }
 0xc81   :  { %v2129_v54 = vadd.f32 %v12602_v46, %v2117_v51  ;;  %v2132_v56 = vadd.f32 %v2130_v53, %v1863_v11  ;;  %v12629_v46 = vld [vmem:[#allocation6 + $0x6] ss:$0 sm:$0xff] }
 0xc83   :  { %v2131_v55 = vmax.f32 %v2129_v54, 0.0 }
 0xc85   :  { %v2133_v57 = vadd.f32 %v2131_v55, %v1864_v12 }
 0xc87   :  { %v2134_v59 = vpack.c.bf16 %v2133_v57, %v2132_v56  ;;  %v16508_v56 = vld [vmem:[#allocation2 + $0x3f8] sm:$0xff]   ;;  %v16509_v57 = vld [vmem:[#allocation2 + $0x3f0] sm:$0xff]  }
 0xc89   :  { %14603 = vmatmul.mubr.bf16.vlgmr.msra.gmra.mxu0 %v2134_v59  ;;  %v16511_v59 = vld [vmem:[#allocation2 + $0x3e0] sm:$0xff]  }
 0xc8a   :  { %14633 = vmatpush3.bf16.msra.mxu0 %v16484_v58  ;;  %14648 = vmatprep.mubr.msk.bf16.mxu0 %vm17367_vm0, %v17366_v5  ;;  %v16510_v58 = vld [vmem:[#allocation2 + $0x3e8] sm:$0xff]  }
 0xc8b   :  { %14634 = vmatprep.subr.bf16.mxu0 %v17366_v5 }
 0xc8e   :  { %14635 = vmatpush3.bf16.msra.mxu0 %v16485_v60  ;;  %v16512_v60 = vld [vmem:[#allocation2 + $0x3d8] sm:$0xff]  }
 0xc8f   :  { %14636 = vmatprep.subr.bf16.mxu0 %v17366_v5 }
 0xc92   :  { %14637 = vmatpush3.bf16.msra.mxu0 %v16486_v61  ;;  %v16513_v61 = vld [vmem:[#allocation2 + $0x3d0] sm:$0xff]  }
 0xc93   :  { %14638 = vmatprep.subr.bf16.mxu0 %v17366_v5 }
 0xc96   :  { %14639 = vmatpush3.bf16.msra.mxu0 %v16487_v62  ;;  %v16514_v62 = vld [vmem:[#allocation2 + $0x3c8] sm:$0xff]  }
 0xc97   :  { %14640 = vmatprep.subr.bf16.mxu0 %v17366_v5 }
 0xc9a   :  { %14641 = vmatpush3.bf16.msra.mxu0 %v16488_v63  ;;  %v16515_v63 = vld [vmem:[#allocation2 + $0x3c0] sm:$0xff]  }
 0xc9b   :  { %14642 = vmatprep.subr.bf16.mxu0 %v17366_v5 }
 0xc9e   :  { %14643 = vmatpush3.bf16.msra.mxu0 %v16489_v0 }
 0xc9f   :  { %14644 = vmatprep.subr.bf16.mxu0 %v17366_v5 }
 0xca2   :  { %14645 = vmatpush3.bf16.msra.mxu0 %v16490_v1 }
 0xca3   :  { %14646 = vmatprep.subr.bf16.mxu0 %v17366_v5 }
 0xca6   :  { %14647 = vmatpush3.bf16.msra.mxu0 %v16491_v2 }
 0xca7   :  { %14678 = vmatprep.subr.bf16.mxu0 %v17366_v5 }
 0xd49   :  { %v2242_v4 = vpop.f32.mrf.mxu0 }
 0xd4a   :  { %v17749_v8 = vadd.f32 %v12603_v3, %v2242_v4 }
 0xd4b   :  { %v14604_v7 = vpop.f32.mrf.mxu0 }
 0xd4c   :  { %v2249_v12 = vmax.f32 %v17749_v8, 0.0 }
 0xd4d   :  { %v2245_v9 = vpop.f32.mrf.mxu0 }
 0xd4e   :  { %v17751_v10 = vadd.f32 %v12603_v3, %v2245_v9 }
 0xd4f   :  { %v14605_v11 = vpop.f32.mrf.mxu0 }
 0xd50   :  { %v2250_v13 = vmax.f32 %v17751_v10, 0.0  ;;  %v16516_v11 = vld [vmem:[#allocation3 + $0x138] sm:$0xff]  }
 0xd52   :  { %v2251_v14 = vpack.c.bf16 %v2250_v13, %v2249_v12 }
 0xd54   :  { %14607 = vmatpush3.bf16.msra.mxu1 %v2251_v14  ;;  %14649 = vmatmul.mubr.bf16.vlgmr.msra.gmra.mxu0 %v2251_v14 }
 0xd55   :  { %14612 = vmatprep.subr.bf16.mxu1 %v17366_v5  ;;  %14694 = vmatprep.mubr.msk.bf16.mxu0 %vm17367_vm0, %v17366_v5 }
 0xd56   :  { %14679 = vmatpush3.bf16.msra.mxu0 %v16500_v23  ;;  %v16524_v23 = vld [vmem:[#allocation3 + $0x178] sm:$0xff]  }
 0xd57   :  { %14609 = vmatmul.mubr.msk.bf16.vlgmr.msra.gmra.mxu1 %vm170_vm1, %v17494_v6  ;;  %14680 = vmatprep.subr.bf16.mxu0 %v17366_v5 }
 0xd58   :  { %14613 = vmatpush3.bf16.msra.mxu1 %v16492_v15  ;;  %14628 = vmatprep.mubr.msk.bf16.mxu1 %vm17367_vm0, %v17366_v5 }
 0xd59   :  { %14614 = vmatprep.subr.bf16.mxu1 %v17366_v5 }
 0xd5a   :  { %14681 = vmatpush3.bf16.msra.mxu0 %v16501_v24  ;;  %v16525_v24 = vld [vmem:[#allocation3 + $0x170] sm:$0xff]  }
 0xd5b   :  { %14682 = vmatprep.subr.bf16.mxu0 %v17366_v5 }
 0xd5c   :  { %14615 = vmatpush3.bf16.msra.mxu1 %v16493_v16  ;;  %v16517_v16 = vld [vmem:[#allocation3 + $0x130] sm:$0xff]  }
 0xd5d   :  { %14616 = vmatprep.subr.bf16.mxu1 %v17366_v5 }
 0xd5e   :  { %14683 = vmatpush3.bf16.msra.mxu0 %v16502_v25  ;;  %v16526_v25 = vld [vmem:[#allocation3 + $0x168] sm:$0xff]  }
 0xd5f   :  { %14684 = vmatprep.subr.bf16.mxu0 %v17366_v5 }
 0xd60   :  { %14617 = vmatpush3.bf16.msra.mxu1 %v16494_v17  ;;  %v16518_v17 = vld [vmem:[#allocation3 + $0x128] sm:$0xff]  }
 0xd61   :  { %14618 = vmatprep.subr.bf16.mxu1 %v17366_v5 }
 0xd62   :  { %14685 = vmatpush3.bf16.msra.mxu0 %v16503_v40  ;;  %v16527_v40 = vld [vmem:[#allocation3 + $0x160] sm:$0xff]  }
 0xd63   :  { %14686 = vmatprep.subr.bf16.mxu0 %v17366_v5 }
 0xd64   :  { %14619 = vmatpush3.bf16.msra.mxu1 %v16495_v18  ;;  %v16519_v18 = vld [vmem:[#allocation3 + $0x120] sm:$0xff]  }
 0xd65   :  { %14620 = vmatprep.subr.bf16.mxu1 %v17366_v5 }
 0xd66   :  { %14687 = vmatpush3.bf16.msra.mxu0 %v16504_v42  ;;  %v16528_v42 = vld [vmem:[#allocation3 + $0x158] sm:$0xff]  }
 0xd67   :  { %14688 = vmatprep.subr.bf16.mxu0 %v17366_v5 }
 0xd68   :  { %14621 = vmatpush3.bf16.msra.mxu1 %v16496_v19  ;;  %v16520_v19 = vld [vmem:[#allocation3 + $0x118] sm:$0xff]  }
 0xd69   :  { %14622 = vmatprep.subr.bf16.mxu1 %v17366_v5 }
 0xd6a   :  { %14689 = vmatpush3.bf16.msra.mxu0 %v16505_v37 }
 0xd6b   :  { %14690 = vmatprep.subr.bf16.mxu0 %v17366_v5 }
 0xd6c   :  { %14623 = vmatpush3.bf16.msra.mxu1 %v16497_v20  ;;  %v16521_v20 = vld [vmem:[#allocation3 + $0x110] sm:$0xff]  }
 0xd6d   :  { %14624 = vmatprep.subr.bf16.mxu1 %v17366_v5 }
 0xd6e   :  { %14691 = vmatpush3.bf16.msra.mxu0 %v16506_v38 }
 0xd6f   :  { %14692 = vmatprep.subr.bf16.mxu0 %v17366_v5 }
 0xd70   :  { %14625 = vmatpush3.bf16.msra.mxu1 %v16498_v21  ;;  %v16522_v21 = vld [vmem:[#allocation3 + $0x108] sm:$0xff]  }
 0xd71   :  { %14626 = vmatprep.subr.bf16.mxu1 %v17366_v5 }
 0xd72   :  { %14693 = vmatpush3.bf16.msra.mxu0 %v16507_v39 }
 0xd73   :  { %14718 = vmatprep.subr.bf16.mxu0 %v17366_v5 }
 0xd74   :  { %14627 = vmatpush3.bf16.msra.mxu1 %v16499_v22  ;;  %v16523_v22 = vld [vmem:[#allocation3 + $0x100] sm:$0xff]  }
 0xd75   :  { %14652 = vmatprep.subr.bf16.mxu1 %v17366_v5 }
 0xe14   :  { %v2499_v44 = vpop.f32.mrf.mxu0 }
 0xe16   :  { %v14650_v45 = vpop.f32.mrf.mxu0 }
 0xe17   :  { %v2286_v26 = vpop.f32.mrf.mxu1  ;;  %v12647_v45 = vld [vmem:[#allocation6 + $0x7] ss:$0 sm:$0xff] }
 0xe18   :  { %v2502_v27 = vpop.f32.mrf.mxu0 }
 0xe19   :  { %v14610_v28 = vpop.f32.mrf.mxu1 }
 0xe1a   :  { %v14651_v29 = vpop.f32.mrf.mxu0 }
 0xe1b   :  { %v2289_v31 = vpop.f32.mrf.mxu1 }
 0xe1c   :  { %v2310_v33 = vpack.c.bf16 %v2289_v31, %v2286_v26 }
 0xe1d   :  { %v14611_v36 = vpop.f32.mrf.mxu1 }
 0xe1e   :  { %14629 = vmatmul.mubr.bf16.vlgmr.msra.gmra.mxu1 %v2310_v33 }
 0xe1f   :  { %14654 = vmatprep.mubr.msk.bf16.mxu1 %vm17367_vm0, %v17366_v5 }
 0xede   :  { %v2410_v41 = vpop.f32.mrf.mxu1 }
 0xedf   :  { %v2500_v43 = vadd.f32 %v2499_v44, %v2410_v41 }
 0xee0   :  { %v14630_v47 = vpop.f32.mrf.mxu1 }
 0xee1   :  { %v17784_v49 = vadd.f32 %v12629_v46, %v2500_v43  ;;  %v16530_v47 = vld [vmem:[#allocation3 + $0x148] sm:$0xff]  }
 0xee2   :  { %v2413_v48 = vpop.f32.mrf.mxu1 }
 0xee3   :  { %v2503_v50 = vadd.f32 %v2502_v27, %v2413_v48  ;;  %v2516_v53 = vmax.f32 %v17784_v49, 0.0  ;;  %v16531_v48 = vld [vmem:[#allocation3 + $0x140] sm:$0xff]   ;;  %v16532_v49 = vld [vmem:[#allocation3 + $0x1b8] sm:$0xff]  }
 0xee4   :  { %v14631_v51 = vpop.f32.mrf.mxu1 }
 0xee5   :  { %v17786_v52 = vadd.f32 %v12629_v46, %v2503_v50  ;;  %v16529_v46 = vld [vmem:[#allocation3 + $0x150] sm:$0xff]   ;;  %v16534_v51 = vld [vmem:[#allocation3 + $0x1a8] sm:$0xff]  }
 0xee6   :  { %v16533_v50 = vld [vmem:[#allocation3 + $0x1b0] sm:$0xff]  }
 0xee7   :  { %v2517_v54 = vmax.f32 %v17786_v52, 0.0  ;;  %v16535_v52 = vld [vmem:[#allocation3 + $0x1a0] sm:$0xff]  }
 0xee9   :  { %v2518_v55 = vpack.c.bf16 %v2517_v54, %v2516_v53 }
 0xeeb   :  { %14653 = vmatpush3.bf16.msra.mxu1 %v2518_v55  ;;  %14695 = vmatmul.mubr.bf16.vlgmr.msra.gmra.mxu0 %v2518_v55 }
 0xeec   :  { %14658 = vmatprep.subr.bf16.mxu1 %v17366_v5  ;;  %14734 = vmatprep.mubr.msk.bf16.mxu0 %vm17367_vm0, %v17366_v5 }
 0xeed   :  { %14719 = vmatpush3.bf16.msra.mxu0 %v16524_v23 }
 0xeee   :  { %14655 = vmatmul.mubr.msk.bf16.vlgmr.msra.gmra.mxu1 %vm170_vm1, %v17494_v6  ;;  %14720 = vmatprep.subr.bf16.mxu0 %v17366_v5 }
 0xeef   :  { %14659 = vmatpush3.bf16.msra.mxu1 %v16508_v56  ;;  %14674 = vmatprep.mubr.msk.bf16.mxu1 %vm17367_vm0, %v17366_v5 }
 0xef0   :  { %14660 = vmatprep.subr.bf16.mxu1 %v17366_v5 }
 0xef1   :  { %14721 = vmatpush3.bf16.msra.mxu0 %v16525_v24 }
 0xef2   :  { %14722 = vmatprep.subr.bf16.mxu0 %v17366_v5 }
 0xef3   :  { %14661 = vmatpush3.bf16.msra.mxu1 %v16509_v57 }
 0xef4   :  { %14662 = vmatprep.subr.bf16.mxu1 %v17366_v5 }
 0xef5   :  { %14723 = vmatpush3.bf16.msra.mxu0 %v16526_v25 }
 0xef6   :  { %14724 = vmatprep.subr.bf16.mxu0 %v17366_v5 }
 0xef7   :  { %14663 = vmatpush3.bf16.msra.mxu1 %v16510_v58 }
 0xef8   :  { %14664 = vmatprep.subr.bf16.mxu1 %v17366_v5 }
 0xef9   :  { %14725 = vmatpush3.bf16.msra.mxu0 %v16527_v40 }
 0xefa   :  { %14726 = vmatprep.subr.bf16.mxu0 %v17366_v5 }
 0xefb   :  { %14665 = vmatpush3.bf16.msra.mxu1 %v16511_v59 }
 0xefc   :  { %14666 = vmatprep.subr.bf16.mxu1 %v17366_v5 }
 0xefd   :  { %14727 = vmatpush3.bf16.msra.mxu0 %v16528_v42 }
 0xefe   :  { %14728 = vmatprep.subr.bf16.mxu0 %v17366_v5 }
 0xeff   :  { %14667 = vmatpush3.bf16.msra.mxu1 %v16512_v60 }
 0xf00   :  { %14668 = vmatprep.subr.bf16.mxu1 %v17366_v5 }
 0xf01   :  { %14729 = vmatpush3.bf16.msra.mxu0 %v16529_v46 }
 0xf02   :  { %14730 = vmatprep.subr.bf16.mxu0 %v17366_v5 }
 0xf03   :  { %14669 = vmatpush3.bf16.msra.mxu1 %v16513_v61 }
 0xf04   :  { %14670 = vmatprep.subr.bf16.mxu1 %v17366_v5 }
 0xf05   :  { %14731 = vmatpush3.bf16.msra.mxu0 %v16530_v47 }
 0xf06   :  { %14732 = vmatprep.subr.bf16.mxu0 %v17366_v5 }
 0xf07   :  { %14671 = vmatpush3.bf16.msra.mxu1 %v16514_v62 }
 0xf08   :  { %14672 = vmatprep.subr.bf16.mxu1 %v17366_v5 }
 0xf09   :  { %14733 = vmatpush3.bf16.msra.mxu0 %v16531_v48 }
 0xf0a   :  { %14758 = vmatprep.subr.bf16.mxu0 %v17366_v5 }
 0xf0b   :  { %14673 = vmatpush3.bf16.msra.mxu1 %v16515_v63 }
 0xf0c   :  { %14698 = vmatprep.subr.bf16.mxu1 %v17366_v5 }
 0xfab   :  { %v2766_v0 = vpop.f32.mrf.mxu0 }
 0xfad   :  { %v14696_v1 = vpop.f32.mrf.mxu0 }
 0xfae   :  { %v2553_v2 = vpop.f32.mrf.mxu1 }
 0xfaf   :  { %v2769_v3 = vpop.f32.mrf.mxu0 }
 0xfb0   :  { %v14656_v4 = vpop.f32.mrf.mxu1 }
 0xfb1   :  { %v14697_v7 = vpop.f32.mrf.mxu0  ;;  %v16539_v4 = vld [vmem:[#allocation3 + $0x180] sm:$0xff]  }
 0xfb2   :  { %v2556_v9 = vpop.f32.mrf.mxu1  ;;  %v12657_v7 = vld [vmem:[#allocation8 + $0x5] ss:$0 sm:$0xff] }
 0xfb3   :  { %v2577_v14 = vpack.c.bf16 %v2556_v9, %v2553_v2  ;;  %v16537_v2 = vld [vmem:[#allocation3 + $0x190] sm:$0xff]  }
 0xfb4   :  { %v14657_v15 = vpop.f32.mrf.mxu1 }
 0xfb5   :  { %14675 = vmatmul.mubr.bf16.vlgmr.msra.gmra.mxu1 %v2577_v14 }
 0xfb6   :  { %14699 = vmatpush3.bf16.msra.mxu1 %v16516_v11  ;;  %14714 = vmatprep.mubr.msk.bf16.mxu1 %vm17367_vm0, %v17366_v5 }
 0xfb7   :  { %14700 = vmatprep.subr.bf16.mxu1 %v17366_v5 }
 0xfba   :  { %14701 = vmatpush3.bf16.msra.mxu1 %v16517_v16 }
 0xfbb   :  { %14702 = vmatprep.subr.bf16.mxu1 %v17366_v5 }
 0xfbe   :  { %14703 = vmatpush3.bf16.msra.mxu1 %v16518_v17  ;;  %v12666_v17 = vld [vmem:[#allocation8 + $0x6] ss:$0 sm:$0xff] }
 0xfbf   :  { %14704 = vmatprep.subr.bf16.mxu1 %v17366_v5 }
 0xfc2   :  { %14705 = vmatpush3.bf16.msra.mxu1 %v16519_v18 }
 0xfc3   :  { %14706 = vmatprep.subr.bf16.mxu1 %v17366_v5 }
 0xfc6   :  { %14707 = vmatpush3.bf16.msra.mxu1 %v16520_v19 }
 0xfc7   :  { %14708 = vmatprep.subr.bf16.mxu1 %v17366_v5 }
 0xfca   :  { %14709 = vmatpush3.bf16.msra.mxu1 %v16521_v20 }
 0xfcb   :  { %14710 = vmatprep.subr.bf16.mxu1 %v17366_v5 }
 0xfce   :  { %14711 = vmatpush3.bf16.msra.mxu1 %v16522_v21 }
 0xfcf   :  { %14712 = vmatprep.subr.bf16.mxu1 %v17366_v5 }
 0xfd2   :  { %14713 = vmatpush3.bf16.msra.mxu1 %v16523_v22 }
 0xfd3   :  { %14738 = vmatprep.subr.bf16.mxu1 %v17366_v5 }
0x1075   :  { %v2677_v44 = vpop.f32.mrf.mxu1 }
0x1076   :  { %v2767_v26 = vadd.f32 %v2766_v0, %v2677_v44 }
0x1077   :  { %v14676_v27 = vpop.f32.mrf.mxu1 }
0x1078   :  { %v2781_v28 = vadd.f32 %v12647_v45, %v2767_v26 }
0x1079   :  { %v2680_v29 = vpop.f32.mrf.mxu1 }
0x107a   :  { %v2770_v31 = vadd.f32 %v2769_v3, %v2680_v29  ;;  %v2783_v36 = vmax.f32 %v2781_v28, 0.0  ;;  %v16538_v3 = vld [vmem:[#allocation3 + $0x188] sm:$0xff]  }
0x107b   :  { %v14677_v33 = vpop.f32.mrf.mxu1 }
0x107c   :  { %v2782_v37 = vadd.f32 %v12647_v45, %v2770_v31  ;;  %v2785_v39 = vadd.f32 %v2783_v36, %v2516_v53  ;;  %v16536_v53 = vld [vmem:[#allocation3 + $0x198] sm:$0xff]  }
0x107e   :  { %v2784_v38 = vmax.f32 %v2782_v37, 0.0 }
0x1080   :  { %v2786_v41 = vadd.f32 %v2784_v38, %v2517_v54  ;;  %v12648_v54 = vld [vmem:[#allocation8 + $0x4] ss:$0 sm:$0xff] }
0x1082   :  { %v2787_v43 = vpack.c.bf16 %v2786_v41, %v2785_v39 }
0x1084   :  { %14715 = vmatmul.mubr.bf16.vlgmr.msra.gmra.mxu1 %v2787_v43 }
0x1085   :  { %14754 = vmatprep.mubr.msk.bf16.mxu1 %vm17367_vm0, %v17366_v5  ;;  %14739 = vmatpush3.bf16.msra.mxu1 %v16532_v49 }
0x1086   :  { %14740 = vmatprep.subr.bf16.mxu1 %v17366_v5 }
0x1089   :  { %14741 = vmatpush3.bf16.msra.mxu1 %v16533_v50 }
0x108a   :  { %14742 = vmatprep.subr.bf16.mxu1 %v17366_v5 }
0x108d   :  { %14743 = vmatpush3.bf16.msra.mxu1 %v16534_v51 }
0x108e   :  { %14744 = vmatprep.subr.bf16.mxu1 %v17366_v5 }
0x1091   :  { %14745 = vmatpush3.bf16.msra.mxu1 %v16535_v52 }
0x1092   :  { %14746 = vmatprep.subr.bf16.mxu1 %v17366_v5 }
0x1095   :  { %14747 = vmatpush3.bf16.msra.mxu1 %v16536_v53 }
0x1096   :  { %14748 = vmatprep.subr.bf16.mxu1 %v17366_v5 }
0x1099   :  { %14749 = vmatpush3.bf16.msra.mxu1 %v16537_v2 }
0x109a   :  { %14750 = vmatprep.subr.bf16.mxu1 %v17366_v5 }
0x109d   :  { %14751 = vmatpush3.bf16.msra.mxu1 %v16538_v3 }
0x109e   :  { %14752 = vmatprep.subr.bf16.mxu1 %v17366_v5 }
0x10a1   :  { %14753 = vmatpush3.bf16.msra.mxu1 %v16539_v4 }
0x1144   :  { %v2895_v55 = vpop.f32.mrf.mxu1 }
0x1145   :  { %v2896_v56 = vadd.f32 %v12648_v54, %v2895_v55 }
0x1146   :  { %v14716_v57 = vpop.f32.mrf.mxu1 }
0x1147   :  { %v2902_v59 = vmax.f32 %v2896_v56, 0.0 }
0x1148   :  { %v2898_v58 = vpop.f32.mrf.mxu1 }
0x1149   :  { %v2899_v60 = vadd.f32 %v12648_v54, %v2898_v58  ;;  %v2904_v63 = vadd.f32 %v2902_v59, %v2249_v12 }
0x114a   :  { %v14717_v61 = vpop.f32.mrf.mxu1 }
0x114b   :  { %v2903_v62 = vmax.f32 %v2899_v60, 0.0 }
0x114d   :  { %v2905_v0 = vadd.f32 %v2903_v62, %v2250_v13 }
0x114f   :  { %v2906_v1 = vpack.c.bf16 %v2905_v0, %v2904_v63 }
0x1151   :  { %14735 = vmatmul.mubr.bf16.vlgmr.msra.gmra.mxu0 %v2906_v1 }
0x1152   :  { %14760 = vmatprep.mubr.msk.bf16.mxu0 %vm17367_vm0, %v17366_v5 }
0x1211   :  { %v3014_v9 = vpop.f32.mrf.mxu0 }
0x1212   :  { %v3015_v8 = vadd.f32 %v12657_v7, %v3014_v9 }
0x1213   :  { %v14736_v11 = vpop.f32.mrf.mxu0 }
0x1214   :  { %v3021_v13 = vadd.f32 %v3015_v8, %v1596_v34 }
0x1215   :  { %v3017_v12 = vpop.f32.mrf.mxu0 }
0x1216   :  { %v3018_v14 = vadd.f32 %v12657_v7, %v3017_v12 }
0x1217   :  { %v14737_v10 = vpop.f32.mrf.mxu0 }
0x1218   :  { %v3022_v15 = vadd.f32 %v3018_v14, %v1597_v35 }
0x121a   :  { %v3023_v16 = vpack.c.bf16 %v3022_v15, %v3021_v13 }
0x121c   :  { %14755 = vmatmul.mubr.bf16.vlgmr.msra.gmra.mxu1 %v3023_v16 }
0x12dc   :  { %v3131_v18 = vpop.f32.mrf.mxu1 }
0x12dd   :  { %v17847_v19 = vadd.f32 %v12666_v17, %v3131_v18 }
0x12de   :  { %v14756_v20 = vpop.f32.mrf.mxu1 }
0x12df   :  { %v3138_v21 = vmax.f32 %v17847_v19, 0.0 }
0x12e0   :  { %v3134_v22 = vpop.f32.mrf.mxu1 }
0x12e1   :  { %v17850_v23 = vadd.f32 %v12666_v17, %v3134_v22 }
0x12e2   :  { %v14757_v24 = vpop.f32.mrf.mxu1 }
0x12e3   :  { %v3139_v25 = vmax.f32 %v17850_v23, 0.0 }
0x12e5   :  { %v3142_v30 = vpack.c.bf16 %v3139_v25, %v3138_v21 }
0x12e6   :  { %17342 = dma.done.wait [#allocation4 + $0x1], 16384 }
0x12e7   :  { %17343 = vsyncadd [#allocation4 + $0x1], 4294950912  ;;  %14784 = vmatprep.subr.bf16.mxu1 %v17366_v5  ;;  %14800 = vmatprep.mubr.msk.bf16.mxu1 %vm17367_vm0, %v17366_v5  ;;  %v16540_v32 = vld [vmem:[#allocation2 + $0x438] sm:$0xff]   ;;  %v16541_v34 = vld [vmem:[#allocation2 + $0x430] sm:$0xff]  }
0x12e8   :  { %14759 = vmatpush3.bf16.msra.mxu0 %v3142_v30  ;;  %14785 = vmatpush3.bf16.msra.mxu1 %v16540_v32  ;;  %v16542_v35 = vld [vmem:[#allocation2 + $0x478] sm:$0xff]   ;;  %v16544_v40 = vld [vmem:[#allocation2 + $0x470] sm:$0xff]   ;;  %v16543_v42 = vld [vmem:[#allocation2 + $0x428] sm:$0xff]  }
0x12e9   :  { %14764 = vmatprep.subr.bf16.mxu0 %v17366_v5  ;;  %14786 = vmatprep.subr.bf16.mxu1 %v17366_v5  ;;  %v16546_v44 = vld [vmem:[#allocation2 + $0x468] sm:$0xff]   ;;  %v16545_v45 = vld [vmem:[#allocation2 + $0x420] sm:$0xff]   ;;  %v16547_v27 = vld [vmem:[#allocation2 + $0x418] sm:$0xff]  }
0x12ea   :  { %v16548_v26 = vld [vmem:[#allocation2 + $0x460] sm:$0xff]   ;;  %v16550_v28 = vld [vmem:[#allocation2 + $0x458] sm:$0xff]   ;;  %v16549_v29 = vld [vmem:[#allocation2 + $0x410] sm:$0xff]  }
0x12eb   :  { %14761 = vmatmul.mubr.msk.bf16.vlgmr.msra.gmra.mxu0 %vm170_vm1, %v17494_v6  ;;  %v16552_v31 = vld [vmem:[#allocation2 + $0x450] sm:$0xff]   ;;  %v16551_v33 = vld [vmem:[#allocation2 + $0x408] sm:$0xff]   ;;  %v16553_v36 = vld [vmem:[#allocation2 + $0x400] sm:$0xff]  }
0x12ec   :  { %14780 = vmatprep.mubr.msk.bf16.mxu0 %vm17367_vm0, %v17366_v5  ;;  %14765 = vmatpush3.bf16.msra.mxu0 %v16542_v35  ;;  %v16554_v37 = vld [vmem:[#allocation2 + $0x448] sm:$0xff]   ;;  %v16555_v38 = vld [vmem:[#allocation2 + $0x440] sm:$0xff]   ;;  %v16556_v39 = vld [vmem:[#allocation2 + $0x4b8] sm:$0xff]  }
0x12ed   :  { %14766 = vmatprep.subr.bf16.mxu0 %v17366_v5  ;;  %14787 = vmatpush3.bf16.msra.mxu1 %v16541_v34  ;;  %v16557_v41 = vld [vmem:[#allocation2 + $0x4b0] sm:$0xff]   ;;  %v16558_v43 = vld [vmem:[#allocation2 + $0x4a8] sm:$0xff]   ;;  %v16559_v46 = vld [vmem:[#allocation2 + $0x4a0] sm:$0xff]  }
0x12ee   :  { %14788 = vmatprep.subr.bf16.mxu1 %v17366_v5  ;;  %v16560_v47 = vld [vmem:[#allocation2 + $0x498] sm:$0xff]   ;;  %v16561_v57 = vld [vmem:[#allocation2 + $0x490] sm:$0xff]   ;;  %v16562_v58 = vld [vmem:[#allocation2 + $0x488] sm:$0xff]  }
0x12ef   :  { %v16563_v59 = vld [vmem:[#allocation2 + $0x480] sm:$0xff]   ;;  %v12692_v62 = vld [vmem:[#allocation6 + $0x8] ss:$0 sm:$0xff]  ;;  %v16564_v8 = vld [vmem:[#allocation2 + $0x4f8] sm:$0xff]  }
0x12f0   :  { %14767 = vmatpush3.bf16.msra.mxu0 %v16544_v40  ;;  %v16565_v12 = vld [vmem:[#allocation2 + $0x4f0] sm:$0xff]   ;;  %v16566_v14 = vld [vmem:[#allocation2 + $0x4e8] sm:$0xff]   ;;  %v16567_v10 = vld [vmem:[#allocation2 + $0x4e0] sm:$0xff]  }
0x12f1   :  { %14768 = vmatprep.subr.bf16.mxu0 %v17366_v5  ;;  %14789 = vmatpush3.bf16.msra.mxu1 %v16543_v42  ;;  %v16568_v13 = vld [vmem:[#allocation2 + $0x4d8] sm:$0xff]   ;;  %v16569_v15 = vld [vmem:[#allocation2 + $0x4d0] sm:$0xff]   ;;  %v16570_v16 = vld [vmem:[#allocation2 + $0x4c8] sm:$0xff]  }
0x12f2   :  { %14790 = vmatprep.subr.bf16.mxu1 %v17366_v5  ;;  %v16571_v17 = vld [vmem:[#allocation2 + $0x4c0] sm:$0xff]   ;;  %v16572_v35 = vld [vmem:[#allocation3 + $0x1f8] sm:$0xff]  }
0x12f4   :  { %14769 = vmatpush3.bf16.msra.mxu0 %v16546_v44  ;;  %v16573_v44 = vld [vmem:[#allocation3 + $0x1f0] sm:$0xff]  }
0x12f5   :  { %14770 = vmatprep.subr.bf16.mxu0 %v17366_v5  ;;  %14791 = vmatpush3.bf16.msra.mxu1 %v16545_v45  ;;  %v16574_v45 = vld [vmem:[#allocation3 + $0x1e8] sm:$0xff]  }
0x12f6   :  { %14792 = vmatprep.subr.bf16.mxu1 %v17366_v5 }
0x12f8   :  { %14771 = vmatpush3.bf16.msra.mxu0 %v16548_v26  ;;  %v16575_v26 = vld [vmem:[#allocation3 + $0x1e0] sm:$0xff]  }
0x12f9   :  { %14772 = vmatprep.subr.bf16.mxu0 %v17366_v5  ;;  %14793 = vmatpush3.bf16.msra.mxu1 %v16547_v27  ;;  %v16576_v27 = vld [vmem:[#allocation3 + $0x1d8] sm:$0xff]  }
0x12fa   :  { %14794 = vmatprep.subr.bf16.mxu1 %v17366_v5 }
0x12fc   :  { %14773 = vmatpush3.bf16.msra.mxu0 %v16550_v28  ;;  %v16577_v28 = vld [vmem:[#allocation3 + $0x1d0] sm:$0xff]  }
0x12fd   :  { %14774 = vmatprep.subr.bf16.mxu0 %v17366_v5  ;;  %14795 = vmatpush3.bf16.msra.mxu1 %v16549_v29  ;;  %v16578_v29 = vld [vmem:[#allocation3 + $0x1c8] sm:$0xff]  }
0x12fe   :  { %14796 = vmatprep.subr.bf16.mxu1 %v17366_v5 }
0x1300   :  { %14775 = vmatpush3.bf16.msra.mxu0 %v16552_v31  ;;  %v16579_v31 = vld [vmem:[#allocation3 + $0x1c0] sm:$0xff]  }
0x1301   :  { %14776 = vmatprep.subr.bf16.mxu0 %v17366_v5  ;;  %14797 = vmatpush3.bf16.msra.mxu1 %v16551_v33 }
0x1302   :  { %14798 = vmatprep.subr.bf16.mxu1 %v17366_v5 }
0x1304   :  { %14777 = vmatpush3.bf16.msra.mxu0 %v16554_v37 }
0x1305   :  { %14799 = vmatpush3.bf16.msra.mxu1 %v16553_v36  ;;  %14778 = vmatprep.subr.bf16.mxu0 %v17366_v5  ;;  %v12710_v36 = vld [vmem:[#allocation6 + $0x9] ss:$0 sm:$0xff] }
0x1306   :  { %14830 = vmatprep.subr.bf16.mxu1 %v17366_v5 }
0x1308   :  { %14801 = vmatmul.mubr.bf16.vlgmr.msra.gmra.mxu1 %v3142_v30  ;;  %14779 = vmatpush3.bf16.msra.mxu0 %v16555_v38 }
0x1309   :  { %14846 = vmatprep.mubr.msk.bf16.mxu1 %vm17367_vm0, %v17366_v5  ;;  %14804 = vmatprep.subr.bf16.mxu0 %v17366_v5 }
0x130a   :  { %14831 = vmatpush3.bf16.msra.mxu1 %v16556_v39 }
0x130b   :  { %14832 = vmatprep.subr.bf16.mxu1 %v17366_v5 }
0x130e   :  { %14833 = vmatpush3.bf16.msra.mxu1 %v16557_v41 }
0x130f   :  { %14834 = vmatprep.subr.bf16.mxu1 %v17366_v5 }
0x1312   :  { %14835 = vmatpush3.bf16.msra.mxu1 %v16558_v43 }
0x1313   :  { %14836 = vmatprep.subr.bf16.mxu1 %v17366_v5 }
0x1316   :  { %14837 = vmatpush3.bf16.msra.mxu1 %v16559_v46 }
0x1317   :  { %14838 = vmatprep.subr.bf16.mxu1 %v17366_v5 }
0x131a   :  { %14839 = vmatpush3.bf16.msra.mxu1 %v16560_v47 }
0x131b   :  { %14840 = vmatprep.subr.bf16.mxu1 %v17366_v5 }
0x131e   :  { %14841 = vmatpush3.bf16.msra.mxu1 %v16561_v57  ;;  %v16584_v57 = vld [vmem:[#allocation2 + $0x518] sm:$0xff]  }
0x131f   :  { %14842 = vmatprep.subr.bf16.mxu1 %v17366_v5 }
0x1322   :  { %14843 = vmatpush3.bf16.msra.mxu1 %v16562_v58  ;;  %v16585_v58 = vld [vmem:[#allocation2 + $0x510] sm:$0xff]  }
0x1323   :  { %14844 = vmatprep.subr.bf16.mxu1 %v17366_v5 }
0x1326   :  { %14845 = vmatpush3.bf16.msra.mxu1 %v16563_v59  ;;  %v16586_v59 = vld [vmem:[#allocation2 + $0x508] sm:$0xff]  }
0x1327   :  { %14870 = vmatprep.subr.bf16.mxu1 %v17366_v5 }
0x13ab   :  { %v3177_v48 = vpop.f32.mrf.mxu0 }
0x13ad   :  { %v14762_v49 = vpop.f32.mrf.mxu0 }
0x13af   :  { %v3180_v50 = vpop.f32.mrf.mxu0 }
0x13b0   :  { %v3200_v51 = vpack.c.bf16 %v3180_v50, %v3177_v48 }
0x13b1   :  { %v14763_v52 = vpop.f32.mrf.mxu0 }
0x13b2   :  { %14781 = vmatmul.mubr.bf16.vlgmr.msra.gmra.mxu0 %v3200_v51  ;;  %v16580_v52 = vld [vmem:[#allocation2 + $0x538] sm:$0xff]  }
0x13b3   :  { %14806 = vmatprep.mubr.msk.bf16.mxu0 %vm17367_vm0, %v17366_v5 }
0x13c8   :  { %v3389_v53 = vpop.f32.mrf.mxu1 }
0x13ca   :  { %v14802_v54 = vpop.f32.mrf.mxu1 }
0x13cb   :  { %v16581_v54 = vld [vmem:[#allocation2 + $0x530] sm:$0xff]  }
0x13cc   :  { %v3392_v55 = vpop.f32.mrf.mxu1 }
0x13ce   :  { %v14803_v56 = vpop.f32.mrf.mxu1 }
0x13cf   :  { %v16583_v56 = vld [vmem:[#allocation2 + $0x520] sm:$0xff]  }
0x1472   :  { %v3300_v60 = vpop.f32.mrf.mxu0 }
0x1473   :  { %v3390_v61 = vadd.f32 %v3389_v53, %v3300_v60  ;;  %v16587_v60 = vld [vmem:[#allocation2 + $0x500] sm:$0xff]  }
0x1474   :  { %v14782_v63 = vpop.f32.mrf.mxu0 }
0x1475   :  { %v17896_v1 = vadd.f32 %v12692_v62, %v3390_v61  ;;  %v12711_v61 = vld [vmem:[#allocation8 + $0x7] ss:$0 sm:$0xff] }
0x1476   :  { %v3303_v0 = vpop.f32.mrf.mxu0 }
0x1477   :  { %v3393_v2 = vadd.f32 %v3392_v55, %v3303_v0  ;;  %v3406_v7 = vmax.f32 %v17896_v1, 0.0  ;;  %v16582_v55 = vld [vmem:[#allocation2 + $0x528] sm:$0xff]  }
0x1478   :  { %v14783_v3 = vpop.f32.mrf.mxu0 }
0x1479   :  { %v17898_v4 = vadd.f32 %v12692_v62, %v3393_v2 }
0x147b   :  { %v3407_v9 = vmax.f32 %v17898_v4, 0.0 }
0x147d   :  { %v3408_v11 = vpack.c.bf16 %v3407_v9, %v3406_v7 }
0x147f   :  { %14805 = vmatpush3.bf16.msra.mxu0 %v3408_v11  ;;  %14847 = vmatmul.mubr.bf16.vlgmr.msra.gmra.mxu1 %v3408_v11  ;;  %v16588_v11 = vld [vmem:[#allocation2 + $0x578] sm:$0xff]  }
0x1480   :  { %14810 = vmatprep.subr.bf16.mxu0 %v17366_v5  ;;  %14872 = vmatprep.mubr.msk.bf16.mxu1 %vm17367_vm0, %v17366_v5 }
0x1482   :  { %14807 = vmatmul.mubr.msk.bf16.vlgmr.msra.gmra.mxu0 %vm170_vm1, %v17494_v6 }
0x1483   :  { %14811 = vmatpush3.bf16.msra.mxu0 %v16564_v8  ;;  %14826 = vmatprep.mubr.msk.bf16.mxu0 %vm17367_vm0, %v17366_v5  ;;  %v16589_v8 = vld [vmem:[#allocation2 + $0x570] sm:$0xff]  }
0x1484   :  { %14812 = vmatprep.subr.bf16.mxu0 %v17366_v5 }
0x1487   :  { %14813 = vmatpush3.bf16.msra.mxu0 %v16565_v12  ;;  %v16590_v12 = vld [vmem:[#allocation2 + $0x568] sm:$0xff]  }
0x1488   :  { %14814 = vmatprep.subr.bf16.mxu0 %v17366_v5 }
0x148b   :  { %14815 = vmatpush3.bf16.msra.mxu0 %v16566_v14  ;;  %v16591_v14 = vld [vmem:[#allocation2 + $0x560] sm:$0xff]  }
0x148c   :  { %14816 = vmatprep.subr.bf16.mxu0 %v17366_v5 }
0x148f   :  { %14817 = vmatpush3.bf16.msra.mxu0 %v16567_v10  ;;  %v16592_v10 = vld [vmem:[#allocation2 + $0x558] sm:$0xff]  }
0x1490   :  { %14818 = vmatprep.subr.bf16.mxu0 %v17366_v5 }
0x1493   :  { %14819 = vmatpush3.bf16.msra.mxu0 %v16568_v13  ;;  %v16593_v13 = vld [vmem:[#allocation2 + $0x550] sm:$0xff]  }
0x1494   :  { %14820 = vmatprep.subr.bf16.mxu0 %v17366_v5 }
0x1497   :  { %14821 = vmatpush3.bf16.msra.mxu0 %v16569_v15  ;;  %v16594_v15 = vld [vmem:[#allocation2 + $0x548] sm:$0xff]  }
0x1498   :  { %14822 = vmatprep.subr.bf16.mxu0 %v17366_v5 }
0x149b   :  { %14823 = vmatpush3.bf16.msra.mxu0 %v16570_v16  ;;  %v16595_v16 = vld [vmem:[#allocation2 + $0x540] sm:$0xff]  }
0x149c   :  { %14824 = vmatprep.subr.bf16.mxu0 %v17366_v5 }
0x149f   :  { %14825 = vmatpush3.bf16.msra.mxu0 %v16571_v17  ;;  %v16596_v17 = vld [vmem:[#allocation2 + $0x5b8] sm:$0xff]  }
0x14a0   :  { %14850 = vmatprep.subr.bf16.mxu0 %v17366_v5 }
0x153f   :  { %v3656_v18 = vpop.f32.mrf.mxu1 }
0x1541   :  { %v14848_v20 = vpop.f32.mrf.mxu1 }
0x1542   :  { %v3443_v22 = vpop.f32.mrf.mxu0  ;;  %v16598_v20 = vld [vmem:[#allocation2 + $0x5a8] sm:$0xff]  }
0x1543   :  { %v3659_v24 = vpop.f32.mrf.mxu1 }
0x1544   :  { %v14808_v30 = vpop.f32.mrf.mxu0 }
0x1545   :  { %v14849_v32 = vpop.f32.mrf.mxu1 }
0x1546   :  { %v3446_v34 = vpop.f32.mrf.mxu0 }
0x1547   :  { %v3467_v40 = vpack.c.bf16 %v3446_v34, %v3443_v22  ;;  %v16599_v22 = vld [vmem:[#allocation2 + $0x5a0] sm:$0xff]  }
0x1548   :  { %v14809_v42 = vpop.f32.mrf.mxu0 }
0x1549   :  { %14827 = vmatmul.mubr.bf16.vlgmr.msra.gmra.mxu0 %v3467_v40 }
0x154a   :  { %14851 = vmatpush3.bf16.msra.mxu0 %v16572_v35  ;;  %14866 = vmatprep.mubr.msk.bf16.mxu0 %vm17367_vm0, %v17366_v5 }
0x154b   :  { %14852 = vmatprep.subr.bf16.mxu0 %v17366_v5 }
0x154e   :  { %14853 = vmatpush3.bf16.msra.mxu0 %v16573_v44 }
0x154f   :  { %14854 = vmatprep.subr.bf16.mxu0 %v17366_v5 }
0x1552   :  { %14855 = vmatpush3.bf16.msra.mxu0 %v16574_v45 }
0x1553   :  { %14856 = vmatprep.subr.bf16.mxu0 %v17366_v5 }
0x1556   :  { %14857 = vmatpush3.bf16.msra.mxu0 %v16575_v26 }
0x1557   :  { %14858 = vmatprep.subr.bf16.mxu0 %v17366_v5 }
0x155a   :  { %14859 = vmatpush3.bf16.msra.mxu0 %v16576_v27  ;;  %v16601_v27 = vld [vmem:[#allocation2 + $0x590] sm:$0xff]  }
0x155b   :  { %14860 = vmatprep.subr.bf16.mxu0 %v17366_v5 }
0x155e   :  { %14861 = vmatpush3.bf16.msra.mxu0 %v16577_v28  ;;  %v16602_v28 = vld [vmem:[#allocation2 + $0x588] sm:$0xff]  }
0x155f   :  { %14862 = vmatprep.subr.bf16.mxu0 %v17366_v5 }
0x1562   :  { %14863 = vmatpush3.bf16.msra.mxu0 %v16578_v29  ;;  %v16603_v29 = vld [vmem:[#allocation2 + $0x580] sm:$0xff]  }
0x1563   :  { %14864 = vmatprep.subr.bf16.mxu0 %v17366_v5 }
0x1566   :  { %14865 = vmatpush3.bf16.msra.mxu0 %v16579_v31 }
0x1567   :  { %14896 = vmatprep.subr.bf16.mxu0 %v17366_v5 }
0x1609   :  { %v3567_v33 = vpop.f32.mrf.mxu0 }
0x160a   :  { %v3657_v37 = vadd.f32 %v3656_v18, %v3567_v33  ;;  %v16597_v18 = vld [vmem:[#allocation2 + $0x5b0] sm:$0xff]  }
0x160b   :  { %v14828_v38 = vpop.f32.mrf.mxu0 }
0x160c   :  { %v3671_v39 = vadd.f32 %v12710_v36, %v3657_v37 }
0x160d   :  { %v3570_v41 = vpop.f32.mrf.mxu0 }
0x160e   :  { %v3660_v43 = vadd.f32 %v3659_v24, %v3570_v41  ;;  %v3673_v47 = vmax.f32 %v3671_v39, 0.0  ;;  %v16600_v24 = vld [vmem:[#allocation2 + $0x598] sm:$0xff]  }
0x160f   :  { %v14829_v46 = vpop.f32.mrf.mxu0 }
0x1610   :  { %v3672_v48 = vadd.f32 %v12710_v36, %v3660_v43  ;;  %v3675_v50 = vadd.f32 %v3673_v47, %v3406_v7  ;;  %v12737_v36 = vld [vmem:[#allocation6 + $0xa] ss:$0 sm:$0xff] }
0x1612   :  { %v3674_v49 = vmax.f32 %v3672_v48, 0.0 }
0x1614   :  { %v3676_v51 = vadd.f32 %v3674_v49, %v3407_v9 }
0x1616   :  { %v3677_v53 = vpack.c.bf16 %v3676_v51, %v3675_v50  ;;  %v16604_v50 = vld [vmem:[#allocation2 + $0x5f8] sm:$0xff]   ;;  %v16605_v51 = vld [vmem:[#allocation2 + $0x5f0] sm:$0xff]  }
0x1618   :  { %14867 = vmatmul.mubr.bf16.vlgmr.msra.gmra.mxu0 %v3677_v53  ;;  %v16607_v53 = vld [vmem:[#allocation2 + $0x5e0] sm:$0xff]  }
0x1619   :  { %14897 = vmatpush3.bf16.msra.mxu0 %v16580_v52  ;;  %14912 = vmatprep.mubr.msk.bf16.mxu0 %vm17367_vm0, %v17366_v5  ;;  %v16606_v52 = vld [vmem:[#allocation2 + $0x5e8] sm:$0xff]  }
0x161a   :  { %14898 = vmatprep.subr.bf16.mxu0 %v17366_v5 }
0x161d   :  { %14899 = vmatpush3.bf16.msra.mxu0 %v16581_v54  ;;  %v16608_v54 = vld [vmem:[#allocation2 + $0x5d8] sm:$0xff]  }
0x161e   :  { %14900 = vmatprep.subr.bf16.mxu0 %v17366_v5 }
0x1621   :  { %14901 = vmatpush3.bf16.msra.mxu0 %v16582_v55  ;;  %v16609_v55 = vld [vmem:[#allocation2 + $0x5d0] sm:$0xff]  }
0x1622   :  { %14902 = vmatprep.subr.bf16.mxu0 %v17366_v5 }
0x1625   :  { %14903 = vmatpush3.bf16.msra.mxu0 %v16583_v56  ;;  %v16610_v56 = vld [vmem:[#allocation2 + $0x5c8] sm:$0xff]  }
0x1626   :  { %14904 = vmatprep.subr.bf16.mxu0 %v17366_v5 }
0x1629   :  { %14905 = vmatpush3.bf16.msra.mxu0 %v16584_v57  ;;  %v16611_v57 = vld [vmem:[#allocation2 + $0x5c0] sm:$0xff]  }
0x162a   :  { %14906 = vmatprep.subr.bf16.mxu0 %v17366_v5 }
0x162d   :  { %14907 = vmatpush3.bf16.msra.mxu0 %v16585_v58 }
0x162e   :  { %14908 = vmatprep.subr.bf16.mxu0 %v17366_v5 }
0x1631   :  { %14909 = vmatpush3.bf16.msra.mxu0 %v16586_v59 }
0x1632   :  { %14910 = vmatprep.subr.bf16.mxu0 %v17366_v5 }
0x1635   :  { %14911 = vmatpush3.bf16.msra.mxu0 %v16587_v60 }
0x1636   :  { %14942 = vmatprep.subr.bf16.mxu0 %v17366_v5 }
0x16d8   :  { %v3785_v62 = vpop.f32.mrf.mxu0 }
0x16d9   :  { %v17945_v0 = vadd.f32 %v12711_v61, %v3785_v62 }
0x16da   :  { %v14868_v63 = vpop.f32.mrf.mxu0 }
0x16db   :  { %v3792_v4 = vmax.f32 %v17945_v0, 0.0 }
0x16dc   :  { %v3788_v1 = vpop.f32.mrf.mxu0 }
0x16dd   :  { %v17947_v2 = vadd.f32 %v12711_v61, %v3788_v1 }
0x16de   :  { %v14869_v3 = vpop.f32.mrf.mxu0 }
0x16df   :  { %v3793_v7 = vmax.f32 %v17947_v2, 0.0 }
0x16e1   :  { %v3794_v9 = vpack.c.bf16 %v3793_v7, %v3792_v4 }
0x16e3   :  { %14871 = vmatpush3.bf16.msra.mxu1 %v3794_v9  ;;  %14913 = vmatmul.mubr.bf16.vlgmr.msra.gmra.mxu0 %v3794_v9 }
0x16e4   :  { %14876 = vmatprep.subr.bf16.mxu1 %v17366_v5  ;;  %14958 = vmatprep.mubr.msk.bf16.mxu0 %vm17367_vm0, %v17366_v5 }
0x16e5   :  { %14943 = vmatpush3.bf16.msra.mxu0 %v16596_v17 }
0x16e6   :  { %14873 = vmatmul.mubr.msk.bf16.vlgmr.msra.gmra.mxu1 %vm170_vm1, %v17494_v6  ;;  %14944 = vmatprep.subr.bf16.mxu0 %v17366_v5 }
0x16e7   :  { %14877 = vmatpush3.bf16.msra.mxu1 %v16588_v11  ;;  %14892 = vmatprep.mubr.msk.bf16.mxu1 %vm17367_vm0, %v17366_v5 }
0x16e8   :  { %14878 = vmatprep.subr.bf16.mxu1 %v17366_v5 }
0x16e9   :  { %14945 = vmatpush3.bf16.msra.mxu0 %v16597_v18 }
0x16ea   :  { %14946 = vmatprep.subr.bf16.mxu0 %v17366_v5 }
0x16eb   :  { %14879 = vmatpush3.bf16.msra.mxu1 %v16589_v8  ;;  %v12755_v8 = vld [vmem:[#allocation6 + $0xb] ss:$0 sm:$0xff] }
0x16ec   :  { %14880 = vmatprep.subr.bf16.mxu1 %v17366_v5 }
0x16ed   :  { %14947 = vmatpush3.bf16.msra.mxu0 %v16598_v20 }
0x16ee   :  { %14948 = vmatprep.subr.bf16.mxu0 %v17366_v5 }
0x16ef   :  { %14881 = vmatpush3.bf16.msra.mxu1 %v16590_v12 }
0x16f0   :  { %14882 = vmatprep.subr.bf16.mxu1 %v17366_v5 }
0x16f1   :  { %14949 = vmatpush3.bf16.msra.mxu0 %v16599_v22 }
0x16f2   :  { %14950 = vmatprep.subr.bf16.mxu0 %v17366_v5 }
0x16f3   :  { %14883 = vmatpush3.bf16.msra.mxu1 %v16591_v14 }
0x16f4   :  { %14884 = vmatprep.subr.bf16.mxu1 %v17366_v5 }
0x16f5   :  { %14951 = vmatpush3.bf16.msra.mxu0 %v16600_v24 }
0x16f6   :  { %14952 = vmatprep.subr.bf16.mxu0 %v17366_v5 }
0x16f7   :  { %14885 = vmatpush3.bf16.msra.mxu1 %v16592_v10 }
0x16f8   :  { %14886 = vmatprep.subr.bf16.mxu1 %v17366_v5 }
0x16f9   :  { %14953 = vmatpush3.bf16.msra.mxu0 %v16601_v27 }
0x16fa   :  { %14954 = vmatprep.subr.bf16.mxu0 %v17366_v5 }
0x16fb   :  { %14887 = vmatpush3.bf16.msra.mxu1 %v16593_v13 }
0x16fc   :  { %14888 = vmatprep.subr.bf16.mxu1 %v17366_v5 }
0x16fd   :  { %14955 = vmatpush3.bf16.msra.mxu0 %v16602_v28 }
0x16fe   :  { %14956 = vmatprep.subr.bf16.mxu0 %v17366_v5 }
0x16ff   :  { %14889 = vmatpush3.bf16.msra.mxu1 %v16594_v15 }
0x1700   :  { %14890 = vmatprep.subr.bf16.mxu1 %v17366_v5 }
0x1701   :  { %14957 = vmatpush3.bf16.msra.mxu0 %v16603_v29 }
0x1703   :  { %14891 = vmatpush3.bf16.msra.mxu1 %v16595_v16 }
0x1704   :  { %14916 = vmatprep.subr.bf16.mxu1 %v17366_v5 }
0x17a3   :  { %v4042_v30 = vpop.f32.mrf.mxu0 }
0x17a5   :  { %v14914_v32 = vpop.f32.mrf.mxu0 }
0x17a6   :  { %v3829_v34 = vpop.f32.mrf.mxu1 }
0x17a7   :  { %v4045_v35 = vpop.f32.mrf.mxu0 }
0x17a8   :  { %v14874_v40 = vpop.f32.mrf.mxu1 }
0x17a9   :  { %v14915_v42 = vpop.f32.mrf.mxu0 }
0x17aa   :  { %v3832_v44 = vpop.f32.mrf.mxu1 }
0x17ab   :  { %v3853_v45 = vpack.c.bf16 %v3832_v44, %v3829_v34 }
0x17ac   :  { %v14875_v26 = vpop.f32.mrf.mxu1 }
0x17ad   :  { %14893 = vmatmul.mubr.bf16.vlgmr.msra.gmra.mxu1 %v3853_v45 }
0x17ae   :  { %14918 = vmatprep.mubr.msk.bf16.mxu1 %vm17367_vm0, %v17366_v5 }
0x186d   :  { %v3953_v31 = vpop.f32.mrf.mxu1 }
0x186e   :  { %v4043_v33 = vadd.f32 %v4042_v30, %v3953_v31 }
0x186f   :  { %v14894_v37 = vpop.f32.mrf.mxu1 }
0x1870   :  { %v4057_v39 = vadd.f32 %v12737_v36, %v4043_v33 }
0x1871   :  { %v3956_v38 = vpop.f32.mrf.mxu1 }
0x1872   :  { %v4046_v41 = vadd.f32 %v4045_v35, %v3956_v38  ;;  %v4059_v47 = vmax.f32 %v4057_v39, 0.0 }
0x1873   :  { %v14895_v43 = vpop.f32.mrf.mxu1 }
0x1874   :  { %v4058_v46 = vadd.f32 %v12737_v36, %v4046_v41 }
0x1876   :  { %v4060_v48 = vmax.f32 %v4058_v46, 0.0 }
0x1878   :  { %v4061_v49 = vpack.c.bf16 %v4060_v48, %v4059_v47 }
0x187a   :  { %14917 = vmatpush3.bf16.msra.mxu1 %v4061_v49  ;;  %14959 = vmatmul.mubr.bf16.vlgmr.msra.gmra.mxu0 %v4061_v49 }
0x187b   :  { %14922 = vmatprep.subr.bf16.mxu1 %v17366_v5 }
0x187d   :  { %14919 = vmatmul.mubr.msk.bf16.vlgmr.msra.gmra.mxu1 %vm170_vm1, %v17494_v6 }
0x187e   :  { %14923 = vmatpush3.bf16.msra.mxu1 %v16604_v50  ;;  %14938 = vmatprep.mubr.msk.bf16.mxu1 %vm17367_vm0, %v17366_v5 }
0x187f   :  { %14924 = vmatprep.subr.bf16.mxu1 %v17366_v5 }
0x1882   :  { %14925 = vmatpush3.bf16.msra.mxu1 %v16605_v51 }
0x1883   :  { %14926 = vmatprep.subr.bf16.mxu1 %v17366_v5 }
0x1886   :  { %14927 = vmatpush3.bf16.msra.mxu1 %v16606_v52 }
0x1887   :  { %14928 = vmatprep.subr.bf16.mxu1 %v17366_v5 }
0x188a   :  { %14929 = vmatpush3.bf16.msra.mxu1 %v16607_v53 }
0x188b   :  { %14930 = vmatprep.subr.bf16.mxu1 %v17366_v5 }
0x188e   :  { %14931 = vmatpush3.bf16.msra.mxu1 %v16608_v54 }
0x188f   :  { %14932 = vmatprep.subr.bf16.mxu1 %v17366_v5 }
0x1892   :  { %14933 = vmatpush3.bf16.msra.mxu1 %v16609_v55 }
0x1893   :  { %14934 = vmatprep.subr.bf16.mxu1 %v17366_v5 }
0x1896   :  { %14935 = vmatpush3.bf16.msra.mxu1 %v16610_v56 }
0x1897   :  { %14936 = vmatprep.subr.bf16.mxu1 %v17366_v5 }
0x189a   :  { %14937 = vmatpush3.bf16.msra.mxu1 %v16611_v57 }
0x193a   :  { %v4309_v58 = vpop.f32.mrf.mxu0 }
0x193c   :  { %v14960_v59 = vpop.f32.mrf.mxu0 }
0x193d   :  { %v4096_v60 = vpop.f32.mrf.mxu1 }
0x193e   :  { %v4312_v61 = vpop.f32.mrf.mxu0 }
0x193f   :  { %v14920_v62 = vpop.f32.mrf.mxu1 }
0x1940   :  { %v14961_v63 = vpop.f32.mrf.mxu0 }
0x1941   :  { %v4099_v1 = vpop.f32.mrf.mxu1 }
0x1942   :  { %v4120_v3 = vpack.c.bf16 %v4099_v1, %v4096_v60 }
0x1943   :  { %v14921_v9 = vpop.f32.mrf.mxu1 }
0x1944   :  { %14939 = vmatmul.mubr.bf16.vlgmr.msra.gmra.mxu1 %v4120_v3 }
0x1a04   :  { %v4220_v11 = vpop.f32.mrf.mxu1 }
0x1a05   :  { %v4310_v12 = vadd.f32 %v4309_v58, %v4220_v11 }
0x1a06   :  { %v14940_v14 = vpop.f32.mrf.mxu1 }
0x1a07   :  { %v4324_v10 = vadd.f32 %v12755_v8, %v4310_v12 }
0x1a08   :  { %v4223_v13 = vpop.f32.mrf.mxu1 }
0x1a09   :  { %v4326_v15 = vmax.f32 %v4324_v10, 0.0  ;;  %v4313_v16 = vadd.f32 %v4312_v61, %v4223_v13 }
0x1a0a   :  { %v14941_v17 = vpop.f32.mrf.mxu1 }
0x1a0b   :  { %v4328_v18 = vadd.f32 %v4326_v15, %v4059_v47  ;;  %v4325_v20 = vadd.f32 %v12755_v8, %v4313_v16 }
0x1a0d   :  { %v4327_v22 = vmax.f32 %v4325_v20, 0.0 }
0x1a0f   :  { %v4329_v24 = vadd.f32 %v4327_v22, %v4060_v48 }
0x1a10   :  { %17344 = dma.done.wait [#allocation5 + $0x1], 8192 }
0x1a11   :  { %17345 = vsyncadd [#allocation5 + $0x1], 4294959104  ;;  %14962 = vmatprep.subr.bf16.mxu1 %v17366_v5  ;;  %14978 = vmatprep.mubr.msk.bf16.mxu1 %vm17367_vm0, %v17366_v5  ;;  %v16612_v30 = vld [vmem:[#allocation3 + $0x238] sm:$0xff]   ;;  %v16613_v32 = vld [vmem:[#allocation3 + $0x230] sm:$0xff]   ;;  %v4332_v33 = vpack.c.bf16 %v4329_v24, %v4328_v18 }
0x1a12   :  { %14982 = vmatprep.subr.bf16.mxu0 %v17366_v5  ;;  %14998 = vmatprep.mubr.msk.bf16.mxu0 %vm17367_vm0, %v17366_v5  ;;  %v16614_v34 = vld [vmem:[#allocation3 + $0x228] sm:$0xff]   ;;  %v16620_v35 = vld [vmem:[#allocation3 + $0x278] sm:$0xff]   ;;  %v16615_v40 = vld [vmem:[#allocation3 + $0x220] sm:$0xff]  }
0x1a13   :  { %14963 = vmatpush3.bf16.msra.mxu1 %v16612_v30  ;;  %14983 = vmatpush3.bf16.msra.mxu0 %v16620_v35  ;;  %v16621_v42 = vld [vmem:[#allocation3 + $0x270] sm:$0xff]   ;;  %v16616_v44 = vld [vmem:[#allocation3 + $0x218] sm:$0xff]   ;;  %v16622_v45 = vld [vmem:[#allocation3 + $0x268] sm:$0xff]  }
0x1a14   :  { %14964 = vmatprep.subr.bf16.mxu1 %v17366_v5  ;;  %14984 = vmatprep.subr.bf16.mxu0 %v17366_v5  ;;  %v16617_v26 = vld [vmem:[#allocation3 + $0x210] sm:$0xff]   ;;  %v16623_v27 = vld [vmem:[#allocation3 + $0x260] sm:$0xff]   ;;  %v16618_v28 = vld [vmem:[#allocation3 + $0x208] sm:$0xff]  }
0x1a15   :  { %v16624_v29 = vld [vmem:[#allocation3 + $0x258] sm:$0xff]   ;;  %v16619_v31 = vld [vmem:[#allocation3 + $0x200] sm:$0xff]   ;;  %v16625_v36 = vld [vmem:[#allocation3 + $0x250] sm:$0xff]  }
0x1a16   :  { %v16626_v37 = vld [vmem:[#allocation3 + $0x248] sm:$0xff]   ;;  %v16627_v38 = vld [vmem:[#allocation3 + $0x240] sm:$0xff]   ;;  %v16628_v54 = vld [vmem:[#allocation2 + $0x638] sm:$0xff]  }
0x1a17   :  { %14965 = vmatpush3.bf16.msra.mxu1 %v16613_v32  ;;  %14985 = vmatpush3.bf16.msra.mxu0 %v16621_v42  ;;  %v12756_v39 = vld [vmem:[#allocation8 + $0x8] ss:$0 sm:$0xff]  ;;  %v16629_v56 = vld [vmem:[#allocation2 + $0x630] sm:$0xff]   ;;  %v16631_v0 = vld [vmem:[#allocation2 + $0x620] sm:$0xff]  }
0x1a18   :  { %14966 = vmatprep.subr.bf16.mxu1 %v17366_v5  ;;  %14986 = vmatprep.subr.bf16.mxu0 %v17366_v5  ;;  %v16630_v57 = vld [vmem:[#allocation2 + $0x628] sm:$0xff]   ;;  %v16632_v2 = vld [vmem:[#allocation2 + $0x618] sm:$0xff]   ;;  %v16635_v58 = vld [vmem:[#allocation2 + $0x600] sm:$0xff]  }
0x1a19   :  { %v12765_v59 = vld [vmem:[#allocation8 + $0x9] ss:$0 sm:$0xff]  ;;  %v16636_v12 = vld [vmem:[#allocation2 + $0x678] sm:$0xff]   ;;  %v16637_v14 = vld [vmem:[#allocation2 + $0x670] sm:$0xff]  }
0x1a1a   :  { %v16638_v10 = vld [vmem:[#allocation2 + $0x668] sm:$0xff]   ;;  %v16639_v13 = vld [vmem:[#allocation2 + $0x660] sm:$0xff]   ;;  %v16640_v15 = vld [vmem:[#allocation2 + $0x658] sm:$0xff]  }
0x1a1b   :  { %14967 = vmatpush3.bf16.msra.mxu1 %v16614_v34  ;;  %14987 = vmatpush3.bf16.msra.mxu0 %v16622_v45  ;;  %v16641_v16 = vld [vmem:[#allocation2 + $0x650] sm:$0xff]   ;;  %v16642_v17 = vld [vmem:[#allocation2 + $0x648] sm:$0xff]   ;;  %v16643_v18 = vld [vmem:[#allocation2 + $0x640] sm:$0xff]  }
0x1a1c   :  { %14968 = vmatprep.subr.bf16.mxu1 %v17366_v5  ;;  %14988 = vmatprep.subr.bf16.mxu0 %v17366_v5  ;;  %v16653_v45 = vld [vmem:[#allocation2 + $0x6f0] sm:$0xff]  }
0x1a1f   :  { %14969 = vmatpush3.bf16.msra.mxu1 %v16615_v40  ;;  %14989 = vmatpush3.bf16.msra.mxu0 %v16623_v27  ;;  %v16655_v27 = vld [vmem:[#allocation2 + $0x6e0] sm:$0xff]  }
0x1a20   :  { %14970 = vmatprep.subr.bf16.mxu1 %v17366_v5  ;;  %14990 = vmatprep.subr.bf16.mxu0 %v17366_v5 }
0x1a23   :  { %14971 = vmatpush3.bf16.msra.mxu1 %v16616_v44  ;;  %14991 = vmatpush3.bf16.msra.mxu0 %v16624_v29  ;;  %v16652_v44 = vld [vmem:[#allocation2 + $0x6f8] sm:$0xff]   ;;  %v16657_v29 = vld [vmem:[#allocation2 + $0x6d0] sm:$0xff]  }
0x1a24   :  { %14972 = vmatprep.subr.bf16.mxu1 %v17366_v5  ;;  %14992 = vmatprep.subr.bf16.mxu0 %v17366_v5 }
0x1a27   :  { %14973 = vmatpush3.bf16.msra.mxu1 %v16617_v26  ;;  %14993 = vmatpush3.bf16.msra.mxu0 %v16625_v36  ;;  %v16654_v26 = vld [vmem:[#allocation2 + $0x6e8] sm:$0xff]  }
0x1a28   :  { %14974 = vmatprep.subr.bf16.mxu1 %v17366_v5  ;;  %14994 = vmatprep.subr.bf16.mxu0 %v17366_v5  ;;  %v12791_v36 = vld [vmem:[#allocation6 + $0xc] ss:$0 sm:$0xff] }
0x1a2b   :  { %14975 = vmatpush3.bf16.msra.mxu1 %v16618_v28  ;;  %14995 = vmatpush3.bf16.msra.mxu0 %v16626_v37  ;;  %v16656_v28 = vld [vmem:[#allocation2 + $0x6d8] sm:$0xff]  }
0x1a2c   :  { %14976 = vmatprep.subr.bf16.mxu1 %v17366_v5  ;;  %14996 = vmatprep.subr.bf16.mxu0 %v17366_v5 }
0x1a2f   :  { %14977 = vmatpush3.bf16.msra.mxu1 %v16619_v31  ;;  %14997 = vmatpush3.bf16.msra.mxu0 %v16627_v38 }
0x1a30   :  { %15002 = vmatprep.subr.bf16.mxu1 %v17366_v5  ;;  %15028 = vmatprep.subr.bf16.mxu0 %v17366_v5 }
0x1a32   :  { %14979 = vmatmul.mubr.bf16.vlgmr.msra.gmra.mxu1 %v4332_v33 }
0x1a33   :  { %15004 = vmatprep.mubr.msk.bf16.mxu1 %vm17367_vm0, %v17366_v5 }
0x1af2   :  { %v4439_v41 = vpop.f32.mrf.mxu1 }
0x1af3   :  { %v4440_v43 = vadd.f32 %v12756_v39, %v4439_v41 }
0x1af4   :  { %v14980_v46 = vpop.f32.mrf.mxu1 }
0x1af5   :  { %v4446_v48 = vmax.f32 %v4440_v43, 0.0 }
0x1af6   :  { %v4442_v47 = vpop.f32.mrf.mxu1 }
0x1af7   :  { %v4443_v49 = vadd.f32 %v12756_v39, %v4442_v47  ;;  %v4448_v52 = vadd.f32 %v4446_v48, %v3792_v4  ;;  %v16633_v4 = vld [vmem:[#allocation2 + $0x610] sm:$0xff]  }
0x1af8   :  { %v14981_v50 = vpop.f32.mrf.mxu1 }
0x1af9   :  { %v4447_v51 = vmax.f32 %v4443_v49, 0.0  ;;  %v16644_v50 = vld [vmem:[#allocation2 + $0x6b8] sm:$0xff]  }
0x1afb   :  { %v4449_v53 = vadd.f32 %v4447_v51, %v3793_v7  ;;  %v16634_v7 = vld [vmem:[#allocation2 + $0x608] sm:$0xff]   ;;  %v16645_v51 = vld [vmem:[#allocation2 + $0x6b0] sm:$0xff]  }
0x1afd   :  { %v4450_v55 = vpack.c.bf16 %v4449_v53, %v4448_v52  ;;  %v16646_v52 = vld [vmem:[#allocation2 + $0x6a8] sm:$0xff]   ;;  %v16647_v53 = vld [vmem:[#allocation2 + $0x6a0] sm:$0xff]  }
0x1aff   :  { %14999 = vmatmul.mubr.bf16.vlgmr.msra.gmra.mxu0 %v4450_v55  ;;  %v16649_v55 = vld [vmem:[#allocation2 + $0x690] sm:$0xff]  }
0x1b00   :  { %15029 = vmatpush3.bf16.msra.mxu0 %v16628_v54  ;;  %15044 = vmatprep.mubr.msk.bf16.mxu0 %vm17367_vm0, %v17366_v5  ;;  %v16648_v54 = vld [vmem:[#allocation2 + $0x698] sm:$0xff]  }
0x1b01   :  { %15030 = vmatprep.subr.bf16.mxu0 %v17366_v5 }
0x1b04   :  { %15031 = vmatpush3.bf16.msra.mxu0 %v16629_v56  ;;  %v16650_v56 = vld [vmem:[#allocation2 + $0x688] sm:$0xff]  }
0x1b05   :  { %15032 = vmatprep.subr.bf16.mxu0 %v17366_v5 }
0x1b08   :  { %15033 = vmatpush3.bf16.msra.mxu0 %v16630_v57  ;;  %v16651_v57 = vld [vmem:[#allocation2 + $0x680] sm:$0xff]  }
0x1b09   :  { %15034 = vmatprep.subr.bf16.mxu0 %v17366_v5 }
0x1b0c   :  { %15035 = vmatpush3.bf16.msra.mxu0 %v16631_v0  ;;  %v16658_v0 = vld [vmem:[#allocation2 + $0x6c8] sm:$0xff]  }
0x1b0d   :  { %15036 = vmatprep.subr.bf16.mxu0 %v17366_v5 }
0x1b10   :  { %15037 = vmatpush3.bf16.msra.mxu0 %v16632_v2  ;;  %v16659_v2 = vld [vmem:[#allocation2 + $0x6c0] sm:$0xff]  }
0x1b11   :  { %15038 = vmatprep.subr.bf16.mxu0 %v17366_v5 }
0x1b14   :  { %15039 = vmatpush3.bf16.msra.mxu0 %v16633_v4 }
0x1b15   :  { %15040 = vmatprep.subr.bf16.mxu0 %v17366_v5 }
0x1b18   :  { %15041 = vmatpush3.bf16.msra.mxu0 %v16634_v7 }
0x1b19   :  { %15042 = vmatprep.subr.bf16.mxu0 %v17366_v5 }
0x1b1c   :  { %15043 = vmatpush3.bf16.msra.mxu0 %v16635_v58 }
0x1b1d   :  { %15054 = vmatprep.subr.bf16.mxu0 %v17366_v5 }
0x1bbf   :  { %v4558_v60 = vpop.f32.mrf.mxu0 }
0x1bc0   :  { %v18029_v62 = vadd.f32 %v12765_v59, %v4558_v60 }
0x1bc1   :  { %v15000_v61 = vpop.f32.mrf.mxu0 }
0x1bc2   :  { %v4565_v9 = vmax.f32 %v18029_v62, 0.0 }
0x1bc3   :  { %v4561_v63 = vpop.f32.mrf.mxu0 }
0x1bc4   :  { %v18031_v1 = vadd.f32 %v12765_v59, %v4561_v63  ;;  %v16660_v59 = vld [vmem:[#allocation3 + $0x2b8] sm:$0xff]   ;;  %v16661_v63 = vld [vmem:[#allocation3 + $0x2b0] sm:$0xff]  }
0x1bc5   :  { %v15001_v3 = vpop.f32.mrf.mxu0 }
0x1bc6   :  { %v4566_v11 = vmax.f32 %v18031_v1, 0.0  ;;  %v16662_v3 = vld [vmem:[#allocation3 + $0x2a8] sm:$0xff]  }
0x1bc8   :  { %v4567_v8 = vpack.c.bf16 %v4566_v11, %v4565_v9 }
0x1bca   :  { %15003 = vmatpush3.bf16.msra.mxu1 %v4567_v8  ;;  %15045 = vmatmul.mubr.bf16.vlgmr.msra.gmra.mxu0 %v4567_v8  ;;  %v16663_v8 = vld [vmem:[#allocation3 + $0x2a0] sm:$0xff]  }
0x1bcb   :  { %15008 = vmatprep.subr.bf16.mxu1 %v17366_v5  ;;  %15070 = vmatprep.mubr.msk.bf16.mxu0 %vm17367_vm0, %v17366_v5 }
0x1bcc   :  { %15055 = vmatpush3.bf16.msra.mxu0 %v16652_v44 }
0x1bcd   :  { %15005 = vmatmul.mubr.msk.bf16.vlgmr.msra.gmra.mxu1 %vm170_vm1, %v17494_v6  ;;  %15056 = vmatprep.subr.bf16.mxu0 %v17366_v5 }
0x1bce   :  { %15009 = vmatpush3.bf16.msra.mxu1 %v16636_v12  ;;  %15024 = vmatprep.mubr.msk.bf16.mxu1 %vm17367_vm0, %v17366_v5 }
0x1bcf   :  { %15010 = vmatprep.subr.bf16.mxu1 %v17366_v5 }
0x1bd0   :  { %15057 = vmatpush3.bf16.msra.mxu0 %v16653_v45 }
0x1bd1   :  { %15058 = vmatprep.subr.bf16.mxu0 %v17366_v5 }
0x1bd2   :  { %15011 = vmatpush3.bf16.msra.mxu1 %v16637_v14 }
0x1bd3   :  { %15012 = vmatprep.subr.bf16.mxu1 %v17366_v5 }
0x1bd4   :  { %15059 = vmatpush3.bf16.msra.mxu0 %v16654_v26 }
0x1bd5   :  { %15060 = vmatprep.subr.bf16.mxu0 %v17366_v5 }
0x1bd6   :  { %15013 = vmatpush3.bf16.msra.mxu1 %v16638_v10 }
0x1bd7   :  { %15014 = vmatprep.subr.bf16.mxu1 %v17366_v5 }
0x1bd8   :  { %15061 = vmatpush3.bf16.msra.mxu0 %v16655_v27 }
0x1bd9   :  { %15062 = vmatprep.subr.bf16.mxu0 %v17366_v5 }
0x1bda   :  { %15015 = vmatpush3.bf16.msra.mxu1 %v16639_v13 }
0x1bdb   :  { %15016 = vmatprep.subr.bf16.mxu1 %v17366_v5 }
0x1bdc   :  { %15063 = vmatpush3.bf16.msra.mxu0 %v16656_v28  ;;  %v16668_v28 = vld [vmem:[#allocation2 + $0x738] sm:$0xff]  }
0x1bdd   :  { %15064 = vmatprep.subr.bf16.mxu0 %v17366_v5 }
0x1bde   :  { %15017 = vmatpush3.bf16.msra.mxu1 %v16640_v15  ;;  %v16664_v15 = vld [vmem:[#allocation3 + $0x298] sm:$0xff]  }
0x1bdf   :  { %15018 = vmatprep.subr.bf16.mxu1 %v17366_v5 }
0x1be0   :  { %15065 = vmatpush3.bf16.msra.mxu0 %v16657_v29 }
0x1be1   :  { %15066 = vmatprep.subr.bf16.mxu0 %v17366_v5 }
0x1be2   :  { %15019 = vmatpush3.bf16.msra.mxu1 %v16641_v16  ;;  %v16665_v16 = vld [vmem:[#allocation3 + $0x290] sm:$0xff]  }
0x1be3   :  { %15020 = vmatprep.subr.bf16.mxu1 %v17366_v5 }
0x1be4   :  { %15067 = vmatpush3.bf16.msra.mxu0 %v16658_v0  ;;  %v16679_v0 = vld [vmem:[#allocation2 + $0x760] sm:$0xff]  }
0x1be5   :  { %15068 = vmatprep.subr.bf16.mxu0 %v17366_v5 }
0x1be6   :  { %15021 = vmatpush3.bf16.msra.mxu1 %v16642_v17  ;;  %v16666_v17 = vld [vmem:[#allocation3 + $0x288] sm:$0xff]  }
0x1be7   :  { %15022 = vmatprep.subr.bf16.mxu1 %v17366_v5 }
0x1be8   :  { %15069 = vmatpush3.bf16.msra.mxu0 %v16659_v2  ;;  %v16680_v2 = vld [vmem:[#allocation2 + $0x758] sm:$0xff]  }
0x1be9   :  { %15094 = vmatprep.subr.bf16.mxu0 %v17366_v5 }
0x1bea   :  { %15023 = vmatpush3.bf16.msra.mxu1 %v16643_v18  ;;  %v16667_v18 = vld [vmem:[#allocation3 + $0x280] sm:$0xff]  }
0x1beb   :  { %15048 = vmatprep.subr.bf16.mxu1 %v17366_v5 }
0x1c8a   :  { %v4815_v20 = vpop.f32.mrf.mxu0 }
0x1c8c   :  { %v15046_v22 = vpop.f32.mrf.mxu0 }
0x1c8d   :  { %v4602_v24 = vpop.f32.mrf.mxu1  ;;  %v12809_v22 = vld [vmem:[#allocation6 + $0xd] ss:$0 sm:$0xff] }
0x1c8e   :  { %v4818_v30 = vpop.f32.mrf.mxu0 }
0x1c8f   :  { %v15006_v32 = vpop.f32.mrf.mxu1 }
0x1c90   :  { %v15047_v34 = vpop.f32.mrf.mxu0 }
0x1c91   :  { %v4605_v35 = vpop.f32.mrf.mxu1 }
0x1c92   :  { %v4626_v40 = vpack.c.bf16 %v4605_v35, %v4602_v24 }
0x1c93   :  { %v15007_v42 = vpop.f32.mrf.mxu1 }
0x1c94   :  { %15025 = vmatmul.mubr.bf16.vlgmr.msra.gmra.mxu1 %v4626_v40 }
0x1c95   :  { %15050 = vmatprep.mubr.msk.bf16.mxu1 %vm17367_vm0, %v17366_v5 }
0x1d54   :  { %v4726_v31 = vpop.f32.mrf.mxu1 }
0x1d55   :  { %v4816_v33 = vadd.f32 %v4815_v20, %v4726_v31  ;;  %v16669_v31 = vld [vmem:[#allocation2 + $0x730] sm:$0xff]  }
0x1d56   :  { %v15026_v37 = vpop.f32.mrf.mxu1 }
0x1d57   :  { %v18062_v39 = vadd.f32 %v12791_v36, %v4816_v33  ;;  %v16670_v33 = vld [vmem:[#allocation2 + $0x728] sm:$0xff]   ;;  %v16672_v37 = vld [vmem:[#allocation2 + $0x718] sm:$0xff]  }
0x1d58   :  { %v4729_v38 = vpop.f32.mrf.mxu1 }
0x1d59   :  { %v4819_v41 = vadd.f32 %v4818_v30, %v4729_v38  ;;  %v4832_v47 = vmax.f32 %v18062_v39, 0.0  ;;  %v16673_v38 = vld [vmem:[#allocation2 + $0x710] sm:$0xff]   ;;  %v16674_v39 = vld [vmem:[#allocation2 + $0x708] sm:$0xff]  }
0x1d5a   :  { %v15027_v43 = vpop.f32.mrf.mxu1 }
0x1d5b   :  { %v18064_v46 = vadd.f32 %v12791_v36, %v4819_v41  ;;  %v16671_v36 = vld [vmem:[#allocation2 + $0x720] sm:$0xff]   ;;  %v12810_v43 = vld [vmem:[#allocation8 + $0xa] ss:$0 sm:$0xff] }
0x1d5c   :  { %v16675_v41 = vld [vmem:[#allocation2 + $0x700] sm:$0xff]  }
0x1d5d   :  { %v4833_v48 = vmax.f32 %v18064_v46, 0.0 }
0x1d5f   :  { %v4834_v49 = vpack.c.bf16 %v4833_v48, %v4832_v47 }
0x1d61   :  { %15049 = vmatpush3.bf16.msra.mxu1 %v4834_v49 }
0x1d62   :  { %15074 = vmatprep.subr.bf16.mxu1 %v17366_v5 }
0x1d64   :  { %15051 = vmatmul.mubr.msk.bf16.vlgmr.msra.gmra.mxu1 %vm170_vm1, %v17494_v6 }
0x1d65   :  { %15075 = vmatpush3.bf16.msra.mxu1 %v16644_v50  ;;  %15090 = vmatprep.mubr.msk.bf16.mxu1 %vm17367_vm0, %v17366_v5 }
0x1d66   :  { %15076 = vmatprep.subr.bf16.mxu1 %v17366_v5 }
0x1d69   :  { %15077 = vmatpush3.bf16.msra.mxu1 %v16645_v51 }
0x1d6a   :  { %15078 = vmatprep.subr.bf16.mxu1 %v17366_v5 }
0x1d6d   :  { %15079 = vmatpush3.bf16.msra.mxu1 %v16646_v52 }
0x1d6e   :  { %15080 = vmatprep.subr.bf16.mxu1 %v17366_v5 }
0x1d71   :  { %15081 = vmatpush3.bf16.msra.mxu1 %v16647_v53 }
0x1d72   :  { %15082 = vmatprep.subr.bf16.mxu1 %v17366_v5 }
0x1d75   :  { %15083 = vmatpush3.bf16.msra.mxu1 %v16648_v54 }
0x1d76   :  { %15084 = vmatprep.subr.bf16.mxu1 %v17366_v5 }
0x1d79   :  { %15085 = vmatpush3.bf16.msra.mxu1 %v16649_v55  ;;  %v16676_v55 = vld [vmem:[#allocation2 + $0x778] sm:$0xff]  }
0x1d7a   :  { %15086 = vmatprep.subr.bf16.mxu1 %v17366_v5 }
0x1d7d   :  { %15087 = vmatpush3.bf16.msra.mxu1 %v16650_v56  ;;  %v16677_v56 = vld [vmem:[#allocation2 + $0x770] sm:$0xff]  }
0x1d7e   :  { %15088 = vmatprep.subr.bf16.mxu1 %v17366_v5 }
0x1d81   :  { %15089 = vmatpush3.bf16.msra.mxu1 %v16651_v57  ;;  %v16678_v57 = vld [vmem:[#allocation2 + $0x768] sm:$0xff]  }
0x1d82   :  { %15114 = vmatprep.subr.bf16.mxu1 %v17366_v5 }
0x1d84   :  { %15091 = vmatmul.mubr.bf16.vlgmr.msra.gmra.mxu1 %v4834_v49 }
0x1d85   :  { %15116 = vmatprep.mubr.msk.bf16.mxu1 %vm17367_vm0, %v17366_v5 }
0x1e24   :  { %v4869_v4 = vpop.f32.mrf.mxu1 }
0x1e26   :  { %v15052_v7 = vpop.f32.mrf.mxu1 }
0x1e27   :  { %v16682_v7 = vld [vmem:[#allocation2 + $0x748] sm:$0xff]  }
0x1e28   :  { %v4872_v58 = vpop.f32.mrf.mxu1 }
0x1e29   :  { %v4893_v60 = vpack.c.bf16 %v4872_v58, %v4869_v4  ;;  %v16681_v4 = vld [vmem:[#allocation2 + $0x750] sm:$0xff]   ;;  %v16683_v58 = vld [vmem:[#allocation2 + $0x740] sm:$0xff]  }
0x1e2a   :  { %v15053_v61 = vpop.f32.mrf.mxu1 }
0x1e2b   :  { %15071 = vmatmul.mubr.bf16.vlgmr.msra.gmra.mxu0 %v4893_v60  ;;  %v16685_v60 = vld [vmem:[#allocation2 + $0x7b0] sm:$0xff]   ;;  %v16686_v61 = vld [vmem:[#allocation2 + $0x7a8] sm:$0xff]  }
0x1e2c   :  { %15095 = vmatpush3.bf16.msra.mxu0 %v16660_v59  ;;  %15110 = vmatprep.mubr.msk.bf16.mxu0 %vm17367_vm0, %v17366_v5  ;;  %v16684_v59 = vld [vmem:[#allocation2 + $0x7b8] sm:$0xff]  }
0x1e2d   :  { %15096 = vmatprep.subr.bf16.mxu0 %v17366_v5 }
0x1e30   :  { %15097 = vmatpush3.bf16.msra.mxu0 %v16661_v63  ;;  %v16687_v63 = vld [vmem:[#allocation2 + $0x7a0] sm:$0xff]  }
0x1e31   :  { %15098 = vmatprep.subr.bf16.mxu0 %v17366_v5 }
0x1e34   :  { %15099 = vmatpush3.bf16.msra.mxu0 %v16662_v3  ;;  %v16688_v3 = vld [vmem:[#allocation2 + $0x798] sm:$0xff]  }
0x1e35   :  { %15100 = vmatprep.subr.bf16.mxu0 %v17366_v5 }
0x1e38   :  { %15101 = vmatpush3.bf16.msra.mxu0 %v16663_v8 }
0x1e39   :  { %15102 = vmatprep.subr.bf16.mxu0 %v17366_v5 }
0x1e3c   :  { %15103 = vmatpush3.bf16.msra.mxu0 %v16664_v15 }
0x1e3d   :  { %15104 = vmatprep.subr.bf16.mxu0 %v17366_v5 }
0x1e40   :  { %15105 = vmatpush3.bf16.msra.mxu0 %v16665_v16 }
0x1e41   :  { %15106 = vmatprep.subr.bf16.mxu0 %v17366_v5 }
0x1e44   :  { %v5082_v12 = vpop.f32.mrf.mxu1  ;;  %15107 = vmatpush3.bf16.msra.mxu0 %v16666_v17 }
0x1e45   :  { %15108 = vmatprep.subr.bf16.mxu0 %v17366_v5 }
0x1e46   :  { %v15092_v14 = vpop.f32.mrf.mxu1 }
0x1e48   :  { %v5085_v10 = vpop.f32.mrf.mxu1  ;;  %15109 = vmatpush3.bf16.msra.mxu0 %v16667_v18 }
0x1e49   :  { %15140 = vmatprep.subr.bf16.mxu0 %v17366_v5 }
0x1e4a   :  { %v15093_v13 = vpop.f32.mrf.mxu1 }
0x1eeb   :  { %v4993_v20 = vpop.f32.mrf.mxu0 }
0x1eec   :  { %v5083_v24 = vadd.f32 %v5082_v12, %v4993_v20  ;;  %v16689_v20 = vld [vmem:[#allocation2 + $0x790] sm:$0xff]  }
0x1eed   :  { %v15072_v30 = vpop.f32.mrf.mxu0 }
0x1eee   :  { %v5097_v32 = vadd.f32 %v12809_v22, %v5083_v24  ;;  %v16691_v24 = vld [vmem:[#allocation2 + $0x780] sm:$0xff]  }
0x1eef   :  { %v4996_v34 = vpop.f32.mrf.mxu0 }
0x1ef0   :  { %v5086_v35 = vadd.f32 %v5085_v10, %v4996_v34  ;;  %v5099_v42 = vmax.f32 %v5097_v32, 0.0  ;;  %v12836_v34 = vld [vmem:[#allocation6 + $0xe] ss:$0 sm:$0xff] }
0x1ef1   :  { %v15073_v40 = vpop.f32.mrf.mxu0 }
0x1ef2   :  { %v5098_v44 = vadd.f32 %v12809_v22, %v5086_v35  ;;  %v5101_v26 = vadd.f32 %v5099_v42, %v4832_v47  ;;  %v16690_v22 = vld [vmem:[#allocation2 + $0x788] sm:$0xff]  }
0x1ef4   :  { %v5100_v45 = vmax.f32 %v5098_v44, 0.0 }
0x1ef6   :  { %v5102_v27 = vadd.f32 %v5100_v45, %v4833_v48 }
0x1ef8   :  { %v5103_v29 = vpack.c.bf16 %v5102_v27, %v5101_v26 }
0x1efa   :  { %15111 = vmatmul.mubr.bf16.vlgmr.msra.gmra.mxu0 %v5103_v29 }
0x1efb   :  { %15141 = vmatpush3.bf16.msra.mxu0 %v16668_v28  ;;  %15156 = vmatprep.mubr.msk.bf16.mxu0 %vm17367_vm0, %v17366_v5 }
0x1efc   :  { %15142 = vmatprep.subr.bf16.mxu0 %v17366_v5 }
0x1eff   :  { %15143 = vmatpush3.bf16.msra.mxu0 %v16669_v31  ;;  %v16692_v31 = vld [vmem:[#allocation2 + $0x7f8] sm:$0xff]  }
0x1f00   :  { %15144 = vmatprep.subr.bf16.mxu0 %v17366_v5 }
0x1f03   :  { %15145 = vmatpush3.bf16.msra.mxu0 %v16670_v33  ;;  %v16693_v33 = vld [vmem:[#allocation2 + $0x7f0] sm:$0xff]  }
0x1f04   :  { %15146 = vmatprep.subr.bf16.mxu0 %v17366_v5 }
0x1f07   :  { %15147 = vmatpush3.bf16.msra.mxu0 %v16671_v36  ;;  %v16694_v36 = vld [vmem:[#allocation2 + $0x7e8] sm:$0xff]  }
0x1f08   :  { %15148 = vmatprep.subr.bf16.mxu0 %v17366_v5 }
0x1f0b   :  { %15149 = vmatpush3.bf16.msra.mxu0 %v16672_v37  ;;  %v16695_v37 = vld [vmem:[#allocation2 + $0x7e0] sm:$0xff]  }
0x1f0c   :  { %15150 = vmatprep.subr.bf16.mxu0 %v17366_v5 }
0x1f0f   :  { %15151 = vmatpush3.bf16.msra.mxu0 %v16673_v38  ;;  %v16696_v38 = vld [vmem:[#allocation2 + $0x7d8] sm:$0xff]  }
0x1f10   :  { %15152 = vmatprep.subr.bf16.mxu0 %v17366_v5 }
0x1f13   :  { %15153 = vmatpush3.bf16.msra.mxu0 %v16674_v39  ;;  %v16697_v39 = vld [vmem:[#allocation2 + $0x7d0] sm:$0xff]  }
0x1f14   :  { %15154 = vmatprep.subr.bf16.mxu0 %v17366_v5 }
0x1f17   :  { %15155 = vmatpush3.bf16.msra.mxu0 %v16675_v41  ;;  %v16698_v41 = vld [vmem:[#allocation2 + $0x7c8] sm:$0xff]  }
0x1f18   :  { %15186 = vmatprep.subr.bf16.mxu0 %v17366_v5 }
0x1fba   :  { %v5211_v46 = vpop.f32.mrf.mxu0 }
0x1fbb   :  { %v18113_v48 = vadd.f32 %v12810_v43, %v5211_v46 }
0x1fbc   :  { %v15112_v47 = vpop.f32.mrf.mxu0 }
0x1fbd   :  { %v5218_v52 = vmax.f32 %v18113_v48, 0.0  ;;  %v16724_v48 = vld [vmem:[#allocation3 + $0x3b8] sm:$0xff]  }
0x1fbe   :  { %v5214_v49 = vpop.f32.mrf.mxu0 }
0x1fbf   :  { %v18115_v50 = vadd.f32 %v12810_v43, %v5214_v49  ;;  %v16699_v43 = vld [vmem:[#allocation2 + $0x7c0] sm:$0xff]  }
0x1fc0   :  { %v15113_v51 = vpop.f32.mrf.mxu0 }
0x1fc1   :  { %v5219_v53 = vmax.f32 %v18115_v50, 0.0  ;;  %v16726_v50 = vld [vmem:[#allocation3 + $0x3a8] sm:$0xff]  }
0x1fc3   :  { %v5220_v54 = vpack.c.bf16 %v5219_v53, %v5218_v52 }
0x1fc5   :  { %15115 = vmatpush3.bf16.msra.mxu1 %v5220_v54  ;;  %15157 = vmatmul.mubr.bf16.vlgmr.msra.gmra.mxu0 %v5220_v54 }
0x1fc6   :  { %15120 = vmatprep.subr.bf16.mxu1 %v17366_v5  ;;  %15202 = vmatprep.mubr.msk.bf16.mxu0 %vm17367_vm0, %v17366_v5 }
0x1fc7   :  { %15187 = vmatpush3.bf16.msra.mxu0 %v16684_v59  ;;  %v16704_v59 = vld [vmem:[#allocation3 + $0x2d8] sm:$0xff]  }
0x1fc8   :  { %15117 = vmatmul.mubr.msk.bf16.vlgmr.msra.gmra.mxu1 %vm170_vm1, %v17494_v6  ;;  %15188 = vmatprep.subr.bf16.mxu0 %v17366_v5 }
0x1fc9   :  { %15121 = vmatpush3.bf16.msra.mxu1 %v16676_v55  ;;  %15136 = vmatprep.mubr.msk.bf16.mxu1 %vm17367_vm0, %v17366_v5 }
0x1fca   :  { %15122 = vmatprep.subr.bf16.mxu1 %v17366_v5 }
0x1fcb   :  { %15189 = vmatpush3.bf16.msra.mxu0 %v16685_v60  ;;  %v16705_v60 = vld [vmem:[#allocation3 + $0x2d0] sm:$0xff]  }
0x1fcc   :  { %15190 = vmatprep.subr.bf16.mxu0 %v17366_v5 }
0x1fcd   :  { %15123 = vmatpush3.bf16.msra.mxu1 %v16677_v56 }
0x1fce   :  { %15124 = vmatprep.subr.bf16.mxu1 %v17366_v5 }
0x1fcf   :  { %15191 = vmatpush3.bf16.msra.mxu0 %v16686_v61  ;;  %v16706_v61 = vld [vmem:[#allocation3 + $0x2c8] sm:$0xff]  }
0x1fd0   :  { %15192 = vmatprep.subr.bf16.mxu0 %v17366_v5 }
0x1fd1   :  { %15125 = vmatpush3.bf16.msra.mxu1 %v16678_v57  ;;  %v16700_v57 = vld [vmem:[#allocation3 + $0x2f8] sm:$0xff]  }
0x1fd2   :  { %15126 = vmatprep.subr.bf16.mxu1 %v17366_v5 }
0x1fd3   :  { %15193 = vmatpush3.bf16.msra.mxu0 %v16687_v63  ;;  %v16707_v63 = vld [vmem:[#allocation3 + $0x2c0] sm:$0xff]  }
0x1fd4   :  { %15194 = vmatprep.subr.bf16.mxu0 %v17366_v5 }
0x1fd5   :  { %15127 = vmatpush3.bf16.msra.mxu1 %v16679_v0 }
0x1fd6   :  { %15128 = vmatprep.subr.bf16.mxu1 %v17366_v5 }
0x1fd7   :  { %15195 = vmatpush3.bf16.msra.mxu0 %v16688_v3  ;;  %v16708_v3 = vld [vmem:[#allocation3 + $0x338] sm:$0xff]  }
0x1fd8   :  { %15196 = vmatprep.subr.bf16.mxu0 %v17366_v5 }
0x1fd9   :  { %15129 = vmatpush3.bf16.msra.mxu1 %v16680_v2 }
0x1fda   :  { %15130 = vmatprep.subr.bf16.mxu1 %v17366_v5 }
0x1fdb   :  { %15197 = vmatpush3.bf16.msra.mxu0 %v16689_v20 }
0x1fdc   :  { %15198 = vmatprep.subr.bf16.mxu0 %v17366_v5 }
0x1fdd   :  { %15131 = vmatpush3.bf16.msra.mxu1 %v16681_v4  ;;  %v16701_v4 = vld [vmem:[#allocation3 + $0x2f0] sm:$0xff]  }
0x1fde   :  { %15132 = vmatprep.subr.bf16.mxu1 %v17366_v5 }
0x1fdf   :  { %15199 = vmatpush3.bf16.msra.mxu0 %v16690_v22 }
0x1fe0   :  { %15200 = vmatprep.subr.bf16.mxu0 %v17366_v5 }
0x1fe1   :  { %15133 = vmatpush3.bf16.msra.mxu1 %v16682_v7  ;;  %v16702_v7 = vld [vmem:[#allocation3 + $0x2e8] sm:$0xff]  }
0x1fe2   :  { %15134 = vmatprep.subr.bf16.mxu1 %v17366_v5 }
0x1fe3   :  { %15201 = vmatpush3.bf16.msra.mxu0 %v16691_v24 }
0x1fe4   :  { %15226 = vmatprep.subr.bf16.mxu0 %v17366_v5 }
0x1fe5   :  { %15135 = vmatpush3.bf16.msra.mxu1 %v16683_v58  ;;  %v16703_v58 = vld [vmem:[#allocation3 + $0x2e0] sm:$0xff]  }
0x1fe6   :  { %15160 = vmatprep.subr.bf16.mxu1 %v17366_v5 }
0x2085   :  { %v5468_v8 = vpop.f32.mrf.mxu0 }
0x2087   :  { %v15158_v12 = vpop.f32.mrf.mxu0 }
0x2088   :  { %v5255_v14 = vpop.f32.mrf.mxu1  ;;  %v16710_v12 = vld [vmem:[#allocation3 + $0x328] sm:$0xff]  }
0x2089   :  { %v5471_v10 = vpop.f32.mrf.mxu0 }
0x208a   :  { %v15118_v13 = vpop.f32.mrf.mxu1 }
0x208b   :  { %v15159_v15 = vpop.f32.mrf.mxu0 }
0x208c   :  { %v5258_v16 = vpop.f32.mrf.mxu1  ;;  %v12854_v15 = vld [vmem:[#allocation6 + $0xf] ss:$0 sm:$0xff] }
0x208d   :  { %v5279_v17 = vpack.c.bf16 %v5258_v16, %v5255_v14  ;;  %v16711_v14 = vld [vmem:[#allocation3 + $0x320] sm:$0xff]  }
0x208e   :  { %v15119_v18 = vpop.f32.mrf.mxu1 }
0x208f   :  { %15137 = vmatmul.mubr.bf16.vlgmr.msra.gmra.mxu1 %v5279_v17 }
0x2090   :  { %15162 = vmatprep.mubr.msk.bf16.mxu1 %vm17367_vm0, %v17366_v5 }
0x214f   :  { %v5379_v30 = vpop.f32.mrf.mxu1 }
0x2150   :  { %v5469_v32 = vadd.f32 %v5468_v8, %v5379_v30  ;;  %v16709_v8 = vld [vmem:[#allocation3 + $0x330] sm:$0xff]  }
0x2151   :  { %v15138_v35 = vpop.f32.mrf.mxu1 }
0x2152   :  { %v18148_v42 = vadd.f32 %v12836_v34, %v5469_v32 }
0x2153   :  { %v5382_v40 = vpop.f32.mrf.mxu1 }
0x2154   :  { %v5472_v44 = vadd.f32 %v5471_v10, %v5382_v40  ;;  %v5485_v27 = vmax.f32 %v18148_v42, 0.0  ;;  %v16712_v10 = vld [vmem:[#allocation3 + $0x318] sm:$0xff]  }
0x2155   :  { %v15139_v45 = vpop.f32.mrf.mxu1  ;;  %v16716_v42 = vld [vmem:[#allocation3 + $0x378] sm:$0xff]  }
0x2156   :  { %v18150_v26 = vadd.f32 %v12836_v34, %v5472_v44  ;;  %v16713_v45 = vld [vmem:[#allocation3 + $0x310] sm:$0xff]  }
0x2158   :  { %v5486_v28 = vmax.f32 %v18150_v26, 0.0  ;;  %v16717_v26 = vld [vmem:[#allocation3 + $0x370] sm:$0xff]  }
0x215a   :  { %v5487_v29 = vpack.c.bf16 %v5486_v28, %v5485_v27 }
0x215c   :  { %15161 = vmatpush3.bf16.msra.mxu1 %v5487_v29  ;;  %15203 = vmatmul.mubr.bf16.vlgmr.msra.gmra.mxu0 %v5487_v29  ;;  %v16714_v29 = vld [vmem:[#allocation3 + $0x308] sm:$0xff]  }
0x215d   :  { %15166 = vmatprep.subr.bf16.mxu1 %v17366_v5  ;;  %15242 = vmatprep.mubr.msk.bf16.mxu0 %vm17367_vm0, %v17366_v5 }
0x215e   :  { %15227 = vmatpush3.bf16.msra.mxu0 %v16708_v3 }
0x215f   :  { %15163 = vmatmul.mubr.msk.bf16.vlgmr.msra.gmra.mxu1 %vm170_vm1, %v17494_v6  ;;  %15228 = vmatprep.subr.bf16.mxu0 %v17366_v5 }
0x2160   :  { %15167 = vmatpush3.bf16.msra.mxu1 %v16692_v31  ;;  %15182 = vmatprep.mubr.msk.bf16.mxu1 %vm17367_vm0, %v17366_v5  ;;  %v16715_v31 = vld [vmem:[#allocation3 + $0x300] sm:$0xff]  }
0x2161   :  { %15168 = vmatprep.subr.bf16.mxu1 %v17366_v5 }
0x2162   :  { %15229 = vmatpush3.bf16.msra.mxu0 %v16709_v8 }
0x2163   :  { %15230 = vmatprep.subr.bf16.mxu0 %v17366_v5 }
0x2164   :  { %15169 = vmatpush3.bf16.msra.mxu1 %v16693_v33  ;;  %v16720_v33 = vld [vmem:[#allocation3 + $0x358] sm:$0xff]  }
0x2165   :  { %15170 = vmatprep.subr.bf16.mxu1 %v17366_v5 }
0x2166   :  { %15231 = vmatpush3.bf16.msra.mxu0 %v16710_v12 }
0x2167   :  { %15232 = vmatprep.subr.bf16.mxu0 %v17366_v5 }
0x2168   :  { %15171 = vmatpush3.bf16.msra.mxu1 %v16694_v36  ;;  %v12855_v36 = vld [vmem:[#allocation8 + $0xb] ss:$0 sm:$0xff] }
0x2169   :  { %15172 = vmatprep.subr.bf16.mxu1 %v17366_v5 }
0x216a   :  { %15233 = vmatpush3.bf16.msra.mxu0 %v16711_v14  ;;  %v16729_v14 = vld [vmem:[#allocation3 + $0x390] sm:$0xff]  }
0x216b   :  { %15234 = vmatprep.subr.bf16.mxu0 %v17366_v5 }
0x216c   :  { %15173 = vmatpush3.bf16.msra.mxu1 %v16695_v37 }
0x216d   :  { %15174 = vmatprep.subr.bf16.mxu1 %v17366_v5 }
0x216e   :  { %15235 = vmatpush3.bf16.msra.mxu0 %v16712_v10  ;;  %v16730_v10 = vld [vmem:[#allocation3 + $0x388] sm:$0xff]  }
0x216f   :  { %15236 = vmatprep.subr.bf16.mxu0 %v17366_v5 }
0x2170   :  { %15175 = vmatpush3.bf16.msra.mxu1 %v16696_v38 }
0x2171   :  { %15176 = vmatprep.subr.bf16.mxu1 %v17366_v5 }
0x2172   :  { %15237 = vmatpush3.bf16.msra.mxu0 %v16713_v45 }
0x2173   :  { %15238 = vmatprep.subr.bf16.mxu0 %v17366_v5 }
0x2174   :  { %15177 = vmatpush3.bf16.msra.mxu1 %v16697_v39 }
0x2175   :  { %15178 = vmatprep.subr.bf16.mxu1 %v17366_v5 }
0x2176   :  { %15239 = vmatpush3.bf16.msra.mxu0 %v16714_v29 }
0x2177   :  { %15240 = vmatprep.subr.bf16.mxu0 %v17366_v5 }
0x2178   :  { %15179 = vmatpush3.bf16.msra.mxu1 %v16698_v41 }
0x2179   :  { %15180 = vmatprep.subr.bf16.mxu1 %v17366_v5 }
0x217a   :  { %15241 = vmatpush3.bf16.msra.mxu0 %v16715_v31 }
0x217b   :  { %15266 = vmatprep.subr.bf16.mxu0 %v17366_v5 }
0x217c   :  { %15181 = vmatpush3.bf16.msra.mxu1 %v16699_v43 }
0x217d   :  { %15206 = vmatprep.subr.bf16.mxu1 %v17366_v5 }
0x221c   :  { %v5735_v46 = vpop.f32.mrf.mxu0 }
0x221e   :  { %v15204_v47 = vpop.f32.mrf.mxu0 }
0x221f   :  { %v5522_v49 = vpop.f32.mrf.mxu1 }
0x2220   :  { %v5738_v51 = vpop.f32.mrf.mxu0 }
0x2221   :  { %v15164_v54 = vpop.f32.mrf.mxu1 }
0x2222   :  { %v15205_v55 = vpop.f32.mrf.mxu0 }
0x2223   :  { %v5525_v56 = vpop.f32.mrf.mxu1 }
0x2224   :  { %v5546_v0 = vpack.c.bf16 %v5525_v56, %v5522_v49  ;;  %v16721_v56 = vld [vmem:[#allocation3 + $0x350] sm:$0xff]  }
0x2225   :  { %v15165_v2 = vpop.f32.mrf.mxu1 }
0x2226   :  { %15183 = vmatmul.mubr.bf16.vlgmr.msra.gmra.mxu1 %v5546_v0  ;;  %v16723_v0 = vld [vmem:[#allocation3 + $0x340] sm:$0xff]   ;;  %v16728_v2 = vld [vmem:[#allocation3 + $0x398] sm:$0xff]  }
0x2227   :  { %15207 = vmatpush3.bf16.msra.mxu1 %v16700_v57  ;;  %15222 = vmatprep.mubr.msk.bf16.mxu1 %vm17367_vm0, %v17366_v5  ;;  %v16722_v57 = vld [vmem:[#allocation3 + $0x348] sm:$0xff]  }
0x2228   :  { %15208 = vmatprep.subr.bf16.mxu1 %v17366_v5 }
0x222b   :  { %15209 = vmatpush3.bf16.msra.mxu1 %v16701_v4  ;;  %v12864_v4 = vld [vmem:[#allocation8 + $0xc] ss:$0 sm:$0xff] }
0x222c   :  { %15210 = vmatprep.subr.bf16.mxu1 %v17366_v5 }
0x222f   :  { %15211 = vmatpush3.bf16.msra.mxu1 %v16702_v7 }
0x2230   :  { %15212 = vmatprep.subr.bf16.mxu1 %v17366_v5 }
0x2233   :  { %15213 = vmatpush3.bf16.msra.mxu1 %v16703_v58 }
0x2234   :  { %15214 = vmatprep.subr.bf16.mxu1 %v17366_v5 }
0x2237   :  { %15215 = vmatpush3.bf16.msra.mxu1 %v16704_v59 }
0x2238   :  { %15216 = vmatprep.subr.bf16.mxu1 %v17366_v5 }
0x223b   :  { %15217 = vmatpush3.bf16.msra.mxu1 %v16705_v60 }
0x223c   :  { %15218 = vmatprep.subr.bf16.mxu1 %v17366_v5 }
0x223f   :  { %15219 = vmatpush3.bf16.msra.mxu1 %v16706_v61 }
0x2240   :  { %15220 = vmatprep.subr.bf16.mxu1 %v17366_v5 }
0x2243   :  { %15221 = vmatpush3.bf16.msra.mxu1 %v16707_v63 }
0x2244   :  { %15246 = vmatprep.subr.bf16.mxu1 %v17366_v5 }
0x22e6   :  { %v5646_v13 = vpop.f32.mrf.mxu1 }
0x22e7   :  { %v5736_v16 = vadd.f32 %v5735_v46, %v5646_v13  ;;  %v16731_v13 = vld [vmem:[#allocation3 + $0x380] sm:$0xff]  }
0x22e8   :  { %v15184_v17 = vpop.f32.mrf.mxu1 }
0x22e9   :  { %v5750_v18 = vadd.f32 %v12854_v15, %v5736_v16 }
0x22ea   :  { %v5649_v20 = vpop.f32.mrf.mxu1 }
0x22eb   :  { %v5739_v22 = vadd.f32 %v5738_v51, %v5649_v20  ;;  %v5752_v30 = vmax.f32 %v5750_v18, 0.0 }
0x22ec   :  { %v15185_v24 = vpop.f32.mrf.mxu1 }
0x22ed   :  { %v5751_v32 = vadd.f32 %v12854_v15, %v5739_v22  ;;  %v5754_v35 = vadd.f32 %v5752_v30, %v5485_v27  ;;  %v16718_v27 = vld [vmem:[#allocation3 + $0x368] sm:$0xff]  }
0x22ee   :  { %v12873_v15 = vld [vmem:[#allocation8 + $0xd] ss:$0 sm:$0xff] }
0x22ef   :  { %v5753_v34 = vmax.f32 %v5751_v32, 0.0  ;;  %v12882_v32 = vld [vmem:[#allocation8 + $0xe] ss:$0 sm:$0xff] }
0x22f1   :  { %v5755_v40 = vadd.f32 %v5753_v34, %v5486_v28  ;;  %v16719_v28 = vld [vmem:[#allocation3 + $0x360] sm:$0xff]  }
0x22f3   :  { %v5756_v44 = vpack.c.bf16 %v5755_v40, %v5754_v35 }
0x22f5   :  { %15223 = vmatmul.mubr.bf16.vlgmr.msra.gmra.mxu1 %v5756_v44 }
0x22f6   :  { %15262 = vmatprep.mubr.msk.bf16.mxu1 %vm17367_vm0, %v17366_v5  ;;  %15247 = vmatpush3.bf16.msra.mxu1 %v16716_v42 }
0x22f7   :  { %15248 = vmatprep.subr.bf16.mxu1 %v17366_v5 }
0x22fa   :  { %15249 = vmatpush3.bf16.msra.mxu1 %v16717_v26 }
0x22fb   :  { %15250 = vmatprep.subr.bf16.mxu1 %v17366_v5 }
0x22fe   :  { %15251 = vmatpush3.bf16.msra.mxu1 %v16718_v27 }
0x22ff   :  { %15252 = vmatprep.subr.bf16.mxu1 %v17366_v5 }
0x2302   :  { %15253 = vmatpush3.bf16.msra.mxu1 %v16719_v28 }
0x2303   :  { %15254 = vmatprep.subr.bf16.mxu1 %v17366_v5 }
0x2306   :  { %15255 = vmatpush3.bf16.msra.mxu1 %v16720_v33 }
0x2307   :  { %15256 = vmatprep.subr.bf16.mxu1 %v17366_v5 }
0x230a   :  { %15257 = vmatpush3.bf16.msra.mxu1 %v16721_v56 }
0x230b   :  { %15258 = vmatprep.subr.bf16.mxu1 %v17366_v5 }
0x230e   :  { %15259 = vmatpush3.bf16.msra.mxu1 %v16722_v57 }
0x230f   :  { %15260 = vmatprep.subr.bf16.mxu1 %v17366_v5 }
0x2312   :  { %15261 = vmatpush3.bf16.msra.mxu1 %v16723_v0 }
0x2313   :  { %15286 = vmatprep.subr.bf16.mxu1 %v17366_v5 }
0x23b5   :  { %v5864_v37 = vpop.f32.mrf.mxu1 }
0x23b6   :  { %v5865_v38 = vadd.f32 %v12855_v36, %v5864_v37 }
0x23b7   :  { %v15224_v39 = vpop.f32.mrf.mxu1 }
0x23b8   :  { %v5871_v43 = vmax.f32 %v5865_v38, 0.0 }
0x23b9   :  { %v5867_v41 = vpop.f32.mrf.mxu1 }
0x23ba   :  { %v5868_v46 = vadd.f32 %v12855_v36, %v5867_v41  ;;  %v5873_v51 = vadd.f32 %v5871_v43, %v5218_v52  ;;  %v16725_v52 = vld [vmem:[#allocation3 + $0x3b0] sm:$0xff]  }
0x23bb   :  { %v15225_v47 = vpop.f32.mrf.mxu1 }
0x23bc   :  { %v5872_v49 = vmax.f32 %v5868_v46, 0.0 }
0x23be   :  { %v5874_v54 = vadd.f32 %v5872_v49, %v5219_v53  ;;  %v16727_v53 = vld [vmem:[#allocation3 + $0x3a0] sm:$0xff]  }
0x23c0   :  { %v5875_v55 = vpack.c.bf16 %v5874_v54, %v5873_v51 }
0x23c2   :  { %15243 = vmatmul.mubr.bf16.vlgmr.msra.gmra.mxu0 %v5875_v55 }
0x23c3   :  { %15282 = vmatprep.mubr.msk.bf16.mxu0 %vm17367_vm0, %v17366_v5  ;;  %15267 = vmatpush3.bf16.msra.mxu0 %v16724_v48 }
0x23c4   :  { %15268 = vmatprep.subr.bf16.mxu0 %v17366_v5 }
0x23c7   :  { %15269 = vmatpush3.bf16.msra.mxu0 %v16725_v52 }
0x23c8   :  { %15270 = vmatprep.subr.bf16.mxu0 %v17366_v5 }
0x23cb   :  { %15271 = vmatpush3.bf16.msra.mxu0 %v16726_v50 }
0x23cc   :  { %15272 = vmatprep.subr.bf16.mxu0 %v17366_v5 }
0x23cf   :  { %15273 = vmatpush3.bf16.msra.mxu0 %v16727_v53 }
0x23d0   :  { %15274 = vmatprep.subr.bf16.mxu0 %v17366_v5 }
0x23d3   :  { %15275 = vmatpush3.bf16.msra.mxu0 %v16728_v2 }
0x23d4   :  { %15276 = vmatprep.subr.bf16.mxu0 %v17366_v5 }
0x23d7   :  { %15277 = vmatpush3.bf16.msra.mxu0 %v16729_v14 }
0x23d8   :  { %15278 = vmatprep.subr.bf16.mxu0 %v17366_v5 }
0x23db   :  { %15279 = vmatpush3.bf16.msra.mxu0 %v16730_v10 }
0x23dc   :  { %15280 = vmatprep.subr.bf16.mxu0 %v17366_v5 }
0x23df   :  { %15281 = vmatpush3.bf16.msra.mxu0 %v16731_v13 }
0x2482   :  { %v5983_v7 = vpop.f32.mrf.mxu0 }
0x2483   :  { %v5984_v59 = vadd.f32 %v12864_v4, %v5983_v7 }
0x2484   :  { %v15244_v58 = vpop.f32.mrf.mxu0 }
0x2485   :  { %v5990_v3 = vadd.f32 %v5984_v59, %v4565_v9 }
0x2486   :  { %v5986_v60 = vpop.f32.mrf.mxu0 }
0x2487   :  { %v5987_v61 = vadd.f32 %v12864_v4, %v5986_v60 }
0x2488   :  { %v15245_v63 = vpop.f32.mrf.mxu0 }
0x2489   :  { %v5991_v8 = vadd.f32 %v5987_v61, %v4566_v11 }
0x248b   :  { %v5992_v12 = vpack.c.bf16 %v5991_v8, %v5990_v3 }
0x248d   :  { %15263 = vmatmul.mubr.bf16.vlgmr.msra.gmra.mxu1 %v5992_v12 }
0x248e   :  { %15288 = vmatprep.mubr.msk.bf16.mxu1 %vm17367_vm0, %v17366_v5 }
0x254d   :  { %v6100_v16 = vpop.f32.mrf.mxu1 }
0x254e   :  { %v6101_v17 = vadd.f32 %v12873_v15, %v6100_v16 }
0x254f   :  { %v15264_v62 = vpop.f32.mrf.mxu1 }
0x2550   :  { %v6107_v18 = vmax.f32 %v6101_v17, 0.0 }
0x2551   :  { %v6103_v9 = vpop.f32.mrf.mxu1 }
0x2552   :  { %v6104_v1 = vadd.f32 %v12873_v15, %v6103_v9  ;;  %v6109_v22 = vadd.f32 %v6107_v18, %v3138_v21 }
0x2553   :  { %v15265_v11 = vpop.f32.mrf.mxu1 }
0x2554   :  { %v6108_v20 = vmax.f32 %v6104_v1, 0.0 }
0x2556   :  { %v6110_v24 = vadd.f32 %v6108_v20, %v3139_v25 }
0x2558   :  { %v6111_v30 = vpack.c.bf16 %v6110_v24, %v6109_v22 }
0x255a   :  { %15283 = vmatmul.mubr.bf16.vlgmr.msra.gmra.mxu0 %v6111_v30 }
0x261a   :  { %v6219_v34 = vpop.f32.mrf.mxu0 }
0x261b   :  { %v18225_v35 = vadd.f32 %v12882_v32, %v6219_v34 }
0x261c   :  { %v15284_v40 = vpop.f32.mrf.mxu0 }
0x261d   :  { %v6226_v44 = vmax.f32 %v18225_v35, 0.0 }
0x261e   :  { %v6222_v45 = vpop.f32.mrf.mxu0 }
0x261f   :  { %v18228_v29 = vadd.f32 %v12882_v32, %v6222_v45 }
0x2620   :  { %v15285_v31 = vpop.f32.mrf.mxu0 }
0x2621   :  { %v6227_v42 = vmax.f32 %v18228_v29, 0.0 }
0x2623   :  { %v6230_v19 = vpack.c.bf16 %v6227_v42, %v6226_v44 }
0x2624   :  { %17346 = dma.done.wait [#allocation4 + $0x2], 16384 }
0x2625   :  { %17347 = vsyncadd [#allocation4 + $0x2], 4294950912  ;;  %15312 = vmatprep.subr.bf16.mxu0 %v17366_v5  ;;  %15328 = vmatprep.mubr.msk.bf16.mxu0 %vm17367_vm0, %v17366_v5  ;;  %v16732_v21 = vld [vmem:[#allocation2 + $0x838] sm:$0xff]   ;;  %v16733_v23 = vld [vmem:[#allocation2 + $0x830] sm:$0xff]  }
0x2626   :  { %15287 = vmatpush3.bf16.msra.mxu1 %v6230_v19  ;;  %15313 = vmatpush3.bf16.msra.mxu0 %v16732_v21  ;;  %v16734_v25 = vld [vmem:[#allocation2 + $0x878] sm:$0xff]   ;;  %v16736_v26 = vld [vmem:[#allocation2 + $0x870] sm:$0xff]   ;;  %v16735_v27 = vld [vmem:[#allocation2 + $0x828] sm:$0xff]  }
0x2627   :  { %15292 = vmatprep.subr.bf16.mxu1 %v17366_v5  ;;  %15314 = vmatprep.subr.bf16.mxu0 %v17366_v5  ;;  %v16738_v28 = vld [vmem:[#allocation2 + $0x868] sm:$0xff]   ;;  %v16737_v33 = vld [vmem:[#allocation2 + $0x820] sm:$0xff]   ;;  %v16739_v37 = vld [vmem:[#allocation2 + $0x818] sm:$0xff]  }
0x2628   :  { %v16740_v36 = vld [vmem:[#allocation2 + $0x860] sm:$0xff]   ;;  %v16742_v38 = vld [vmem:[#allocation2 + $0x858] sm:$0xff]   ;;  %v16741_v39 = vld [vmem:[#allocation2 + $0x810] sm:$0xff]  }
0x2629   :  { %15289 = vmatmul.mubr.msk.bf16.vlgmr.msra.gmra.mxu1 %vm170_vm1, %v17494_v6  ;;  %v16744_v41 = vld [vmem:[#allocation2 + $0x850] sm:$0xff]   ;;  %v16743_v43 = vld [vmem:[#allocation2 + $0x808] sm:$0xff]   ;;  %v16745_v46 = vld [vmem:[#allocation2 + $0x800] sm:$0xff]  }
0x262a   :  { %15308 = vmatprep.mubr.msk.bf16.mxu1 %vm17367_vm0, %v17366_v5  ;;  %15293 = vmatpush3.bf16.msra.mxu1 %v16734_v25  ;;  %v16746_v47 = vld [vmem:[#allocation2 + $0x848] sm:$0xff]   ;;  %v16747_v49 = vld [vmem:[#allocation2 + $0x840] sm:$0xff]   ;;  %v16756_v53 = vld [vmem:[#allocation2 + $0x8f8] sm:$0xff]  }
0x262b   :  { %15294 = vmatprep.subr.bf16.mxu1 %v17366_v5  ;;  %15315 = vmatpush3.bf16.msra.mxu0 %v16733_v23  ;;  %v16757_v2 = vld [vmem:[#allocation2 + $0x8f0] sm:$0xff]   ;;  %v16758_v4 = vld [vmem:[#allocation2 + $0x8e8] sm:$0xff]   ;;  %v16759_v7 = vld [vmem:[#allocation2 + $0x8e0] sm:$0xff]  }
0x262c   :  { %15316 = vmatprep.subr.bf16.mxu0 %v17366_v5  ;;  %v16760_v58 = vld [vmem:[#allocation2 + $0x8d8] sm:$0xff]   ;;  %v16761_v59 = vld [vmem:[#allocation2 + $0x8d0] sm:$0xff]   ;;  %v16750_v18 = vld [vmem:[#allocation2 + $0x8a8] sm:$0xff]  }
0x262d   :  { %v12908_v63 = vld [vmem:[#allocation6 + $0x10] ss:$0 sm:$0xff]  ;;  %v16748_v62 = vld [vmem:[#allocation2 + $0x8b8] sm:$0xff]   ;;  %v16751_v1 = vld [vmem:[#allocation2 + $0x8a0] sm:$0xff]  }
0x262e   :  { %15295 = vmatpush3.bf16.msra.mxu1 %v16736_v26  ;;  %v16749_v9 = vld [vmem:[#allocation2 + $0x8b0] sm:$0xff]   ;;  %v16752_v11 = vld [vmem:[#allocation2 + $0x898] sm:$0xff]   ;;  %v16754_v22 = vld [vmem:[#allocation2 + $0x888] sm:$0xff]  }
0x262f   :  { %15296 = vmatprep.subr.bf16.mxu1 %v17366_v5  ;;  %15317 = vmatpush3.bf16.msra.mxu0 %v16735_v27  ;;  %v16753_v20 = vld [vmem:[#allocation2 + $0x890] sm:$0xff]   ;;  %v16755_v24 = vld [vmem:[#allocation2 + $0x880] sm:$0xff]   ;;  %v16762_v30 = vld [vmem:[#allocation2 + $0x8c8] sm:$0xff]  }
0x2630   :  { %15318 = vmatprep.subr.bf16.mxu0 %v17366_v5  ;;  %v16763_v32 = vld [vmem:[#allocation2 + $0x8c0] sm:$0xff]   ;;  %v16764_v31 = vld [vmem:[#allocation3 + $0x3f8] sm:$0xff]   ;;  %v16765_v23 = vld [vmem:[#allocation3 + $0x3f0] sm:$0xff]  }
0x2631   :  { %v16766_v25 = vld [vmem:[#allocation3 + $0x3e8] sm:$0xff]   ;;  %v16767_v26 = vld [vmem:[#allocation3 + $0x3e0] sm:$0xff]  }
0x2632   :  { %15297 = vmatpush3.bf16.msra.mxu1 %v16738_v28 }
0x2633   :  { %15298 = vmatprep.subr.bf16.mxu1 %v17366_v5  ;;  %15319 = vmatpush3.bf16.msra.mxu0 %v16737_v33 }
0x2634   :  { %15320 = vmatprep.subr.bf16.mxu0 %v17366_v5 }
0x2636   :  { %15299 = vmatpush3.bf16.msra.mxu1 %v16740_v36 }
0x2637   :  { %15300 = vmatprep.subr.bf16.mxu1 %v17366_v5  ;;  %15321 = vmatpush3.bf16.msra.mxu0 %v16739_v37  ;;  %v16768_v37 = vld [vmem:[#allocation3 + $0x3d8] sm:$0xff]  }
0x2638   :  { %15322 = vmatprep.subr.bf16.mxu0 %v17366_v5 }
0x263a   :  { %15301 = vmatpush3.bf16.msra.mxu1 %v16742_v38  ;;  %v16769_v38 = vld [vmem:[#allocation3 + $0x3d0] sm:$0xff]  }
0x263b   :  { %15302 = vmatprep.subr.bf16.mxu1 %v17366_v5  ;;  %15323 = vmatpush3.bf16.msra.mxu0 %v16741_v39  ;;  %v16770_v39 = vld [vmem:[#allocation3 + $0x3c8] sm:$0xff]  }
0x263c   :  { %15324 = vmatprep.subr.bf16.mxu0 %v17366_v5 }
0x263e   :  { %15303 = vmatpush3.bf16.msra.mxu1 %v16744_v41  ;;  %v16771_v41 = vld [vmem:[#allocation3 + $0x3c0] sm:$0xff]  }
0x263f   :  { %15304 = vmatprep.subr.bf16.mxu1 %v17366_v5  ;;  %15325 = vmatpush3.bf16.msra.mxu0 %v16743_v43 }
0x2640   :  { %15326 = vmatprep.subr.bf16.mxu0 %v17366_v5 }
0x2642   :  { %15305 = vmatpush3.bf16.msra.mxu1 %v16746_v47 }
0x2643   :  { %15327 = vmatpush3.bf16.msra.mxu0 %v16745_v46  ;;  %15306 = vmatprep.subr.bf16.mxu1 %v17366_v5  ;;  %v12926_v46 = vld [vmem:[#allocation6 + $0x11] ss:$0 sm:$0xff] }
0x2644   :  { %15338 = vmatprep.subr.bf16.mxu0 %v17366_v5 }
0x2646   :  { %15329 = vmatmul.mubr.bf16.vlgmr.msra.gmra.mxu0 %v6230_v19  ;;  %15307 = vmatpush3.bf16.msra.mxu1 %v16747_v49 }
0x2647   :  { %15354 = vmatprep.mubr.msk.bf16.mxu0 %vm17367_vm0, %v17366_v5  ;;  %15332 = vmatprep.subr.bf16.mxu1 %v17366_v5 }
0x2648   :  { %15339 = vmatpush3.bf16.msra.mxu0 %v16756_v53  ;;  %v16772_v53 = vld [vmem:[#allocation2 + $0x938] sm:$0xff]  }
0x2649   :  { %15340 = vmatprep.subr.bf16.mxu0 %v17366_v5 }
0x264c   :  { %15341 = vmatpush3.bf16.msra.mxu0 %v16757_v2 }
0x264d   :  { %15342 = vmatprep.subr.bf16.mxu0 %v17366_v5 }
0x2650   :  { %15343 = vmatpush3.bf16.msra.mxu0 %v16758_v4  ;;  %v16773_v4 = vld [vmem:[#allocation2 + $0x930] sm:$0xff]  }
0x2651   :  { %15344 = vmatprep.subr.bf16.mxu0 %v17366_v5 }
0x2654   :  { %15345 = vmatpush3.bf16.msra.mxu0 %v16759_v7  ;;  %v16774_v7 = vld [vmem:[#allocation2 + $0x928] sm:$0xff]  }
0x2655   :  { %15346 = vmatprep.subr.bf16.mxu0 %v17366_v5 }
0x2658   :  { %15347 = vmatpush3.bf16.msra.mxu0 %v16760_v58  ;;  %v16775_v58 = vld [vmem:[#allocation2 + $0x920] sm:$0xff]  }
0x2659   :  { %15348 = vmatprep.subr.bf16.mxu0 %v17366_v5 }
0x265c   :  { %15349 = vmatpush3.bf16.msra.mxu0 %v16761_v59  ;;  %v16776_v59 = vld [vmem:[#allocation2 + $0x918] sm:$0xff]  }
0x265d   :  { %15350 = vmatprep.subr.bf16.mxu0 %v17366_v5 }
0x2660   :  { %15351 = vmatpush3.bf16.msra.mxu0 %v16762_v30  ;;  %v16787_v30 = vld [vmem:[#allocation2 + $0x940] sm:$0xff]  }
0x2661   :  { %15352 = vmatprep.subr.bf16.mxu0 %v17366_v5 }
0x2664   :  { %15353 = vmatpush3.bf16.msra.mxu0 %v16763_v32  ;;  %v16788_v32 = vld [vmem:[#allocation2 + $0x9b8] sm:$0xff]  }
0x2665   :  { %15378 = vmatprep.subr.bf16.mxu0 %v17366_v5 }
0x26e9   :  { %v6265_v51 = vpop.f32.mrf.mxu1 }
0x26eb   :  { %v15290_v54 = vpop.f32.mrf.mxu1 }
0x26ed   :  { %v6268_v55 = vpop.f32.mrf.mxu1 }
0x26ee   :  { %v6288_v56 = vpack.c.bf16 %v6268_v55, %v6265_v51 }
0x26ef   :  { %v15291_v57 = vpop.f32.mrf.mxu1 }
0x26f0   :  { %15309 = vmatmul.mubr.bf16.vlgmr.msra.gmra.mxu1 %v6288_v56 }
0x26f1   :  { %15334 = vmatprep.mubr.msk.bf16.mxu1 %vm17367_vm0, %v17366_v5 }
0x2706   :  { %v6477_v0 = vpop.f32.mrf.mxu0 }
0x2708   :  { %v15330_v48 = vpop.f32.mrf.mxu0 }
0x270a   :  { %v6480_v52 = vpop.f32.mrf.mxu0 }
0x270c   :  { %v15331_v50 = vpop.f32.mrf.mxu0 }
0x27b0   :  { %v6388_v60 = vpop.f32.mrf.mxu1 }
0x27b1   :  { %v6478_v61 = vadd.f32 %v6477_v0, %v6388_v60  ;;  %v16777_v60 = vld [vmem:[#allocation2 + $0x910] sm:$0xff]  }
0x27b2   :  { %v15310_v3 = vpop.f32.mrf.mxu1 }
0x27b3   :  { %v18272_v12 = vadd.f32 %v12908_v63, %v6478_v61  ;;  %v16778_v61 = vld [vmem:[#allocation2 + $0x908] sm:$0xff]  }
0x27b4   :  { %v6391_v8 = vpop.f32.mrf.mxu1  ;;  %v12927_v3 = vld [vmem:[#allocation8 + $0xf] ss:$0 sm:$0xff] }
0x27b5   :  { %v6481_v14 = vadd.f32 %v6480_v52, %v6391_v8  ;;  %v6494_v15 = vmax.f32 %v18272_v12, 0.0 }
0x27b6   :  { %v15311_v10 = vpop.f32.mrf.mxu1 }
0x27b7   :  { %v18274_v13 = vadd.f32 %v12908_v63, %v6481_v14  ;;  %v16779_v63 = vld [vmem:[#allocation2 + $0x900] sm:$0xff]  }
0x27b9   :  { %v6495_v16 = vmax.f32 %v18274_v13, 0.0 }
0x27bb   :  { %v6496_v17 = vpack.c.bf16 %v6495_v16, %v6494_v15 }
0x27bd   :  { %15333 = vmatpush3.bf16.msra.mxu1 %v6496_v17 }
0x27be   :  { %15358 = vmatprep.subr.bf16.mxu1 %v17366_v5 }
0x27c0   :  { %15335 = vmatmul.mubr.msk.bf16.vlgmr.msra.gmra.mxu1 %vm170_vm1, %v17494_v6 }
0x27c1   :  { %15359 = vmatpush3.bf16.msra.mxu1 %v16748_v62  ;;  %15374 = vmatprep.mubr.msk.bf16.mxu1 %vm17367_vm0, %v17366_v5 }
0x27c2   :  { %15360 = vmatprep.subr.bf16.mxu1 %v17366_v5 }
0x27c5   :  { %15361 = vmatpush3.bf16.msra.mxu1 %v16749_v9  ;;  %v16780_v9 = vld [vmem:[#allocation2 + $0x978] sm:$0xff]  }
0x27c6   :  { %15362 = vmatprep.subr.bf16.mxu1 %v17366_v5 }
0x27c9   :  { %15363 = vmatpush3.bf16.msra.mxu1 %v16750_v18  ;;  %v16781_v18 = vld [vmem:[#allocation2 + $0x970] sm:$0xff]  }
0x27ca   :  { %15364 = vmatprep.subr.bf16.mxu1 %v17366_v5 }
0x27cd   :  { %15365 = vmatpush3.bf16.msra.mxu1 %v16751_v1  ;;  %v16782_v1 = vld [vmem:[#allocation2 + $0x968] sm:$0xff]  }
0x27ce   :  { %15366 = vmatprep.subr.bf16.mxu1 %v17366_v5 }
0x27d1   :  { %15367 = vmatpush3.bf16.msra.mxu1 %v16752_v11  ;;  %v16783_v11 = vld [vmem:[#allocation2 + $0x960] sm:$0xff]  }
0x27d2   :  { %15368 = vmatprep.subr.bf16.mxu1 %v17366_v5 }
0x27d5   :  { %15369 = vmatpush3.bf16.msra.mxu1 %v16753_v20  ;;  %v16784_v20 = vld [vmem:[#allocation2 + $0x958] sm:$0xff]  }
0x27d6   :  { %15370 = vmatprep.subr.bf16.mxu1 %v17366_v5 }
0x27d9   :  { %15371 = vmatpush3.bf16.msra.mxu1 %v16754_v22  ;;  %v16785_v22 = vld [vmem:[#allocation2 + $0x950] sm:$0xff]  }
0x27da   :  { %15372 = vmatprep.subr.bf16.mxu1 %v17366_v5 }
0x27dd   :  { %15373 = vmatpush3.bf16.msra.mxu1 %v16755_v24  ;;  %v16786_v24 = vld [vmem:[#allocation2 + $0x948] sm:$0xff]  }
0x27de   :  { %15398 = vmatprep.subr.bf16.mxu1 %v17366_v5 }
0x27e0   :  { %15375 = vmatmul.mubr.bf16.vlgmr.msra.gmra.mxu1 %v6496_v17 }
0x27e1   :  { %15400 = vmatprep.mubr.msk.bf16.mxu1 %vm17367_vm0, %v17366_v5 }
0x2880   :  { %v6531_v34 = vpop.f32.mrf.mxu1 }
0x2882   :  { %v15336_v40 = vpop.f32.mrf.mxu1 }
0x2883   :  { %v16790_v40 = vld [vmem:[#allocation2 + $0x9a8] sm:$0xff]  }
0x2884   :  { %v6534_v45 = vpop.f32.mrf.mxu1 }
0x2885   :  { %v6555_v19 = vpack.c.bf16 %v6534_v45, %v6531_v34  ;;  %v16789_v34 = vld [vmem:[#allocation2 + $0x9b0] sm:$0xff]   ;;  %v16791_v45 = vld [vmem:[#allocation2 + $0x9a0] sm:$0xff]  }
0x2886   :  { %v15337_v21 = vpop.f32.mrf.mxu1 }
0x2887   :  { %15355 = vmatmul.mubr.bf16.vlgmr.msra.gmra.mxu0 %v6555_v19 }
0x2888   :  { %15379 = vmatpush3.bf16.msra.mxu0 %v16764_v31  ;;  %15394 = vmatprep.mubr.msk.bf16.mxu0 %vm17367_vm0, %v17366_v5  ;;  %v16792_v31 = vld [vmem:[#allocation2 + $0x998] sm:$0xff]  }
0x2889   :  { %15380 = vmatprep.subr.bf16.mxu0 %v17366_v5 }
0x288c   :  { %15381 = vmatpush3.bf16.msra.mxu0 %v16765_v23 }
0x288d   :  { %15382 = vmatprep.subr.bf16.mxu0 %v17366_v5 }
0x2890   :  { %15383 = vmatpush3.bf16.msra.mxu0 %v16766_v25 }
0x2891   :  { %15384 = vmatprep.subr.bf16.mxu0 %v17366_v5 }
0x2894   :  { %15385 = vmatpush3.bf16.msra.mxu0 %v16767_v26 }
0x2895   :  { %15386 = vmatprep.subr.bf16.mxu0 %v17366_v5 }
0x2898   :  { %15387 = vmatpush3.bf16.msra.mxu0 %v16768_v37  ;;  %v16793_v37 = vld [vmem:[#allocation2 + $0x990] sm:$0xff]  }
0x2899   :  { %15388 = vmatprep.subr.bf16.mxu0 %v17366_v5 }
0x289c   :  { %15389 = vmatpush3.bf16.msra.mxu0 %v16769_v38  ;;  %v16794_v38 = vld [vmem:[#allocation2 + $0x988] sm:$0xff]  }
0x289d   :  { %15390 = vmatprep.subr.bf16.mxu0 %v17366_v5 }
0x28a0   :  { %v6744_v27 = vpop.f32.mrf.mxu1  ;;  %15391 = vmatpush3.bf16.msra.mxu0 %v16770_v39  ;;  %v16795_v39 = vld [vmem:[#allocation2 + $0x980] sm:$0xff]  }
0x28a1   :  { %15392 = vmatprep.subr.bf16.mxu0 %v17366_v5 }
0x28a2   :  { %v15376_v28 = vpop.f32.mrf.mxu1 }
0x28a4   :  { %v6747_v33 = vpop.f32.mrf.mxu1  ;;  %15393 = vmatpush3.bf16.msra.mxu0 %v16771_v41 }
0x28a5   :  { %15424 = vmatprep.subr.bf16.mxu0 %v17366_v5 }
0x28a6   :  { %v15377_v36 = vpop.f32.mrf.mxu1 }
0x2947   :  { %v6655_v43 = vpop.f32.mrf.mxu0 }
0x2948   :  { %v6745_v47 = vadd.f32 %v6744_v27, %v6655_v43 }
0x2949   :  { %v15356_v49 = vpop.f32.mrf.mxu0 }
0x294a   :  { %v6759_v51 = vadd.f32 %v12926_v46, %v6745_v47 }
0x294b   :  { %v6658_v54 = vpop.f32.mrf.mxu0 }
0x294c   :  { %v6748_v55 = vadd.f32 %v6747_v33, %v6658_v54  ;;  %v6761_v57 = vmax.f32 %v6759_v51, 0.0 }
0x294d   :  { %v15357_v56 = vpop.f32.mrf.mxu0 }
0x294e   :  { %v6760_v0 = vadd.f32 %v12926_v46, %v6748_v55  ;;  %v6763_v52 = vadd.f32 %v6761_v57, %v6494_v15  ;;  %v12953_v46 = vld [vmem:[#allocation6 + $0x12] ss:$0 sm:$0xff] }
0x2950   :  { %v6762_v48 = vmax.f32 %v6760_v0, 0.0 }
0x2952   :  { %v6764_v50 = vadd.f32 %v6762_v48, %v6495_v16 }
0x2954   :  { %v6765_v2 = vpack.c.bf16 %v6764_v50, %v6763_v52  ;;  %v16796_v52 = vld [vmem:[#allocation2 + $0x9f8] sm:$0xff]   ;;  %v16797_v50 = vld [vmem:[#allocation2 + $0x9f0] sm:$0xff]  }
0x2956   :  { %15395 = vmatmul.mubr.bf16.vlgmr.msra.gmra.mxu0 %v6765_v2  ;;  %v16799_v2 = vld [vmem:[#allocation2 + $0x9e0] sm:$0xff]  }
0x2957   :  { %15425 = vmatpush3.bf16.msra.mxu0 %v16772_v53  ;;  %15440 = vmatprep.mubr.msk.bf16.mxu0 %vm17367_vm0, %v17366_v5  ;;  %v16798_v53 = vld [vmem:[#allocation2 + $0x9e8] sm:$0xff]  }
0x2958   :  { %15426 = vmatprep.subr.bf16.mxu0 %v17366_v5 }
0x295b   :  { %15427 = vmatpush3.bf16.msra.mxu0 %v16773_v4  ;;  %v16800_v4 = vld [vmem:[#allocation2 + $0x9d8] sm:$0xff]  }
0x295c   :  { %15428 = vmatprep.subr.bf16.mxu0 %v17366_v5 }
0x295f   :  { %15429 = vmatpush3.bf16.msra.mxu0 %v16774_v7  ;;  %v16801_v7 = vld [vmem:[#allocation2 + $0x9d0] sm:$0xff]  }
0x2960   :  { %15430 = vmatprep.subr.bf16.mxu0 %v17366_v5 }
0x2963   :  { %15431 = vmatpush3.bf16.msra.mxu0 %v16775_v58  ;;  %v16802_v58 = vld [vmem:[#allocation2 + $0x9c8] sm:$0xff]  }
0x2964   :  { %15432 = vmatprep.subr.bf16.mxu0 %v17366_v5 }
0x2967   :  { %15433 = vmatpush3.bf16.msra.mxu0 %v16776_v59  ;;  %v16803_v59 = vld [vmem:[#allocation2 + $0x9c0] sm:$0xff]  }
0x2968   :  { %15434 = vmatprep.subr.bf16.mxu0 %v17366_v5 }
0x296b   :  { %15435 = vmatpush3.bf16.msra.mxu0 %v16777_v60 }
0x296c   :  { %15436 = vmatprep.subr.bf16.mxu0 %v17366_v5 }
0x296f   :  { %15437 = vmatpush3.bf16.msra.mxu0 %v16778_v61 }
0x2970   :  { %15438 = vmatprep.subr.bf16.mxu0 %v17366_v5 }
0x2973   :  { %15439 = vmatpush3.bf16.msra.mxu0 %v16779_v63 }
0x2974   :  { %15470 = vmatprep.subr.bf16.mxu0 %v17366_v5 }
0x2a16   :  { %v6873_v8 = vpop.f32.mrf.mxu0 }
0x2a17   :  { %v18323_v14 = vadd.f32 %v12927_v3, %v6873_v8 }
0x2a18   :  { %v15396_v12 = vpop.f32.mrf.mxu0 }
0x2a19   :  { %v6880_v16 = vmax.f32 %v18323_v14, 0.0 }
0x2a1a   :  { %v6876_v10 = vpop.f32.mrf.mxu0 }
0x2a1b   :  { %v18325_v13 = vadd.f32 %v12927_v3, %v6876_v10 }
0x2a1c   :  { %v15397_v15 = vpop.f32.mrf.mxu0 }
0x2a1d   :  { %v6881_v17 = vmax.f32 %v18325_v13, 0.0 }
0x2a1f   :  { %v6882_v62 = vpack.c.bf16 %v6881_v17, %v6880_v16 }
0x2a21   :  { %15399 = vmatpush3.bf16.msra.mxu1 %v6882_v62  ;;  %15441 = vmatmul.mubr.bf16.vlgmr.msra.gmra.mxu0 %v6882_v62 }
0x2a22   :  { %15404 = vmatprep.subr.bf16.mxu1 %v17366_v5  ;;  %15486 = vmatprep.mubr.msk.bf16.mxu0 %vm17367_vm0, %v17366_v5 }
0x2a23   :  { %15471 = vmatpush3.bf16.msra.mxu0 %v16788_v32 }
0x2a24   :  { %15401 = vmatmul.mubr.msk.bf16.vlgmr.msra.gmra.mxu1 %vm170_vm1, %v17494_v6  ;;  %15472 = vmatprep.subr.bf16.mxu0 %v17366_v5 }
0x2a25   :  { %15405 = vmatpush3.bf16.msra.mxu1 %v16780_v9  ;;  %15420 = vmatprep.mubr.msk.bf16.mxu1 %vm17367_vm0, %v17366_v5 }
0x2a26   :  { %15406 = vmatprep.subr.bf16.mxu1 %v17366_v5 }
0x2a27   :  { %15473 = vmatpush3.bf16.msra.mxu0 %v16789_v34 }
0x2a28   :  { %15474 = vmatprep.subr.bf16.mxu0 %v17366_v5 }
0x2a29   :  { %15407 = vmatpush3.bf16.msra.mxu1 %v16781_v18  ;;  %v12971_v18 = vld [vmem:[#allocation6 + $0x13] ss:$0 sm:$0xff] }
0x2a2a   :  { %15408 = vmatprep.subr.bf16.mxu1 %v17366_v5 }
0x2a2b   :  { %15475 = vmatpush3.bf16.msra.mxu0 %v16790_v40 }
0x2a2c   :  { %15476 = vmatprep.subr.bf16.mxu0 %v17366_v5 }
0x2a2d   :  { %15409 = vmatpush3.bf16.msra.mxu1 %v16782_v1 }
0x2a2e   :  { %15410 = vmatprep.subr.bf16.mxu1 %v17366_v5 }
0x2a2f   :  { %15477 = vmatpush3.bf16.msra.mxu0 %v16791_v45 }
0x2a30   :  { %15478 = vmatprep.subr.bf16.mxu0 %v17366_v5 }
0x2a31   :  { %15411 = vmatpush3.bf16.msra.mxu1 %v16783_v11 }
0x2a32   :  { %15412 = vmatprep.subr.bf16.mxu1 %v17366_v5 }
0x2a33   :  { %15479 = vmatpush3.bf16.msra.mxu0 %v16792_v31 }
0x2a34   :  { %15480 = vmatprep.subr.bf16.mxu0 %v17366_v5 }
0x2a35   :  { %15413 = vmatpush3.bf16.msra.mxu1 %v16784_v20 }
0x2a36   :  { %15414 = vmatprep.subr.bf16.mxu1 %v17366_v5 }
0x2a37   :  { %15481 = vmatpush3.bf16.msra.mxu0 %v16793_v37 }
0x2a38   :  { %15482 = vmatprep.subr.bf16.mxu0 %v17366_v5 }
0x2a39   :  { %15415 = vmatpush3.bf16.msra.mxu1 %v16785_v22 }
0x2a3a   :  { %15416 = vmatprep.subr.bf16.mxu1 %v17366_v5 }
0x2a3b   :  { %15483 = vmatpush3.bf16.msra.mxu0 %v16794_v38 }
0x2a3c   :  { %15484 = vmatprep.subr.bf16.mxu0 %v17366_v5 }
0x2a3d   :  { %15417 = vmatpush3.bf16.msra.mxu1 %v16786_v24 }
0x2a3e   :  { %15418 = vmatprep.subr.bf16.mxu1 %v17366_v5 }
0x2a3f   :  { %15485 = vmatpush3.bf16.msra.mxu0 %v16795_v39 }
0x2a41   :  { %15419 = vmatpush3.bf16.msra.mxu1 %v16787_v30 }
0x2a42   :  { %15444 = vmatprep.subr.bf16.mxu1 %v17366_v5 }
0x2ae1   :  { %v7130_v19 = vpop.f32.mrf.mxu0 }
0x2ae3   :  { %v15442_v21 = vpop.f32.mrf.mxu0 }
0x2ae4   :  { %v6917_v23 = vpop.f32.mrf.mxu1 }
0x2ae5   :  { %v7133_v25 = vpop.f32.mrf.mxu0 }
0x2ae6   :  { %v15402_v26 = vpop.f32.mrf.mxu1 }
0x2ae7   :  { %v15443_v27 = vpop.f32.mrf.mxu0 }
0x2ae8   :  { %v6920_v28 = vpop.f32.mrf.mxu1 }
0x2ae9   :  { %v6941_v33 = vpack.c.bf16 %v6920_v28, %v6917_v23 }
0x2aea   :  { %v15403_v36 = vpop.f32.mrf.mxu1 }
0x2aeb   :  { %15421 = vmatmul.mubr.bf16.vlgmr.msra.gmra.mxu1 %v6941_v33 }
0x2aec   :  { %15446 = vmatprep.mubr.msk.bf16.mxu1 %vm17367_vm0, %v17366_v5 }
0x2bab   :  { %v7041_v41 = vpop.f32.mrf.mxu1 }
0x2bac   :  { %v7131_v43 = vadd.f32 %v7130_v19, %v7041_v41 }
0x2bad   :  { %v15422_v47 = vpop.f32.mrf.mxu1 }
0x2bae   :  { %v7145_v51 = vadd.f32 %v12953_v46, %v7131_v43 }
0x2baf   :  { %v7044_v49 = vpop.f32.mrf.mxu1 }
0x2bb0   :  { %v7134_v54 = vadd.f32 %v7133_v25, %v7044_v49  ;;  %v7147_v57 = vmax.f32 %v7145_v51, 0.0 }
0x2bb1   :  { %v15423_v55 = vpop.f32.mrf.mxu1 }
0x2bb2   :  { %v7146_v56 = vadd.f32 %v12953_v46, %v7134_v54 }
0x2bb4   :  { %v7148_v0 = vmax.f32 %v7146_v56, 0.0 }
0x2bb6   :  { %v7149_v48 = vpack.c.bf16 %v7148_v0, %v7147_v57 }
0x2bb8   :  { %15445 = vmatpush3.bf16.msra.mxu1 %v7149_v48  ;;  %15487 = vmatmul.mubr.bf16.vlgmr.msra.gmra.mxu0 %v7149_v48 }
0x2bb9   :  { %15450 = vmatprep.subr.bf16.mxu1 %v17366_v5 }
0x2bbb   :  { %15447 = vmatmul.mubr.msk.bf16.vlgmr.msra.gmra.mxu1 %vm170_vm1, %v17494_v6 }
0x2bbc   :  { %15451 = vmatpush3.bf16.msra.mxu1 %v16796_v52  ;;  %15466 = vmatprep.mubr.msk.bf16.mxu1 %vm17367_vm0, %v17366_v5 }
0x2bbd   :  { %15452 = vmatprep.subr.bf16.mxu1 %v17366_v5 }
0x2bc0   :  { %15453 = vmatpush3.bf16.msra.mxu1 %v16797_v50 }
0x2bc1   :  { %15454 = vmatprep.subr.bf16.mxu1 %v17366_v5 }
0x2bc4   :  { %15455 = vmatpush3.bf16.msra.mxu1 %v16798_v53 }
0x2bc5   :  { %15456 = vmatprep.subr.bf16.mxu1 %v17366_v5 }
0x2bc8   :  { %15457 = vmatpush3.bf16.msra.mxu1 %v16799_v2 }
0x2bc9   :  { %15458 = vmatprep.subr.bf16.mxu1 %v17366_v5 }
0x2bcc   :  { %15459 = vmatpush3.bf16.msra.mxu1 %v16800_v4 }
0x2bcd   :  { %15460 = vmatprep.subr.bf16.mxu1 %v17366_v5 }
0x2bd0   :  { %15461 = vmatpush3.bf16.msra.mxu1 %v16801_v7 }
0x2bd1   :  { %15462 = vmatprep.subr.bf16.mxu1 %v17366_v5 }
0x2bd4   :  { %15463 = vmatpush3.bf16.msra.mxu1 %v16802_v58 }
0x2bd5   :  { %15464 = vmatprep.subr.bf16.mxu1 %v17366_v5 }
0x2bd8   :  { %15465 = vmatpush3.bf16.msra.mxu1 %v16803_v59 }
0x2c78   :  { %v7397_v60 = vpop.f32.mrf.mxu0 }
0x2c7a   :  { %v15488_v61 = vpop.f32.mrf.mxu0 }
0x2c7b   :  { %v7184_v63 = vpop.f32.mrf.mxu1 }
0x2c7c   :  { %v7400_v3 = vpop.f32.mrf.mxu0 }
0x2c7d   :  { %v15448_v8 = vpop.f32.mrf.mxu1 }
0x2c7e   :  { %v15489_v12 = vpop.f32.mrf.mxu0 }
0x2c7f   :  { %v7187_v10 = vpop.f32.mrf.mxu1 }
0x2c80   :  { %v7208_v15 = vpack.c.bf16 %v7187_v10, %v7184_v63 }
0x2c81   :  { %v15449_v62 = vpop.f32.mrf.mxu1 }
0x2c82   :  { %15467 = vmatmul.mubr.bf16.vlgmr.msra.gmra.mxu1 %v7208_v15 }
0x2d42   :  { %v7308_v9 = vpop.f32.mrf.mxu1 }
0x2d43   :  { %v7398_v1 = vadd.f32 %v7397_v60, %v7308_v9 }
0x2d44   :  { %v15468_v11 = vpop.f32.mrf.mxu1 }
0x2d45   :  { %v7412_v20 = vadd.f32 %v12971_v18, %v7398_v1 }
0x2d46   :  { %v7311_v22 = vpop.f32.mrf.mxu1 }
0x2d47   :  { %v7414_v24 = vmax.f32 %v7412_v20, 0.0  ;;  %v7401_v30 = vadd.f32 %v7400_v3, %v7311_v22 }
0x2d48   :  { %v15469_v32 = vpop.f32.mrf.mxu1 }
0x2d49   :  { %v7416_v34 = vadd.f32 %v7414_v24, %v7147_v57  ;;  %v7413_v40 = vadd.f32 %v12971_v18, %v7401_v30 }
0x2d4b   :  { %v7415_v45 = vmax.f32 %v7413_v40, 0.0 }
0x2d4d   :  { %v7417_v31 = vadd.f32 %v7415_v45, %v7148_v0 }
0x2d4e   :  { %17348 = dma.done.wait [#allocation5 + $0x2], 8192 }
0x2d4f   :  { %17349 = vsyncadd [#allocation5 + $0x2], 4294959104  ;;  %15490 = vmatprep.subr.bf16.mxu1 %v17366_v5  ;;  %15506 = vmatprep.mubr.msk.bf16.mxu1 %vm17367_vm0, %v17366_v5  ;;  %v16804_v19 = vld [vmem:[#allocation3 + $0x438] sm:$0xff]   ;;  %v16805_v21 = vld [vmem:[#allocation3 + $0x430] sm:$0xff]   ;;  %v7420_v43 = vpack.c.bf16 %v7417_v31, %v7416_v34 }
0x2d50   :  { %15510 = vmatprep.subr.bf16.mxu0 %v17366_v5  ;;  %15526 = vmatprep.mubr.msk.bf16.mxu0 %vm17367_vm0, %v17366_v5  ;;  %v16806_v23 = vld [vmem:[#allocation3 + $0x428] sm:$0xff]   ;;  %v16812_v25 = vld [vmem:[#allocation3 + $0x478] sm:$0xff]   ;;  %v16807_v26 = vld [vmem:[#allocation3 + $0x420] sm:$0xff]  }
0x2d51   :  { %15491 = vmatpush3.bf16.msra.mxu1 %v16804_v19  ;;  %15511 = vmatpush3.bf16.msra.mxu0 %v16812_v25  ;;  %v16813_v27 = vld [vmem:[#allocation3 + $0x470] sm:$0xff]   ;;  %v16808_v28 = vld [vmem:[#allocation3 + $0x418] sm:$0xff]   ;;  %v16814_v33 = vld [vmem:[#allocation3 + $0x468] sm:$0xff]  }
0x2d52   :  { %15492 = vmatprep.subr.bf16.mxu1 %v17366_v5  ;;  %15512 = vmatprep.subr.bf16.mxu0 %v17366_v5  ;;  %v16809_v36 = vld [vmem:[#allocation3 + $0x410] sm:$0xff]   ;;  %v16815_v37 = vld [vmem:[#allocation3 + $0x460] sm:$0xff]   ;;  %v16810_v38 = vld [vmem:[#allocation3 + $0x408] sm:$0xff]  }
0x2d53   :  { %v16816_v39 = vld [vmem:[#allocation3 + $0x458] sm:$0xff]   ;;  %v16811_v41 = vld [vmem:[#allocation3 + $0x400] sm:$0xff]   ;;  %v16817_v46 = vld [vmem:[#allocation3 + $0x450] sm:$0xff]  }
0x2d54   :  { %v16818_v47 = vld [vmem:[#allocation3 + $0x448] sm:$0xff]   ;;  %v16819_v49 = vld [vmem:[#allocation3 + $0x440] sm:$0xff]   ;;  %v12972_v51 = vld [vmem:[#allocation8 + $0x10] ss:$0 sm:$0xff] }
0x2d55   :  { %15493 = vmatpush3.bf16.msra.mxu1 %v16805_v21  ;;  %15513 = vmatpush3.bf16.msra.mxu0 %v16813_v27  ;;  %v16820_v4 = vld [vmem:[#allocation2 + $0xa38] sm:$0xff]   ;;  %v16821_v58 = vld [vmem:[#allocation2 + $0xa30] sm:$0xff]   ;;  %v16822_v59 = vld [vmem:[#allocation2 + $0xa28] sm:$0xff]  }
0x2d56   :  { %15494 = vmatprep.subr.bf16.mxu1 %v17366_v5  ;;  %15514 = vmatprep.subr.bf16.mxu0 %v17366_v5  ;;  %v16823_v14 = vld [vmem:[#allocation2 + $0xa20] sm:$0xff]   ;;  %v16824_v13 = vld [vmem:[#allocation2 + $0xa18] sm:$0xff]   ;;  %v12981_v61 = vld [vmem:[#allocation8 + $0x11] ss:$0 sm:$0xff] }
0x2d57   :  { %v16827_v60 = vld [vmem:[#allocation2 + $0xa00] sm:$0xff]   ;;  %v16828_v1 = vld [vmem:[#allocation2 + $0xa78] sm:$0xff]   ;;  %v16829_v11 = vld [vmem:[#allocation2 + $0xa70] sm:$0xff]  }
0x2d58   :  { %v16830_v20 = vld [vmem:[#allocation2 + $0xa68] sm:$0xff]   ;;  %v16831_v22 = vld [vmem:[#allocation2 + $0xa60] sm:$0xff]   ;;  %v16832_v24 = vld [vmem:[#allocation2 + $0xa58] sm:$0xff]  }
0x2d59   :  { %15495 = vmatpush3.bf16.msra.mxu1 %v16806_v23  ;;  %15515 = vmatpush3.bf16.msra.mxu0 %v16814_v33  ;;  %v16833_v30 = vld [vmem:[#allocation2 + $0xa50] sm:$0xff]   ;;  %v16834_v32 = vld [vmem:[#allocation2 + $0xa48] sm:$0xff]   ;;  %v16835_v34 = vld [vmem:[#allocation2 + $0xa40] sm:$0xff]  }
0x2d5a   :  { %15496 = vmatprep.subr.bf16.mxu1 %v17366_v5  ;;  %15516 = vmatprep.subr.bf16.mxu0 %v17366_v5  ;;  %v16845_v33 = vld [vmem:[#allocation2 + $0xaf0] sm:$0xff]  }
0x2d5d   :  { %15497 = vmatpush3.bf16.msra.mxu1 %v16807_v26  ;;  %15517 = vmatpush3.bf16.msra.mxu0 %v16815_v37  ;;  %v16847_v37 = vld [vmem:[#allocation2 + $0xae0] sm:$0xff]  }
0x2d5e   :  { %15498 = vmatprep.subr.bf16.mxu1 %v17366_v5  ;;  %15518 = vmatprep.subr.bf16.mxu0 %v17366_v5 }
0x2d61   :  { %15499 = vmatpush3.bf16.msra.mxu1 %v16808_v28  ;;  %15519 = vmatpush3.bf16.msra.mxu0 %v16816_v39  ;;  %v16844_v28 = vld [vmem:[#allocation2 + $0xaf8] sm:$0xff]   ;;  %v16849_v39 = vld [vmem:[#allocation2 + $0xad0] sm:$0xff]  }
0x2d62   :  { %15500 = vmatprep.subr.bf16.mxu1 %v17366_v5  ;;  %15520 = vmatprep.subr.bf16.mxu0 %v17366_v5 }
0x2d65   :  { %15501 = vmatpush3.bf16.msra.mxu1 %v16809_v36  ;;  %15521 = vmatpush3.bf16.msra.mxu0 %v16817_v46  ;;  %v16846_v36 = vld [vmem:[#allocation2 + $0xae8] sm:$0xff]   ;;  %v13007_v46 = vld [vmem:[#allocation6 + $0x14] ss:$0 sm:$0xff] }
0x2d66   :  { %15502 = vmatprep.subr.bf16.mxu1 %v17366_v5  ;;  %15522 = vmatprep.subr.bf16.mxu0 %v17366_v5 }
0x2d69   :  { %15503 = vmatpush3.bf16.msra.mxu1 %v16810_v38  ;;  %15523 = vmatpush3.bf16.msra.mxu0 %v16818_v47  ;;  %v16848_v38 = vld [vmem:[#allocation2 + $0xad8] sm:$0xff]  }
0x2d6a   :  { %15504 = vmatprep.subr.bf16.mxu1 %v17366_v5  ;;  %15524 = vmatprep.subr.bf16.mxu0 %v17366_v5 }
0x2d6d   :  { %15505 = vmatpush3.bf16.msra.mxu1 %v16811_v41  ;;  %15525 = vmatpush3.bf16.msra.mxu0 %v16819_v49 }
0x2d6e   :  { %15530 = vmatprep.subr.bf16.mxu1 %v17366_v5  ;;  %15556 = vmatprep.subr.bf16.mxu0 %v17366_v5 }
0x2d70   :  { %15507 = vmatmul.mubr.bf16.vlgmr.msra.gmra.mxu1 %v7420_v43 }
0x2d71   :  { %15532 = vmatprep.mubr.msk.bf16.mxu1 %vm17367_vm0, %v17366_v5 }
0x2e30   :  { %v7527_v54 = vpop.f32.mrf.mxu1 }
0x2e31   :  { %v7528_v55 = vadd.f32 %v12972_v51, %v7527_v54 }
0x2e32   :  { %v15508_v56 = vpop.f32.mrf.mxu1 }
0x2e33   :  { %v7534_v0 = vmax.f32 %v7528_v55, 0.0 }
0x2e34   :  { %v7530_v57 = vpop.f32.mrf.mxu1 }
0x2e35   :  { %v7531_v48 = vadd.f32 %v12972_v51, %v7530_v57  ;;  %v7536_v53 = vadd.f32 %v7534_v0, %v6880_v16  ;;  %v16825_v16 = vld [vmem:[#allocation2 + $0xa10] sm:$0xff]  }
0x2e36   :  { %v15509_v52 = vpop.f32.mrf.mxu1 }
0x2e37   :  { %v7535_v50 = vmax.f32 %v7531_v48, 0.0  ;;  %v16836_v52 = vld [vmem:[#allocation2 + $0xab8] sm:$0xff]  }
0x2e39   :  { %v7537_v2 = vadd.f32 %v7535_v50, %v6881_v17  ;;  %v16826_v17 = vld [vmem:[#allocation2 + $0xa08] sm:$0xff]   ;;  %v16837_v50 = vld [vmem:[#allocation2 + $0xab0] sm:$0xff]  }
0x2e3b   :  { %v7538_v7 = vpack.c.bf16 %v7537_v2, %v7536_v53  ;;  %v16838_v53 = vld [vmem:[#allocation2 + $0xaa8] sm:$0xff]   ;;  %v16839_v2 = vld [vmem:[#allocation2 + $0xaa0] sm:$0xff]  }
0x2e3d   :  { %15527 = vmatmul.mubr.bf16.vlgmr.msra.gmra.mxu0 %v7538_v7  ;;  %v16841_v7 = vld [vmem:[#allocation2 + $0xa90] sm:$0xff]  }
0x2e3e   :  { %15557 = vmatpush3.bf16.msra.mxu0 %v16820_v4  ;;  %15572 = vmatprep.mubr.msk.bf16.mxu0 %vm17367_vm0, %v17366_v5  ;;  %v16840_v4 = vld [vmem:[#allocation2 + $0xa98] sm:$0xff]  }
0x2e3f   :  { %15558 = vmatprep.subr.bf16.mxu0 %v17366_v5 }
0x2e42   :  { %15559 = vmatpush3.bf16.msra.mxu0 %v16821_v58  ;;  %v16842_v58 = vld [vmem:[#allocation2 + $0xa88] sm:$0xff]  }
0x2e43   :  { %15560 = vmatprep.subr.bf16.mxu0 %v17366_v5 }
0x2e46   :  { %15561 = vmatpush3.bf16.msra.mxu0 %v16822_v59  ;;  %v16843_v59 = vld [vmem:[#allocation2 + $0xa80] sm:$0xff]  }
0x2e47   :  { %15562 = vmatprep.subr.bf16.mxu0 %v17366_v5 }
0x2e4a   :  { %15563 = vmatpush3.bf16.msra.mxu0 %v16823_v14  ;;  %v16850_v14 = vld [vmem:[#allocation2 + $0xac8] sm:$0xff]  }
0x2e4b   :  { %15564 = vmatprep.subr.bf16.mxu0 %v17366_v5 }
0x2e4e   :  { %15565 = vmatpush3.bf16.msra.mxu0 %v16824_v13  ;;  %v16851_v13 = vld [vmem:[#allocation2 + $0xac0] sm:$0xff]  }
0x2e4f   :  { %15566 = vmatprep.subr.bf16.mxu0 %v17366_v5 }
0x2e52   :  { %15567 = vmatpush3.bf16.msra.mxu0 %v16825_v16 }
0x2e53   :  { %15568 = vmatprep.subr.bf16.mxu0 %v17366_v5 }
0x2e56   :  { %15569 = vmatpush3.bf16.msra.mxu0 %v16826_v17 }
0x2e57   :  { %15570 = vmatprep.subr.bf16.mxu0 %v17366_v5 }
0x2e5a   :  { %15571 = vmatpush3.bf16.msra.mxu0 %v16827_v60 }
0x2e5b   :  { %15582 = vmatprep.subr.bf16.mxu0 %v17366_v5 }
0x2efd   :  { %v7646_v63 = vpop.f32.mrf.mxu0 }
0x2efe   :  { %v18407_v8 = vadd.f32 %v12981_v61, %v7646_v63 }
0x2eff   :  { %v15528_v3 = vpop.f32.mrf.mxu0 }
0x2f00   :  { %v7653_v62 = vmax.f32 %v18407_v8, 0.0 }
0x2f01   :  { %v7649_v12 = vpop.f32.mrf.mxu0 }
0x2f02   :  { %v18409_v10 = vadd.f32 %v12981_v61, %v7649_v12  ;;  %v16852_v61 = vld [vmem:[#allocation3 + $0x4b8] sm:$0xff]   ;;  %v16853_v12 = vld [vmem:[#allocation3 + $0x4b0] sm:$0xff]  }
0x2f03   :  { %v15529_v15 = vpop.f32.mrf.mxu0 }
0x2f04   :  { %v7654_v9 = vmax.f32 %v18409_v10, 0.0  ;;  %v16854_v15 = vld [vmem:[#allocation3 + $0x4a8] sm:$0xff]  }
0x2f06   :  { %v7655_v18 = vpack.c.bf16 %v7654_v9, %v7653_v62 }
0x2f08   :  { %15531 = vmatpush3.bf16.msra.mxu1 %v7655_v18  ;;  %15573 = vmatmul.mubr.bf16.vlgmr.msra.gmra.mxu0 %v7655_v18  ;;  %v16855_v18 = vld [vmem:[#allocation3 + $0x4a0] sm:$0xff]  }
0x2f09   :  { %15536 = vmatprep.subr.bf16.mxu1 %v17366_v5  ;;  %15598 = vmatprep.mubr.msk.bf16.mxu0 %vm17367_vm0, %v17366_v5 }
0x2f0a   :  { %15583 = vmatpush3.bf16.msra.mxu0 %v16844_v28 }
0x2f0b   :  { %15533 = vmatmul.mubr.msk.bf16.vlgmr.msra.gmra.mxu1 %vm170_vm1, %v17494_v6  ;;  %15584 = vmatprep.subr.bf16.mxu0 %v17366_v5 }
0x2f0c   :  { %15537 = vmatpush3.bf16.msra.mxu1 %v16828_v1  ;;  %15552 = vmatprep.mubr.msk.bf16.mxu1 %vm17367_vm0, %v17366_v5 }
0x2f0d   :  { %15538 = vmatprep.subr.bf16.mxu1 %v17366_v5 }
0x2f0e   :  { %15585 = vmatpush3.bf16.msra.mxu0 %v16845_v33 }
0x2f0f   :  { %15586 = vmatprep.subr.bf16.mxu0 %v17366_v5 }
0x2f10   :  { %15539 = vmatpush3.bf16.msra.mxu1 %v16829_v11 }
0x2f11   :  { %15540 = vmatprep.subr.bf16.mxu1 %v17366_v5 }
0x2f12   :  { %15587 = vmatpush3.bf16.msra.mxu0 %v16846_v36 }
0x2f13   :  { %15588 = vmatprep.subr.bf16.mxu0 %v17366_v5 }
0x2f14   :  { %15541 = vmatpush3.bf16.msra.mxu1 %v16830_v20 }
0x2f15   :  { %15542 = vmatprep.subr.bf16.mxu1 %v17366_v5 }
0x2f16   :  { %15589 = vmatpush3.bf16.msra.mxu0 %v16847_v37 }
0x2f17   :  { %15590 = vmatprep.subr.bf16.mxu0 %v17366_v5 }
0x2f18   :  { %15543 = vmatpush3.bf16.msra.mxu1 %v16831_v22 }
0x2f19   :  { %15544 = vmatprep.subr.bf16.mxu1 %v17366_v5 }
0x2f1a   :  { %15591 = vmatpush3.bf16.msra.mxu0 %v16848_v38  ;;  %v16860_v38 = vld [vmem:[#allocation2 + $0xb38] sm:$0xff]  }
0x2f1b   :  { %15592 = vmatprep.subr.bf16.mxu0 %v17366_v5 }
0x2f1c   :  { %15545 = vmatpush3.bf16.msra.mxu1 %v16832_v24  ;;  %v16856_v24 = vld [vmem:[#allocation3 + $0x498] sm:$0xff]  }
0x2f1d   :  { %15546 = vmatprep.subr.bf16.mxu1 %v17366_v5 }
0x2f1e   :  { %15593 = vmatpush3.bf16.msra.mxu0 %v16849_v39 }
0x2f1f   :  { %15594 = vmatprep.subr.bf16.mxu0 %v17366_v5 }
0x2f20   :  { %15547 = vmatpush3.bf16.msra.mxu1 %v16833_v30  ;;  %v16857_v30 = vld [vmem:[#allocation3 + $0x490] sm:$0xff]  }
0x2f21   :  { %15548 = vmatprep.subr.bf16.mxu1 %v17366_v5 }
0x2f22   :  { %15595 = vmatpush3.bf16.msra.mxu0 %v16850_v14  ;;  %v16871_v14 = vld [vmem:[#allocation2 + $0xb60] sm:$0xff]  }
0x2f23   :  { %15596 = vmatprep.subr.bf16.mxu0 %v17366_v5 }
0x2f24   :  { %15549 = vmatpush3.bf16.msra.mxu1 %v16834_v32  ;;  %v16858_v32 = vld [vmem:[#allocation3 + $0x488] sm:$0xff]  }
0x2f25   :  { %15550 = vmatprep.subr.bf16.mxu1 %v17366_v5 }
0x2f26   :  { %15597 = vmatpush3.bf16.msra.mxu0 %v16851_v13  ;;  %v16872_v13 = vld [vmem:[#allocation2 + $0xb58] sm:$0xff]  }
0x2f27   :  { %15622 = vmatprep.subr.bf16.mxu0 %v17366_v5 }
0x2f28   :  { %15551 = vmatpush3.bf16.msra.mxu1 %v16835_v34  ;;  %v16859_v34 = vld [vmem:[#allocation3 + $0x480] sm:$0xff]  }
0x2f29   :  { %15576 = vmatprep.subr.bf16.mxu1 %v17366_v5 }
0x2fc8   :  { %v7903_v40 = vpop.f32.mrf.mxu0 }
0x2fca   :  { %v15574_v45 = vpop.f32.mrf.mxu0 }
0x2fcb   :  { %v7690_v31 = vpop.f32.mrf.mxu1  ;;  %v13025_v45 = vld [vmem:[#allocation6 + $0x15] ss:$0 sm:$0xff] }
0x2fcc   :  { %v7906_v19 = vpop.f32.mrf.mxu0 }
0x2fcd   :  { %v15534_v21 = vpop.f32.mrf.mxu1 }
0x2fce   :  { %v15575_v23 = vpop.f32.mrf.mxu0 }
0x2fcf   :  { %v7693_v25 = vpop.f32.mrf.mxu1 }
0x2fd0   :  { %v7714_v26 = vpack.c.bf16 %v7693_v25, %v7690_v31 }
0x2fd1   :  { %v15535_v27 = vpop.f32.mrf.mxu1 }
0x2fd2   :  { %15553 = vmatmul.mubr.bf16.vlgmr.msra.gmra.mxu1 %v7714_v26 }
0x2fd3   :  { %15578 = vmatprep.mubr.msk.bf16.mxu1 %vm17367_vm0, %v17366_v5 }
0x3092   :  { %v7814_v41 = vpop.f32.mrf.mxu1 }
0x3093   :  { %v7904_v43 = vadd.f32 %v7903_v40, %v7814_v41  ;;  %v16861_v41 = vld [vmem:[#allocation2 + $0xb30] sm:$0xff]  }
0x3094   :  { %v15554_v47 = vpop.f32.mrf.mxu1 }
0x3095   :  { %v18440_v51 = vadd.f32 %v13007_v46, %v7904_v43  ;;  %v16862_v43 = vld [vmem:[#allocation2 + $0xb28] sm:$0xff]   ;;  %v16864_v47 = vld [vmem:[#allocation2 + $0xb18] sm:$0xff]  }
0x3096   :  { %v7817_v49 = vpop.f32.mrf.mxu1 }
0x3097   :  { %v7907_v54 = vadd.f32 %v7906_v19, %v7817_v49  ;;  %v7920_v57 = vmax.f32 %v18440_v51, 0.0  ;;  %v16865_v49 = vld [vmem:[#allocation2 + $0xb10] sm:$0xff]   ;;  %v16866_v51 = vld [vmem:[#allocation2 + $0xb08] sm:$0xff]  }
0x3098   :  { %v15555_v55 = vpop.f32.mrf.mxu1 }
0x3099   :  { %v18442_v56 = vadd.f32 %v13007_v46, %v7907_v54  ;;  %v16863_v46 = vld [vmem:[#allocation2 + $0xb20] sm:$0xff]   ;;  %v13026_v55 = vld [vmem:[#allocation8 + $0x12] ss:$0 sm:$0xff] }
0x309a   :  { %v16867_v54 = vld [vmem:[#allocation2 + $0xb00] sm:$0xff]  }
0x309b   :  { %v7921_v0 = vmax.f32 %v18442_v56, 0.0 }
0x309d   :  { %v7922_v48 = vpack.c.bf16 %v7921_v0, %v7920_v57 }
0x309f   :  { %15577 = vmatpush3.bf16.msra.mxu1 %v7922_v48 }
0x30a0   :  { %15602 = vmatprep.subr.bf16.mxu1 %v17366_v5 }
0x30a2   :  { %15579 = vmatmul.mubr.msk.bf16.vlgmr.msra.gmra.mxu1 %vm170_vm1, %v17494_v6 }
0x30a3   :  { %15603 = vmatpush3.bf16.msra.mxu1 %v16836_v52  ;;  %15618 = vmatprep.mubr.msk.bf16.mxu1 %vm17367_vm0, %v17366_v5 }
0x30a4   :  { %15604 = vmatprep.subr.bf16.mxu1 %v17366_v5 }
0x30a7   :  { %15605 = vmatpush3.bf16.msra.mxu1 %v16837_v50 }
0x30a8   :  { %15606 = vmatprep.subr.bf16.mxu1 %v17366_v5 }
0x30ab   :  { %15607 = vmatpush3.bf16.msra.mxu1 %v16838_v53 }
0x30ac   :  { %15608 = vmatprep.subr.bf16.mxu1 %v17366_v5 }
0x30af   :  { %15609 = vmatpush3.bf16.msra.mxu1 %v16839_v2 }
0x30b0   :  { %15610 = vmatprep.subr.bf16.mxu1 %v17366_v5 }
0x30b3   :  { %15611 = vmatpush3.bf16.msra.mxu1 %v16840_v4 }
0x30b4   :  { %15612 = vmatprep.subr.bf16.mxu1 %v17366_v5 }
0x30b7   :  { %15613 = vmatpush3.bf16.msra.mxu1 %v16841_v7  ;;  %v16868_v7 = vld [vmem:[#allocation2 + $0xb78] sm:$0xff]  }
0x30b8   :  { %15614 = vmatprep.subr.bf16.mxu1 %v17366_v5 }
0x30bb   :  { %15615 = vmatpush3.bf16.msra.mxu1 %v16842_v58  ;;  %v16869_v58 = vld [vmem:[#allocation2 + $0xb70] sm:$0xff]  }
0x30bc   :  { %15616 = vmatprep.subr.bf16.mxu1 %v17366_v5 }
0x30bf   :  { %15617 = vmatpush3.bf16.msra.mxu1 %v16843_v59  ;;  %v16870_v59 = vld [vmem:[#allocation2 + $0xb68] sm:$0xff]  }
0x30c0   :  { %15642 = vmatprep.subr.bf16.mxu1 %v17366_v5 }
0x30c2   :  { %15619 = vmatmul.mubr.bf16.vlgmr.msra.gmra.mxu1 %v7922_v48 }
0x30c3   :  { %15644 = vmatprep.mubr.msk.bf16.mxu1 %vm17367_vm0, %v17366_v5 }
0x3162   :  { %v7957_v16 = vpop.f32.mrf.mxu1 }
0x3164   :  { %v15580_v17 = vpop.f32.mrf.mxu1 }
0x3165   :  { %v16874_v17 = vld [vmem:[#allocation2 + $0xb48] sm:$0xff]  }
0x3166   :  { %v7960_v60 = vpop.f32.mrf.mxu1 }
0x3167   :  { %v7981_v63 = vpack.c.bf16 %v7960_v60, %v7957_v16  ;;  %v16873_v16 = vld [vmem:[#allocation2 + $0xb50] sm:$0xff]   ;;  %v16875_v60 = vld [vmem:[#allocation2 + $0xb40] sm:$0xff]  }
0x3168   :  { %v15581_v3 = vpop.f32.mrf.mxu1 }
0x3169   :  { %15599 = vmatmul.mubr.bf16.vlgmr.msra.gmra.mxu0 %v7981_v63  ;;  %v16877_v63 = vld [vmem:[#allocation2 + $0xbb0] sm:$0xff]   ;;  %v16878_v3 = vld [vmem:[#allocation2 + $0xba8] sm:$0xff]  }
0x316a   :  { %15623 = vmatpush3.bf16.msra.mxu0 %v16852_v61  ;;  %15638 = vmatprep.mubr.msk.bf16.mxu0 %vm17367_vm0, %v17366_v5  ;;  %v16876_v61 = vld [vmem:[#allocation2 + $0xbb8] sm:$0xff]  }
0x316b   :  { %15624 = vmatprep.subr.bf16.mxu0 %v17366_v5 }
0x316e   :  { %15625 = vmatpush3.bf16.msra.mxu0 %v16853_v12  ;;  %v16879_v12 = vld [vmem:[#allocation2 + $0xba0] sm:$0xff]  }
0x316f   :  { %15626 = vmatprep.subr.bf16.mxu0 %v17366_v5 }
0x3172   :  { %15627 = vmatpush3.bf16.msra.mxu0 %v16854_v15  ;;  %v16880_v15 = vld [vmem:[#allocation2 + $0xb98] sm:$0xff]  }
0x3173   :  { %15628 = vmatprep.subr.bf16.mxu0 %v17366_v5 }
0x3176   :  { %15629 = vmatpush3.bf16.msra.mxu0 %v16855_v18 }
0x3177   :  { %15630 = vmatprep.subr.bf16.mxu0 %v17366_v5 }
0x317a   :  { %15631 = vmatpush3.bf16.msra.mxu0 %v16856_v24 }
0x317b   :  { %15632 = vmatprep.subr.bf16.mxu0 %v17366_v5 }
0x317e   :  { %15633 = vmatpush3.bf16.msra.mxu0 %v16857_v30 }
0x317f   :  { %15634 = vmatprep.subr.bf16.mxu0 %v17366_v5 }
0x3182   :  { %v8170_v1 = vpop.f32.mrf.mxu1  ;;  %15635 = vmatpush3.bf16.msra.mxu0 %v16858_v32 }
0x3183   :  { %15636 = vmatprep.subr.bf16.mxu0 %v17366_v5 }
0x3184   :  { %v15620_v11 = vpop.f32.mrf.mxu1 }
0x3186   :  { %v8173_v20 = vpop.f32.mrf.mxu1  ;;  %15637 = vmatpush3.bf16.msra.mxu0 %v16859_v34 }
0x3187   :  { %15668 = vmatprep.subr.bf16.mxu0 %v17366_v5 }
0x3188   :  { %v15621_v22 = vpop.f32.mrf.mxu1 }
0x3229   :  { %v8081_v40 = vpop.f32.mrf.mxu0 }
0x322a   :  { %v8171_v31 = vadd.f32 %v8170_v1, %v8081_v40  ;;  %v16881_v40 = vld [vmem:[#allocation2 + $0xb90] sm:$0xff]  }
0x322b   :  { %v15600_v19 = vpop.f32.mrf.mxu0 }
0x322c   :  { %v8185_v21 = vadd.f32 %v13025_v45, %v8171_v31  ;;  %v16883_v31 = vld [vmem:[#allocation2 + $0xb80] sm:$0xff]  }
0x322d   :  { %v8084_v23 = vpop.f32.mrf.mxu0 }
0x322e   :  { %v8174_v25 = vadd.f32 %v8173_v20, %v8084_v23  ;;  %v8187_v27 = vmax.f32 %v8185_v21, 0.0  ;;  %v13052_v23 = vld [vmem:[#allocation6 + $0x16] ss:$0 sm:$0xff] }
0x322f   :  { %v15601_v26 = vpop.f32.mrf.mxu0 }
0x3230   :  { %v8186_v28 = vadd.f32 %v13025_v45, %v8174_v25  ;;  %v8189_v36 = vadd.f32 %v8187_v27, %v7920_v57  ;;  %v16882_v45 = vld [vmem:[#allocation2 + $0xb88] sm:$0xff]  }
0x3232   :  { %v8188_v33 = vmax.f32 %v8186_v28, 0.0 }
0x3234   :  { %v8190_v37 = vadd.f32 %v8188_v33, %v7921_v0 }
0x3236   :  { %v8191_v39 = vpack.c.bf16 %v8190_v37, %v8189_v36 }
0x3238   :  { %15639 = vmatmul.mubr.bf16.vlgmr.msra.gmra.mxu0 %v8191_v39 }
0x3239   :  { %15669 = vmatpush3.bf16.msra.mxu0 %v16860_v38  ;;  %15684 = vmatprep.mubr.msk.bf16.mxu0 %vm17367_vm0, %v17366_v5 }
0x323a   :  { %15670 = vmatprep.subr.bf16.mxu0 %v17366_v5 }
0x323d   :  { %15671 = vmatpush3.bf16.msra.mxu0 %v16861_v41  ;;  %v16884_v41 = vld [vmem:[#allocation2 + $0xbf8] sm:$0xff]  }
0x323e   :  { %15672 = vmatprep.subr.bf16.mxu0 %v17366_v5 }
0x3241   :  { %15673 = vmatpush3.bf16.msra.mxu0 %v16862_v43  ;;  %v16885_v43 = vld [vmem:[#allocation2 + $0xbf0] sm:$0xff]  }
0x3242   :  { %15674 = vmatprep.subr.bf16.mxu0 %v17366_v5 }
0x3245   :  { %15675 = vmatpush3.bf16.msra.mxu0 %v16863_v46  ;;  %v16886_v46 = vld [vmem:[#allocation2 + $0xbe8] sm:$0xff]  }
0x3246   :  { %15676 = vmatprep.subr.bf16.mxu0 %v17366_v5 }
0x3249   :  { %15677 = vmatpush3.bf16.msra.mxu0 %v16864_v47  ;;  %v16887_v47 = vld [vmem:[#allocation2 + $0xbe0] sm:$0xff]  }
0x324a   :  { %15678 = vmatprep.subr.bf16.mxu0 %v17366_v5 }
0x324d   :  { %15679 = vmatpush3.bf16.msra.mxu0 %v16865_v49  ;;  %v16888_v49 = vld [vmem:[#allocation2 + $0xbd8] sm:$0xff]  }
0x324e   :  { %15680 = vmatprep.subr.bf16.mxu0 %v17366_v5 }
0x3251   :  { %15681 = vmatpush3.bf16.msra.mxu0 %v16866_v51  ;;  %v16889_v51 = vld [vmem:[#allocation2 + $0xbd0] sm:$0xff]  }
0x3252   :  { %15682 = vmatprep.subr.bf16.mxu0 %v17366_v5 }
0x3255   :  { %15683 = vmatpush3.bf16.msra.mxu0 %v16867_v54  ;;  %v16890_v54 = vld [vmem:[#allocation2 + $0xbc8] sm:$0xff]  }
0x3256   :  { %15714 = vmatprep.subr.bf16.mxu0 %v17366_v5 }
0x32f8   :  { %v8299_v56 = vpop.f32.mrf.mxu0 }
0x32f9   :  { %v18491_v0 = vadd.f32 %v13026_v55, %v8299_v56 }
0x32fa   :  { %v15640_v57 = vpop.f32.mrf.mxu0 }
0x32fb   :  { %v8306_v53 = vmax.f32 %v18491_v0, 0.0 }
0x32fc   :  { %v8302_v48 = vpop.f32.mrf.mxu0 }
0x32fd   :  { %v18493_v52 = vadd.f32 %v13026_v55, %v8302_v48  ;;  %v16891_v55 = vld [vmem:[#allocation2 + $0xbc0] sm:$0xff]  }
0x32fe   :  { %v15641_v50 = vpop.f32.mrf.mxu0 }
0x32ff   :  { %v8307_v2 = vmax.f32 %v18493_v52, 0.0 }
0x3301   :  { %v8308_v4 = vpack.c.bf16 %v8307_v2, %v8306_v53 }
0x3303   :  { %15643 = vmatpush3.bf16.msra.mxu1 %v8308_v4  ;;  %15685 = vmatmul.mubr.bf16.vlgmr.msra.gmra.mxu0 %v8308_v4 }
0x3304   :  { %15648 = vmatprep.subr.bf16.mxu1 %v17366_v5  ;;  %15730 = vmatprep.mubr.msk.bf16.mxu0 %vm17367_vm0, %v17366_v5 }
0x3305   :  { %15715 = vmatpush3.bf16.msra.mxu0 %v16876_v61  ;;  %v16896_v61 = vld [vmem:[#allocation3 + $0x4d8] sm:$0xff]  }
0x3306   :  { %15645 = vmatmul.mubr.msk.bf16.vlgmr.msra.gmra.mxu1 %vm170_vm1, %v17494_v6  ;;  %15716 = vmatprep.subr.bf16.mxu0 %v17366_v5 }
0x3307   :  { %15649 = vmatpush3.bf16.msra.mxu1 %v16868_v7  ;;  %15664 = vmatprep.mubr.msk.bf16.mxu1 %vm17367_vm0, %v17366_v5 }
0x3308   :  { %15650 = vmatprep.subr.bf16.mxu1 %v17366_v5 }
0x3309   :  { %15717 = vmatpush3.bf16.msra.mxu0 %v16877_v63  ;;  %v16897_v63 = vld [vmem:[#allocation3 + $0x4d0] sm:$0xff]  }
0x330a   :  { %15718 = vmatprep.subr.bf16.mxu0 %v17366_v5 }
0x330b   :  { %15651 = vmatpush3.bf16.msra.mxu1 %v16869_v58 }
0x330c   :  { %15652 = vmatprep.subr.bf16.mxu1 %v17366_v5 }
0x330d   :  { %15719 = vmatpush3.bf16.msra.mxu0 %v16878_v3  ;;  %v16898_v3 = vld [vmem:[#allocation3 + $0x4c8] sm:$0xff]  }
0x330e   :  { %15720 = vmatprep.subr.bf16.mxu0 %v17366_v5 }
0x330f   :  { %15653 = vmatpush3.bf16.msra.mxu1 %v16870_v59  ;;  %v16892_v59 = vld [vmem:[#allocation3 + $0x4f8] sm:$0xff]  }
0x3310   :  { %15654 = vmatprep.subr.bf16.mxu1 %v17366_v5 }
0x3311   :  { %15721 = vmatpush3.bf16.msra.mxu0 %v16879_v12  ;;  %v16899_v12 = vld [vmem:[#allocation3 + $0x4c0] sm:$0xff]  }
0x3312   :  { %15722 = vmatprep.subr.bf16.mxu0 %v17366_v5 }
0x3313   :  { %15655 = vmatpush3.bf16.msra.mxu1 %v16871_v14 }
0x3314   :  { %15656 = vmatprep.subr.bf16.mxu1 %v17366_v5 }
0x3315   :  { %15723 = vmatpush3.bf16.msra.mxu0 %v16880_v15  ;;  %v16900_v15 = vld [vmem:[#allocation3 + $0x538] sm:$0xff]  }
0x3316   :  { %15724 = vmatprep.subr.bf16.mxu0 %v17366_v5 }
0x3317   :  { %15657 = vmatpush3.bf16.msra.mxu1 %v16872_v13 }
0x3318   :  { %15658 = vmatprep.subr.bf16.mxu1 %v17366_v5 }
0x3319   :  { %15725 = vmatpush3.bf16.msra.mxu0 %v16881_v40 }
0x331a   :  { %15726 = vmatprep.subr.bf16.mxu0 %v17366_v5 }
0x331b   :  { %15659 = vmatpush3.bf16.msra.mxu1 %v16873_v16  ;;  %v16893_v16 = vld [vmem:[#allocation3 + $0x4f0] sm:$0xff]  }
0x331c   :  { %15660 = vmatprep.subr.bf16.mxu1 %v17366_v5 }
0x331d   :  { %15727 = vmatpush3.bf16.msra.mxu0 %v16882_v45 }
0x331e   :  { %15728 = vmatprep.subr.bf16.mxu0 %v17366_v5 }
0x331f   :  { %15661 = vmatpush3.bf16.msra.mxu1 %v16874_v17  ;;  %v16894_v17 = vld [vmem:[#allocation3 + $0x4e8] sm:$0xff]  }
0x3320   :  { %15662 = vmatprep.subr.bf16.mxu1 %v17366_v5 }
0x3321   :  { %15729 = vmatpush3.bf16.msra.mxu0 %v16883_v31 }
0x3322   :  { %15754 = vmatprep.subr.bf16.mxu0 %v17366_v5 }
0x3323   :  { %15663 = vmatpush3.bf16.msra.mxu1 %v16875_v60  ;;  %v16895_v60 = vld [vmem:[#allocation3 + $0x4e0] sm:$0xff]  }
0x3324   :  { %15688 = vmatprep.subr.bf16.mxu1 %v17366_v5 }
0x33c3   :  { %v8556_v18 = vpop.f32.mrf.mxu0 }
0x33c5   :  { %v15686_v1 = vpop.f32.mrf.mxu0 }
0x33c6   :  { %v8343_v11 = vpop.f32.mrf.mxu1  ;;  %v16902_v1 = vld [vmem:[#allocation3 + $0x528] sm:$0xff]  }
0x33c7   :  { %v8559_v20 = vpop.f32.mrf.mxu0 }
0x33c8   :  { %v15646_v22 = vpop.f32.mrf.mxu1 }
0x33c9   :  { %v15687_v24 = vpop.f32.mrf.mxu0 }
0x33ca   :  { %v8346_v30 = vpop.f32.mrf.mxu1  ;;  %v13070_v24 = vld [vmem:[#allocation6 + $0x17] ss:$0 sm:$0xff] }
0x33cb   :  { %v8367_v32 = vpack.c.bf16 %v8346_v30, %v8343_v11  ;;  %v16903_v11 = vld [vmem:[#allocation3 + $0x520] sm:$0xff]  }
0x33cc   :  { %v15647_v34 = vpop.f32.mrf.mxu1 }
0x33cd   :  { %15665 = vmatmul.mubr.bf16.vlgmr.msra.gmra.mxu1 %v8367_v32 }
0x33ce   :  { %15690 = vmatprep.mubr.msk.bf16.mxu1 %vm17367_vm0, %v17366_v5 }
0x348d   :  { %v8467_v19 = vpop.f32.mrf.mxu1 }
0x348e   :  { %v8557_v21 = vadd.f32 %v8556_v18, %v8467_v19  ;;  %v16901_v18 = vld [vmem:[#allocation3 + $0x530] sm:$0xff]  }
0x348f   :  { %v15666_v25 = vpop.f32.mrf.mxu1 }
0x3490   :  { %v18526_v27 = vadd.f32 %v13052_v23, %v8557_v21 }
0x3491   :  { %v8470_v26 = vpop.f32.mrf.mxu1 }
0x3492   :  { %v8560_v28 = vadd.f32 %v8559_v20, %v8470_v26  ;;  %v8573_v37 = vmax.f32 %v18526_v27, 0.0  ;;  %v16904_v20 = vld [vmem:[#allocation3 + $0x518] sm:$0xff]  }
0x3493   :  { %v15667_v33 = vpop.f32.mrf.mxu1  ;;  %v16908_v27 = vld [vmem:[#allocation3 + $0x578] sm:$0xff]  }
0x3494   :  { %v18528_v36 = vadd.f32 %v13052_v23, %v8560_v28  ;;  %v16905_v33 = vld [vmem:[#allocation3 + $0x510] sm:$0xff]  }
0x3496   :  { %v8574_v38 = vmax.f32 %v18528_v36, 0.0  ;;  %v16910_v36 = vld [vmem:[#allocation3 + $0x568] sm:$0xff]  }
0x3498   :  { %v8575_v39 = vpack.c.bf16 %v8574_v38, %v8573_v37 }
0x349a   :  { %15689 = vmatpush3.bf16.msra.mxu1 %v8575_v39  ;;  %15731 = vmatmul.mubr.bf16.vlgmr.msra.gmra.mxu0 %v8575_v39  ;;  %v16906_v39 = vld [vmem:[#allocation3 + $0x508] sm:$0xff]  }
0x349b   :  { %15694 = vmatprep.subr.bf16.mxu1 %v17366_v5  ;;  %15770 = vmatprep.mubr.msk.bf16.mxu0 %vm17367_vm0, %v17366_v5 }
0x349c   :  { %15755 = vmatpush3.bf16.msra.mxu0 %v16900_v15 }
0x349d   :  { %15691 = vmatmul.mubr.msk.bf16.vlgmr.msra.gmra.mxu1 %vm170_vm1, %v17494_v6  ;;  %15756 = vmatprep.subr.bf16.mxu0 %v17366_v5 }
0x349e   :  { %15695 = vmatpush3.bf16.msra.mxu1 %v16884_v41  ;;  %15710 = vmatprep.mubr.msk.bf16.mxu1 %vm17367_vm0, %v17366_v5  ;;  %v16907_v41 = vld [vmem:[#allocation3 + $0x500] sm:$0xff]  }
0x349f   :  { %15696 = vmatprep.subr.bf16.mxu1 %v17366_v5 }
0x34a0   :  { %15757 = vmatpush3.bf16.msra.mxu0 %v16901_v18 }
0x34a1   :  { %15758 = vmatprep.subr.bf16.mxu0 %v17366_v5 }
0x34a2   :  { %15697 = vmatpush3.bf16.msra.mxu1 %v16885_v43  ;;  %v16912_v43 = vld [vmem:[#allocation3 + $0x558] sm:$0xff]  }
0x34a3   :  { %15698 = vmatprep.subr.bf16.mxu1 %v17366_v5 }
0x34a4   :  { %15759 = vmatpush3.bf16.msra.mxu0 %v16902_v1 }
0x34a5   :  { %15760 = vmatprep.subr.bf16.mxu0 %v17366_v5 }
0x34a6   :  { %15699 = vmatpush3.bf16.msra.mxu1 %v16886_v46  ;;  %v13071_v46 = vld [vmem:[#allocation8 + $0x13] ss:$0 sm:$0xff] }
0x34a7   :  { %15700 = vmatprep.subr.bf16.mxu1 %v17366_v5 }
0x34a8   :  { %15761 = vmatpush3.bf16.msra.mxu0 %v16903_v11 }
0x34a9   :  { %15762 = vmatprep.subr.bf16.mxu0 %v17366_v5 }
0x34aa   :  { %15701 = vmatpush3.bf16.msra.mxu1 %v16887_v47 }
0x34ab   :  { %15702 = vmatprep.subr.bf16.mxu1 %v17366_v5 }
0x34ac   :  { %15763 = vmatpush3.bf16.msra.mxu0 %v16904_v20 }
0x34ad   :  { %15764 = vmatprep.subr.bf16.mxu0 %v17366_v5 }
0x34ae   :  { %15703 = vmatpush3.bf16.msra.mxu1 %v16888_v49 }
0x34af   :  { %15704 = vmatprep.subr.bf16.mxu1 %v17366_v5 }
0x34b0   :  { %15765 = vmatpush3.bf16.msra.mxu0 %v16905_v33 }
0x34b1   :  { %15766 = vmatprep.subr.bf16.mxu0 %v17366_v5 }
0x34b2   :  { %15705 = vmatpush3.bf16.msra.mxu1 %v16889_v51 }
0x34b3   :  { %15706 = vmatprep.subr.bf16.mxu1 %v17366_v5 }
0x34b4   :  { %15767 = vmatpush3.bf16.msra.mxu0 %v16906_v39 }
0x34b5   :  { %15768 = vmatprep.subr.bf16.mxu0 %v17366_v5 }
0x34b6   :  { %15707 = vmatpush3.bf16.msra.mxu1 %v16890_v54 }
0x34b7   :  { %15708 = vmatprep.subr.bf16.mxu1 %v17366_v5 }
0x34b8   :  { %15769 = vmatpush3.bf16.msra.mxu0 %v16907_v41 }
0x34b9   :  { %15794 = vmatprep.subr.bf16.mxu0 %v17366_v5 }
0x34ba   :  { %15709 = vmatpush3.bf16.msra.mxu1 %v16891_v55 }
0x34bb   :  { %15734 = vmatprep.subr.bf16.mxu1 %v17366_v5 }
0x355a   :  { %v8823_v56 = vpop.f32.mrf.mxu0 }
0x355c   :  { %v15732_v57 = vpop.f32.mrf.mxu0 }
0x355d   :  { %v8610_v48 = vpop.f32.mrf.mxu1 }
0x355e   :  { %v8826_v50 = vpop.f32.mrf.mxu0 }
0x355f   :  { %v15692_v4 = vpop.f32.mrf.mxu1 }
0x3560   :  { %v15733_v7 = vpop.f32.mrf.mxu0 }
0x3561   :  { %v8613_v58 = vpop.f32.mrf.mxu1 }
0x3562   :  { %v8634_v14 = vpack.c.bf16 %v8613_v58, %v8610_v48  ;;  %v16913_v58 = vld [vmem:[#allocation3 + $0x550] sm:$0xff]  }
0x3563   :  { %v15693_v13 = vpop.f32.mrf.mxu1 }
0x3564   :  { %15711 = vmatmul.mubr.bf16.vlgmr.msra.gmra.mxu1 %v8634_v14  ;;  %v16915_v14 = vld [vmem:[#allocation3 + $0x540] sm:$0xff]   ;;  %v13080_v13 = vld [vmem:[#allocation8 + $0x14] ss:$0 sm:$0xff] }
0x3565   :  { %15735 = vmatpush3.bf16.msra.mxu1 %v16892_v59  ;;  %15750 = vmatprep.mubr.msk.bf16.mxu1 %vm17367_vm0, %v17366_v5  ;;  %v16914_v59 = vld [vmem:[#allocation3 + $0x548] sm:$0xff]  }
0x3566   :  { %15736 = vmatprep.subr.bf16.mxu1 %v17366_v5 }
0x3569   :  { %15737 = vmatpush3.bf16.msra.mxu1 %v16893_v16 }
0x356a   :  { %15738 = vmatprep.subr.bf16.mxu1 %v17366_v5 }
0x356d   :  { %15739 = vmatpush3.bf16.msra.mxu1 %v16894_v17 }
0x356e   :  { %15740 = vmatprep.subr.bf16.mxu1 %v17366_v5 }
0x3571   :  { %15741 = vmatpush3.bf16.msra.mxu1 %v16895_v60 }
0x3572   :  { %15742 = vmatprep.subr.bf16.mxu1 %v17366_v5 }
0x3575   :  { %15743 = vmatpush3.bf16.msra.mxu1 %v16896_v61 }
0x3576   :  { %15744 = vmatprep.subr.bf16.mxu1 %v17366_v5 }
0x3579   :  { %15745 = vmatpush3.bf16.msra.mxu1 %v16897_v63 }
0x357a   :  { %15746 = vmatprep.subr.bf16.mxu1 %v17366_v5 }
0x357d   :  { %15747 = vmatpush3.bf16.msra.mxu1 %v16898_v3  ;;  %v13089_v3 = vld [vmem:[#allocation8 + $0x15] ss:$0 sm:$0xff] }
0x357e   :  { %15748 = vmatprep.subr.bf16.mxu1 %v17366_v5 }
0x3581   :  { %15749 = vmatpush3.bf16.msra.mxu1 %v16899_v12 }
0x3582   :  { %15774 = vmatprep.subr.bf16.mxu1 %v17366_v5 }
0x3624   :  { %v8734_v22 = vpop.f32.mrf.mxu1 }
0x3625   :  { %v8824_v30 = vadd.f32 %v8823_v56, %v8734_v22 }
0x3626   :  { %v15712_v32 = vpop.f32.mrf.mxu1 }
0x3627   :  { %v8838_v34 = vadd.f32 %v13070_v24, %v8824_v30 }
0x3628   :  { %v8737_v40 = vpop.f32.mrf.mxu1 }
0x3629   :  { %v8827_v45 = vadd.f32 %v8826_v50, %v8737_v40  ;;  %v8840_v19 = vmax.f32 %v8838_v34, 0.0 }
0x362a   :  { %v15713_v31 = vpop.f32.mrf.mxu1 }
0x362b   :  { %v8839_v21 = vadd.f32 %v13070_v24, %v8827_v45  ;;  %v8842_v25 = vadd.f32 %v8840_v19, %v8573_v37  ;;  %v16909_v37 = vld [vmem:[#allocation3 + $0x570] sm:$0xff]  }
0x362d   :  { %v8841_v23 = vmax.f32 %v8839_v21, 0.0 }
0x362f   :  { %v8843_v26 = vadd.f32 %v8841_v23, %v8574_v38  ;;  %v16911_v38 = vld [vmem:[#allocation3 + $0x560] sm:$0xff]  }
0x3631   :  { %v8844_v28 = vpack.c.bf16 %v8843_v26, %v8842_v25 }
0x3633   :  { %15751 = vmatmul.mubr.bf16.vlgmr.msra.gmra.mxu1 %v8844_v28 }
0x3634   :  { %15790 = vmatprep.mubr.msk.bf16.mxu1 %vm17367_vm0, %v17366_v5  ;;  %15775 = vmatpush3.bf16.msra.mxu1 %v16908_v27 }
0x3635   :  { %15776 = vmatprep.subr.bf16.mxu1 %v17366_v5 }
0x3638   :  { %15777 = vmatpush3.bf16.msra.mxu1 %v16909_v37 }
0x3639   :  { %15778 = vmatprep.subr.bf16.mxu1 %v17366_v5 }
0x363c   :  { %15779 = vmatpush3.bf16.msra.mxu1 %v16910_v36 }
0x363d   :  { %15780 = vmatprep.subr.bf16.mxu1 %v17366_v5 }
0x3640   :  { %15781 = vmatpush3.bf16.msra.mxu1 %v16911_v38 }
0x3641   :  { %15782 = vmatprep.subr.bf16.mxu1 %v17366_v5 }
0x3644   :  { %15783 = vmatpush3.bf16.msra.mxu1 %v16912_v43 }
0x3645   :  { %15784 = vmatprep.subr.bf16.mxu1 %v17366_v5 }
0x3648   :  { %15785 = vmatpush3.bf16.msra.mxu1 %v16913_v58 }
0x3649   :  { %15786 = vmatprep.subr.bf16.mxu1 %v17366_v5 }
0x364c   :  { %15787 = vmatpush3.bf16.msra.mxu1 %v16914_v59 }
0x364d   :  { %15788 = vmatprep.subr.bf16.mxu1 %v17366_v5 }
0x3650   :  { %15789 = vmatpush3.bf16.msra.mxu1 %v16915_v14 }
0x36f3   :  { %v8952_v47 = vpop.f32.mrf.mxu1 }
0x36f4   :  { %v8953_v49 = vadd.f32 %v13071_v46, %v8952_v47 }
0x36f5   :  { %v15752_v51 = vpop.f32.mrf.mxu1 }
0x36f6   :  { %v8959_v55 = vmax.f32 %v8953_v49, 0.0 }
0x36f7   :  { %v8955_v54 = vpop.f32.mrf.mxu1 }
0x36f8   :  { %v8956_v56 = vadd.f32 %v13071_v46, %v8955_v54  ;;  %v8961_v50 = vadd.f32 %v8959_v55, %v8306_v53 }
0x36f9   :  { %v15753_v57 = vpop.f32.mrf.mxu1 }
0x36fa   :  { %v8960_v48 = vmax.f32 %v8956_v56, 0.0 }
0x36fc   :  { %v8962_v4 = vadd.f32 %v8960_v48, %v8307_v2 }
0x36fe   :  { %v8963_v7 = vpack.c.bf16 %v8962_v4, %v8961_v50 }
0x3700   :  { %15771 = vmatmul.mubr.bf16.vlgmr.msra.gmra.mxu0 %v8963_v7 }
0x3701   :  { %15796 = vmatprep.mubr.msk.bf16.mxu0 %vm17367_vm0, %v17366_v5 }
0x37c0   :  { %v9071_v16 = vpop.f32.mrf.mxu0 }
0x37c1   :  { %v9072_v0 = vadd.f32 %v13080_v13, %v9071_v16 }
0x37c2   :  { %v15772_v17 = vpop.f32.mrf.mxu0 }
0x37c3   :  { %v9078_v2 = vadd.f32 %v9072_v0, %v7653_v62 }
0x37c4   :  { %v9074_v53 = vpop.f32.mrf.mxu0 }
0x37c5   :  { %v9075_v60 = vadd.f32 %v13080_v13, %v9074_v53 }
0x37c6   :  { %v15773_v52 = vpop.f32.mrf.mxu0 }
0x37c7   :  { %v9079_v61 = vadd.f32 %v9075_v60, %v7654_v9 }
0x37c9   :  { %v9080_v63 = vpack.c.bf16 %v9079_v61, %v9078_v2 }
0x37cb   :  { %15791 = vmatmul.mubr.bf16.vlgmr.msra.gmra.mxu1 %v9080_v63 }
0x388b   :  { %v9188_v12 = vpop.f32.mrf.mxu1 }
0x388c   :  { %v18589_v15 = vadd.f32 %v13089_v3, %v9188_v12 }
0x388d   :  { %v15792_v18 = vpop.f32.mrf.mxu1 }
0x388e   :  { %v9195_v1 = vmax.f32 %v18589_v15, 0.0 }
0x388f   :  { %v9191_v11 = vpop.f32.mrf.mxu1 }
0x3890   :  { %v18592_v20 = vadd.f32 %v13089_v3, %v9191_v11 }
0x3891   :  { %v15793_v22 = vpop.f32.mrf.mxu1 }
0x3892   :  { %v9196_v24 = vmax.f32 %v18592_v20, 0.0 }
0x3894   :  { %v9199_v8 = vpack.c.bf16 %v9196_v24, %v9195_v1 }
0x3895   :  { %17350 = dma.done.wait [#allocation4 + $0x3], 16384 }
0x3896   :  { %17351 = vsyncadd [#allocation4 + $0x3], 4294950912  ;;  %15820 = vmatprep.subr.bf16.mxu1 %v17366_v5  ;;  %15836 = vmatprep.mubr.msk.bf16.mxu1 %vm17367_vm0, %v17366_v5  ;;  %v16916_v10 = vld [vmem:[#allocation2 + $0xc38] sm:$0xff]   ;;  %v16917_v62 = vld [vmem:[#allocation2 + $0xc30] sm:$0xff]  }
0x3897   :  { %15795 = vmatpush3.bf16.msra.mxu0 %v9199_v8  ;;  %15821 = vmatpush3.bf16.msra.mxu1 %v16916_v10  ;;  %v16918_v9 = vld [vmem:[#allocation2 + $0xc78] sm:$0xff]   ;;  %v16920_v30 = vld [vmem:[#allocation2 + $0xc70] sm:$0xff]   ;;  %v16919_v32 = vld [vmem:[#allocation2 + $0xc28] sm:$0xff]  }
0x3898   :  { %15800 = vmatprep.subr.bf16.mxu0 %v17366_v5  ;;  %15822 = vmatprep.subr.bf16.mxu1 %v17366_v5  ;;  %v16922_v34 = vld [vmem:[#allocation2 + $0xc68] sm:$0xff]   ;;  %v16921_v40 = vld [vmem:[#allocation2 + $0xc20] sm:$0xff]   ;;  %v16923_v31 = vld [vmem:[#allocation2 + $0xc18] sm:$0xff]  }
0x3899   :  { %v16924_v45 = vld [vmem:[#allocation2 + $0xc60] sm:$0xff]   ;;  %v16926_v19 = vld [vmem:[#allocation2 + $0xc58] sm:$0xff]   ;;  %v16925_v21 = vld [vmem:[#allocation2 + $0xc10] sm:$0xff]  }
0x389a   :  { %15797 = vmatmul.mubr.msk.bf16.vlgmr.msra.gmra.mxu0 %vm170_vm1, %v17494_v6  ;;  %v16928_v23 = vld [vmem:[#allocation2 + $0xc50] sm:$0xff]   ;;  %v16927_v25 = vld [vmem:[#allocation2 + $0xc08] sm:$0xff]   ;;  %v16929_v26 = vld [vmem:[#allocation2 + $0xc00] sm:$0xff]  }
0x389b   :  { %15816 = vmatprep.mubr.msk.bf16.mxu0 %vm17367_vm0, %v17366_v5  ;;  %15801 = vmatpush3.bf16.msra.mxu0 %v16918_v9  ;;  %v16930_v28 = vld [vmem:[#allocation2 + $0xc48] sm:$0xff]   ;;  %v16931_v33 = vld [vmem:[#allocation2 + $0xc40] sm:$0xff]   ;;  %v16932_v39 = vld [vmem:[#allocation2 + $0xcb8] sm:$0xff]  }
0x389c   :  { %15802 = vmatprep.subr.bf16.mxu0 %v17366_v5  ;;  %15823 = vmatpush3.bf16.msra.mxu1 %v16917_v62  ;;  %v16933_v41 = vld [vmem:[#allocation2 + $0xcb0] sm:$0xff]   ;;  %v16934_v27 = vld [vmem:[#allocation2 + $0xca8] sm:$0xff]   ;;  %v16935_v37 = vld [vmem:[#allocation2 + $0xca0] sm:$0xff]  }
0x389d   :  { %15824 = vmatprep.subr.bf16.mxu1 %v17366_v5  ;;  %v16936_v36 = vld [vmem:[#allocation2 + $0xc98] sm:$0xff]   ;;  %v16937_v57 = vld [vmem:[#allocation2 + $0xc90] sm:$0xff]   ;;  %v16938_v48 = vld [vmem:[#allocation2 + $0xc88] sm:$0xff]  }
0x389e   :  { %v16939_v50 = vld [vmem:[#allocation2 + $0xc80] sm:$0xff]   ;;  %v13115_v58 = vld [vmem:[#allocation6 + $0x18] ss:$0 sm:$0xff]  ;;  %v16941_v61 = vld [vmem:[#allocation2 + $0xcf0] sm:$0xff]  }
0x389f   :  { %15803 = vmatpush3.bf16.msra.mxu0 %v16920_v30  ;;  %v16940_v2 = vld [vmem:[#allocation2 + $0xcf8] sm:$0xff]   ;;  %v16942_v63 = vld [vmem:[#allocation2 + $0xce8] sm:$0xff]   ;;  %v16943_v3 = vld [vmem:[#allocation2 + $0xce0] sm:$0xff]  }
0x38a0   :  { %15804 = vmatprep.subr.bf16.mxu0 %v17366_v5  ;;  %15825 = vmatpush3.bf16.msra.mxu1 %v16919_v32  ;;  %v16944_v12 = vld [vmem:[#allocation2 + $0xcd8] sm:$0xff]   ;;  %v16945_v18 = vld [vmem:[#allocation2 + $0xcd0] sm:$0xff]   ;;  %v16946_v11 = vld [vmem:[#allocation2 + $0xcc8] sm:$0xff]  }
0x38a1   :  { %15826 = vmatprep.subr.bf16.mxu1 %v17366_v5  ;;  %v16947_v22 = vld [vmem:[#allocation2 + $0xcc0] sm:$0xff]  }
0x38a3   :  { %15805 = vmatpush3.bf16.msra.mxu0 %v16922_v34 }
0x38a4   :  { %15806 = vmatprep.subr.bf16.mxu0 %v17366_v5  ;;  %15827 = vmatpush3.bf16.msra.mxu1 %v16921_v40  ;;  %v16948_v40 = vld [vmem:[#allocation3 + $0x5b8] sm:$0xff]  }
0x38a5   :  { %15828 = vmatprep.subr.bf16.mxu1 %v17366_v5 }
0x38a7   :  { %15807 = vmatpush3.bf16.msra.mxu0 %v16924_v45 }
0x38a8   :  { %15808 = vmatprep.subr.bf16.mxu0 %v17366_v5  ;;  %15829 = vmatpush3.bf16.msra.mxu1 %v16923_v31 }
0x38a9   :  { %15830 = vmatprep.subr.bf16.mxu1 %v17366_v5 }
0x38ab   :  { %15809 = vmatpush3.bf16.msra.mxu0 %v16926_v19  ;;  %v16949_v19 = vld [vmem:[#allocation3 + $0x5b0] sm:$0xff]  }
0x38ac   :  { %15810 = vmatprep.subr.bf16.mxu0 %v17366_v5  ;;  %15831 = vmatpush3.bf16.msra.mxu1 %v16925_v21  ;;  %v16950_v21 = vld [vmem:[#allocation3 + $0x5a8] sm:$0xff]  }
0x38ad   :  { %15832 = vmatprep.subr.bf16.mxu1 %v17366_v5 }
0x38af   :  { %15811 = vmatpush3.bf16.msra.mxu0 %v16928_v23  ;;  %v16951_v23 = vld [vmem:[#allocation3 + $0x5a0] sm:$0xff]  }
0x38b0   :  { %15812 = vmatprep.subr.bf16.mxu0 %v17366_v5  ;;  %15833 = vmatpush3.bf16.msra.mxu1 %v16927_v25  ;;  %v16952_v25 = vld [vmem:[#allocation3 + $0x598] sm:$0xff]  }
0x38b1   :  { %15834 = vmatprep.subr.bf16.mxu1 %v17366_v5 }
0x38b3   :  { %15813 = vmatpush3.bf16.msra.mxu0 %v16930_v28  ;;  %v16954_v28 = vld [vmem:[#allocation3 + $0x588] sm:$0xff]  }
0x38b4   :  { %15835 = vmatpush3.bf16.msra.mxu1 %v16929_v26  ;;  %15814 = vmatprep.subr.bf16.mxu0 %v17366_v5  ;;  %v16953_v26 = vld [vmem:[#allocation3 + $0x590] sm:$0xff]  }
0x38b5   :  { %15866 = vmatprep.subr.bf16.mxu1 %v17366_v5 }
0x38b7   :  { %15837 = vmatmul.mubr.bf16.vlgmr.msra.gmra.mxu1 %v9199_v8  ;;  %15815 = vmatpush3.bf16.msra.mxu0 %v16931_v33  ;;  %v16955_v33 = vld [vmem:[#allocation3 + $0x580] sm:$0xff]  }
0x38b8   :  { %15882 = vmatprep.mubr.msk.bf16.mxu1 %vm17367_vm0, %v17366_v5  ;;  %15840 = vmatprep.subr.bf16.mxu0 %v17366_v5 }
0x38b9   :  { %15867 = vmatpush3.bf16.msra.mxu1 %v16932_v39 }
0x38ba   :  { %15868 = vmatprep.subr.bf16.mxu1 %v17366_v5 }
0x38bd   :  { %15869 = vmatpush3.bf16.msra.mxu1 %v16933_v41  ;;  %v13133_v41 = vld [vmem:[#allocation6 + $0x19] ss:$0 sm:$0xff] }
0x38be   :  { %15870 = vmatprep.subr.bf16.mxu1 %v17366_v5 }
0x38c1   :  { %15871 = vmatpush3.bf16.msra.mxu1 %v16934_v27 }
0x38c2   :  { %15872 = vmatprep.subr.bf16.mxu1 %v17366_v5 }
0x38c5   :  { %15873 = vmatpush3.bf16.msra.mxu1 %v16935_v37 }
0x38c6   :  { %15874 = vmatprep.subr.bf16.mxu1 %v17366_v5 }
0x38c9   :  { %15875 = vmatpush3.bf16.msra.mxu1 %v16936_v36 }
0x38ca   :  { %15876 = vmatprep.subr.bf16.mxu1 %v17366_v5 }
0x38cd   :  { %15877 = vmatpush3.bf16.msra.mxu1 %v16937_v57 }
0x38ce   :  { %15878 = vmatprep.subr.bf16.mxu1 %v17366_v5 }
0x38d1   :  { %15879 = vmatpush3.bf16.msra.mxu1 %v16938_v48  ;;  %v16957_v48 = vld [vmem:[#allocation2 + $0xd30] sm:$0xff]  }
0x38d2   :  { %15880 = vmatprep.subr.bf16.mxu1 %v17366_v5 }
0x38d5   :  { %15881 = vmatpush3.bf16.msra.mxu1 %v16939_v50  ;;  %v16958_v50 = vld [vmem:[#allocation2 + $0xd28] sm:$0xff]  }
0x38d6   :  { %15906 = vmatprep.subr.bf16.mxu1 %v17366_v5 }
0x395a   :  { %v9234_v38 = vpop.f32.mrf.mxu0 }
0x395c   :  { %v15798_v43 = vpop.f32.mrf.mxu0 }
0x395e   :  { %v9237_v46 = vpop.f32.mrf.mxu0 }
0x395f   :  { %v9257_v47 = vpack.c.bf16 %v9237_v46, %v9234_v38 }
0x3960   :  { %v15799_v49 = vpop.f32.mrf.mxu0 }
0x3961   :  { %15817 = vmatmul.mubr.bf16.vlgmr.msra.gmra.mxu0 %v9257_v47 }
0x3962   :  { %15842 = vmatprep.mubr.msk.bf16.mxu0 %vm17367_vm0, %v17366_v5 }
0x3977   :  { %v9446_v51 = vpop.f32.mrf.mxu1 }
0x3979   :  { %v15838_v54 = vpop.f32.mrf.mxu1 }
0x397b   :  { %v9449_v55 = vpop.f32.mrf.mxu1 }
0x397d   :  { %v15839_v56 = vpop.f32.mrf.mxu1 }
0x397e   :  { %v16956_v56 = vld [vmem:[#allocation2 + $0xd38] sm:$0xff]  }
0x3a21   :  { %v9357_v4 = vpop.f32.mrf.mxu0 }
0x3a22   :  { %v9447_v7 = vadd.f32 %v9446_v51, %v9357_v4  ;;  %v16959_v4 = vld [vmem:[#allocation2 + $0xd20] sm:$0xff]  }
0x3a23   :  { %v15818_v59 = vpop.f32.mrf.mxu0 }
0x3a24   :  { %v18638_v13 = vadd.f32 %v13115_v58, %v9447_v7  ;;  %v16960_v7 = vld [vmem:[#allocation2 + $0xd18] sm:$0xff]   ;;  %v16962_v59 = vld [vmem:[#allocation2 + $0xd08] sm:$0xff]  }
0x3a25   :  { %v9360_v14 = vpop.f32.mrf.mxu0 }
0x3a26   :  { %v9450_v16 = vadd.f32 %v9449_v55, %v9360_v14  ;;  %v9463_v53 = vmax.f32 %v18638_v13, 0.0  ;;  %v16963_v14 = vld [vmem:[#allocation2 + $0xd00] sm:$0xff]   ;;  %v13134_v13 = vld [vmem:[#allocation8 + $0x16] ss:$0 sm:$0xff] }
0x3a27   :  { %v15819_v17 = vpop.f32.mrf.mxu0 }
0x3a28   :  { %v18640_v0 = vadd.f32 %v13115_v58, %v9450_v16  ;;  %v16961_v58 = vld [vmem:[#allocation2 + $0xd10] sm:$0xff]  }
0x3a2a   :  { %v9464_v60 = vmax.f32 %v18640_v0, 0.0 }
0x3a2c   :  { %v9465_v52 = vpack.c.bf16 %v9464_v60, %v9463_v53 }
0x3a2e   :  { %15841 = vmatpush3.bf16.msra.mxu0 %v9465_v52  ;;  %15883 = vmatmul.mubr.bf16.vlgmr.msra.gmra.mxu1 %v9465_v52 }
0x3a2f   :  { %15846 = vmatprep.subr.bf16.mxu0 %v17366_v5  ;;  %15908 = vmatprep.mubr.msk.bf16.mxu1 %vm17367_vm0, %v17366_v5 }
0x3a31   :  { %15843 = vmatmul.mubr.msk.bf16.vlgmr.msra.gmra.mxu0 %vm170_vm1, %v17494_v6 }
0x3a32   :  { %15847 = vmatpush3.bf16.msra.mxu0 %v16940_v2  ;;  %15862 = vmatprep.mubr.msk.bf16.mxu0 %vm17367_vm0, %v17366_v5 }
0x3a33   :  { %15848 = vmatprep.subr.bf16.mxu0 %v17366_v5 }
0x3a36   :  { %15849 = vmatpush3.bf16.msra.mxu0 %v16941_v61 }
0x3a37   :  { %15850 = vmatprep.subr.bf16.mxu0 %v17366_v5 }
0x3a3a   :  { %15851 = vmatpush3.bf16.msra.mxu0 %v16942_v63 }
0x3a3b   :  { %15852 = vmatprep.subr.bf16.mxu0 %v17366_v5 }
0x3a3e   :  { %15853 = vmatpush3.bf16.msra.mxu0 %v16943_v3  ;;  %v16964_v3 = vld [vmem:[#allocation2 + $0xd78] sm:$0xff]  }
0x3a3f   :  { %15854 = vmatprep.subr.bf16.mxu0 %v17366_v5 }
0x3a42   :  { %15855 = vmatpush3.bf16.msra.mxu0 %v16944_v12  ;;  %v16965_v12 = vld [vmem:[#allocation2 + $0xd70] sm:$0xff]  }
0x3a43   :  { %15856 = vmatprep.subr.bf16.mxu0 %v17366_v5 }
0x3a46   :  { %15857 = vmatpush3.bf16.msra.mxu0 %v16945_v18  ;;  %v16966_v18 = vld [vmem:[#allocation2 + $0xd68] sm:$0xff]  }
0x3a47   :  { %15858 = vmatprep.subr.bf16.mxu0 %v17366_v5 }
0x3a4a   :  { %15859 = vmatpush3.bf16.msra.mxu0 %v16946_v11  ;;  %v16967_v11 = vld [vmem:[#allocation2 + $0xd60] sm:$0xff]  }
0x3a4b   :  { %15860 = vmatprep.subr.bf16.mxu0 %v17366_v5 }
0x3a4e   :  { %15861 = vmatpush3.bf16.msra.mxu0 %v16947_v22  ;;  %v16968_v22 = vld [vmem:[#allocation2 + $0xd58] sm:$0xff]  }
0x3a4f   :  { %15886 = vmatprep.subr.bf16.mxu0 %v17366_v5 }
0x3aee   :  { %v9713_v8 = vpop.f32.mrf.mxu1 }
0x3af0   :  { %v15884_v10 = vpop.f32.mrf.mxu1 }
0x3af1   :  { %v9500_v62 = vpop.f32.mrf.mxu0  ;;  %v16970_v10 = vld [vmem:[#allocation2 + $0xd48] sm:$0xff]  }
0x3af2   :  { %v9716_v9 = vpop.f32.mrf.mxu1 }
0x3af3   :  { %v15844_v30 = vpop.f32.mrf.mxu0 }
0x3af4   :  { %v15885_v32 = vpop.f32.mrf.mxu1  ;;  %v16973_v30 = vld [vmem:[#allocation2 + $0xdb0] sm:$0xff]  }
0x3af5   :  { %v9503_v34 = vpop.f32.mrf.mxu0  ;;  %v16974_v32 = vld [vmem:[#allocation2 + $0xda8] sm:$0xff]  }
0x3af6   :  { %v9524_v45 = vpack.c.bf16 %v9503_v34, %v9500_v62  ;;  %v16971_v62 = vld [vmem:[#allocation2 + $0xd40] sm:$0xff]  }
0x3af7   :  { %v15845_v31 = vpop.f32.mrf.mxu0  ;;  %v16975_v34 = vld [vmem:[#allocation2 + $0xda0] sm:$0xff]  }
0x3af8   :  { %15863 = vmatmul.mubr.bf16.vlgmr.msra.gmra.mxu0 %v9524_v45 }
0x3af9   :  { %15887 = vmatpush3.bf16.msra.mxu0 %v16948_v40  ;;  %15902 = vmatprep.mubr.msk.bf16.mxu0 %vm17367_vm0, %v17366_v5  ;;  %v16976_v40 = vld [vmem:[#allocation2 + $0xd98] sm:$0xff]  }
0x3afa   :  { %15888 = vmatprep.subr.bf16.mxu0 %v17366_v5 }
0x3afd   :  { %15889 = vmatpush3.bf16.msra.mxu0 %v16949_v19 }
0x3afe   :  { %15890 = vmatprep.subr.bf16.mxu0 %v17366_v5 }
0x3b01   :  { %15891 = vmatpush3.bf16.msra.mxu0 %v16950_v21 }
0x3b02   :  { %15892 = vmatprep.subr.bf16.mxu0 %v17366_v5 }
0x3b05   :  { %15893 = vmatpush3.bf16.msra.mxu0 %v16951_v23 }
0x3b06   :  { %15894 = vmatprep.subr.bf16.mxu0 %v17366_v5 }
0x3b09   :  { %15895 = vmatpush3.bf16.msra.mxu0 %v16952_v25 }
0x3b0a   :  { %15896 = vmatprep.subr.bf16.mxu0 %v17366_v5 }
0x3b0d   :  { %15897 = vmatpush3.bf16.msra.mxu0 %v16953_v26 }
0x3b0e   :  { %15898 = vmatprep.subr.bf16.mxu0 %v17366_v5 }
0x3b11   :  { %15899 = vmatpush3.bf16.msra.mxu0 %v16954_v28 }
0x3b12   :  { %15900 = vmatprep.subr.bf16.mxu0 %v17366_v5 }
0x3b15   :  { %15901 = vmatpush3.bf16.msra.mxu0 %v16955_v33 }
0x3b16   :  { %15932 = vmatprep.subr.bf16.mxu0 %v17366_v5 }
0x3bb8   :  { %v9624_v39 = vpop.f32.mrf.mxu0 }
0x3bb9   :  { %v9714_v27 = vadd.f32 %v9713_v8, %v9624_v39  ;;  %v16969_v8 = vld [vmem:[#allocation2 + $0xd50] sm:$0xff]  }
0x3bba   :  { %v15864_v37 = vpop.f32.mrf.mxu0  ;;  %v16977_v39 = vld [vmem:[#allocation2 + $0xd90] sm:$0xff]  }
0x3bbb   :  { %v9728_v36 = vadd.f32 %v13133_v41, %v9714_v27  ;;  %v16979_v27 = vld [vmem:[#allocation2 + $0xd80] sm:$0xff]  }
0x3bbc   :  { %v9627_v38 = vpop.f32.mrf.mxu0 }
0x3bbd   :  { %v9717_v43 = vadd.f32 %v9716_v9, %v9627_v38  ;;  %v9730_v47 = vmax.f32 %v9728_v36, 0.0  ;;  %v16972_v9 = vld [vmem:[#allocation2 + $0xdb8] sm:$0xff]  }
0x3bbe   :  { %v15865_v46 = vpop.f32.mrf.mxu0  ;;  %v13160_v38 = vld [vmem:[#allocation6 + $0x1a] ss:$0 sm:$0xff] }
0x3bbf   :  { %v9729_v49 = vadd.f32 %v13133_v41, %v9717_v43  ;;  %v9732_v54 = vadd.f32 %v9730_v47, %v9463_v53  ;;  %v16978_v41 = vld [vmem:[#allocation2 + $0xd88] sm:$0xff]  }
0x3bc1   :  { %v9731_v51 = vmax.f32 %v9729_v49, 0.0 }
0x3bc3   :  { %v9733_v55 = vadd.f32 %v9731_v51, %v9464_v60 }
0x3bc5   :  { %v9734_v57 = vpack.c.bf16 %v9733_v55, %v9732_v54 }
0x3bc7   :  { %15903 = vmatmul.mubr.bf16.vlgmr.msra.gmra.mxu0 %v9734_v57 }
0x3bc8   :  { %15933 = vmatpush3.bf16.msra.mxu0 %v16956_v56  ;;  %15948 = vmatprep.mubr.msk.bf16.mxu0 %vm17367_vm0, %v17366_v5 }
0x3bc9   :  { %15934 = vmatprep.subr.bf16.mxu0 %v17366_v5 }
0x3bcc   :  { %15935 = vmatpush3.bf16.msra.mxu0 %v16957_v48  ;;  %v16980_v48 = vld [vmem:[#allocation2 + $0xdf8] sm:$0xff]  }
0x3bcd   :  { %15936 = vmatprep.subr.bf16.mxu0 %v17366_v5 }
0x3bd0   :  { %15937 = vmatpush3.bf16.msra.mxu0 %v16958_v50  ;;  %v16981_v50 = vld [vmem:[#allocation2 + $0xdf0] sm:$0xff]  }
0x3bd1   :  { %15938 = vmatprep.subr.bf16.mxu0 %v17366_v5 }
0x3bd4   :  { %15939 = vmatpush3.bf16.msra.mxu0 %v16959_v4  ;;  %v16982_v4 = vld [vmem:[#allocation2 + $0xde8] sm:$0xff]  }
0x3bd5   :  { %15940 = vmatprep.subr.bf16.mxu0 %v17366_v5 }
0x3bd8   :  { %15941 = vmatpush3.bf16.msra.mxu0 %v16960_v7  ;;  %v16983_v7 = vld [vmem:[#allocation2 + $0xde0] sm:$0xff]  }
0x3bd9   :  { %15942 = vmatprep.subr.bf16.mxu0 %v17366_v5 }
0x3bdc   :  { %15943 = vmatpush3.bf16.msra.mxu0 %v16961_v58  ;;  %v16984_v58 = vld [vmem:[#allocation2 + $0xdd8] sm:$0xff]  }
0x3bdd   :  { %15944 = vmatprep.subr.bf16.mxu0 %v17366_v5 }
0x3be0   :  { %15945 = vmatpush3.bf16.msra.mxu0 %v16962_v59  ;;  %v16985_v59 = vld [vmem:[#allocation2 + $0xdd0] sm:$0xff]  }
0x3be1   :  { %15946 = vmatprep.subr.bf16.mxu0 %v17366_v5 }
0x3be4   :  { %15947 = vmatpush3.bf16.msra.mxu0 %v16963_v14  ;;  %v16986_v14 = vld [vmem:[#allocation2 + $0xdc8] sm:$0xff]  }
0x3be5   :  { %15978 = vmatprep.subr.bf16.mxu0 %v17366_v5 }
0x3c87   :  { %v9842_v16 = vpop.f32.mrf.mxu0 }
0x3c88   :  { %v18687_v0 = vadd.f32 %v13134_v13, %v9842_v16 }
0x3c89   :  { %v15904_v17 = vpop.f32.mrf.mxu0 }
0x3c8a   :  { %v9849_v2 = vmax.f32 %v18687_v0, 0.0 }
0x3c8b   :  { %v9845_v53 = vpop.f32.mrf.mxu0 }
0x3c8c   :  { %v18689_v60 = vadd.f32 %v13134_v13, %v9845_v53  ;;  %v16987_v13 = vld [vmem:[#allocation2 + $0xdc0] sm:$0xff]  }
0x3c8d   :  { %v15905_v52 = vpop.f32.mrf.mxu0 }
0x3c8e   :  { %v9850_v61 = vmax.f32 %v18689_v60, 0.0 }
0x3c90   :  { %v9851_v63 = vpack.c.bf16 %v9850_v61, %v9849_v2 }
0x3c92   :  { %15907 = vmatpush3.bf16.msra.mxu1 %v9851_v63  ;;  %15949 = vmatmul.mubr.bf16.vlgmr.msra.gmra.mxu0 %v9851_v63 }
0x3c93   :  { %15912 = vmatprep.subr.bf16.mxu1 %v17366_v5  ;;  %15994 = vmatprep.mubr.msk.bf16.mxu0 %vm17367_vm0, %v17366_v5 }
0x3c94   :  { %15979 = vmatpush3.bf16.msra.mxu0 %v16972_v9  ;;  %v16992_v9 = vld [vmem:[#allocation3 + $0x5d8] sm:$0xff]  }
0x3c95   :  { %15909 = vmatmul.mubr.msk.bf16.vlgmr.msra.gmra.mxu1 %vm170_vm1, %v17494_v6  ;;  %15980 = vmatprep.subr.bf16.mxu0 %v17366_v5 }
0x3c96   :  { %15913 = vmatpush3.bf16.msra.mxu1 %v16964_v3  ;;  %15928 = vmatprep.mubr.msk.bf16.mxu1 %vm17367_vm0, %v17366_v5 }
0x3c97   :  { %15914 = vmatprep.subr.bf16.mxu1 %v17366_v5 }
0x3c98   :  { %15981 = vmatpush3.bf16.msra.mxu0 %v16973_v30  ;;  %v16993_v30 = vld [vmem:[#allocation3 + $0x5d0] sm:$0xff]  }
0x3c99   :  { %15982 = vmatprep.subr.bf16.mxu0 %v17366_v5 }
0x3c9a   :  { %15915 = vmatpush3.bf16.msra.mxu1 %v16965_v12 }
0x3c9b   :  { %15916 = vmatprep.subr.bf16.mxu1 %v17366_v5 }
0x3c9c   :  { %15983 = vmatpush3.bf16.msra.mxu0 %v16974_v32  ;;  %v16994_v32 = vld [vmem:[#allocation3 + $0x5c8] sm:$0xff]  }
0x3c9d   :  { %15984 = vmatprep.subr.bf16.mxu0 %v17366_v5 }
0x3c9e   :  { %15917 = vmatpush3.bf16.msra.mxu1 %v16966_v18  ;;  %v16988_v18 = vld [vmem:[#allocation3 + $0x5f8] sm:$0xff]  }
0x3c9f   :  { %15918 = vmatprep.subr.bf16.mxu1 %v17366_v5 }
0x3ca0   :  { %15985 = vmatpush3.bf16.msra.mxu0 %v16975_v34  ;;  %v16995_v34 = vld [vmem:[#allocation3 + $0x5c0] sm:$0xff]  }
0x3ca1   :  { %15986 = vmatprep.subr.bf16.mxu0 %v17366_v5 }
0x3ca2   :  { %15919 = vmatpush3.bf16.msra.mxu1 %v16967_v11 }
0x3ca3   :  { %15920 = vmatprep.subr.bf16.mxu1 %v17366_v5 }
0x3ca4   :  { %15987 = vmatpush3.bf16.msra.mxu0 %v16976_v40 }
0x3ca5   :  { %15988 = vmatprep.subr.bf16.mxu0 %v17366_v5 }
0x3ca6   :  { %15921 = vmatpush3.bf16.msra.mxu1 %v16968_v22 }
0x3ca7   :  { %15922 = vmatprep.subr.bf16.mxu1 %v17366_v5 }
0x3ca8   :  { %15989 = vmatpush3.bf16.msra.mxu0 %v16977_v39 }
0x3ca9   :  { %15990 = vmatprep.subr.bf16.mxu0 %v17366_v5 }
0x3caa   :  { %15923 = vmatpush3.bf16.msra.mxu1 %v16969_v8  ;;  %v16989_v8 = vld [vmem:[#allocation3 + $0x5f0] sm:$0xff]  }
0x3cab   :  { %15924 = vmatprep.subr.bf16.mxu1 %v17366_v5 }
0x3cac   :  { %15991 = vmatpush3.bf16.msra.mxu0 %v16978_v41 }
0x3cad   :  { %15992 = vmatprep.subr.bf16.mxu0 %v17366_v5 }
0x3cae   :  { %15925 = vmatpush3.bf16.msra.mxu1 %v16970_v10  ;;  %v16990_v10 = vld [vmem:[#allocation3 + $0x5e8] sm:$0xff]  }
0x3caf   :  { %15926 = vmatprep.subr.bf16.mxu1 %v17366_v5 }
0x3cb0   :  { %15993 = vmatpush3.bf16.msra.mxu0 %v16979_v27 }
0x3cb2   :  { %15927 = vmatpush3.bf16.msra.mxu1 %v16971_v62  ;;  %v16991_v62 = vld [vmem:[#allocation3 + $0x5e0] sm:$0xff]  }
0x3cb3   :  { %15952 = vmatprep.subr.bf16.mxu1 %v17366_v5 }
0x3d52   :  { %v10099_v45 = vpop.f32.mrf.mxu0 }
0x3d54   :  { %v15950_v31 = vpop.f32.mrf.mxu0 }
0x3d55   :  { %v9886_v19 = vpop.f32.mrf.mxu1 }
0x3d56   :  { %v10102_v21 = vpop.f32.mrf.mxu0 }
0x3d57   :  { %v15910_v23 = vpop.f32.mrf.mxu1 }
0x3d58   :  { %v15951_v25 = vpop.f32.mrf.mxu0 }
0x3d59   :  { %v9889_v26 = vpop.f32.mrf.mxu1 }
0x3d5a   :  { %v9910_v28 = vpack.c.bf16 %v9889_v26, %v9886_v19 }
0x3d5b   :  { %v15911_v33 = vpop.f32.mrf.mxu1 }
0x3d5c   :  { %15929 = vmatmul.mubr.bf16.vlgmr.msra.gmra.mxu1 %v9910_v28 }
0x3d5d   :  { %15954 = vmatprep.mubr.msk.bf16.mxu1 %vm17367_vm0, %v17366_v5 }
0x3e1c   :  { %v10010_v37 = vpop.f32.mrf.mxu1 }
0x3e1d   :  { %v10100_v36 = vadd.f32 %v10099_v45, %v10010_v37  ;;  %v13178_v45 = vld [vmem:[#allocation6 + $0x1b] ss:$0 sm:$0xff] }
0x3e1e   :  { %v15930_v43 = vpop.f32.mrf.mxu1 }
0x3e1f   :  { %v18721_v47 = vadd.f32 %v13160_v38, %v10100_v36  ;;  %v13179_v36 = vld [vmem:[#allocation8 + $0x17] ss:$0 sm:$0xff] }
0x3e20   :  { %v10013_v46 = vpop.f32.mrf.mxu1 }
0x3e21   :  { %v10103_v49 = vadd.f32 %v10102_v21, %v10013_v46  ;;  %v10116_v55 = vmax.f32 %v18721_v47, 0.0 }
0x3e22   :  { %v15931_v51 = vpop.f32.mrf.mxu1 }
0x3e23   :  { %v18723_v54 = vadd.f32 %v13160_v38, %v10103_v49 }
0x3e25   :  { %v10117_v56 = vmax.f32 %v18723_v54, 0.0 }
0x3e27   :  { %v10118_v57 = vpack.c.bf16 %v10117_v56, %v10116_v55 }
0x3e29   :  { %15953 = vmatpush3.bf16.msra.mxu1 %v10118_v57  ;;  %15995 = vmatmul.mubr.bf16.vlgmr.msra.gmra.mxu0 %v10118_v57 }
0x3e2a   :  { %15958 = vmatprep.subr.bf16.mxu1 %v17366_v5 }
0x3e2c   :  { %15955 = vmatmul.mubr.msk.bf16.vlgmr.msra.gmra.mxu1 %vm170_vm1, %v17494_v6 }
0x3e2d   :  { %15959 = vmatpush3.bf16.msra.mxu1 %v16980_v48  ;;  %15974 = vmatprep.mubr.msk.bf16.mxu1 %vm17367_vm0, %v17366_v5 }
0x3e2e   :  { %15960 = vmatprep.subr.bf16.mxu1 %v17366_v5 }
0x3e31   :  { %15961 = vmatpush3.bf16.msra.mxu1 %v16981_v50 }
0x3e32   :  { %15962 = vmatprep.subr.bf16.mxu1 %v17366_v5 }
0x3e35   :  { %15963 = vmatpush3.bf16.msra.mxu1 %v16982_v4 }
0x3e36   :  { %15964 = vmatprep.subr.bf16.mxu1 %v17366_v5 }
0x3e39   :  { %15965 = vmatpush3.bf16.msra.mxu1 %v16983_v7 }
0x3e3a   :  { %15966 = vmatprep.subr.bf16.mxu1 %v17366_v5 }
0x3e3d   :  { %15967 = vmatpush3.bf16.msra.mxu1 %v16984_v58 }
0x3e3e   :  { %15968 = vmatprep.subr.bf16.mxu1 %v17366_v5 }
0x3e41   :  { %15969 = vmatpush3.bf16.msra.mxu1 %v16985_v59 }
0x3e42   :  { %15970 = vmatprep.subr.bf16.mxu1 %v17366_v5 }
0x3e45   :  { %15971 = vmatpush3.bf16.msra.mxu1 %v16986_v14 }
0x3e46   :  { %15972 = vmatprep.subr.bf16.mxu1 %v17366_v5 }
0x3e49   :  { %15973 = vmatpush3.bf16.msra.mxu1 %v16987_v13 }
0x3e4a   :  { %15998 = vmatprep.subr.bf16.mxu1 %v17366_v5 }
0x3ee9   :  { %v10366_v16 = vpop.f32.mrf.mxu0 }
0x3eeb   :  { %v15996_v17 = vpop.f32.mrf.mxu0 }
0x3eec   :  { %v10153_v53 = vpop.f32.mrf.mxu1 }
0x3eed   :  { %v10369_v52 = vpop.f32.mrf.mxu0 }
0x3eee   :  { %v15956_v63 = vpop.f32.mrf.mxu1 }
0x3eef   :  { %v15997_v3 = vpop.f32.mrf.mxu0 }
0x3ef0   :  { %v10156_v12 = vpop.f32.mrf.mxu1 }
0x3ef1   :  { %v10177_v11 = vpack.c.bf16 %v10156_v12, %v10153_v53 }
0x3ef2   :  { %v15957_v22 = vpop.f32.mrf.mxu1 }
0x3ef3   :  { %15975 = vmatmul.mubr.bf16.vlgmr.msra.gmra.mxu1 %v10177_v11 }
0x3ef4   :  { %15999 = vmatpush3.bf16.msra.mxu1 %v16988_v18  ;;  %16014 = vmatprep.mubr.msk.bf16.mxu1 %vm17367_vm0, %v17366_v5 }
0x3ef5   :  { %16000 = vmatprep.subr.bf16.mxu1 %v17366_v5 }
0x3ef8   :  { %16001 = vmatpush3.bf16.msra.mxu1 %v16989_v8 }
0x3ef9   :  { %16002 = vmatprep.subr.bf16.mxu1 %v17366_v5 }
0x3efc   :  { %16003 = vmatpush3.bf16.msra.mxu1 %v16990_v10 }
0x3efd   :  { %16004 = vmatprep.subr.bf16.mxu1 %v17366_v5 }
0x3f00   :  { %16005 = vmatpush3.bf16.msra.mxu1 %v16991_v62 }
0x3f01   :  { %16006 = vmatprep.subr.bf16.mxu1 %v17366_v5 }
0x3f04   :  { %16007 = vmatpush3.bf16.msra.mxu1 %v16992_v9 }
0x3f05   :  { %16008 = vmatprep.subr.bf16.mxu1 %v17366_v5 }
0x3f08   :  { %16009 = vmatpush3.bf16.msra.mxu1 %v16993_v30 }
0x3f09   :  { %16010 = vmatprep.subr.bf16.mxu1 %v17366_v5 }
0x3f0c   :  { %16011 = vmatpush3.bf16.msra.mxu1 %v16994_v32 }
0x3f0d   :  { %16012 = vmatprep.subr.bf16.mxu1 %v17366_v5 }
0x3f10   :  { %16013 = vmatpush3.bf16.msra.mxu1 %v16995_v34 }
0x3fb3   :  { %v10277_v40 = vpop.f32.mrf.mxu1 }
0x3fb4   :  { %v10367_v31 = vadd.f32 %v10366_v16, %v10277_v40 }
0x3fb5   :  { %v15976_v19 = vpop.f32.mrf.mxu1 }
0x3fb6   :  { %v10381_v21 = vadd.f32 %v13178_v45, %v10367_v31 }
0x3fb7   :  { %v10280_v23 = vpop.f32.mrf.mxu1 }
0x3fb8   :  { %v10370_v25 = vadd.f32 %v10369_v52, %v10280_v23  ;;  %v10383_v28 = vmax.f32 %v10381_v21, 0.0 }
0x3fb9   :  { %v15977_v26 = vpop.f32.mrf.mxu1 }
0x3fba   :  { %v10382_v33 = vadd.f32 %v13178_v45, %v10370_v25  ;;  %v10385_v41 = vadd.f32 %v10383_v28, %v10116_v55 }
0x3fbc   :  { %v10384_v39 = vmax.f32 %v10382_v33, 0.0 }
0x3fbe   :  { %v10386_v27 = vadd.f32 %v10384_v39, %v10117_v56 }
0x3fc0   :  { %v10387_v37 = vpack.c.bf16 %v10386_v27, %v10385_v41 }
0x3fc2   :  { %16015 = vmatmul.mubr.bf16.vlgmr.msra.gmra.mxu1 %v10387_v37 }
0x4082   :  { %v10495_v38 = vpop.f32.mrf.mxu1 }
0x4083   :  { %v10496_v43 = vadd.f32 %v13179_v36, %v10495_v38 }
0x4084   :  { %v16016_v46 = vpop.f32.mrf.mxu1 }
0x4085   :  { %v10502_v49 = vmax.f32 %v10496_v43, 0.0 }
0x4086   :  { %v10498_v51 = vpop.f32.mrf.mxu1 }
0x4087   :  { %v10504_v57 = vadd.f32 %v10502_v49, %v9849_v2  ;;  %v10499_v48 = vadd.f32 %v13179_v36, %v10498_v51 }
0x4088   :  { %v16017_v50 = vpop.f32.mrf.mxu1 }
0x4089   :  { %v10503_v4 = vmax.f32 %v10499_v48, 0.0 }
0x408b   :  { %v10505_v47 = vadd.f32 %v10503_v4, %v9850_v61 }
0x408c   :  { %17352 = dma.done.wait [#allocation5 + $0x3], 7168 }
0x408d   :  { %17353 = vsyncadd [#allocation5 + $0x3], 4294960128  ;;  %16018 = vmatprep.subr.bf16.mxu0 %v17366_v5  ;;  %16034 = vmatprep.mubr.msk.bf16.mxu0 %vm17367_vm0, %v17366_v5  ;;  %v16996_v0 = vld [vmem:[#allocation3 + $0x638] sm:$0xff]   ;;  %v16997_v2 = vld [vmem:[#allocation3 + $0x630] sm:$0xff]   ;;  %v10511_v59 = vpack.c.bf16 %v10505_v47, %v10504_v57 }
0x408e   :  { %16038 = vmatprep.subr.bf16.mxu1 %v17366_v5  ;;  %16040 = vmatprep.mubr.msk.bf16.mxu1 %vm17367_vm0, %v17366_v5  ;;  %v16998_v60 = vld [vmem:[#allocation3 + $0x628] sm:$0xff]   ;;  %v16999_v61 = vld [vmem:[#allocation3 + $0x620] sm:$0xff]   ;;  %v17000_v54 = vld [vmem:[#allocation3 + $0x618] sm:$0xff]  }
0x408f   :  { %16019 = vmatpush3.bf16.msra.mxu0 %v16996_v0  ;;  %v17001_v55 = vld [vmem:[#allocation3 + $0x610] sm:$0xff]   ;;  %v17002_v56 = vld [vmem:[#allocation3 + $0x608] sm:$0xff]   ;;  %v17003_v7 = vld [vmem:[#allocation3 + $0x600] sm:$0xff]  }
0x4090   :  { %16020 = vmatprep.subr.bf16.mxu0 %v17366_v5  ;;  %v17004_v58 = vld [vmem:[#allocation2 + $0xe38] sm:$0xff]   ;;  %v17005_v14 = vld [vmem:[#allocation2 + $0xe30] sm:$0xff]   ;;  %v17006_v13 = vld [vmem:[#allocation2 + $0xe28] sm:$0xff]  }
0x4091   :  { %v17007_v16 = vld [vmem:[#allocation2 + $0xe20] sm:$0xff]   ;;  %v17008_v17 = vld [vmem:[#allocation2 + $0xe18] sm:$0xff]   ;;  %v17009_v53 = vld [vmem:[#allocation2 + $0xe10] sm:$0xff]  }
0x4092   :  { %v17010_v52 = vld [vmem:[#allocation2 + $0xe08] sm:$0xff]   ;;  %v17011_v63 = vld [vmem:[#allocation2 + $0xe00] sm:$0xff]   ;;  %v13188_v3 = vld [vmem:[#allocation8 + $0x18] ss:$0 sm:$0xff] }
0x4093   :  { %16021 = vmatpush3.bf16.msra.mxu0 %v16997_v2  ;;  %v17012_v32 = vld [vmem:[#allocation2 + $0xe78] sm:$0xff]   ;;  %v17013_v34 = vld [vmem:[#allocation2 + $0xe70] sm:$0xff]   ;;  %v17014_v40 = vld [vmem:[#allocation2 + $0xe68] sm:$0xff]  }
0x4094   :  { %16022 = vmatprep.subr.bf16.mxu0 %v17366_v5  ;;  %v17015_v45 = vld [vmem:[#allocation2 + $0xe60] sm:$0xff]   ;;  %v17016_v31 = vld [vmem:[#allocation2 + $0xe58] sm:$0xff]   ;;  %v17017_v19 = vld [vmem:[#allocation2 + $0xe50] sm:$0xff]  }
0x4095   :  { %v17018_v21 = vld [vmem:[#allocation2 + $0xe48] sm:$0xff]   ;;  %v17019_v23 = vld [vmem:[#allocation2 + $0xe40] sm:$0xff]   ;;  %v17028_v38 = vld [vmem:[#allocation2 + $0xef8] sm:$0xff]  }
0x4096   :  { %v17029_v43 = vld [vmem:[#allocation2 + $0xef0] sm:$0xff]   ;;  %v17030_v46 = vld [vmem:[#allocation2 + $0xee8] sm:$0xff]   ;;  %v17031_v49 = vld [vmem:[#allocation2 + $0xee0] sm:$0xff]  }
0x4097   :  { %16023 = vmatpush3.bf16.msra.mxu0 %v16998_v60  ;;  %v17032_v51 = vld [vmem:[#allocation2 + $0xed8] sm:$0xff]   ;;  %v17033_v57 = vld [vmem:[#allocation2 + $0xed0] sm:$0xff]  }
0x4098   :  { %16024 = vmatprep.subr.bf16.mxu0 %v17366_v5  ;;  %v13214_v4 = vld [vmem:[#allocation6 + $0x1c] ss:$0 sm:$0xff] }
0x409b   :  { %16025 = vmatpush3.bf16.msra.mxu0 %v16999_v61 }
0x409c   :  { %16026 = vmatprep.subr.bf16.mxu0 %v17366_v5 }
0x409f   :  { %16027 = vmatpush3.bf16.msra.mxu0 %v17000_v54 }
0x40a0   :  { %16028 = vmatprep.subr.bf16.mxu0 %v17366_v5 }
0x40a3   :  { %16029 = vmatpush3.bf16.msra.mxu0 %v17001_v55 }
0x40a4   :  { %16030 = vmatprep.subr.bf16.mxu0 %v17366_v5 }
0x40a7   :  { %16031 = vmatpush3.bf16.msra.mxu0 %v17002_v56 }
0x40a8   :  { %16032 = vmatprep.subr.bf16.mxu0 %v17366_v5 }
0x40ab   :  { %16033 = vmatpush3.bf16.msra.mxu0 %v17003_v7 }
0x40ac   :  { %16064 = vmatprep.subr.bf16.mxu0 %v17366_v5 }
0x40ae   :  { %16035 = vmatmul.mubr.bf16.vlgmr.msra.gmra.mxu0 %v10511_v59  ;;  %v17021_v59 = vld [vmem:[#allocation2 + $0xeb0] sm:$0xff]  }
0x40af   :  { %16065 = vmatpush3.bf16.msra.mxu0 %v17004_v58  ;;  %16080 = vmatprep.mubr.msk.bf16.mxu0 %vm17367_vm0, %v17366_v5  ;;  %v17020_v58 = vld [vmem:[#allocation2 + $0xeb8] sm:$0xff]  }
0x40b0   :  { %16066 = vmatprep.subr.bf16.mxu0 %v17366_v5 }
0x40b3   :  { %16067 = vmatpush3.bf16.msra.mxu0 %v17005_v14  ;;  %v17022_v14 = vld [vmem:[#allocation2 + $0xea8] sm:$0xff]  }
0x40b4   :  { %16068 = vmatprep.subr.bf16.mxu0 %v17366_v5 }
0x40b7   :  { %16069 = vmatpush3.bf16.msra.mxu0 %v17006_v13  ;;  %v17023_v13 = vld [vmem:[#allocation2 + $0xea0] sm:$0xff]  }
0x40b8   :  { %16070 = vmatprep.subr.bf16.mxu0 %v17366_v5 }
0x40bb   :  { %16071 = vmatpush3.bf16.msra.mxu0 %v17007_v16  ;;  %v17024_v16 = vld [vmem:[#allocation2 + $0xe98] sm:$0xff]  }
0x40bc   :  { %16072 = vmatprep.subr.bf16.mxu0 %v17366_v5 }
0x40bf   :  { %16073 = vmatpush3.bf16.msra.mxu0 %v17008_v17  ;;  %v17025_v17 = vld [vmem:[#allocation2 + $0xe90] sm:$0xff]  }
0x40c0   :  { %16074 = vmatprep.subr.bf16.mxu0 %v17366_v5 }
0x40c3   :  { %16075 = vmatpush3.bf16.msra.mxu0 %v17009_v53  ;;  %v17026_v53 = vld [vmem:[#allocation2 + $0xe88] sm:$0xff]  }
0x40c4   :  { %16076 = vmatprep.subr.bf16.mxu0 %v17366_v5 }
0x40c7   :  { %16077 = vmatpush3.bf16.msra.mxu0 %v17010_v52  ;;  %v17027_v52 = vld [vmem:[#allocation2 + $0xe80] sm:$0xff]  }
0x40c8   :  { %16078 = vmatprep.subr.bf16.mxu0 %v17366_v5 }
0x40cb   :  { %16079 = vmatpush3.bf16.msra.mxu0 %v17011_v63  ;;  %v17034_v63 = vld [vmem:[#allocation2 + $0xec8] sm:$0xff]  }
0x40cc   :  { %16090 = vmatprep.subr.bf16.mxu0 %v17366_v5 }
0x416e   :  { %v10618_v12 = vpop.f32.mrf.mxu0 }
0x416f   :  { %v18785_v11 = vadd.f32 %v13188_v3, %v10618_v12 }
0x4170   :  { %v16036_v18 = vpop.f32.mrf.mxu0 }
0x4171   :  { %v10625_v62 = vmax.f32 %v18785_v11, 0.0  ;;  %v17108_v11 = vld [vmem:[#allocation3 + $0x7b8] sm:$0xff]  }
0x4172   :  { %v10621_v22 = vpop.f32.mrf.mxu0 }
0x4173   :  { %v18787_v8 = vadd.f32 %v13188_v3, %v10621_v22  ;;  %v17035_v3 = vld [vmem:[#allocation2 + $0xec0] sm:$0xff]  }
0x4174   :  { %v16037_v10 = vpop.f32.mrf.mxu0 }
0x4175   :  { %v10626_v9 = vmax.f32 %v18787_v8, 0.0  ;;  %v17036_v10 = vld [vmem:[#allocation3 + $0x678] sm:$0xff]   ;;  %v17110_v8 = vld [vmem:[#allocation3 + $0x7a8] sm:$0xff]  }
0x4177   :  { %v10627_v30 = vpack.c.bf16 %v10626_v9, %v10625_v62 }
0x4179   :  { %16039 = vmatpush3.bf16.msra.mxu1 %v10627_v30  ;;  %16081 = vmatmul.mubr.bf16.vlgmr.msra.gmra.mxu0 %v10627_v30 }
0x417a   :  { %16044 = vmatprep.subr.bf16.mxu1 %v17366_v5  ;;  %16106 = vmatprep.mubr.msk.bf16.mxu0 %vm17367_vm0, %v17366_v5 }
0x417b   :  { %16091 = vmatpush3.bf16.msra.mxu0 %v17028_v38 }
0x417c   :  { %16041 = vmatmul.mubr.msk.bf16.vlgmr.msra.gmra.mxu1 %vm170_vm1, %v17494_v6  ;;  %16092 = vmatprep.subr.bf16.mxu0 %v17366_v5 }
0x417d   :  { %16045 = vmatpush3.bf16.msra.mxu1 %v17012_v32  ;;  %16060 = vmatprep.mubr.msk.bf16.mxu1 %vm17367_vm0, %v17366_v5 }
0x417e   :  { %16046 = vmatprep.subr.bf16.mxu1 %v17366_v5 }
0x417f   :  { %16093 = vmatpush3.bf16.msra.mxu0 %v17029_v43 }
0x4180   :  { %16094 = vmatprep.subr.bf16.mxu0 %v17366_v5 }
0x4181   :  { %16047 = vmatpush3.bf16.msra.mxu1 %v17013_v34  ;;  %v17037_v34 = vld [vmem:[#allocation3 + $0x670] sm:$0xff]  }
0x4182   :  { %16048 = vmatprep.subr.bf16.mxu1 %v17366_v5 }
0x4183   :  { %16095 = vmatpush3.bf16.msra.mxu0 %v17030_v46 }
0x4184   :  { %16096 = vmatprep.subr.bf16.mxu0 %v17366_v5 }
0x4185   :  { %16049 = vmatpush3.bf16.msra.mxu1 %v17014_v40  ;;  %v17038_v40 = vld [vmem:[#allocation3 + $0x668] sm:$0xff]  }
0x4186   :  { %16050 = vmatprep.subr.bf16.mxu1 %v17366_v5 }
0x4187   :  { %16097 = vmatpush3.bf16.msra.mxu0 %v17031_v49 }
0x4188   :  { %16098 = vmatprep.subr.bf16.mxu0 %v17366_v5 }
0x4189   :  { %16051 = vmatpush3.bf16.msra.mxu1 %v17015_v45  ;;  %v17039_v45 = vld [vmem:[#allocation3 + $0x660] sm:$0xff]  }
0x418a   :  { %16052 = vmatprep.subr.bf16.mxu1 %v17366_v5 }
0x418b   :  { %16099 = vmatpush3.bf16.msra.mxu0 %v17032_v51 }
0x418c   :  { %16100 = vmatprep.subr.bf16.mxu0 %v17366_v5 }
0x418d   :  { %16053 = vmatpush3.bf16.msra.mxu1 %v17016_v31 }
0x418e   :  { %16054 = vmatprep.subr.bf16.mxu1 %v17366_v5 }
0x418f   :  { %16101 = vmatpush3.bf16.msra.mxu0 %v17033_v57 }
0x4190   :  { %16102 = vmatprep.subr.bf16.mxu0 %v17366_v5 }
0x4191   :  { %16055 = vmatpush3.bf16.msra.mxu1 %v17017_v19 }
0x4192   :  { %16056 = vmatprep.subr.bf16.mxu1 %v17366_v5 }
0x4193   :  { %16103 = vmatpush3.bf16.msra.mxu0 %v17034_v63 }
0x4194   :  { %16104 = vmatprep.subr.bf16.mxu0 %v17366_v5 }
0x4195   :  { %16057 = vmatpush3.bf16.msra.mxu1 %v17018_v21 }
0x4196   :  { %16058 = vmatprep.subr.bf16.mxu1 %v17366_v5 }
0x4197   :  { %16105 = vmatpush3.bf16.msra.mxu0 %v17035_v3  ;;  %v17052_v3 = vld [vmem:[#allocation2 + $0xf78] sm:$0xff]  }
0x4198   :  { %16130 = vmatprep.subr.bf16.mxu0 %v17366_v5 }
0x4199   :  { %16059 = vmatpush3.bf16.msra.mxu1 %v17019_v23 }
0x419a   :  { %16084 = vmatprep.subr.bf16.mxu1 %v17366_v5 }
0x4239   :  { %v10875_v25 = vpop.f32.mrf.mxu0 }
0x423b   :  { %v16082_v26 = vpop.f32.mrf.mxu0 }
0x423c   :  { %v10662_v28 = vpop.f32.mrf.mxu1  ;;  %v17041_v26 = vld [vmem:[#allocation3 + $0x650] sm:$0xff]  }
0x423d   :  { %v10878_v33 = vpop.f32.mrf.mxu0 }
0x423e   :  { %v16042_v39 = vpop.f32.mrf.mxu1 }
0x423f   :  { %v16083_v41 = vpop.f32.mrf.mxu0 }
0x4240   :  { %v10665_v27 = vpop.f32.mrf.mxu1  ;;  %v13232_v41 = vld [vmem:[#allocation6 + $0x1d] ss:$0 sm:$0xff] }
0x4241   :  { %v10686_v37 = vpack.c.bf16 %v10665_v27, %v10662_v28  ;;  %v17042_v28 = vld [vmem:[#allocation3 + $0x648] sm:$0xff]  }
0x4242   :  { %v16043_v36 = vpop.f32.mrf.mxu1 }
0x4243   :  { %16061 = vmatmul.mubr.bf16.vlgmr.msra.gmra.mxu1 %v10686_v37 }
0x4244   :  { %16086 = vmatprep.mubr.msk.bf16.mxu1 %vm17367_vm0, %v17366_v5 }
0x4303   :  { %v10786_v48 = vpop.f32.mrf.mxu1 }
0x4304   :  { %v10876_v50 = vadd.f32 %v10875_v25, %v10786_v48  ;;  %v17040_v25 = vld [vmem:[#allocation3 + $0x658] sm:$0xff]  }
0x4305   :  { %v16062_v47 = vpop.f32.mrf.mxu1 }
0x4306   :  { %v18818_v2 = vadd.f32 %v13214_v4, %v10876_v50 }
0x4307   :  { %v10789_v0 = vpop.f32.mrf.mxu1 }
0x4308   :  { %v10879_v60 = vadd.f32 %v10878_v33, %v10789_v0  ;;  %v10892_v55 = vmax.f32 %v18818_v2, 0.0  ;;  %v17043_v33 = vld [vmem:[#allocation3 + $0x640] sm:$0xff]   ;;  %v17045_v0 = vld [vmem:[#allocation2 + $0xf30] sm:$0xff]  }
0x4309   :  { %v16063_v61 = vpop.f32.mrf.mxu1  ;;  %v17047_v2 = vld [vmem:[#allocation2 + $0xf20] sm:$0xff]  }
0x430a   :  { %v18820_v54 = vadd.f32 %v13214_v4, %v10879_v60  ;;  %v17044_v4 = vld [vmem:[#allocation2 + $0xf38] sm:$0xff]   ;;  %v17046_v60 = vld [vmem:[#allocation2 + $0xf28] sm:$0xff]  }
0x430b   :  { %v17048_v61 = vld [vmem:[#allocation2 + $0xf18] sm:$0xff]  }
0x430c   :  { %v10893_v56 = vmax.f32 %v18820_v54, 0.0  ;;  %v17049_v54 = vld [vmem:[#allocation2 + $0xf10] sm:$0xff]  }
0x430e   :  { %v10894_v7 = vpack.c.bf16 %v10893_v56, %v10892_v55 }
0x4310   :  { %16085 = vmatpush3.bf16.msra.mxu1 %v10894_v7 }
0x4311   :  { %16110 = vmatprep.subr.bf16.mxu1 %v17366_v5 }
0x4313   :  { %16087 = vmatmul.mubr.msk.bf16.vlgmr.msra.gmra.mxu1 %vm170_vm1, %v17494_v6 }
0x4314   :  { %16111 = vmatpush3.bf16.msra.mxu1 %v17020_v58  ;;  %16126 = vmatprep.mubr.msk.bf16.mxu1 %vm17367_vm0, %v17366_v5 }
0x4315   :  { %16112 = vmatprep.subr.bf16.mxu1 %v17366_v5 }
0x4318   :  { %16113 = vmatpush3.bf16.msra.mxu1 %v17021_v59 }
0x4319   :  { %16114 = vmatprep.subr.bf16.mxu1 %v17366_v5 }
0x431c   :  { %16115 = vmatpush3.bf16.msra.mxu1 %v17022_v14 }
0x431d   :  { %16116 = vmatprep.subr.bf16.mxu1 %v17366_v5 }
0x4320   :  { %16117 = vmatpush3.bf16.msra.mxu1 %v17023_v13 }
0x4321   :  { %16118 = vmatprep.subr.bf16.mxu1 %v17366_v5 }
0x4324   :  { %16119 = vmatpush3.bf16.msra.mxu1 %v17024_v16 }
0x4325   :  { %16120 = vmatprep.subr.bf16.mxu1 %v17366_v5 }
0x4328   :  { %16121 = vmatpush3.bf16.msra.mxu1 %v17025_v17 }
0x4329   :  { %16122 = vmatprep.subr.bf16.mxu1 %v17366_v5 }
0x432c   :  { %16123 = vmatpush3.bf16.msra.mxu1 %v17026_v53 }
0x432d   :  { %16124 = vmatprep.subr.bf16.mxu1 %v17366_v5 }
0x4330   :  { %16125 = vmatpush3.bf16.msra.mxu1 %v17027_v52 }
0x4331   :  { %16150 = vmatprep.subr.bf16.mxu1 %v17366_v5 }
0x4333   :  { %16127 = vmatmul.mubr.bf16.vlgmr.msra.gmra.mxu1 %v10894_v7  ;;  %v13233_v7 = vld [vmem:[#allocation8 + $0x19] ss:$0 sm:$0xff] }
0x4334   :  { %16152 = vmatprep.mubr.msk.bf16.mxu1 %vm17367_vm0, %v17366_v5 }
0x43d3   :  { %v10929_v12 = vpop.f32.mrf.mxu1 }
0x43d5   :  { %v16088_v18 = vpop.f32.mrf.mxu1 }
0x43d6   :  { %v17054_v18 = vld [vmem:[#allocation2 + $0xf68] sm:$0xff]  }
0x43d7   :  { %v10932_v22 = vpop.f32.mrf.mxu1 }
0x43d8   :  { %v10953_v30 = vpack.c.bf16 %v10932_v22, %v10929_v12  ;;  %v17053_v12 = vld [vmem:[#allocation2 + $0xf70] sm:$0xff]   ;;  %v17055_v22 = vld [vmem:[#allocation2 + $0xf60] sm:$0xff]  }
0x43d9   :  { %v16089_v32 = vpop.f32.mrf.mxu1 }
0x43da   :  { %16107 = vmatmul.mubr.bf16.vlgmr.msra.gmra.mxu0 %v10953_v30  ;;  %v17057_v30 = vld [vmem:[#allocation2 + $0xf50] sm:$0xff]   ;;  %v17058_v32 = vld [vmem:[#allocation2 + $0xf48] sm:$0xff]  }
0x43db   :  { %16131 = vmatpush3.bf16.msra.mxu0 %v17036_v10  ;;  %16146 = vmatprep.mubr.msk.bf16.mxu0 %vm17367_vm0, %v17366_v5  ;;  %v17056_v10 = vld [vmem:[#allocation2 + $0xf58] sm:$0xff]  }
0x43dc   :  { %16132 = vmatprep.subr.bf16.mxu0 %v17366_v5 }
0x43df   :  { %16133 = vmatpush3.bf16.msra.mxu0 %v17037_v34  ;;  %v17059_v34 = vld [vmem:[#allocation2 + $0xf40] sm:$0xff]  }
0x43e0   :  { %16134 = vmatprep.subr.bf16.mxu0 %v17366_v5 }
0x43e3   :  { %16135 = vmatpush3.bf16.msra.mxu0 %v17038_v40  ;;  %v17060_v40 = vld [vmem:[#allocation2 + $0xfb8] sm:$0xff]  }
0x43e4   :  { %16136 = vmatprep.subr.bf16.mxu0 %v17366_v5 }
0x43e7   :  { %16137 = vmatpush3.bf16.msra.mxu0 %v17039_v45  ;;  %v17061_v45 = vld [vmem:[#allocation2 + $0xfb0] sm:$0xff]  }
0x43e8   :  { %16138 = vmatprep.subr.bf16.mxu0 %v17366_v5 }
0x43eb   :  { %16139 = vmatpush3.bf16.msra.mxu0 %v17040_v25 }
0x43ec   :  { %16140 = vmatprep.subr.bf16.mxu0 %v17366_v5 }
0x43ef   :  { %16141 = vmatpush3.bf16.msra.mxu0 %v17041_v26 }
0x43f0   :  { %16142 = vmatprep.subr.bf16.mxu0 %v17366_v5 }
0x43f3   :  { %v11142_v31 = vpop.f32.mrf.mxu1  ;;  %16143 = vmatpush3.bf16.msra.mxu0 %v17042_v28 }
0x43f4   :  { %16144 = vmatprep.subr.bf16.mxu0 %v17366_v5 }
0x43f5   :  { %v16128_v19 = vpop.f32.mrf.mxu1 }
0x43f6   :  { %v17063_v19 = vld [vmem:[#allocation2 + $0xfa0] sm:$0xff]  }
0x43f7   :  { %v11145_v21 = vpop.f32.mrf.mxu1  ;;  %16145 = vmatpush3.bf16.msra.mxu0 %v17043_v33 }
0x43f8   :  { %16176 = vmatprep.subr.bf16.mxu0 %v17366_v5 }
0x43f9   :  { %v16129_v23 = vpop.f32.mrf.mxu1 }
0x449a   :  { %v11053_v39 = vpop.f32.mrf.mxu0 }
0x449b   :  { %v11143_v27 = vadd.f32 %v11142_v31, %v11053_v39  ;;  %v17062_v31 = vld [vmem:[#allocation2 + $0xfa8] sm:$0xff]  }
0x449c   :  { %v16108_v37 = vpop.f32.mrf.mxu0 }
0x449d   :  { %v11157_v36 = vadd.f32 %v13232_v41, %v11143_v27 }
0x449e   :  { %v11056_v38 = vpop.f32.mrf.mxu0 }
0x449f   :  { %v11146_v43 = vadd.f32 %v11145_v21, %v11056_v38  ;;  %v11159_v49 = vmax.f32 %v11157_v36, 0.0  ;;  %v17064_v21 = vld [vmem:[#allocation2 + $0xf98] sm:$0xff]   ;;  %v17065_v36 = vld [vmem:[#allocation2 + $0xf90] sm:$0xff]   ;;  %v17066_v38 = vld [vmem:[#allocation2 + $0xf88] sm:$0xff]  }
0x44a0   :  { %v16109_v46 = vpop.f32.mrf.mxu0 }
0x44a1   :  { %v11158_v51 = vadd.f32 %v13232_v41, %v11146_v43  ;;  %v11161_v48 = vadd.f32 %v11159_v49, %v10892_v55  ;;  %v17050_v55 = vld [vmem:[#allocation2 + $0xf08] sm:$0xff]   ;;  %v17067_v43 = vld [vmem:[#allocation2 + $0xf80] sm:$0xff]  }
0x44a3   :  { %v11160_v57 = vmax.f32 %v11158_v51, 0.0  ;;  %v13259_v51 = vld [vmem:[#allocation6 + $0x1e] ss:$0 sm:$0xff] }
0x44a5   :  { %v11162_v50 = vadd.f32 %v11160_v57, %v10893_v56  ;;  %v17051_v56 = vld [vmem:[#allocation2 + $0xf00] sm:$0xff]  }
0x44a7   :  { %v11163_v47 = vpack.c.bf16 %v11162_v50, %v11161_v48 }
0x44a9   :  { %16147 = vmatmul.mubr.bf16.vlgmr.msra.gmra.mxu0 %v11163_v47 }
0x44aa   :  { %16177 = vmatpush3.bf16.msra.mxu0 %v17044_v4  ;;  %16192 = vmatprep.mubr.msk.bf16.mxu0 %vm17367_vm0, %v17366_v5 }
0x44ab   :  { %16178 = vmatprep.subr.bf16.mxu0 %v17366_v5 }
0x44ae   :  { %16179 = vmatpush3.bf16.msra.mxu0 %v17045_v0 }
0x44af   :  { %16180 = vmatprep.subr.bf16.mxu0 %v17366_v5 }
0x44b2   :  { %16181 = vmatpush3.bf16.msra.mxu0 %v17046_v60 }
0x44b3   :  { %16182 = vmatprep.subr.bf16.mxu0 %v17366_v5 }
0x44b6   :  { %16183 = vmatpush3.bf16.msra.mxu0 %v17047_v2 }
0x44b7   :  { %16184 = vmatprep.subr.bf16.mxu0 %v17366_v5 }
0x44ba   :  { %16185 = vmatpush3.bf16.msra.mxu0 %v17048_v61 }
0x44bb   :  { %16186 = vmatprep.subr.bf16.mxu0 %v17366_v5 }
0x44be   :  { %16187 = vmatpush3.bf16.msra.mxu0 %v17049_v54  ;;  %v17068_v54 = vld [vmem:[#allocation2 + $0xff8] sm:$0xff]  }
0x44bf   :  { %16188 = vmatprep.subr.bf16.mxu0 %v17366_v5 }
0x44c2   :  { %16189 = vmatpush3.bf16.msra.mxu0 %v17050_v55  ;;  %v17069_v55 = vld [vmem:[#allocation2 + $0xff0] sm:$0xff]  }
0x44c3   :  { %16190 = vmatprep.subr.bf16.mxu0 %v17366_v5 }
0x44c6   :  { %16191 = vmatpush3.bf16.msra.mxu0 %v17051_v56  ;;  %v17070_v56 = vld [vmem:[#allocation2 + $0xfe8] sm:$0xff]  }
0x44c7   :  { %16222 = vmatprep.subr.bf16.mxu0 %v17366_v5 }
0x4569   :  { %v11271_v58 = vpop.f32.mrf.mxu0 }
0x456a   :  { %v18869_v14 = vadd.f32 %v13233_v7, %v11271_v58  ;;  %v17072_v58 = vld [vmem:[#allocation2 + $0xfd8] sm:$0xff]  }
0x456b   :  { %v16148_v59 = vpop.f32.mrf.mxu0 }
0x456c   :  { %v11278_v53 = vmax.f32 %v18869_v14, 0.0  ;;  %v17074_v59 = vld [vmem:[#allocation2 + $0xfc8] sm:$0xff]   ;;  %v17100_v14 = vld [vmem:[#allocation3 + $0x778] sm:$0xff]  }
0x456d   :  { %v11274_v13 = vpop.f32.mrf.mxu0 }
0x456e   :  { %v18871_v16 = vadd.f32 %v13233_v7, %v11274_v13  ;;  %v17071_v7 = vld [vmem:[#allocation2 + $0xfe0] sm:$0xff]  }
0x456f   :  { %v16149_v17 = vpop.f32.mrf.mxu0  ;;  %v17075_v13 = vld [vmem:[#allocation2 + $0xfc0] sm:$0xff]  }
0x4570   :  { %v11279_v52 = vmax.f32 %v18871_v16, 0.0  ;;  %v17101_v16 = vld [vmem:[#allocation3 + $0x770] sm:$0xff]  }
0x4572   :  { %v11280_v63 = vpack.c.bf16 %v11279_v52, %v11278_v53 }
0x4574   :  { %16151 = vmatpush3.bf16.msra.mxu1 %v11280_v63  ;;  %16193 = vmatmul.mubr.bf16.vlgmr.msra.gmra.mxu0 %v11280_v63 }
0x4575   :  { %16156 = vmatprep.subr.bf16.mxu1 %v17366_v5  ;;  %16238 = vmatprep.mubr.msk.bf16.mxu0 %vm17367_vm0, %v17366_v5 }
0x4576   :  { %16223 = vmatpush3.bf16.msra.mxu0 %v17060_v40  ;;  %v17077_v40 = vld [vmem:[#allocation3 + $0x6b0] sm:$0xff]  }
0x4577   :  { %16153 = vmatmul.mubr.msk.bf16.vlgmr.msra.gmra.mxu1 %vm170_vm1, %v17494_v6  ;;  %16224 = vmatprep.subr.bf16.mxu0 %v17366_v5 }
0x4578   :  { %16157 = vmatpush3.bf16.msra.mxu1 %v17052_v3  ;;  %16172 = vmatprep.mubr.msk.bf16.mxu1 %vm17367_vm0, %v17366_v5 }
0x4579   :  { %16158 = vmatprep.subr.bf16.mxu1 %v17366_v5 }
0x457a   :  { %16225 = vmatpush3.bf16.msra.mxu0 %v17061_v45  ;;  %v17078_v45 = vld [vmem:[#allocation3 + $0x6a8] sm:$0xff]  }
0x457b   :  { %16226 = vmatprep.subr.bf16.mxu0 %v17366_v5 }
0x457c   :  { %16159 = vmatpush3.bf16.msra.mxu1 %v17053_v12 }
0x457d   :  { %16160 = vmatprep.subr.bf16.mxu1 %v17366_v5 }
0x457e   :  { %16227 = vmatpush3.bf16.msra.mxu0 %v17062_v31  ;;  %v17079_v31 = vld [vmem:[#allocation3 + $0x6a0] sm:$0xff]  }
0x457f   :  { %16228 = vmatprep.subr.bf16.mxu0 %v17366_v5 }
0x4580   :  { %16161 = vmatpush3.bf16.msra.mxu1 %v17054_v18 }
0x4581   :  { %16162 = vmatprep.subr.bf16.mxu1 %v17366_v5 }
0x4582   :  { %16229 = vmatpush3.bf16.msra.mxu0 %v17063_v19  ;;  %v17080_v19 = vld [vmem:[#allocation3 + $0x698] sm:$0xff]  }
0x4583   :  { %16230 = vmatprep.subr.bf16.mxu0 %v17366_v5 }
0x4584   :  { %16163 = vmatpush3.bf16.msra.mxu1 %v17055_v22 }
0x4585   :  { %16164 = vmatprep.subr.bf16.mxu1 %v17366_v5 }
0x4586   :  { %16231 = vmatpush3.bf16.msra.mxu0 %v17064_v21  ;;  %v17081_v21 = vld [vmem:[#allocation3 + $0x690] sm:$0xff]  }
0x4587   :  { %16232 = vmatprep.subr.bf16.mxu0 %v17366_v5 }
0x4588   :  { %16165 = vmatpush3.bf16.msra.mxu1 %v17056_v10 }
0x4589   :  { %16166 = vmatprep.subr.bf16.mxu1 %v17366_v5 }
0x458a   :  { %16233 = vmatpush3.bf16.msra.mxu0 %v17065_v36 }
0x458b   :  { %16234 = vmatprep.subr.bf16.mxu0 %v17366_v5 }
0x458c   :  { %16167 = vmatpush3.bf16.msra.mxu1 %v17057_v30  ;;  %v17076_v30 = vld [vmem:[#allocation3 + $0x6b8] sm:$0xff]  }
0x458d   :  { %16168 = vmatprep.subr.bf16.mxu1 %v17366_v5 }
0x458e   :  { %16235 = vmatpush3.bf16.msra.mxu0 %v17066_v38 }
0x458f   :  { %16236 = vmatprep.subr.bf16.mxu0 %v17366_v5 }
0x4590   :  { %16169 = vmatpush3.bf16.msra.mxu1 %v17058_v32 }
0x4591   :  { %16170 = vmatprep.subr.bf16.mxu1 %v17366_v5 }
0x4592   :  { %16237 = vmatpush3.bf16.msra.mxu0 %v17067_v43 }
0x4593   :  { %16262 = vmatprep.subr.bf16.mxu0 %v17366_v5 }
0x4594   :  { %16171 = vmatpush3.bf16.msra.mxu1 %v17059_v34 }
0x4595   :  { %16196 = vmatprep.subr.bf16.mxu1 %v17366_v5 }
0x4634   :  { %v11528_v23 = vpop.f32.mrf.mxu0 }
0x4636   :  { %v16194_v25 = vpop.f32.mrf.mxu0 }
0x4637   :  { %v11315_v26 = vpop.f32.mrf.mxu1  ;;  %v17083_v25 = vld [vmem:[#allocation3 + $0x680] sm:$0xff]  }
0x4638   :  { %v11531_v28 = vpop.f32.mrf.mxu0 }
0x4639   :  { %v16154_v33 = vpop.f32.mrf.mxu1 }
0x463a   :  { %v16195_v39 = vpop.f32.mrf.mxu0  ;;  %v17086_v33 = vld [vmem:[#allocation3 + $0x6e8] sm:$0xff]  }
0x463b   :  { %v11318_v41 = vpop.f32.mrf.mxu1  ;;  %v17087_v39 = vld [vmem:[#allocation3 + $0x6e0] sm:$0xff]  }
0x463c   :  { %v11339_v27 = vpack.c.bf16 %v11318_v41, %v11315_v26  ;;  %v17084_v26 = vld [vmem:[#allocation3 + $0x6f8] sm:$0xff]  }
0x463d   :  { %v16155_v37 = vpop.f32.mrf.mxu1  ;;  %v17088_v41 = vld [vmem:[#allocation3 + $0x6d8] sm:$0xff]  }
0x463e   :  { %16173 = vmatmul.mubr.bf16.vlgmr.msra.gmra.mxu1 %v11339_v27  ;;  %v13277_v37 = vld [vmem:[#allocation6 + $0x1f] ss:$0 sm:$0xff] }
0x463f   :  { %16198 = vmatprep.mubr.msk.bf16.mxu1 %vm17367_vm0, %v17366_v5 }
0x46fe   :  { %v11439_v46 = vpop.f32.mrf.mxu1 }
0x46ff   :  { %v11529_v49 = vadd.f32 %v11528_v23, %v11439_v46  ;;  %v17082_v23 = vld [vmem:[#allocation3 + $0x688] sm:$0xff]  }
0x4700   :  { %v16174_v57 = vpop.f32.mrf.mxu1 }
0x4701   :  { %v18904_v50 = vadd.f32 %v13259_v51, %v11529_v49 }
0x4702   :  { %v11442_v48 = vpop.f32.mrf.mxu1 }
0x4703   :  { %v11532_v4 = vadd.f32 %v11531_v28, %v11442_v48  ;;  %v11545_v60 = vmax.f32 %v18904_v50, 0.0  ;;  %v17085_v28 = vld [vmem:[#allocation3 + $0x6f0] sm:$0xff]   ;;  %v17092_v50 = vld [vmem:[#allocation3 + $0x738] sm:$0xff]  }
0x4704   :  { %v16175_v47 = vpop.f32.mrf.mxu1 }
0x4705   :  { %v18906_v0 = vadd.f32 %v13259_v51, %v11532_v4 }
0x4707   :  { %v11546_v2 = vmax.f32 %v18906_v0, 0.0  ;;  %v17093_v0 = vld [vmem:[#allocation3 + $0x730] sm:$0xff]  }
0x4709   :  { %v11547_v61 = vpack.c.bf16 %v11546_v2, %v11545_v60 }
0x470b   :  { %16197 = vmatpush3.bf16.msra.mxu1 %v11547_v61  ;;  %16239 = vmatmul.mubr.bf16.vlgmr.msra.gmra.mxu0 %v11547_v61 }
0x470c   :  { %16202 = vmatprep.subr.bf16.mxu1 %v17366_v5  ;;  %16278 = vmatprep.mubr.msk.bf16.mxu0 %vm17367_vm0, %v17366_v5 }
0x470d   :  { %16263 = vmatpush3.bf16.msra.mxu0 %v17084_v26 }
0x470e   :  { %16199 = vmatmul.mubr.msk.bf16.vlgmr.msra.gmra.mxu1 %vm170_vm1, %v17494_v6  ;;  %v17073_v6 = vld [vmem:[#allocation2 + $0xfd0] sm:$0xff]   ;;  %16264 = vmatprep.subr.bf16.mxu0 %v17366_v5 }
0x470f   :  { %16203 = vmatpush3.bf16.msra.mxu1 %v17068_v54  ;;  %16218 = vmatprep.mubr.msk.bf16.mxu1 %vm17367_vm0, %v17366_v5 }
0x4710   :  { %16204 = vmatprep.subr.bf16.mxu1 %v17366_v5 }
0x4711   :  { %16265 = vmatpush3.bf16.msra.mxu0 %v17085_v28 }
0x4712   :  { %16266 = vmatprep.subr.bf16.mxu0 %v17366_v5 }
0x4713   :  { %16205 = vmatpush3.bf16.msra.mxu1 %v17069_v55  ;;  %v17089_v55 = vld [vmem:[#allocation3 + $0x6d0] sm:$0xff]  }
0x4714   :  { %16206 = vmatprep.subr.bf16.mxu1 %v17366_v5 }
0x4715   :  { %16267 = vmatpush3.bf16.msra.mxu0 %v17086_v33 }
0x4716   :  { %16268 = vmatprep.subr.bf16.mxu0 %v17366_v5 }
0x4717   :  { %16207 = vmatpush3.bf16.msra.mxu1 %v17070_v56  ;;  %v17090_v56 = vld [vmem:[#allocation3 + $0x6c8] sm:$0xff]  }
0x4718   :  { %16208 = vmatprep.subr.bf16.mxu1 %v17366_v5 }
0x4719   :  { %16269 = vmatpush3.bf16.msra.mxu0 %v17087_v39 }
0x471a   :  { %16270 = vmatprep.subr.bf16.mxu0 %v17366_v5 }
0x471b   :  { %16209 = vmatpush3.bf16.msra.mxu1 %v17071_v7  ;;  %v17091_v7 = vld [vmem:[#allocation3 + $0x6c0] sm:$0xff]  }
0x471c   :  { %16210 = vmatprep.subr.bf16.mxu1 %v17366_v5 }
0x471d   :  { %16271 = vmatpush3.bf16.msra.mxu0 %v17088_v41 }
0x471e   :  { %16272 = vmatprep.subr.bf16.mxu0 %v17366_v5 }
0x471f   :  { %16211 = vmatpush3.bf16.msra.mxu1 %v17072_v58  ;;  %v17096_v58 = vld [vmem:[#allocation3 + $0x718] sm:$0xff]  }
0x4720   :  { %16212 = vmatprep.subr.bf16.mxu1 %v17366_v5 }
0x4721   :  { %16273 = vmatpush3.bf16.msra.mxu0 %v17089_v55 }
0x4722   :  { %16274 = vmatprep.subr.bf16.mxu0 %v17366_v5 }
0x4723   :  { %16213 = vmatpush3.bf16.msra.mxu1 %v17073_v6  ;;  %v13278_v6 = vld [vmem:[#allocation8 + $0x1a] ss:$0 sm:$0xff] }
0x4724   :  { %16214 = vmatprep.subr.bf16.mxu1 %v17366_v5 }
0x4725   :  { %16275 = vmatpush3.bf16.msra.mxu0 %v17090_v56 }
0x4726   :  { %16276 = vmatprep.subr.bf16.mxu0 %v17366_v5 }
0x4727   :  { %16215 = vmatpush3.bf16.msra.mxu1 %v17074_v59 }
0x4728   :  { %16216 = vmatprep.subr.bf16.mxu1 %v17366_v5 }
0x4729   :  { %16277 = vmatpush3.bf16.msra.mxu0 %v17091_v7 }
0x472a   :  { %16302 = vmatprep.subr.bf16.mxu0 %v17366_v5 }
0x472b   :  { %16217 = vmatpush3.bf16.msra.mxu1 %v17075_v13 }
0x472c   :  { %16242 = vmatprep.subr.bf16.mxu1 %v17366_v5 }
0x47cb   :  { %v11795_v17 = vpop.f32.mrf.mxu0 }
0x47cd   :  { %v16240_v63 = vpop.f32.mrf.mxu0 }
0x47ce   :  { %v11582_v3 = vpop.f32.mrf.mxu1 }
0x47cf   :  { %v11798_v12 = vpop.f32.mrf.mxu0 }
0x47d0   :  { %v16200_v18 = vpop.f32.mrf.mxu1 }
0x47d1   :  { %v16241_v22 = vpop.f32.mrf.mxu0 }
0x47d2   :  { %v11585_v10 = vpop.f32.mrf.mxu1 }
0x47d3   :  { %v11606_v32 = vpack.c.bf16 %v11585_v10, %v11582_v3 }
0x47d4   :  { %v16201_v34 = vpop.f32.mrf.mxu1 }
0x47d5   :  { %16219 = vmatmul.mubr.bf16.vlgmr.msra.gmra.mxu1 %v11606_v32  ;;  %v17097_v34 = vld [vmem:[#allocation3 + $0x710] sm:$0xff]  }
0x47d6   :  { %16243 = vmatpush3.bf16.msra.mxu1 %v17076_v30  ;;  %16258 = vmatprep.mubr.msk.bf16.mxu1 %vm17367_vm0, %v17366_v5 }
0x47d7   :  { %16244 = vmatprep.subr.bf16.mxu1 %v17366_v5 }
0x47da   :  { %16245 = vmatpush3.bf16.msra.mxu1 %v17077_v40  ;;  %v17098_v40 = vld [vmem:[#allocation3 + $0x708] sm:$0xff]  }
0x47db   :  { %16246 = vmatprep.subr.bf16.mxu1 %v17366_v5 }
0x47de   :  { %16247 = vmatpush3.bf16.msra.mxu1 %v17078_v45  ;;  %v17099_v45 = vld [vmem:[#allocation3 + $0x700] sm:$0xff]  }
0x47df   :  { %16248 = vmatprep.subr.bf16.mxu1 %v17366_v5 }
0x47e2   :  { %16249 = vmatpush3.bf16.msra.mxu1 %v17079_v31  ;;  %v17104_v31 = vld [vmem:[#allocation3 + $0x758] sm:$0xff]  }
0x47e3   :  { %16250 = vmatprep.subr.bf16.mxu1 %v17366_v5 }
0x47e6   :  { %16251 = vmatpush3.bf16.msra.mxu1 %v17080_v19  ;;  %v13287_v19 = vld [vmem:[#allocation8 + $0x1b] ss:$0 sm:$0xff] }
0x47e7   :  { %16252 = vmatprep.subr.bf16.mxu1 %v17366_v5 }
0x47ea   :  { %16253 = vmatpush3.bf16.msra.mxu1 %v17081_v21 }
0x47eb   :  { %16254 = vmatprep.subr.bf16.mxu1 %v17366_v5 }
0x47ee   :  { %16255 = vmatpush3.bf16.msra.mxu1 %v17082_v23 }
0x47ef   :  { %16256 = vmatprep.subr.bf16.mxu1 %v17366_v5 }
0x47f2   :  { %16257 = vmatpush3.bf16.msra.mxu1 %v17083_v25 }
0x47f3   :  { %16282 = vmatprep.subr.bf16.mxu1 %v17366_v5 }
0x4895   :  { %v11706_v27 = vpop.f32.mrf.mxu1 }
0x4896   :  { %v11796_v36 = vadd.f32 %v11795_v17, %v11706_v27 }
0x4897   :  { %v16220_v38 = vpop.f32.mrf.mxu1 }
0x4898   :  { %v11810_v43 = vadd.f32 %v13277_v37, %v11796_v36  ;;  %v17106_v36 = vld [vmem:[#allocation3 + $0x748] sm:$0xff]   ;;  %v17107_v38 = vld [vmem:[#allocation3 + $0x740] sm:$0xff]  }
0x4899   :  { %v11709_v46 = vpop.f32.mrf.mxu1 }
0x489a   :  { %v11799_v49 = vadd.f32 %v11798_v12, %v11709_v46  ;;  %v11812_v57 = vmax.f32 %v11810_v43, 0.0  ;;  %v17112_v43 = vld [vmem:[#allocation3 + $0x798] sm:$0xff]  }
0x489b   :  { %v16221_v51 = vpop.f32.mrf.mxu1  ;;  %v13296_v46 = vld [vmem:[#allocation8 + $0x1c] ss:$0 sm:$0xff] }
0x489c   :  { %v11811_v48 = vadd.f32 %v13277_v37, %v11799_v49  ;;  %v11814_v47 = vadd.f32 %v11812_v57, %v11545_v60  ;;  %v17094_v60 = vld [vmem:[#allocation3 + $0x728] sm:$0xff]   ;;  %v17105_v37 = vld [vmem:[#allocation3 + $0x750] sm:$0xff]  }
0x489e   :  { %v11813_v4 = vmax.f32 %v11811_v48, 0.0 }
0x48a0   :  { %v11815_v61 = vadd.f32 %v11813_v4, %v11546_v2  ;;  %v17095_v2 = vld [vmem:[#allocation3 + $0x720] sm:$0xff]  }
0x48a2   :  { %v11816_v54 = vpack.c.bf16 %v11815_v61, %v11814_v47 }
0x48a4   :  { %16259 = vmatmul.mubr.bf16.vlgmr.msra.gmra.mxu1 %v11816_v54 }
0x48a5   :  { %16298 = vmatprep.mubr.msk.bf16.mxu1 %vm17367_vm0, %v17366_v5  ;;  %16283 = vmatpush3.bf16.msra.mxu1 %v17092_v50  ;;  %v17113_v50 = vld [vmem:[#allocation3 + $0x790] sm:$0xff]  }
0x48a6   :  { %16284 = vmatprep.subr.bf16.mxu1 %v17366_v5 }
0x48a9   :  { %16285 = vmatpush3.bf16.msra.mxu1 %v17093_v0  ;;  %v17114_v0 = vld [vmem:[#allocation3 + $0x788] sm:$0xff]  }
0x48aa   :  { %16286 = vmatprep.subr.bf16.mxu1 %v17366_v5 }
0x48ad   :  { %16287 = vmatpush3.bf16.msra.mxu1 %v17094_v60  ;;  %v17115_v60 = vld [vmem:[#allocation3 + $0x780] sm:$0xff]  }
0x48ae   :  { %16288 = vmatprep.subr.bf16.mxu1 %v17366_v5 }
0x48b1   :  { %16289 = vmatpush3.bf16.msra.mxu1 %v17095_v2  ;;  %v13305_v2 = vld [vmem:[#allocation8 + $0x1d] ss:$0 sm:$0xff] }
0x48b2   :  { %16290 = vmatprep.subr.bf16.mxu1 %v17366_v5 }
0x48b5   :  { %16291 = vmatpush3.bf16.msra.mxu1 %v17096_v58 }
0x48b6   :  { %16292 = vmatprep.subr.bf16.mxu1 %v17366_v5 }
0x48b9   :  { %16293 = vmatpush3.bf16.msra.mxu1 %v17097_v34 }
0x48ba   :  { %16294 = vmatprep.subr.bf16.mxu1 %v17366_v5 }
0x48bd   :  { %16295 = vmatpush3.bf16.msra.mxu1 %v17098_v40 }
0x48be   :  { %16296 = vmatprep.subr.bf16.mxu1 %v17366_v5 }
0x48c1   :  { %16297 = vmatpush3.bf16.msra.mxu1 %v17099_v45 }
0x48c2   :  { %16322 = vmatprep.subr.bf16.mxu1 %v17366_v5 }
0x4964   :  { %v11924_v59 = vpop.f32.mrf.mxu1 }
0x4965   :  { %v11925_v13 = vadd.f32 %v13278_v6, %v11924_v59 }
0x4966   :  { %v16260_v17 = vpop.f32.mrf.mxu1 }
0x4967   :  { %v11931_v3 = vmax.f32 %v11925_v13, 0.0 }
0x4968   :  { %v11927_v63 = vpop.f32.mrf.mxu1 }
0x4969   :  { %v11928_v12 = vadd.f32 %v13278_v6, %v11927_v63  ;;  %v11933_v10 = vadd.f32 %v11931_v3, %v11278_v53  ;;  %v17102_v53 = vld [vmem:[#allocation3 + $0x768] sm:$0xff]  }
0x496a   :  { %v16261_v18 = vpop.f32.mrf.mxu1 }
0x496b   :  { %v11932_v22 = vmax.f32 %v11928_v12, 0.0 }
0x496d   :  { %v11934_v30 = vadd.f32 %v11932_v22, %v11279_v52  ;;  %v17103_v52 = vld [vmem:[#allocation3 + $0x760] sm:$0xff]  }
0x496f   :  { %v11935_v32 = vpack.c.bf16 %v11934_v30, %v11933_v10 }
0x4971   :  { %16279 = vmatmul.mubr.bf16.vlgmr.msra.gmra.mxu0 %v11935_v32 }
0x4972   :  { %16318 = vmatprep.mubr.msk.bf16.mxu0 %vm17367_vm0, %v17366_v5  ;;  %16303 = vmatpush3.bf16.msra.mxu0 %v17100_v14 }
0x4973   :  { %16304 = vmatprep.subr.bf16.mxu0 %v17366_v5 }
0x4976   :  { %16305 = vmatpush3.bf16.msra.mxu0 %v17101_v16 }
0x4977   :  { %16306 = vmatprep.subr.bf16.mxu0 %v17366_v5 }
0x497a   :  { %16307 = vmatpush3.bf16.msra.mxu0 %v17102_v53 }
0x497b   :  { %16308 = vmatprep.subr.bf16.mxu0 %v17366_v5 }
0x497e   :  { %16309 = vmatpush3.bf16.msra.mxu0 %v17103_v52 }
0x497f   :  { %16310 = vmatprep.subr.bf16.mxu0 %v17366_v5 }
0x4982   :  { %16311 = vmatpush3.bf16.msra.mxu0 %v17104_v31 }
0x4983   :  { %16312 = vmatprep.subr.bf16.mxu0 %v17366_v5 }
0x4986   :  { %16313 = vmatpush3.bf16.msra.mxu0 %v17105_v37 }
0x4987   :  { %16314 = vmatprep.subr.bf16.mxu0 %v17366_v5 }
0x498a   :  { %16315 = vmatpush3.bf16.msra.mxu0 %v17106_v36 }
0x498b   :  { %16316 = vmatprep.subr.bf16.mxu0 %v17366_v5 }
0x498e   :  { %16317 = vmatpush3.bf16.msra.mxu0 %v17107_v38 }
0x4a31   :  { %v12043_v21 = vpop.f32.mrf.mxu0 }
0x4a32   :  { %v12044_v25 = vadd.f32 %v13287_v19, %v12043_v21 }
0x4a33   :  { %v16280_v23 = vpop.f32.mrf.mxu0 }
0x4a34   :  { %v12050_v39 = vadd.f32 %v12044_v25, %v10625_v62  ;;  %v17109_v62 = vld [vmem:[#allocation3 + $0x7b0] sm:$0xff]  }
0x4a35   :  { %v12046_v26 = vpop.f32.mrf.mxu0 }
0x4a36   :  { %v12047_v28 = vadd.f32 %v13287_v19, %v12046_v26 }
0x4a37   :  { %v16281_v33 = vpop.f32.mrf.mxu0 }
0x4a38   :  { %v12051_v41 = vadd.f32 %v12047_v28, %v10626_v9  ;;  %v17111_v9 = vld [vmem:[#allocation3 + $0x7a0] sm:$0xff]  }
0x4a3a   :  { %v12052_v27 = vpack.c.bf16 %v12051_v41, %v12050_v39 }
0x4a3c   :  { %16299 = vmatmul.mubr.bf16.vlgmr.msra.gmra.mxu1 %v12052_v27 }
0x4a3d   :  { %16338 = vmatprep.mubr.msk.bf16.mxu1 %vm17367_vm0, %v17366_v5  ;;  %16323 = vmatpush3.bf16.msra.mxu1 %v17108_v11 }
0x4a3e   :  { %16324 = vmatprep.subr.bf16.mxu1 %v17366_v5 }
0x4a41   :  { %16325 = vmatpush3.bf16.msra.mxu1 %v17109_v62 }
0x4a42   :  { %16326 = vmatprep.subr.bf16.mxu1 %v17366_v5 }
0x4a45   :  { %16327 = vmatpush3.bf16.msra.mxu1 %v17110_v8 }
0x4a46   :  { %16328 = vmatprep.subr.bf16.mxu1 %v17366_v5 }
0x4a49   :  { %16329 = vmatpush3.bf16.msra.mxu1 %v17111_v9 }
0x4a4a   :  { %16330 = vmatprep.subr.bf16.mxu1 %v17366_v5 }
0x4a4d   :  { %16331 = vmatpush3.bf16.msra.mxu1 %v17112_v43 }
0x4a4e   :  { %16332 = vmatprep.subr.bf16.mxu1 %v17366_v5 }
0x4a51   :  { %16333 = vmatpush3.bf16.msra.mxu1 %v17113_v50 }
0x4a52   :  { %16334 = vmatprep.subr.bf16.mxu1 %v17366_v5 }
0x4a55   :  { %16335 = vmatpush3.bf16.msra.mxu1 %v17114_v0 }
0x4a56   :  { %16336 = vmatprep.subr.bf16.mxu1 %v17366_v5  ;;  %v13314_v5 = vld [vmem:[#allocation8 + $0x1e] ss:$0 sm:$0xff] }
0x4a59   :  { %16337 = vmatpush3.bf16.msra.mxu1 %v17115_v60 }
0x4afc   :  { %v12160_v49 = vpop.f32.mrf.mxu1 }
0x4afd   :  { %v12161_v51 = vadd.f32 %v13296_v46, %v12160_v49 }
0x4afe   :  { %v16300_v57 = vpop.f32.mrf.mxu1 }
0x4aff   :  { %v12167_v4 = vmax.f32 %v12161_v51, 0.0 }
0x4b00   :  { %v12163_v48 = vpop.f32.mrf.mxu1 }
0x4b01   :  { %v12164_v47 = vadd.f32 %v13296_v46, %v12163_v48  ;;  %v12169_v55 = vadd.f32 %v12167_v4, %v9195_v1 }
0x4b02   :  { %v16301_v61 = vpop.f32.mrf.mxu1 }
0x4b03   :  { %v12168_v54 = vmax.f32 %v12164_v47, 0.0 }
0x4b05   :  { %v12170_v56 = vadd.f32 %v12168_v54, %v9196_v24 }
0x4b07   :  { %v12171_v7 = vpack.c.bf16 %v12170_v56, %v12169_v55 }
0x4b09   :  { %16319 = vmatmul.mubr.bf16.vlgmr.msra.gmra.mxu0 %v12171_v7 }
0x4bc9   :  { %v12279_v58 = vpop.f32.mrf.mxu0 }
0x4bca   :  { %v12280_v6 = vadd.f32 %v13305_v2, %v12279_v58 }
0x4bcb   :  { %v16320_v15 = vpop.f32.mrf.mxu0 }
0x4bcc   :  { %v12286_v59 = vmax.f32 %v12280_v6, 0.0 }
0x4bcd   :  { %v12282_v1 = vpop.f32.mrf.mxu0 }
0x4bce   :  { %v12283_v20 = vadd.f32 %v13305_v2, %v12282_v1  ;;  %v12288_v17 = vadd.f32 %v12286_v59, %v6226_v44 }
0x4bcf   :  { %v16321_v24 = vpop.f32.mrf.mxu0 }
0x4bd0   :  { %v12287_v13 = vmax.f32 %v12283_v20, 0.0 }
0x4bd2   :  { %v12289_v63 = vadd.f32 %v12287_v13, %v6227_v42 }
0x4bd4   :  { %v12290_v3 = vpack.c.bf16 %v12289_v63, %v12288_v17 }
0x4bd6   :  { %16339 = vmatmul.mubr.bf16.vlgmr.msra.gmra.mxu1 %v12290_v3 }
0x4c96   :  { %v12398_v12 = vpop.f32.mrf.mxu1 }
0x4c97   :  { %v12399_v18 = vadd.f32 %v13314_v5, %v12398_v12 }
0x4c98   :  { %v16340_v22 = vpop.f32.mrf.mxu1 }
0x4c99   :  { %12405 = vst [vmem:[%s19007_s6] sm:$0xff] %v12399_v18 }
0x4c9a   :  { %v12401_v10 = vpop.f32.mrf.mxu1 }
0x4c9b   :  { %v12402_v30 = vadd.f32 %v13314_v5, %v12401_v10 }
0x4c9c   :  { %v16341_v32 = vpop.f32.mrf.mxu1 }
0x4c9d   :  { %12406 = vst [vmem:[%s19007_s6 + $0x8] sm:$0xff] %v12402_v30 }
0x4c9e   :  { %12411 = vsyncpa [#allocation7], 1 }
0x4c9f   :  { %12412 = vsyncpa [#allocation9], 1 }
0x4ca0   :  { %12413 = vsyncmov [#allocation4] }
0x4ca3   :  { %s12414_s17 = vpop.sfrf %12413 }
0x4ca4   :  { %p13323_p8 = scmp.ne.s32.totalorder %s12414_s17, 0 }
0x4ca6   :  { %12418 = shalt.err (%p13323_p8)  }
0x4ca7   :  { %12420 = vsyncmov [#allocation4 + $0x1] }
0x4caa   :  { %s12421_s15 = vpop.sfrf %12420 }
0x4cab   :  { %p13324_p9 = scmp.ne.s32.totalorder %s12421_s15, 0 }
0x4cad   :  { %12425 = shalt.err (%p13324_p9)  }
0x4cae   :  { %12427 = vsyncmov [#allocation4 + $0x2] }
0x4cb1   :  { %s12428_s16 = vpop.sfrf %12427 }
0x4cb2   :  { %p13325_p10 = scmp.ne.s32.totalorder %s12428_s16, 0 }
0x4cb4   :  { %12432 = shalt.err (%p13325_p10)  }
0x4cb5   :  { %12434 = vsyncmov [#allocation4 + $0x3] }
0x4cb8   :  { %s12435_s18 = vpop.sfrf %12434 }
0x4cb9   :  { %p13326_p11 = scmp.ne.s32.totalorder %s12435_s18, 0 }
0x4cbb   :  { %12439 = shalt.err (%p13326_p11)  }
0x4cbc   :  { %12440 = vsyncmov [#allocation5] }
0x4cbf   :  { %s12441_s6 = vpop.sfrf %12440 }
0x4cc0   :  { %p13327_p12 = scmp.ne.s32.totalorder %s12441_s6, 0 }
0x4cc2   :  { %12445 = shalt.err (%p13327_p12)  }
0x4cc3   :  { %12447 = vsyncmov [#allocation5 + $0x1] }
0x4cc6   :  { %s12448_s19 = vpop.sfrf %12447 }
0x4cc7   :  { %p13328_p13 = scmp.ne.s32.totalorder %s12448_s19, 0 }
0x4cc9   :  { %12452 = shalt.err (%p13328_p13)  }
0x4cca   :  { %12454 = vsyncmov [#allocation5 + $0x2] }
0x4ccd   :  { %s12455_s1 = vpop.sfrf %12454 }
0x4cce   :  { %p13329_p0 = scmp.ne.s32.totalorder %s12455_s1, 0 }
0x4cd0   :  { %12459 = shalt.err (%p13329_p0)  }
0x4cd1   :  { %12461 = vsyncmov [#allocation5 + $0x3] }
0x4cd4   :  { %s12462_s20 = vpop.sfrf %12461 }
0x4cd5   :  { %p13330_p1 = scmp.ne.s32.totalorder %s12462_s20, 0 }
0x4cd7   :  { %12466 = shalt.err (%p13330_p1)  }

</bundles_post_ra>
